<compile_context>
chip_gen: v6e
topology: v6e:2x2x1
jax: 0.10.0
libtpu: 0.0.40
codegen_flags: <defaults>
</compile_context>

<pallas_src>
import functools

import jax
import jax.numpy as jnp
from jax.experimental import pallas as pl
from jax.experimental.pallas import tpu as pltpu

EPS = 1e-5  # nn.LayerNorm / nn.GroupNorm default eps


def _vmem_limit_bytes():
    # ~75% of physical VMEM, capped at 100 MiB: ~96 MiB on v5e/v6e (128 MiB), ~48 MiB on v7x (64 MiB).
    try:
        cap = int(pltpu.get_tpu_info().vmem_capacity_bytes)
        return int(min(cap * 3 // 4, 100 * 1024 * 1024))
    except Exception:
        return 64 * 1024 * 1024


# ----------------------------- in-kernel math -----------------------------

def _erf(x):
    # Abramowitz & Stegun 7.1.26 polynomial erf (float32-level accuracy, |err| < 1.5e-7).
    a1, a2, a3, a4, a5 = (0.254829592, -0.284496736, 1.421413741,
                          -1.453152027, 1.061405429)
    p = 0.3275911
    s = jnp.where(x < 0.0, -1.0, 1.0)
    z = jnp.abs(x)
    t = 1.0 / (1.0 + p * z)
    poly = ((((a5 * t + a4) * t + a3) * t + a2) * t + a1) * t
    return s * (1.0 - poly * jnp.exp(-z * z))


def _gelu_exact(x):
    # nn.GELU() default is exact (erf) GELU.
    # TODO(synk): lax.erf lowering on Mosaic unverified; the polynomial keeps exact-GELU semantics.
    return 0.5 * x * (1.0 + _erf(x * 0.7071067811865476))


# ------------------------------ Pallas kernel ------------------------------

def _block_kernel(x_ref, segA_ref, segB_ref, ln_ref, w1cat_ref,
                  w2a1_ref, w2a2_ref, w3a_ref,
                  w2c1_ref, w2c2_ref, w3c_ref,
                  vec_ref, fc1w_ref, fc1b_ref, fc2w_ref,
                  o_ref, *, C, H, W, shift_size, k1, k2):
    N = H * W
    x = x_ref[0]                      # (C, N) f32, H*W on the 128-lane axis
    segA = segA_ref[...]              # (N, H) f32 : per-W-row segment mean matrix
    segB = segB_ref[...]              # (H, N) f32 : segment broadcast matrix
    ln = ln_ref[...]                  # (4, N) f32 : [ln1_g, ln1_b, ln2_g, ln2_b] tiled over W
    vec = vec_ref[...]                # (C, 17) f32: packed per-channel biases / GN affines

    def col(i):                       # (C, 1) column of the packed per-channel vectors
        return vec[:, i:i + 1]

    # ---- positions & masks: static-shape only, hoisted once, shared by all branches ----
    p = jax.lax.broadcasted_iota(jnp.int32, (1, N), 1)
    hpos = jnp.zeros_like(p)
    for h in range(1, H):             # hpos = p // W without vector integer division
        hpos = hpos + (p >= h * W).astype(jnp.int32)
    wpos = p - hpos * W
    cpos = jax.lax.broadcasted_iota(jnp.int32, (C, 1), 0)

    def roll_lane(v, d):
        # y[:, q] = v[:, (q + d) mod N]; wrapped positions are always masked by callers.
        if d % N == 0:
            return v
        return pltpu.roll(v, shift=(-d) % N, axis=1)

    # shift_cuda masks:  s = -(c // group - shift // 2), zero fill outside bounds.
    pad = shift_size // 2
    if shift_size > 1:
        group = -(-C // shift_size)          # ceil(C / shift)
        n_groups = -(-C // group)
        shift_s, grp_m, val_w, val_h = [], [], [], []
        for g in range(n_groups):
            s = pad - g
            shift_s.append(s)
            grp_m.append(jnp.logical_and(cpos >= g * group,
                                         cpos < (g + 1) * group).astype(jnp.float32))
            val_w.append(jnp.logical_and(wpos + s >= 0, wpos + s < W).astype(jnp.float32))
            val_h.append(jnp.logical_and(hpos + s >= 0, hpos + s < H).astype(jnp.float32))

    # 'same'-conv boundary masks for the k1 x k1 taps (shared by conv2_1 / conv2_2 of as1).
    conv_mask = {}
    kp1 = k1 // 2
    for dh in range(-kp1, kp1 + 1):
        for dw in range(-kp1, kp1 + 1):
            if dh == 0 and dw == 0:
                conv_mask[(dh, dw)] = None
            else:
                conv_mask[(dh, dw)] = jnp.logical_and(
                    jnp.logical_and(hpos + dh >= 0, hpos + dh < H),
                    jnp.logical_and(wpos + dw >= 0, wpos + dw < W)).astype(jnp.float32)

    # ---------------------------- building blocks ----------------------------
    def layer_norm_w(v, gamma, beta):
        # nn.LayerNorm(dim) on NCHW == normalize over the W axis per (c, h) row (W == dim).
        # One stacked segment matmul gives both moments: var = E[x^2] - E[x]^2.
        st = jnp.dot(jnp.concatenate([v, v * v], axis=0), segA,
                     preferred_element_type=jnp.float32)              # (2C, H)
        st = jnp.dot(st, segB, preferred_element_type=jnp.float32)    # (2C, N)
        mu = st[:C, :]
        var = jnp.maximum(st[C:, :] - mu * mu, 0.0)
        return (v - mu) * jax.lax.rsqrt(var + EPS) * gamma + beta

    def group_norm(v, g, b):
        # nn.GroupNorm(1, C): per-sample stats over all of (C, H, W), per-channel affine.
        m = jnp.mean(v, axis=(0, 1), keepdims=True)
        s = jnp.mean((v - m) ** 2, axis=(0, 1), keepdims=True)
        return (v - m) * jax.lax.rsqrt(s + EPS) * g + b

    def axial_shift(v, along_w):
        if shift_size == 1:
            return v
        out = None
        for g in range(n_groups):
            s = shift_s[g]
            d = s if along_w else s * W
            valid = val_w[g] if along_w else val_h[g]
            term = roll_lane(v, d) * (grp_m[g] * valid)
            out = term if out is None else out + term
        return out

    def conv_same(v, w_ref, b, k):
        # k x k stride-1 'same' conv: k^2 lane-rolled + masked taps stacked along channels,
        # then ONE (C, k*k*C) @ (k*k*C, N) MXU dot (single weight push / result pop).
        kp = k // 2
        taps = []
        for dh in range(-kp, kp + 1):
            for dw in range(-kp, kp + 1):
                tap = roll_lane(v, dh * W + dw)
                m = conv_mask[(dh, dw)]
                if m is not None:
                    tap = tap * m
                taps.append(tap.astype(jnp.bfloat16))
        stacked = taps[0] if len(taps) == 1 else jnp.concatenate(taps, axis=0)
        return jnp.dot(w_ref[...], stacked, preferred_element_type=jnp.float32) + b

    def as_module(t, w21_ref, w22_ref, w3_ref, b21, b22, b3, g1g, g1b, g2g, g2b, k):
        t = _gelu_exact(group_norm(t, g1g, g1b))                    # norm1 + GELU
        x_lr = axial_shift(t, along_w=True)                         # Shift(dim=3)
        x_td = axial_shift(t, along_w=False)                        # Shift(dim=2)
        y = (_gelu_exact(conv_same(x_lr, w21_ref, b21, k))          # conv2_1 + GELU
             + _gelu_exact(conv_same(x_td, w22_ref, b22, k)))       # conv2_2 + GELU
        u = group_norm(y, g2g, g2b)                                 # norm2
        return jnp.dot(w3_ref[...], u.astype(jnp.bfloat16),         # conv3 (1x1)
                       preferred_element_type=jnp.float32) + b3

    # ------------------------ AxialShiftedBlock.forward ------------------------
    xn = layer_norm_w(x, ln[0:1, :], ln[1:2, :])                    # norm1 (LayerNorm)
    # conv1 of both AxialShift modules fused into one (2C, C) @ (C, N) matmul.
    t_both = jnp.dot(w1cat_ref[...], xn.astype(jnp.bfloat16),
                     preferred_element_type=jnp.float32)
    a = as_module(t_both[:C, :] + col(0), w2a1_ref, w2a2_ref, w3a_ref,
                  col(2), col(3), col(4), col(5), col(6), col(7), col(8), k1)
    c = as_module(t_both[C:, :] + col(1), w2c1_ref, w2c2_ref, w3c_ref,
                  col(9), col(10), col(11), col(12), col(13), col(14), col(15), k2)
    x2 = x + a + c                                                  # shortcut + drop_path(as1+as2)

    xn2 = layer_norm_w(x2, ln[2:3, :], ln[3:4, :])                  # norm2 (LayerNorm)
    hdn = _gelu_exact(jnp.dot(fc1w_ref[...], xn2.astype(jnp.bfloat16),
                              preferred_element_type=jnp.float32) + fc1b_ref[...])
    y = jnp.dot(fc2w_ref[...], hdn.astype(jnp.bfloat16),
                preferred_element_type=jnp.float32) + col(16)
    o_ref[0] = x2 + y                                               # + drop_path(mlp(norm2(x)))


# ----------------------------- Pallas wrapper -----------------------------

def _block_call(xf, consts, *, C, H, W, shift_size, single_buf):
    B, _, N = xf.shape
    kern = functools.partial(_block_kernel, C=C, H=H, W=W,
                             shift_size=shift_size, k1=3, k2=1)

    def const_spec(a):
        kwargs = {}
        if single_buf:
            # Constant block index across the whole grid -> double buffering is pure VMEM waste.
            kwargs["pipeline_mode"] = pl.Buffered(1)
        return pl.BlockSpec(a.shape, lambda i, _n=a.ndim: (0,) * _n, **kwargs)

    return pl.pallas_call(
        kern,
        out_shape=jax.ShapeDtypeStruct((B, C, N), jnp.float32),
        grid=(B,),
        in_specs=[pl.BlockSpec((1, C, N), lambda i: (i, 0, 0))]
                 + [const_spec(a) for a in consts],
        out_specs=pl.BlockSpec((1, C, N), lambda i: (i, 0, 0)),
        compiler_params=pltpu.CompilerParams(
            dimension_semantics=("parallel",),
            vmem_limit_bytes=_vmem_limit_bytes()),
    )(xf, *consts)


# --------------------------- parameter preprocessing ---------------------------

def _prep_block_params(p, C, H, W):
    N = H * W
    f32, bf16 = jnp.float32, jnp.bfloat16

    row = jnp.arange(N, dtype=jnp.int32) // W
    segA = (row[:, None] == jnp.arange(H, dtype=jnp.int32)[None, :]).astype(f32) / float(W)
    segB = (jnp.arange(H, dtype=jnp.int32)[:, None] == row[None, :]).astype(f32)

    def wrep(v):                      # LayerNorm affine (over W) tiled to the flat H*W axis
        return jnp.tile(v.astype(f32), H)

    ln_pack = jnp.stack([wrep(p["ln1_g"]), wrep(p["ln1_b"]),
                         wrep(p["ln2_g"]), wrep(p["ln2_b"])], axis=0)         # (4, N)

    def fuse_taps(w):                 # (Cout, Cin, k, k) -> (Cout, k*k*Cin) bf16 fused-tap weight
        Cout, Cin, k, _ = w.shape
        return jnp.transpose(w, (0, 2, 3, 1)).reshape(Cout, k * k * Cin).astype(bf16)

    a1, a2 = p["as1"], p["as2"]
    w1cat = jnp.concatenate([a1["conv1_w"].reshape(C, C),
                             a2["conv1_w"].reshape(C, C)], axis=0).astype(bf16)   # (2C, C)

    def as_cols(a):
        return [a["conv2_1_b"], a["conv2_2_b"], a["conv3_b"],
                a["gn1_g"], a["gn1_b"], a["gn2_g"], a["gn2_b"]]

    vec_pack = jnp.stack(
        [v.astype(f32) for v in
         [a1["conv1_b"], a2["conv1_b"]] + as_cols(a1) + as_cols(a2) + [p["fc2_b"]]],
        axis=1)                                                               # (C, 17)

    hidden = p["fc1_w"].shape[0]
    consts = [segA, segB, ln_pack, w1cat,
              fuse_taps(a1["conv2_1_w"]), fuse_taps(a1["conv2_2_w"]),
              a1["conv3_w"].reshape(C, C).astype(bf16),
              fuse_taps(a2["conv2_1_w"]), fuse_taps(a2["conv2_2_w"]),
              a2["conv3_w"].reshape(C, C).astype(bf16),
              vec_pack,
              p["fc1_w"].reshape(hidden, C).astype(bf16),
              p["fc1_b"].reshape(hidden, 1).astype(f32),
              p["fc2_w"].reshape(C, hidden).astype(bf16)]
    return consts


# ------------------------------- model forward ------------------------------

@functools.partial(jax.jit, static_argnames=("shift_size", "single_buffer_consts"))
def _forward_impl(x_nchw, params, shift_size, single_buffer_consts):
    B, C, H, W = x_nchw.shape
    consts = _prep_block_params(params, C, H, W)
    xf = x_nchw.reshape(B, C, H * W)          # lane-dense: H*W on the 128-lane axis
    out = _block_call(xf, consts, C=C, H=H, W=W, shift_size=shift_size,
                      single_buf=single_buffer_consts)
    return out.reshape(B, C, H, W)


def axial_shifted_block_forward(x_nchw, params, shift_size=7):
    # AxialShiftedBlock.forward on an NCHW tensor.  nn.LayerNorm(dim) applied to NCHW
    # normalizes over the LAST axis (W), so W == dim is required (literal PyTorch semantics).
    assert x_nchw.shape[-1] == params["ln1_g"].shape[0], "LayerNorm(dim) on NCHW needs W == dim"
    try:
        return _forward_impl(x_nchw, params,
                             shift_size=shift_size, single_buffer_consts=True)
    except Exception:
        # pl.Buffered(1) (single-buffered constants) unsupported on this jax/libtpu:
        # fall back to default double-buffered constant operands.
        return _forward_impl(x_nchw, params,
                             shift_size=shift_size, single_buffer_consts=False)


# ------------------------------ parameter init ------------------------------

def _rnd(key, shape, scale):
    return scale * jax.random.normal(key, shape, jnp.float32)


def _init_axial_shift(key, dim, k):
    ks = jax.random.split(key, 12)
    return {
        "conv1_w": _rnd(ks[0], (dim, dim, 1, 1), 0.1), "conv1_b": _rnd(ks[1], (dim,), 0.02),
        "conv2_1_w": _rnd(ks[2], (dim, dim, k, k), 0.1), "conv2_1_b": _rnd(ks[3], (dim,), 0.02),
        "conv2_2_w": _rnd(ks[4], (dim, dim, k, k), 0.1), "conv2_2_b": _rnd(ks[5], (dim,), 0.02),
        "conv3_w": _rnd(ks[6], (dim, dim, 1, 1), 0.1), "conv3_b": _rnd(ks[7], (dim,), 0.02),
        "gn1_g": 1.0 + _rnd(ks[8], (dim,), 0.02), "gn1_b": _rnd(ks[9], (dim,), 0.02),
        "gn2_g": 1.0 + _rnd(ks[10], (dim,), 0.02), "gn2_b": _rnd(ks[11], (dim,), 0.02),
    }


def _init_block(key, dim, mlp_ratio):
    hidden = int(dim * mlp_ratio)
    ks = jax.random.split(key, 10)
    return {
        "ln1_g": 1.0 + _rnd(ks[0], (dim,), 0.02), "ln1_b": _rnd(ks[1], (dim,), 0.02),
        "ln2_g": 1.0 + _rnd(ks[2], (dim,), 0.02), "ln2_b": _rnd(ks[3], (dim,), 0.02),
        "as1": _init_axial_shift(ks[4], dim, 3),   # conv_kernel = 3
        "as2": _init_axial_shift(ks[5], dim, 1),   # conv_kernel = 1
        "fc1_w": _rnd(ks[6], (hidden, dim, 1, 1), 0.1), "fc1_b": _rnd(ks[7], (hidden,), 0.02),
        "fc2_w": _rnd(ks[8], (dim, hidden, 1, 1), 0.1), "fc2_b": _rnd(ks[9], (dim,), 0.02),
    }


# ----------------------------------- main -----------------------------------

if __name__ == "__main__":
    # Small shapes: dim == C == W == 16 (LayerNorm(dim)-on-NCHW needs W == dim),
    # H = 8 (so H*W = 128 lanes, lane-dense stores), batch = 2 (>=2 parallel grid steps),
    # shift_size = 7, mlp_ratio = 4.0.
    B, C, H, W = 2, 16, 8, 16
    shift_size, mlp_ratio = 7, 4.0

    key = jax.random.PRNGKey(0)
    kx, kp = jax.random.split(key)
    x = jax.random.normal(kx, (B, C, H, W), jnp.float32)      # NCHW, like the PyTorch module
    params = _init_block(kp, C, mlp_ratio)

    out = axial_shifted_block_forward(x, params, shift_size=shift_size)
    out = jax.block_until_ready(out)

    assert out.shape == (B, C, H, W), out.shape
    assert bool(jnp.isfinite(out).all())
    print("KERNEL_OK")
</pallas_src>

<mosaic_0001>
module attributes {stable_mosaic.version = 11 : i64} {
  func.func @_block_kernel(%arg0: i32, %arg1: memref<1x16x128xf32, #tpu.memory_space<vmem>>, %arg2: memref<128x8xf32, #tpu.memory_space<vmem>>, %arg3: memref<8x128xf32, #tpu.memory_space<vmem>>, %arg4: memref<4x128xf32, #tpu.memory_space<vmem>>, %arg5: memref<32x16xbf16, #tpu.memory_space<vmem>>, %arg6: memref<16x144xbf16, #tpu.memory_space<vmem>>, %arg7: memref<16x144xbf16, #tpu.memory_space<vmem>>, %arg8: memref<16x16xbf16, #tpu.memory_space<vmem>>, %arg9: memref<16x16xbf16, #tpu.memory_space<vmem>>, %arg10: memref<16x16xbf16, #tpu.memory_space<vmem>>, %arg11: memref<16x16xbf16, #tpu.memory_space<vmem>>, %arg12: memref<16x17xf32, #tpu.memory_space<vmem>>, %arg13: memref<64x16xbf16, #tpu.memory_space<vmem>>, %arg14: memref<64x1xf32, #tpu.memory_space<vmem>>, %arg15: memref<16x64xbf16, #tpu.memory_space<vmem>>, %arg16: memref<1x16x128xf32, #tpu.memory_space<vmem>>) attributes {dimension_semantics = [#tpu.dimension_semantics<parallel>], iteration_bounds = array<i64: 2>, scalar_prefetch = 0 : i64, scratch_operands = 0 : i64, tpu.core_type = #tpu.core_type<tc>, window_params = [{transform_indices = @transform_0, window_bounds = array<i64: 1, 16, 128>}, {pipeline_mode = #tpu.pipeline_mode<synchronous>, transform_indices = @transform_1, window_bounds = array<i64: 128, 8>}, {pipeline_mode = #tpu.pipeline_mode<synchronous>, transform_indices = @transform_2, window_bounds = array<i64: 8, 128>}, {pipeline_mode = #tpu.pipeline_mode<synchronous>, transform_indices = @transform_3, window_bounds = array<i64: 4, 128>}, {pipeline_mode = #tpu.pipeline_mode<synchronous>, transform_indices = @transform_4, window_bounds = array<i64: 32, 16>}, {pipeline_mode = #tpu.pipeline_mode<synchronous>, transform_indices = @transform_5, window_bounds = array<i64: 16, 144>}, {pipeline_mode = #tpu.pipeline_mode<synchronous>, transform_indices = @transform_6, window_bounds = array<i64: 16, 144>}, {pipeline_mode = #tpu.pipeline_mode<synchronous>, transform_indices = @transform_7, window_bounds = array<i64: 16, 16>}, {pipeline_mode = #tpu.pipeline_mode<synchronous>, transform_indices = @transform_8, window_bounds = array<i64: 16, 16>}, {pipeline_mode = #tpu.pipeline_mode<synchronous>, transform_indices = @transform_9, window_bounds = array<i64: 16, 16>}, {pipeline_mode = #tpu.pipeline_mode<synchronous>, transform_indices = @transform_10, window_bounds = array<i64: 16, 16>}, {pipeline_mode = #tpu.pipeline_mode<synchronous>, transform_indices = @transform_11, window_bounds = array<i64: 16, 17>}, {pipeline_mode = #tpu.pipeline_mode<synchronous>, transform_indices = @transform_12, window_bounds = array<i64: 64, 16>}, {pipeline_mode = #tpu.pipeline_mode<synchronous>, transform_indices = @transform_13, window_bounds = array<i64: 64, 1>}, {pipeline_mode = #tpu.pipeline_mode<synchronous>, transform_indices = @transform_14, window_bounds = array<i64: 16, 64>}, {transform_indices = @transform_15, window_bounds = array<i64: 1, 16, 128>}]} {
    %c0 = arith.constant 0 : index
    %c0_0 = arith.constant 0 : index
    %c0_1 = arith.constant 0 : index
    %0 = vector.load %arg1[%c0, %c0_0, %c0_1] : memref<1x16x128xf32, #tpu.memory_space<vmem>>, vector<1x16x128xf32>
    %1 = vector.shape_cast %0 : vector<1x16x128xf32> to vector<16x128xf32>
    %c0_2 = arith.constant 0 : index
    %c0_3 = arith.constant 0 : index
    %2 = vector.load %arg2[%c0_2, %c0_3] : memref<128x8xf32, #tpu.memory_space<vmem>>, vector<128x8xf32>
    %c0_4 = arith.constant 0 : index
    %c0_5 = arith.constant 0 : index
    %3 = vector.load %arg3[%c0_4, %c0_5] : memref<8x128xf32, #tpu.memory_space<vmem>>, vector<8x128xf32>
    %c0_6 = arith.constant 0 : index
    %c0_7 = arith.constant 0 : index
    %4 = vector.load %arg4[%c0_6, %c0_7] : memref<4x128xf32, #tpu.memory_space<vmem>>, vector<4x128xf32>
    %c0_8 = arith.constant 0 : index
    %c0_9 = arith.constant 0 : index
    %5 = vector.load %arg12[%c0_8, %c0_9] : memref<16x17xf32, #tpu.memory_space<vmem>>, vector<16x17xf32>
    %6 = tpu.iota {dimensions = array<i32: 1>} : vector<1x128xi32>
    %c0_i32 = arith.constant 0 : i32
    %7 = vector.broadcast %c0_i32 : i32 to vector<1x128xi32>
    %c16_i32 = arith.constant 16 : i32
    %8 = vector.broadcast %c16_i32 : i32 to vector<1x128xi32>
    %9 = arith.cmpi sge, %6, %8 : vector<1x128xi32>
    %10 = arith.extui %9 : vector<1x128xi1> to vector<1x128xi32>
    %11 = arith.addi %7, %10 : vector<1x128xi32>
    %c32_i32 = arith.constant 32 : i32
    %12 = vector.broadcast %c32_i32 : i32 to vector<1x128xi32>
    %13 = arith.cmpi sge, %6, %12 : vector<1x128xi32>
    %14 = arith.extui %13 : vector<1x128xi1> to vector<1x128xi32>
    %15 = arith.addi %11, %14 : vector<1x128xi32>
    %c48_i32 = arith.constant 48 : i32
    %16 = vector.broadcast %c48_i32 : i32 to vector<1x128xi32>
    %17 = arith.cmpi sge, %6, %16 : vector<1x128xi32>
    %18 = arith.extui %17 : vector<1x128xi1> to vector<1x128xi32>
    %19 = arith.addi %15, %18 : vector<1x128xi32>
    %c64_i32 = arith.constant 64 : i32
    %20 = vector.broadcast %c64_i32 : i32 to vector<1x128xi32>
    %21 = arith.cmpi sge, %6, %20 : vector<1x128xi32>
    %22 = arith.extui %21 : vector<1x128xi1> to vector<1x128xi32>
    %23 = arith.addi %19, %22 : vector<1x128xi32>
    %c80_i32 = arith.constant 80 : i32
    %24 = vector.broadcast %c80_i32 : i32 to vector<1x128xi32>
    %25 = arith.cmpi sge, %6, %24 : vector<1x128xi32>
    %26 = arith.extui %25 : vector<1x128xi1> to vector<1x128xi32>
    %27 = arith.addi %23, %26 : vector<1x128xi32>
    %c96_i32 = arith.constant 96 : i32
    %28 = vector.broadcast %c96_i32 : i32 to vector<1x128xi32>
    %29 = arith.cmpi sge, %6, %28 : vector<1x128xi32>
    %30 = arith.extui %29 : vector<1x128xi1> to vector<1x128xi32>
    %31 = arith.addi %27, %30 : vector<1x128xi32>
    %c112_i32 = arith.constant 112 : i32
    %32 = vector.broadcast %c112_i32 : i32 to vector<1x128xi32>
    %33 = arith.cmpi sge, %6, %32 : vector<1x128xi32>
    %34 = arith.extui %33 : vector<1x128xi1> to vector<1x128xi32>
    %35 = arith.addi %31, %34 : vector<1x128xi32>
    %c16_i32_10 = arith.constant 16 : i32
    %36 = vector.broadcast %c16_i32_10 : i32 to vector<1x128xi32>
    %37 = arith.muli %35, %36 : vector<1x128xi32>
    %38 = arith.subi %6, %37 : vector<1x128xi32>
    %39 = tpu.iota {dimensions = array<i32: 0>} : vector<16x1xi32>
    %c0_i32_11 = arith.constant 0 : i32
    %40 = vector.broadcast %c0_i32_11 : i32 to vector<16x1xi32>
    %41 = arith.cmpi sge, %39, %40 : vector<16x1xi32>
    %c3_i32 = arith.constant 3 : i32
    %42 = vector.broadcast %c3_i32 : i32 to vector<16x1xi32>
    %43 = arith.cmpi slt, %39, %42 : vector<16x1xi32>
    %44 = arith.andi %41, %43 : vector<16x1xi1>
    %45 = arith.extui %44 : vector<16x1xi1> to vector<16x1xi32>
    %46 = arith.sitofp %45 : vector<16x1xi32> to vector<16x1xf32>
    %c3_i32_12 = arith.constant 3 : i32
    %47 = vector.broadcast %c3_i32_12 : i32 to vector<1x128xi32>
    %48 = arith.addi %38, %47 : vector<1x128xi32>
    %c0_i32_13 = arith.constant 0 : i32
    %49 = vector.broadcast %c0_i32_13 : i32 to vector<1x128xi32>
    %50 = arith.cmpi sge, %48, %49 : vector<1x128xi32>
    %c3_i32_14 = arith.constant 3 : i32
    %51 = vector.broadcast %c3_i32_14 : i32 to vector<1x128xi32>
    %52 = arith.addi %38, %51 : vector<1x128xi32>
    %c16_i32_15 = arith.constant 16 : i32
    %53 = vector.broadcast %c16_i32_15 : i32 to vector<1x128xi32>
    %54 = arith.cmpi slt, %52, %53 : vector<1x128xi32>
    %55 = arith.andi %50, %54 : vector<1x128xi1>
    %56 = arith.extui %55 : vector<1x128xi1> to vector<1x128xi32>
    %57 = arith.sitofp %56 : vector<1x128xi32> to vector<1x128xf32>
    %c3_i32_16 = arith.constant 3 : i32
    %58 = vector.broadcast %c3_i32_16 : i32 to vector<1x128xi32>
    %59 = arith.addi %35, %58 : vector<1x128xi32>
    %c0_i32_17 = arith.constant 0 : i32
    %60 = vector.broadcast %c0_i32_17 : i32 to vector<1x128xi32>
    %61 = arith.cmpi sge, %59, %60 : vector<1x128xi32>
    %c3_i32_18 = arith.constant 3 : i32
    %62 = vector.broadcast %c3_i32_18 : i32 to vector<1x128xi32>
    %63 = arith.addi %35, %62 : vector<1x128xi32>
    %c8_i32 = arith.constant 8 : i32
    %64 = vector.broadcast %c8_i32 : i32 to vector<1x128xi32>
    %65 = arith.cmpi slt, %63, %64 : vector<1x128xi32>
    %66 = arith.andi %61, %65 : vector<1x128xi1>
    %67 = arith.extui %66 : vector<1x128xi1> to vector<1x128xi32>
    %68 = arith.sitofp %67 : vector<1x128xi32> to vector<1x128xf32>
    %c3_i32_19 = arith.constant 3 : i32
    %69 = vector.broadcast %c3_i32_19 : i32 to vector<16x1xi32>
    %70 = arith.cmpi sge, %39, %69 : vector<16x1xi32>
    %c6_i32 = arith.constant 6 : i32
    %71 = vector.broadcast %c6_i32 : i32 to vector<16x1xi32>
    %72 = arith.cmpi slt, %39, %71 : vector<16x1xi32>
    %73 = arith.andi %70, %72 : vector<16x1xi1>
    %74 = arith.extui %73 : vector<16x1xi1> to vector<16x1xi32>
    %75 = arith.sitofp %74 : vector<16x1xi32> to vector<16x1xf32>
    %c2_i32 = arith.constant 2 : i32
    %76 = vector.broadcast %c2_i32 : i32 to vector<1x128xi32>
    %77 = arith.addi %38, %76 : vector<1x128xi32>
    %c0_i32_20 = arith.constant 0 : i32
    %78 = vector.broadcast %c0_i32_20 : i32 to vector<1x128xi32>
    %79 = arith.cmpi sge, %77, %78 : vector<1x128xi32>
    %c2_i32_21 = arith.constant 2 : i32
    %80 = vector.broadcast %c2_i32_21 : i32 to vector<1x128xi32>
    %81 = arith.addi %38, %80 : vector<1x128xi32>
    %c16_i32_22 = arith.constant 16 : i32
    %82 = vector.broadcast %c16_i32_22 : i32 to vector<1x128xi32>
    %83 = arith.cmpi slt, %81, %82 : vector<1x128xi32>
    %84 = arith.andi %79, %83 : vector<1x128xi1>
    %85 = arith.extui %84 : vector<1x128xi1> to vector<1x128xi32>
    %86 = arith.sitofp %85 : vector<1x128xi32> to vector<1x128xf32>
    %c2_i32_23 = arith.constant 2 : i32
    %87 = vector.broadcast %c2_i32_23 : i32 to vector<1x128xi32>
    %88 = arith.addi %35, %87 : vector<1x128xi32>
    %c0_i32_24 = arith.constant 0 : i32
    %89 = vector.broadcast %c0_i32_24 : i32 to vector<1x128xi32>
    %90 = arith.cmpi sge, %88, %89 : vector<1x128xi32>
    %c2_i32_25 = arith.constant 2 : i32
    %91 = vector.broadcast %c2_i32_25 : i32 to vector<1x128xi32>
    %92 = arith.addi %35, %91 : vector<1x128xi32>
    %c8_i32_26 = arith.constant 8 : i32
    %93 = vector.broadcast %c8_i32_26 : i32 to vector<1x128xi32>
    %94 = arith.cmpi slt, %92, %93 : vector<1x128xi32>
    %95 = arith.andi %90, %94 : vector<1x128xi1>
    %96 = arith.extui %95 : vector<1x128xi1> to vector<1x128xi32>
    %97 = arith.sitofp %96 : vector<1x128xi32> to vector<1x128xf32>
    %c6_i32_27 = arith.constant 6 : i32
    %98 = vector.broadcast %c6_i32_27 : i32 to vector<16x1xi32>
    %99 = arith.cmpi sge, %39, %98 : vector<16x1xi32>
    %c9_i32 = arith.constant 9 : i32
    %100 = vector.broadcast %c9_i32 : i32 to vector<16x1xi32>
    %101 = arith.cmpi slt, %39, %100 : vector<16x1xi32>
    %102 = arith.andi %99, %101 : vector<16x1xi1>
    %103 = arith.extui %102 : vector<16x1xi1> to vector<16x1xi32>
    %104 = arith.sitofp %103 : vector<16x1xi32> to vector<16x1xf32>
    %c1_i32 = arith.constant 1 : i32
    %105 = vector.broadcast %c1_i32 : i32 to vector<1x128xi32>
    %106 = arith.addi %38, %105 : vector<1x128xi32>
    %c0_i32_28 = arith.constant 0 : i32
    %107 = vector.broadcast %c0_i32_28 : i32 to vector<1x128xi32>
    %108 = arith.cmpi sge, %106, %107 : vector<1x128xi32>
    %c1_i32_29 = arith.constant 1 : i32
    %109 = vector.broadcast %c1_i32_29 : i32 to vector<1x128xi32>
    %110 = arith.addi %38, %109 : vector<1x128xi32>
    %c16_i32_30 = arith.constant 16 : i32
    %111 = vector.broadcast %c16_i32_30 : i32 to vector<1x128xi32>
    %112 = arith.cmpi slt, %110, %111 : vector<1x128xi32>
    %113 = arith.andi %108, %112 : vector<1x128xi1>
    %114 = arith.extui %113 : vector<1x128xi1> to vector<1x128xi32>
    %115 = arith.sitofp %114 : vector<1x128xi32> to vector<1x128xf32>
    %c1_i32_31 = arith.constant 1 : i32
    %116 = vector.broadcast %c1_i32_31 : i32 to vector<1x128xi32>
    %117 = arith.addi %35, %116 : vector<1x128xi32>
    %c0_i32_32 = arith.constant 0 : i32
    %118 = vector.broadcast %c0_i32_32 : i32 to vector<1x128xi32>
    %119 = arith.cmpi sge, %117, %118 : vector<1x128xi32>
    %c1_i32_33 = arith.constant 1 : i32
    %120 = vector.broadcast %c1_i32_33 : i32 to vector<1x128xi32>
    %121 = arith.addi %35, %120 : vector<1x128xi32>
    %c8_i32_34 = arith.constant 8 : i32
    %122 = vector.broadcast %c8_i32_34 : i32 to vector<1x128xi32>
    %123 = arith.cmpi slt, %121, %122 : vector<1x128xi32>
    %124 = arith.andi %119, %123 : vector<1x128xi1>
    %125 = arith.extui %124 : vector<1x128xi1> to vector<1x128xi32>
    %126 = arith.sitofp %125 : vector<1x128xi32> to vector<1x128xf32>
    %c9_i32_35 = arith.constant 9 : i32
    %127 = vector.broadcast %c9_i32_35 : i32 to vector<16x1xi32>
    %128 = arith.cmpi sge, %39, %127 : vector<16x1xi32>
    %c12_i32 = arith.constant 12 : i32
    %129 = vector.broadcast %c12_i32 : i32 to vector<16x1xi32>
    %130 = arith.cmpi slt, %39, %129 : vector<16x1xi32>
    %131 = arith.andi %128, %130 : vector<16x1xi1>
    %132 = arith.extui %131 : vector<16x1xi1> to vector<16x1xi32>
    %133 = arith.sitofp %132 : vector<16x1xi32> to vector<16x1xf32>
    %c0_i32_36 = arith.constant 0 : i32
    %134 = vector.broadcast %c0_i32_36 : i32 to vector<1x128xi32>
    %135 = arith.addi %38, %134 : vector<1x128xi32>
    %c0_i32_37 = arith.constant 0 : i32
    %136 = vector.broadcast %c0_i32_37 : i32 to vector<1x128xi32>
    %137 = arith.cmpi sge, %135, %136 : vector<1x128xi32>
    %c0_i32_38 = arith.constant 0 : i32
    %138 = vector.broadcast %c0_i32_38 : i32 to vector<1x128xi32>
    %139 = arith.addi %38, %138 : vector<1x128xi32>
    %c16_i32_39 = arith.constant 16 : i32
    %140 = vector.broadcast %c16_i32_39 : i32 to vector<1x128xi32>
    %141 = arith.cmpi slt, %139, %140 : vector<1x128xi32>
    %142 = arith.andi %137, %141 : vector<1x128xi1>
    %143 = arith.extui %142 : vector<1x128xi1> to vector<1x128xi32>
    %144 = arith.sitofp %143 : vector<1x128xi32> to vector<1x128xf32>
    %c0_i32_40 = arith.constant 0 : i32
    %145 = vector.broadcast %c0_i32_40 : i32 to vector<1x128xi32>
    %146 = arith.addi %35, %145 : vector<1x128xi32>
    %c0_i32_41 = arith.constant 0 : i32
    %147 = vector.broadcast %c0_i32_41 : i32 to vector<1x128xi32>
    %148 = arith.cmpi sge, %146, %147 : vector<1x128xi32>
    %c0_i32_42 = arith.constant 0 : i32
    %149 = vector.broadcast %c0_i32_42 : i32 to vector<1x128xi32>
    %150 = arith.addi %35, %149 : vector<1x128xi32>
    %c8_i32_43 = arith.constant 8 : i32
    %151 = vector.broadcast %c8_i32_43 : i32 to vector<1x128xi32>
    %152 = arith.cmpi slt, %150, %151 : vector<1x128xi32>
    %153 = arith.andi %148, %152 : vector<1x128xi1>
    %154 = arith.extui %153 : vector<1x128xi1> to vector<1x128xi32>
    %155 = arith.sitofp %154 : vector<1x128xi32> to vector<1x128xf32>
    %c12_i32_44 = arith.constant 12 : i32
    %156 = vector.broadcast %c12_i32_44 : i32 to vector<16x1xi32>
    %157 = arith.cmpi sge, %39, %156 : vector<16x1xi32>
    %c15_i32 = arith.constant 15 : i32
    %158 = vector.broadcast %c15_i32 : i32 to vector<16x1xi32>
    %159 = arith.cmpi slt, %39, %158 : vector<16x1xi32>
    %160 = arith.andi %157, %159 : vector<16x1xi1>
    %161 = arith.extui %160 : vector<16x1xi1> to vector<16x1xi32>
    %162 = arith.sitofp %161 : vector<16x1xi32> to vector<16x1xf32>
    %c-1_i32 = arith.constant -1 : i32
    %163 = vector.broadcast %c-1_i32 : i32 to vector<1x128xi32>
    %164 = arith.addi %38, %163 : vector<1x128xi32>
    %c0_i32_45 = arith.constant 0 : i32
    %165 = vector.broadcast %c0_i32_45 : i32 to vector<1x128xi32>
    %166 = arith.cmpi sge, %164, %165 : vector<1x128xi32>
    %c-1_i32_46 = arith.constant -1 : i32
    %167 = vector.broadcast %c-1_i32_46 : i32 to vector<1x128xi32>
    %168 = arith.addi %38, %167 : vector<1x128xi32>
    %c16_i32_47 = arith.constant 16 : i32
    %169 = vector.broadcast %c16_i32_47 : i32 to vector<1x128xi32>
    %170 = arith.cmpi slt, %168, %169 : vector<1x128xi32>
    %171 = arith.andi %166, %170 : vector<1x128xi1>
    %172 = arith.extui %171 : vector<1x128xi1> to vector<1x128xi32>
    %173 = arith.sitofp %172 : vector<1x128xi32> to vector<1x128xf32>
    %c-1_i32_48 = arith.constant -1 : i32
    %174 = vector.broadcast %c-1_i32_48 : i32 to vector<1x128xi32>
    %175 = arith.addi %35, %174 : vector<1x128xi32>
    %c0_i32_49 = arith.constant 0 : i32
    %176 = vector.broadcast %c0_i32_49 : i32 to vector<1x128xi32>
    %177 = arith.cmpi sge, %175, %176 : vector<1x128xi32>
    %c-1_i32_50 = arith.constant -1 : i32
    %178 = vector.broadcast %c-1_i32_50 : i32 to vector<1x128xi32>
    %179 = arith.addi %35, %178 : vector<1x128xi32>
    %c8_i32_51 = arith.constant 8 : i32
    %180 = vector.broadcast %c8_i32_51 : i32 to vector<1x128xi32>
    %181 = arith.cmpi slt, %179, %180 : vector<1x128xi32>
    %182 = arith.andi %177, %181 : vector<1x128xi1>
    %183 = arith.extui %182 : vector<1x128xi1> to vector<1x128xi32>
    %184 = arith.sitofp %183 : vector<1x128xi32> to vector<1x128xf32>
    %c15_i32_52 = arith.constant 15 : i32
    %185 = vector.broadcast %c15_i32_52 : i32 to vector<16x1xi32>
    %186 = arith.cmpi sge, %39, %185 : vector<16x1xi32>
    %c18_i32 = arith.constant 18 : i32
    %187 = vector.broadcast %c18_i32 : i32 to vector<16x1xi32>
    %188 = arith.cmpi slt, %39, %187 : vector<16x1xi32>
    %189 = arith.andi %186, %188 : vector<16x1xi1>
    %190 = arith.extui %189 : vector<16x1xi1> to vector<16x1xi32>
    %191 = arith.sitofp %190 : vector<16x1xi32> to vector<16x1xf32>
    %c-2_i32 = arith.constant -2 : i32
    %192 = vector.broadcast %c-2_i32 : i32 to vector<1x128xi32>
    %193 = arith.addi %38, %192 : vector<1x128xi32>
    %c0_i32_53 = arith.constant 0 : i32
    %194 = vector.broadcast %c0_i32_53 : i32 to vector<1x128xi32>
    %195 = arith.cmpi sge, %193, %194 : vector<1x128xi32>
    %c-2_i32_54 = arith.constant -2 : i32
    %196 = vector.broadcast %c-2_i32_54 : i32 to vector<1x128xi32>
    %197 = arith.addi %38, %196 : vector<1x128xi32>
    %c16_i32_55 = arith.constant 16 : i32
    %198 = vector.broadcast %c16_i32_55 : i32 to vector<1x128xi32>
    %199 = arith.cmpi slt, %197, %198 : vector<1x128xi32>
    %200 = arith.andi %195, %199 : vector<1x128xi1>
    %201 = arith.extui %200 : vector<1x128xi1> to vector<1x128xi32>
    %202 = arith.sitofp %201 : vector<1x128xi32> to vector<1x128xf32>
    %c-2_i32_56 = arith.constant -2 : i32
    %203 = vector.broadcast %c-2_i32_56 : i32 to vector<1x128xi32>
    %204 = arith.addi %35, %203 : vector<1x128xi32>
    %c0_i32_57 = arith.constant 0 : i32
    %205 = vector.broadcast %c0_i32_57 : i32 to vector<1x128xi32>
    %206 = arith.cmpi sge, %204, %205 : vector<1x128xi32>
    %c-2_i32_58 = arith.constant -2 : i32
    %207 = vector.broadcast %c-2_i32_58 : i32 to vector<1x128xi32>
    %208 = arith.addi %35, %207 : vector<1x128xi32>
    %c8_i32_59 = arith.constant 8 : i32
    %209 = vector.broadcast %c8_i32_59 : i32 to vector<1x128xi32>
    %210 = arith.cmpi slt, %208, %209 : vector<1x128xi32>
    %211 = arith.andi %206, %210 : vector<1x128xi1>
    %212 = arith.extui %211 : vector<1x128xi1> to vector<1x128xi32>
    %213 = arith.sitofp %212 : vector<1x128xi32> to vector<1x128xf32>
    %c-1_i32_60 = arith.constant -1 : i32
    %214 = vector.broadcast %c-1_i32_60 : i32 to vector<1x128xi32>
    %215 = arith.addi %35, %214 : vector<1x128xi32>
    %c0_i32_61 = arith.constant 0 : i32
    %216 = vector.broadcast %c0_i32_61 : i32 to vector<1x128xi32>
    %217 = arith.cmpi sge, %215, %216 : vector<1x128xi32>
    %c-1_i32_62 = arith.constant -1 : i32
    %218 = vector.broadcast %c-1_i32_62 : i32 to vector<1x128xi32>
    %219 = arith.addi %35, %218 : vector<1x128xi32>
    %c8_i32_63 = arith.constant 8 : i32
    %220 = vector.broadcast %c8_i32_63 : i32 to vector<1x128xi32>
    %221 = arith.cmpi slt, %219, %220 : vector<1x128xi32>
    %222 = arith.andi %217, %221 : vector<1x128xi1>
    %c-1_i32_64 = arith.constant -1 : i32
    %223 = vector.broadcast %c-1_i32_64 : i32 to vector<1x128xi32>
    %224 = arith.addi %38, %223 : vector<1x128xi32>
    %c0_i32_65 = arith.constant 0 : i32
    %225 = vector.broadcast %c0_i32_65 : i32 to vector<1x128xi32>
    %226 = arith.cmpi sge, %224, %225 : vector<1x128xi32>
    %c-1_i32_66 = arith.constant -1 : i32
    %227 = vector.broadcast %c-1_i32_66 : i32 to vector<1x128xi32>
    %228 = arith.addi %38, %227 : vector<1x128xi32>
    %c16_i32_67 = arith.constant 16 : i32
    %229 = vector.broadcast %c16_i32_67 : i32 to vector<1x128xi32>
    %230 = arith.cmpi slt, %228, %229 : vector<1x128xi32>
    %231 = arith.andi %226, %230 : vector<1x128xi1>
    %232 = arith.andi %222, %231 : vector<1x128xi1>
    %233 = arith.extui %232 : vector<1x128xi1> to vector<1x128xi32>
    %234 = arith.sitofp %233 : vector<1x128xi32> to vector<1x128xf32>
    %c-1_i32_68 = arith.constant -1 : i32
    %235 = vector.broadcast %c-1_i32_68 : i32 to vector<1x128xi32>
    %236 = arith.addi %35, %235 : vector<1x128xi32>
    %c0_i32_69 = arith.constant 0 : i32
    %237 = vector.broadcast %c0_i32_69 : i32 to vector<1x128xi32>
    %238 = arith.cmpi sge, %236, %237 : vector<1x128xi32>
    %c-1_i32_70 = arith.constant -1 : i32
    %239 = vector.broadcast %c-1_i32_70 : i32 to vector<1x128xi32>
    %240 = arith.addi %35, %239 : vector<1x128xi32>
    %c8_i32_71 = arith.constant 8 : i32
    %241 = vector.broadcast %c8_i32_71 : i32 to vector<1x128xi32>
    %242 = arith.cmpi slt, %240, %241 : vector<1x128xi32>
    %243 = arith.andi %238, %242 : vector<1x128xi1>
    %c0_i32_72 = arith.constant 0 : i32
    %244 = vector.broadcast %c0_i32_72 : i32 to vector<1x128xi32>
    %245 = arith.addi %38, %244 : vector<1x128xi32>
    %c0_i32_73 = arith.constant 0 : i32
    %246 = vector.broadcast %c0_i32_73 : i32 to vector<1x128xi32>
    %247 = arith.cmpi sge, %245, %246 : vector<1x128xi32>
    %c0_i32_74 = arith.constant 0 : i32
    %248 = vector.broadcast %c0_i32_74 : i32 to vector<1x128xi32>
    %249 = arith.addi %38, %248 : vector<1x128xi32>
    %c16_i32_75 = arith.constant 16 : i32
    %250 = vector.broadcast %c16_i32_75 : i32 to vector<1x128xi32>
    %251 = arith.cmpi slt, %249, %250 : vector<1x128xi32>
    %252 = arith.andi %247, %251 : vector<1x128xi1>
    %253 = arith.andi %243, %252 : vector<1x128xi1>
    %254 = arith.extui %253 : vector<1x128xi1> to vector<1x128xi32>
    %255 = arith.sitofp %254 : vector<1x128xi32> to vector<1x128xf32>
    %c-1_i32_76 = arith.constant -1 : i32
    %256 = vector.broadcast %c-1_i32_76 : i32 to vector<1x128xi32>
    %257 = arith.addi %35, %256 : vector<1x128xi32>
    %c0_i32_77 = arith.constant 0 : i32
    %258 = vector.broadcast %c0_i32_77 : i32 to vector<1x128xi32>
    %259 = arith.cmpi sge, %257, %258 : vector<1x128xi32>
    %c-1_i32_78 = arith.constant -1 : i32
    %260 = vector.broadcast %c-1_i32_78 : i32 to vector<1x128xi32>
    %261 = arith.addi %35, %260 : vector<1x128xi32>
    %c8_i32_79 = arith.constant 8 : i32
    %262 = vector.broadcast %c8_i32_79 : i32 to vector<1x128xi32>
    %263 = arith.cmpi slt, %261, %262 : vector<1x128xi32>
    %264 = arith.andi %259, %263 : vector<1x128xi1>
    %c1_i32_80 = arith.constant 1 : i32
    %265 = vector.broadcast %c1_i32_80 : i32 to vector<1x128xi32>
    %266 = arith.addi %38, %265 : vector<1x128xi32>
    %c0_i32_81 = arith.constant 0 : i32
    %267 = vector.broadcast %c0_i32_81 : i32 to vector<1x128xi32>
    %268 = arith.cmpi sge, %266, %267 : vector<1x128xi32>
    %c1_i32_82 = arith.constant 1 : i32
    %269 = vector.broadcast %c1_i32_82 : i32 to vector<1x128xi32>
    %270 = arith.addi %38, %269 : vector<1x128xi32>
    %c16_i32_83 = arith.constant 16 : i32
    %271 = vector.broadcast %c16_i32_83 : i32 to vector<1x128xi32>
    %272 = arith.cmpi slt, %270, %271 : vector<1x128xi32>
    %273 = arith.andi %268, %272 : vector<1x128xi1>
    %274 = arith.andi %264, %273 : vector<1x128xi1>
    %275 = arith.extui %274 : vector<1x128xi1> to vector<1x128xi32>
    %276 = arith.sitofp %275 : vector<1x128xi32> to vector<1x128xf32>
    %c0_i32_84 = arith.constant 0 : i32
    %277 = vector.broadcast %c0_i32_84 : i32 to vector<1x128xi32>
    %278 = arith.addi %35, %277 : vector<1x128xi32>
    %c0_i32_85 = arith.constant 0 : i32
    %279 = vector.broadcast %c0_i32_85 : i32 to vector<1x128xi32>
    %280 = arith.cmpi sge, %278, %279 : vector<1x128xi32>
    %c0_i32_86 = arith.constant 0 : i32
    %281 = vector.broadcast %c0_i32_86 : i32 to vector<1x128xi32>
    %282 = arith.addi %35, %281 : vector<1x128xi32>
    %c8_i32_87 = arith.constant 8 : i32
    %283 = vector.broadcast %c8_i32_87 : i32 to vector<1x128xi32>
    %284 = arith.cmpi slt, %282, %283 : vector<1x128xi32>
    %285 = arith.andi %280, %284 : vector<1x128xi1>
    %c-1_i32_88 = arith.constant -1 : i32
    %286 = vector.broadcast %c-1_i32_88 : i32 to vector<1x128xi32>
    %287 = arith.addi %38, %286 : vector<1x128xi32>
    %c0_i32_89 = arith.constant 0 : i32
    %288 = vector.broadcast %c0_i32_89 : i32 to vector<1x128xi32>
    %289 = arith.cmpi sge, %287, %288 : vector<1x128xi32>
    %c-1_i32_90 = arith.constant -1 : i32
    %290 = vector.broadcast %c-1_i32_90 : i32 to vector<1x128xi32>
    %291 = arith.addi %38, %290 : vector<1x128xi32>
    %c16_i32_91 = arith.constant 16 : i32
    %292 = vector.broadcast %c16_i32_91 : i32 to vector<1x128xi32>
    %293 = arith.cmpi slt, %291, %292 : vector<1x128xi32>
    %294 = arith.andi %289, %293 : vector<1x128xi1>
    %295 = arith.andi %285, %294 : vector<1x128xi1>
    %296 = arith.extui %295 : vector<1x128xi1> to vector<1x128xi32>
    %297 = arith.sitofp %296 : vector<1x128xi32> to vector<1x128xf32>
    %c0_i32_92 = arith.constant 0 : i32
    %298 = vector.broadcast %c0_i32_92 : i32 to vector<1x128xi32>
    %299 = arith.addi %35, %298 : vector<1x128xi32>
    %c0_i32_93 = arith.constant 0 : i32
    %300 = vector.broadcast %c0_i32_93 : i32 to vector<1x128xi32>
    %301 = arith.cmpi sge, %299, %300 : vector<1x128xi32>
    %c0_i32_94 = arith.constant 0 : i32
    %302 = vector.broadcast %c0_i32_94 : i32 to vector<1x128xi32>
    %303 = arith.addi %35, %302 : vector<1x128xi32>
    %c8_i32_95 = arith.constant 8 : i32
    %304 = vector.broadcast %c8_i32_95 : i32 to vector<1x128xi32>
    %305 = arith.cmpi slt, %303, %304 : vector<1x128xi32>
    %306 = arith.andi %301, %305 : vector<1x128xi1>
    %c1_i32_96 = arith.constant 1 : i32
    %307 = vector.broadcast %c1_i32_96 : i32 to vector<1x128xi32>
    %308 = arith.addi %38, %307 : vector<1x128xi32>
    %c0_i32_97 = arith.constant 0 : i32
    %309 = vector.broadcast %c0_i32_97 : i32 to vector<1x128xi32>
    %310 = arith.cmpi sge, %308, %309 : vector<1x128xi32>
    %c1_i32_98 = arith.constant 1 : i32
    %311 = vector.broadcast %c1_i32_98 : i32 to vector<1x128xi32>
    %312 = arith.addi %38, %311 : vector<1x128xi32>
    %c16_i32_99 = arith.constant 16 : i32
    %313 = vector.broadcast %c16_i32_99 : i32 to vector<1x128xi32>
    %314 = arith.cmpi slt, %312, %313 : vector<1x128xi32>
    %315 = arith.andi %310, %314 : vector<1x128xi1>
    %316 = arith.andi %306, %315 : vector<1x128xi1>
    %317 = arith.extui %316 : vector<1x128xi1> to vector<1x128xi32>
    %318 = arith.sitofp %317 : vector<1x128xi32> to vector<1x128xf32>
    %c1_i32_100 = arith.constant 1 : i32
    %319 = vector.broadcast %c1_i32_100 : i32 to vector<1x128xi32>
    %320 = arith.addi %35, %319 : vector<1x128xi32>
    %c0_i32_101 = arith.constant 0 : i32
    %321 = vector.broadcast %c0_i32_101 : i32 to vector<1x128xi32>
    %322 = arith.cmpi sge, %320, %321 : vector<1x128xi32>
    %c1_i32_102 = arith.constant 1 : i32
    %323 = vector.broadcast %c1_i32_102 : i32 to vector<1x128xi32>
    %324 = arith.addi %35, %323 : vector<1x128xi32>
    %c8_i32_103 = arith.constant 8 : i32
    %325 = vector.broadcast %c8_i32_103 : i32 to vector<1x128xi32>
    %326 = arith.cmpi slt, %324, %325 : vector<1x128xi32>
    %327 = arith.andi %322, %326 : vector<1x128xi1>
    %c-1_i32_104 = arith.constant -1 : i32
    %328 = vector.broadcast %c-1_i32_104 : i32 to vector<1x128xi32>
    %329 = arith.addi %38, %328 : vector<1x128xi32>
    %c0_i32_105 = arith.constant 0 : i32
    %330 = vector.broadcast %c0_i32_105 : i32 to vector<1x128xi32>
    %331 = arith.cmpi sge, %329, %330 : vector<1x128xi32>
    %c-1_i32_106 = arith.constant -1 : i32
    %332 = vector.broadcast %c-1_i32_106 : i32 to vector<1x128xi32>
    %333 = arith.addi %38, %332 : vector<1x128xi32>
    %c16_i32_107 = arith.constant 16 : i32
    %334 = vector.broadcast %c16_i32_107 : i32 to vector<1x128xi32>
    %335 = arith.cmpi slt, %333, %334 : vector<1x128xi32>
    %336 = arith.andi %331, %335 : vector<1x128xi1>
    %337 = arith.andi %327, %336 : vector<1x128xi1>
    %338 = arith.extui %337 : vector<1x128xi1> to vector<1x128xi32>
    %339 = arith.sitofp %338 : vector<1x128xi32> to vector<1x128xf32>
    %c1_i32_108 = arith.constant 1 : i32
    %340 = vector.broadcast %c1_i32_108 : i32 to vector<1x128xi32>
    %341 = arith.addi %35, %340 : vector<1x128xi32>
    %c0_i32_109 = arith.constant 0 : i32
    %342 = vector.broadcast %c0_i32_109 : i32 to vector<1x128xi32>
    %343 = arith.cmpi sge, %341, %342 : vector<1x128xi32>
    %c1_i32_110 = arith.constant 1 : i32
    %344 = vector.broadcast %c1_i32_110 : i32 to vector<1x128xi32>
    %345 = arith.addi %35, %344 : vector<1x128xi32>
    %c8_i32_111 = arith.constant 8 : i32
    %346 = vector.broadcast %c8_i32_111 : i32 to vector<1x128xi32>
    %347 = arith.cmpi slt, %345, %346 : vector<1x128xi32>
    %348 = arith.andi %343, %347 : vector<1x128xi1>
    %c0_i32_112 = arith.constant 0 : i32
    %349 = vector.broadcast %c0_i32_112 : i32 to vector<1x128xi32>
    %350 = arith.addi %38, %349 : vector<1x128xi32>
    %c0_i32_113 = arith.constant 0 : i32
    %351 = vector.broadcast %c0_i32_113 : i32 to vector<1x128xi32>
    %352 = arith.cmpi sge, %350, %351 : vector<1x128xi32>
    %c0_i32_114 = arith.constant 0 : i32
    %353 = vector.broadcast %c0_i32_114 : i32 to vector<1x128xi32>
    %354 = arith.addi %38, %353 : vector<1x128xi32>
    %c16_i32_115 = arith.constant 16 : i32
    %355 = vector.broadcast %c16_i32_115 : i32 to vector<1x128xi32>
    %356 = arith.cmpi slt, %354, %355 : vector<1x128xi32>
    %357 = arith.andi %352, %356 : vector<1x128xi1>
    %358 = arith.andi %348, %357 : vector<1x128xi1>
    %359 = arith.extui %358 : vector<1x128xi1> to vector<1x128xi32>
    %360 = arith.sitofp %359 : vector<1x128xi32> to vector<1x128xf32>
    %c1_i32_116 = arith.constant 1 : i32
    %361 = vector.broadcast %c1_i32_116 : i32 to vector<1x128xi32>
    %362 = arith.addi %35, %361 : vector<1x128xi32>
    %c0_i32_117 = arith.constant 0 : i32
    %363 = vector.broadcast %c0_i32_117 : i32 to vector<1x128xi32>
    %364 = arith.cmpi sge, %362, %363 : vector<1x128xi32>
    %c1_i32_118 = arith.constant 1 : i32
    %365 = vector.broadcast %c1_i32_118 : i32 to vector<1x128xi32>
    %366 = arith.addi %35, %365 : vector<1x128xi32>
    %c8_i32_119 = arith.constant 8 : i32
    %367 = vector.broadcast %c8_i32_119 : i32 to vector<1x128xi32>
    %368 = arith.cmpi slt, %366, %367 : vector<1x128xi32>
    %369 = arith.andi %364, %368 : vector<1x128xi1>
    %c1_i32_120 = arith.constant 1 : i32
    %370 = vector.broadcast %c1_i32_120 : i32 to vector<1x128xi32>
    %371 = arith.addi %38, %370 : vector<1x128xi32>
    %c0_i32_121 = arith.constant 0 : i32
    %372 = vector.broadcast %c0_i32_121 : i32 to vector<1x128xi32>
    %373 = arith.cmpi sge, %371, %372 : vector<1x128xi32>
    %c1_i32_122 = arith.constant 1 : i32
    %374 = vector.broadcast %c1_i32_122 : i32 to vector<1x128xi32>
    %375 = arith.addi %38, %374 : vector<1x128xi32>
    %c16_i32_123 = arith.constant 16 : i32
    %376 = vector.broadcast %c16_i32_123 : i32 to vector<1x128xi32>
    %377 = arith.cmpi slt, %375, %376 : vector<1x128xi32>
    %378 = arith.andi %373, %377 : vector<1x128xi1>
    %379 = arith.andi %369, %378 : vector<1x128xi1>
    %380 = arith.extui %379 : vector<1x128xi1> to vector<1x128xi32>
    %381 = arith.sitofp %380 : vector<1x128xi32> to vector<1x128xf32>
    %382 = vector.extract_strided_slice %4 {offsets = [0, 0], sizes = [1, 128], strides = [1, 1]} : vector<4x128xf32> to vector<1x128xf32>
    %383 = vector.extract_strided_slice %4 {offsets = [1, 0], sizes = [1, 128], strides = [1, 1]} : vector<4x128xf32> to vector<1x128xf32>
    %384 = arith.mulf %1, %1 : vector<16x128xf32>
    %385 = tpu.concatenate %1, %384 in 0 : vector<16x128xf32>, vector<16x128xf32> -> vector<32x128xf32>
    %cst = arith.constant dense<0.000000e+00> : vector<32x8xf32>
    %386 = tpu.matmul %385, %2, %cst {dimension_numbers = #tpu.dot_dimension_numbers<[1], [0], [0], [1], [0, 0, 1, 1], [], []>} : vector<32x128xf32>, vector<128x8xf32>, vector<32x8xf32> -> vector<32x8xf32>
    %cst_124 = arith.constant dense<0.000000e+00> : vector<32x128xf32>
    %387 = tpu.matmul %386, %3, %cst_124 {dimension_numbers = #tpu.dot_dimension_numbers<[1], [0], [0], [1], [0, 0, 1, 1], [], []>} : vector<32x8xf32>, vector<8x128xf32>, vector<32x128xf32> -> vector<32x128xf32>
    %388 = vector.extract_strided_slice %387 {offsets = [0, 0], sizes = [16, 128], strides = [1, 1]} : vector<32x128xf32> to vector<16x128xf32>
    %389 = vector.extract_strided_slice %387 {offsets = [16, 0], sizes = [16, 128], strides = [1, 1]} : vector<32x128xf32> to vector<16x128xf32>
    %390 = arith.mulf %388, %388 : vector<16x128xf32>
    %391 = arith.subf %389, %390 : vector<16x128xf32>
    %cst_125 = arith.constant 0.000000e+00 : f32
    %392 = vector.broadcast %cst_125 : f32 to vector<16x128xf32>
    %393 = arith.maximumf %391, %392 : vector<16x128xf32>
    %394 = arith.subf %1, %388 : vector<16x128xf32>
    %cst_126 = arith.constant 9.99999974E-6 : f32
    %395 = vector.broadcast %cst_126 : f32 to vector<16x128xf32>
    %396 = arith.addf %393, %395 : vector<16x128xf32>
    %397 = math.rsqrt %396 : vector<16x128xf32>
    %398 = arith.mulf %394, %397 : vector<16x128xf32>
    %399 = vector.broadcast %382 : vector<1x128xf32> to vector<16x128xf32>
    %400 = arith.mulf %398, %399 : vector<16x128xf32>
    %401 = vector.broadcast %383 : vector<1x128xf32> to vector<16x128xf32>
    %402 = arith.addf %400, %401 : vector<16x128xf32>
    %c0_127 = arith.constant 0 : index
    %c0_128 = arith.constant 0 : index
    %403 = vector.load %arg5[%c0_127, %c0_128] : memref<32x16xbf16, #tpu.memory_space<vmem>>, vector<32x16xbf16>
    %404 = arith.truncf %402 : vector<16x128xf32> to vector<16x128xbf16>
    %cst_129 = arith.constant dense<0.000000e+00> : vector<32x128xf32>
    %405 = tpu.matmul %403, %404, %cst_129 {dimension_numbers = #tpu.dot_dimension_numbers<[1], [0], [0], [1], [0, 0, 1, 1], [], []>} : vector<32x16xbf16>, vector<16x128xbf16>, vector<32x128xf32> -> vector<32x128xf32>
    %406 = vector.extract_strided_slice %405 {offsets = [0, 0], sizes = [16, 128], strides = [1, 1]} : vector<32x128xf32> to vector<16x128xf32>
    %407 = vector.extract_strided_slice %5 {offsets = [0, 0], sizes = [16, 1], strides = [1, 1]} : vector<16x17xf32> to vector<16x1xf32>
    %408 = vector.broadcast %407 : vector<16x1xf32> to vector<16x128xf32>
    %409 = arith.addf %406, %408 : vector<16x128xf32>
    %410 = vector.extract_strided_slice %5 {offsets = [0, 2], sizes = [16, 1], strides = [1, 1]} : vector<16x17xf32> to vector<16x1xf32>
    %411 = vector.extract_strided_slice %5 {offsets = [0, 3], sizes = [16, 1], strides = [1, 1]} : vector<16x17xf32> to vector<16x1xf32>
    %412 = vector.extract_strided_slice %5 {offsets = [0, 4], sizes = [16, 1], strides = [1, 1]} : vector<16x17xf32> to vector<16x1xf32>
    %413 = vector.extract_strided_slice %5 {offsets = [0, 5], sizes = [16, 1], strides = [1, 1]} : vector<16x17xf32> to vector<16x1xf32>
    %414 = vector.extract_strided_slice %5 {offsets = [0, 6], sizes = [16, 1], strides = [1, 1]} : vector<16x17xf32> to vector<16x1xf32>
    %415 = vector.extract_strided_slice %5 {offsets = [0, 7], sizes = [16, 1], strides = [1, 1]} : vector<16x17xf32> to vector<16x1xf32>
    %416 = vector.extract_strided_slice %5 {offsets = [0, 8], sizes = [16, 1], strides = [1, 1]} : vector<16x17xf32> to vector<16x1xf32>
    %417 = vector.shape_cast %409 : vector<16x128xf32> to vector<1x16x128xf32>
    %cst_130 = arith.constant dense<0.000000e+00> : vector<1xf32>
    %418 = vector.multi_reduction <add>, %417, %cst_130 [1, 2] : vector<1x16x128xf32> to vector<1xf32>
    %419 = vector.shape_cast %418 : vector<1xf32> to vector<1x1x1xf32>
    %420 = vector.extract %419[0, 0, 0] : f32 from vector<1x1x1xf32>
    %421 = vector.broadcast %420 : f32 to vector<1x1xf32>
    %cst_131 = arith.constant 2.048000e+03 : f32
    %422 = vector.broadcast %cst_131 : f32 to vector<1x1xf32>
    %423 = arith.divf %421, %422 : vector<1x1xf32>
    %424 = vector.broadcast %423 : vector<1x1xf32> to vector<16x128xf32>
    %425 = arith.subf %409, %424 : vector<16x128xf32>
    %426 = arith.mulf %425, %425 : vector<16x128xf32>
    %427 = vector.shape_cast %426 : vector<16x128xf32> to vector<1x16x128xf32>
    %cst_132 = arith.constant dense<0.000000e+00> : vector<1xf32>
    %428 = vector.multi_reduction <add>, %427, %cst_132 [1, 2] : vector<1x16x128xf32> to vector<1xf32>
    %429 = vector.shape_cast %428 : vector<1xf32> to vector<1x1x1xf32>
    %430 = vector.extract %429[0, 0, 0] : f32 from vector<1x1x1xf32>
    %431 = vector.broadcast %430 : f32 to vector<1x1xf32>
    %cst_133 = arith.constant 2.048000e+03 : f32
    %432 = vector.broadcast %cst_133 : f32 to vector<1x1xf32>
    %433 = arith.divf %431, %432 : vector<1x1xf32>
    %434 = vector.broadcast %423 : vector<1x1xf32> to vector<16x128xf32>
    %435 = arith.subf %409, %434 : vector<16x128xf32>
    %cst_134 = arith.constant 9.99999974E-6 : f32
    %436 = vector.broadcast %cst_134 : f32 to vector<1x1xf32>
    %437 = arith.addf %433, %436 : vector<1x1xf32>
    %438 = math.rsqrt %437 : vector<1x1xf32>
    %439 = vector.broadcast %438 : vector<1x1xf32> to vector<16x128xf32>
    %440 = arith.mulf %435, %439 : vector<16x128xf32>
    %441 = vector.broadcast %413 : vector<16x1xf32> to vector<16x128xf32>
    %442 = arith.mulf %440, %441 : vector<16x128xf32>
    %443 = vector.broadcast %414 : vector<16x1xf32> to vector<16x128xf32>
    %444 = arith.addf %442, %443 : vector<16x128xf32>
    %cst_135 = arith.constant 5.000000e-01 : f32
    %445 = vector.broadcast %cst_135 : f32 to vector<16x128xf32>
    %446 = arith.mulf %445, %444 : vector<16x128xf32>
    %cst_136 = arith.constant 0.707106769 : f32
    %447 = vector.broadcast %cst_136 : f32 to vector<16x128xf32>
    %448 = arith.mulf %444, %447 : vector<16x128xf32>
    %cst_137 = arith.constant 0.000000e+00 : f32
    %449 = vector.broadcast %cst_137 : f32 to vector<16x128xf32>
    %450 = arith.cmpf olt, %448, %449 : vector<16x128xf32>
    %cst_138 = arith.constant -1.000000e+00 : f32
    %cst_139 = arith.constant 1.000000e+00 : f32
    %451 = vector.broadcast %cst_138 : f32 to vector<16x128xf32>
    %452 = vector.broadcast %cst_139 : f32 to vector<16x128xf32>
    %453 = arith.select %450, %451, %452 : vector<16x128xi1>, vector<16x128xf32>
    %454 = math.absf %448 : vector<16x128xf32>
    %cst_140 = arith.constant 0.327591091 : f32
    %455 = vector.broadcast %cst_140 : f32 to vector<16x128xf32>
    %456 = arith.mulf %455, %454 : vector<16x128xf32>
    %cst_141 = arith.constant 1.000000e+00 : f32
    %457 = vector.broadcast %cst_141 : f32 to vector<16x128xf32>
    %458 = arith.addf %457, %456 : vector<16x128xf32>
    %cst_142 = arith.constant 1.000000e+00 : f32
    %459 = vector.broadcast %cst_142 : f32 to vector<16x128xf32>
    %460 = arith.divf %459, %458 : vector<16x128xf32>
    %cst_143 = arith.constant 1.06140542 : f32
    %461 = vector.broadcast %cst_143 : f32 to vector<16x128xf32>
    %462 = arith.mulf %461, %460 : vector<16x128xf32>
    %cst_144 = arith.constant -1.45315206 : f32
    %463 = vector.broadcast %cst_144 : f32 to vector<16x128xf32>
    %464 = arith.addf %462, %463 : vector<16x128xf32>
    %465 = arith.mulf %464, %460 : vector<16x128xf32>
    %cst_145 = arith.constant 1.42141378 : f32
    %466 = vector.broadcast %cst_145 : f32 to vector<16x128xf32>
    %467 = arith.addf %465, %466 : vector<16x128xf32>
    %468 = arith.mulf %467, %460 : vector<16x128xf32>
    %cst_146 = arith.constant -0.284496725 : f32
    %469 = vector.broadcast %cst_146 : f32 to vector<16x128xf32>
    %470 = arith.addf %468, %469 : vector<16x128xf32>
    %471 = arith.mulf %470, %460 : vector<16x128xf32>
    %cst_147 = arith.constant 0.254829586 : f32
    %472 = vector.broadcast %cst_147 : f32 to vector<16x128xf32>
    %473 = arith.addf %471, %472 : vector<16x128xf32>
    %474 = arith.mulf %473, %460 : vector<16x128xf32>
    %cst_148 = arith.constant 0.000000e+00 : f32
    %475 = vector.broadcast %cst_148 : f32 to vector<16x128xf32>
    %476 = arith.subf %475, %454 : vector<16x128xf32>
    %477 = arith.mulf %476, %454 : vector<16x128xf32>
    %478 = math.exp %477 : vector<16x128xf32>
    %479 = arith.mulf %474, %478 : vector<16x128xf32>
    %cst_149 = arith.constant 1.000000e+00 : f32
    %480 = vector.broadcast %cst_149 : f32 to vector<16x128xf32>
    %481 = arith.subf %480, %479 : vector<16x128xf32>
    %482 = arith.mulf %453, %481 : vector<16x128xf32>
    %cst_150 = arith.constant 1.000000e+00 : f32
    %483 = vector.broadcast %cst_150 : f32 to vector<16x128xf32>
    %484 = arith.addf %483, %482 : vector<16x128xf32>
    %485 = arith.mulf %446, %484 : vector<16x128xf32>
    %c125_i32 = arith.constant 125 : i32
    %486 = tpu.dynamic_rotate %485 by %c125_i32 dim 1 : vector<16x128xf32>, i32 -> vector<16x128xf32>
    %487 = vector.broadcast %46 : vector<16x1xf32> to vector<16x128xf32>
    %488 = vector.broadcast %57 : vector<1x128xf32> to vector<16x128xf32>
    %489 = arith.mulf %487, %488 : vector<16x128xf32>
    %490 = arith.mulf %486, %489 : vector<16x128xf32>
    %c126_i32 = arith.constant 126 : i32
    %491 = tpu.dynamic_rotate %485 by %c126_i32 dim 1 : vector<16x128xf32>, i32 -> vector<16x128xf32>
    %492 = vector.broadcast %75 : vector<16x1xf32> to vector<16x128xf32>
    %493 = vector.broadcast %86 : vector<1x128xf32> to vector<16x128xf32>
    %494 = arith.mulf %492, %493 : vector<16x128xf32>
    %495 = arith.mulf %491, %494 : vector<16x128xf32>
    %496 = arith.addf %490, %495 : vector<16x128xf32>
    %c127_i32 = arith.constant 127 : i32
    %497 = tpu.dynamic_rotate %485 by %c127_i32 dim 1 : vector<16x128xf32>, i32 -> vector<16x128xf32>
    %498 = vector.broadcast %104 : vector<16x1xf32> to vector<16x128xf32>
    %499 = vector.broadcast %115 : vector<1x128xf32> to vector<16x128xf32>
    %500 = arith.mulf %498, %499 : vector<16x128xf32>
    %501 = arith.mulf %497, %500 : vector<16x128xf32>
    %502 = arith.addf %496, %501 : vector<16x128xf32>
    %503 = vector.broadcast %133 : vector<16x1xf32> to vector<16x128xf32>
    %504 = vector.broadcast %144 : vector<1x128xf32> to vector<16x128xf32>
    %505 = arith.mulf %503, %504 : vector<16x128xf32>
    %506 = arith.mulf %485, %505 : vector<16x128xf32>
    %507 = arith.addf %502, %506 : vector<16x128xf32>
    %c1_i32_151 = arith.constant 1 : i32
    %508 = tpu.dynamic_rotate %485 by %c1_i32_151 dim 1 : vector<16x128xf32>, i32 -> vector<16x128xf32>
    %509 = vector.broadcast %162 : vector<16x1xf32> to vector<16x128xf32>
    %510 = vector.broadcast %173 : vector<1x128xf32> to vector<16x128xf32>
    %511 = arith.mulf %509, %510 : vector<16x128xf32>
    %512 = arith.mulf %508, %511 : vector<16x128xf32>
    %513 = arith.addf %507, %512 : vector<16x128xf32>
    %c2_i32_152 = arith.constant 2 : i32
    %514 = tpu.dynamic_rotate %485 by %c2_i32_152 dim 1 : vector<16x128xf32>, i32 -> vector<16x128xf32>
    %515 = vector.broadcast %191 : vector<16x1xf32> to vector<16x128xf32>
    %516 = vector.broadcast %202 : vector<1x128xf32> to vector<16x128xf32>
    %517 = arith.mulf %515, %516 : vector<16x128xf32>
    %518 = arith.mulf %514, %517 : vector<16x128xf32>
    %519 = arith.addf %513, %518 : vector<16x128xf32>
    %c80_i32_153 = arith.constant 80 : i32
    %520 = tpu.dynamic_rotate %485 by %c80_i32_153 dim 1 : vector<16x128xf32>, i32 -> vector<16x128xf32>
    %521 = vector.broadcast %46 : vector<16x1xf32> to vector<16x128xf32>
    %522 = vector.broadcast %68 : vector<1x128xf32> to vector<16x128xf32>
    %523 = arith.mulf %521, %522 : vector<16x128xf32>
    %524 = arith.mulf %520, %523 : vector<16x128xf32>
    %c96_i32_154 = arith.constant 96 : i32
    %525 = tpu.dynamic_rotate %485 by %c96_i32_154 dim 1 : vector<16x128xf32>, i32 -> vector<16x128xf32>
    %526 = vector.broadcast %75 : vector<16x1xf32> to vector<16x128xf32>
    %527 = vector.broadcast %97 : vector<1x128xf32> to vector<16x128xf32>
    %528 = arith.mulf %526, %527 : vector<16x128xf32>
    %529 = arith.mulf %525, %528 : vector<16x128xf32>
    %530 = arith.addf %524, %529 : vector<16x128xf32>
    %c112_i32_155 = arith.constant 112 : i32
    %531 = tpu.dynamic_rotate %485 by %c112_i32_155 dim 1 : vector<16x128xf32>, i32 -> vector<16x128xf32>
    %532 = vector.broadcast %104 : vector<16x1xf32> to vector<16x128xf32>
    %533 = vector.broadcast %126 : vector<1x128xf32> to vector<16x128xf32>
    %534 = arith.mulf %532, %533 : vector<16x128xf32>
    %535 = arith.mulf %531, %534 : vector<16x128xf32>
    %536 = arith.addf %530, %535 : vector<16x128xf32>
    %537 = vector.broadcast %133 : vector<16x1xf32> to vector<16x128xf32>
    %538 = vector.broadcast %155 : vector<1x128xf32> to vector<16x128xf32>
    %539 = arith.mulf %537, %538 : vector<16x128xf32>
    %540 = arith.mulf %485, %539 : vector<16x128xf32>
    %541 = arith.addf %536, %540 : vector<16x128xf32>
    %c16_i32_156 = arith.constant 16 : i32
    %542 = tpu.dynamic_rotate %485 by %c16_i32_156 dim 1 : vector<16x128xf32>, i32 -> vector<16x128xf32>
    %543 = vector.broadcast %162 : vector<16x1xf32> to vector<16x128xf32>
    %544 = vector.broadcast %184 : vector<1x128xf32> to vector<16x128xf32>
    %545 = arith.mulf %543, %544 : vector<16x128xf32>
    %546 = arith.mulf %542, %545 : vector<16x128xf32>
    %547 = arith.addf %541, %546 : vector<16x128xf32>
    %c32_i32_157 = arith.constant 32 : i32
    %548 = tpu.dynamic_rotate %485 by %c32_i32_157 dim 1 : vector<16x128xf32>, i32 -> vector<16x128xf32>
    %549 = vector.broadcast %191 : vector<16x1xf32> to vector<16x128xf32>
    %550 = vector.broadcast %213 : vector<1x128xf32> to vector<16x128xf32>
    %551 = arith.mulf %549, %550 : vector<16x128xf32>
    %552 = arith.mulf %548, %551 : vector<16x128xf32>
    %553 = arith.addf %547, %552 : vector<16x128xf32>
    %c17_i32 = arith.constant 17 : i32
    %554 = tpu.dynamic_rotate %519 by %c17_i32 dim 1 : vector<16x128xf32>, i32 -> vector<16x128xf32>
    %555 = vector.broadcast %234 : vector<1x128xf32> to vector<16x128xf32>
    %556 = arith.mulf %554, %555 : vector<16x128xf32>
    %557 = arith.truncf %556 : vector<16x128xf32> to vector<16x128xbf16>
    %c16_i32_158 = arith.constant 16 : i32
    %558 = tpu.dynamic_rotate %519 by %c16_i32_158 dim 1 : vector<16x128xf32>, i32 -> vector<16x128xf32>
    %559 = vector.broadcast %255 : vector<1x128xf32> to vector<16x128xf32>
    %560 = arith.mulf %558, %559 : vector<16x128xf32>
    %561 = arith.truncf %560 : vector<16x128xf32> to vector<16x128xbf16>
    %c15_i32_159 = arith.constant 15 : i32
    %562 = tpu.dynamic_rotate %519 by %c15_i32_159 dim 1 : vector<16x128xf32>, i32 -> vector<16x128xf32>
    %563 = vector.broadcast %276 : vector<1x128xf32> to vector<16x128xf32>
    %564 = arith.mulf %562, %563 : vector<16x128xf32>
    %565 = arith.truncf %564 : vector<16x128xf32> to vector<16x128xbf16>
    %c1_i32_160 = arith.constant 1 : i32
    %566 = tpu.dynamic_rotate %519 by %c1_i32_160 dim 1 : vector<16x128xf32>, i32 -> vector<16x128xf32>
    %567 = vector.broadcast %297 : vector<1x128xf32> to vector<16x128xf32>
    %568 = arith.mulf %566, %567 : vector<16x128xf32>
    %569 = arith.truncf %568 : vector<16x128xf32> to vector<16x128xbf16>
    %570 = arith.truncf %519 : vector<16x128xf32> to vector<16x128xbf16>
    %c127_i32_161 = arith.constant 127 : i32
    %571 = tpu.dynamic_rotate %519 by %c127_i32_161 dim 1 : vector<16x128xf32>, i32 -> vector<16x128xf32>
    %572 = vector.broadcast %318 : vector<1x128xf32> to vector<16x128xf32>
    %573 = arith.mulf %571, %572 : vector<16x128xf32>
    %574 = arith.truncf %573 : vector<16x128xf32> to vector<16x128xbf16>
    %c113_i32 = arith.constant 113 : i32
    %575 = tpu.dynamic_rotate %519 by %c113_i32 dim 1 : vector<16x128xf32>, i32 -> vector<16x128xf32>
    %576 = vector.broadcast %339 : vector<1x128xf32> to vector<16x128xf32>
    %577 = arith.mulf %575, %576 : vector<16x128xf32>
    %578 = arith.truncf %577 : vector<16x128xf32> to vector<16x128xbf16>
    %c112_i32_162 = arith.constant 112 : i32
    %579 = tpu.dynamic_rotate %519 by %c112_i32_162 dim 1 : vector<16x128xf32>, i32 -> vector<16x128xf32>
    %580 = vector.broadcast %360 : vector<1x128xf32> to vector<16x128xf32>
    %581 = arith.mulf %579, %580 : vector<16x128xf32>
    %582 = arith.truncf %581 : vector<16x128xf32> to vector<16x128xbf16>
    %c111_i32 = arith.constant 111 : i32
    %583 = tpu.dynamic_rotate %519 by %c111_i32 dim 1 : vector<16x128xf32>, i32 -> vector<16x128xf32>
    %584 = vector.broadcast %381 : vector<1x128xf32> to vector<16x128xf32>
    %585 = arith.mulf %583, %584 : vector<16x128xf32>
    %586 = arith.truncf %585 : vector<16x128xf32> to vector<16x128xbf16>
    %587 = tpu.concatenate %557, %561, %565, %569, %570, %574, %578, %582, %586 in 0 : vector<16x128xbf16>, vector<16x128xbf16>, vector<16x128xbf16>, vector<16x128xbf16>, vector<16x128xbf16>, vector<16x128xbf16>, vector<16x128xbf16>, vector<16x128xbf16>, vector<16x128xbf16> -> vector<144x128xbf16>
    %c0_163 = arith.constant 0 : index
    %c0_164 = arith.constant 0 : index
    %588 = vector.load %arg6[%c0_163, %c0_164] : memref<16x144xbf16, #tpu.memory_space<vmem>>, vector<16x144xbf16>
    %cst_165 = arith.constant dense<0.000000e+00> : vector<16x128xf32>
    %589 = tpu.matmul %588, %587, %cst_165 {dimension_numbers = #tpu.dot_dimension_numbers<[1], [0], [0], [1], [0, 0, 1, 1], [], []>} : vector<16x144xbf16>, vector<144x128xbf16>, vector<16x128xf32> -> vector<16x128xf32>
    %590 = vector.broadcast %410 : vector<16x1xf32> to vector<16x128xf32>
    %591 = arith.addf %589, %590 : vector<16x128xf32>
    %cst_166 = arith.constant 5.000000e-01 : f32
    %592 = vector.broadcast %cst_166 : f32 to vector<16x128xf32>
    %593 = arith.mulf %592, %591 : vector<16x128xf32>
    %cst_167 = arith.constant 0.707106769 : f32
    %594 = vector.broadcast %cst_167 : f32 to vector<16x128xf32>
    %595 = arith.mulf %591, %594 : vector<16x128xf32>
    %cst_168 = arith.constant 0.000000e+00 : f32
    %596 = vector.broadcast %cst_168 : f32 to vector<16x128xf32>
    %597 = arith.cmpf olt, %595, %596 : vector<16x128xf32>
    %cst_169 = arith.constant -1.000000e+00 : f32
    %cst_170 = arith.constant 1.000000e+00 : f32
    %598 = vector.broadcast %cst_169 : f32 to vector<16x128xf32>
    %599 = vector.broadcast %cst_170 : f32 to vector<16x128xf32>
    %600 = arith.select %597, %598, %599 : vector<16x128xi1>, vector<16x128xf32>
    %601 = math.absf %595 : vector<16x128xf32>
    %cst_171 = arith.constant 0.327591091 : f32
    %602 = vector.broadcast %cst_171 : f32 to vector<16x128xf32>
    %603 = arith.mulf %602, %601 : vector<16x128xf32>
    %cst_172 = arith.constant 1.000000e+00 : f32
    %604 = vector.broadcast %cst_172 : f32 to vector<16x128xf32>
    %605 = arith.addf %604, %603 : vector<16x128xf32>
    %cst_173 = arith.constant 1.000000e+00 : f32
    %606 = vector.broadcast %cst_173 : f32 to vector<16x128xf32>
    %607 = arith.divf %606, %605 : vector<16x128xf32>
    %cst_174 = arith.constant 1.06140542 : f32
    %608 = vector.broadcast %cst_174 : f32 to vector<16x128xf32>
    %609 = arith.mulf %608, %607 : vector<16x128xf32>
    %cst_175 = arith.constant -1.45315206 : f32
    %610 = vector.broadcast %cst_175 : f32 to vector<16x128xf32>
    %611 = arith.addf %609, %610 : vector<16x128xf32>
    %612 = arith.mulf %611, %607 : vector<16x128xf32>
    %cst_176 = arith.constant 1.42141378 : f32
    %613 = vector.broadcast %cst_176 : f32 to vector<16x128xf32>
    %614 = arith.addf %612, %613 : vector<16x128xf32>
    %615 = arith.mulf %614, %607 : vector<16x128xf32>
    %cst_177 = arith.constant -0.284496725 : f32
    %616 = vector.broadcast %cst_177 : f32 to vector<16x128xf32>
    %617 = arith.addf %615, %616 : vector<16x128xf32>
    %618 = arith.mulf %617, %607 : vector<16x128xf32>
    %cst_178 = arith.constant 0.254829586 : f32
    %619 = vector.broadcast %cst_178 : f32 to vector<16x128xf32>
    %620 = arith.addf %618, %619 : vector<16x128xf32>
    %621 = arith.mulf %620, %607 : vector<16x128xf32>
    %cst_179 = arith.constant 0.000000e+00 : f32
    %622 = vector.broadcast %cst_179 : f32 to vector<16x128xf32>
    %623 = arith.subf %622, %601 : vector<16x128xf32>
    %624 = arith.mulf %623, %601 : vector<16x128xf32>
    %625 = math.exp %624 : vector<16x128xf32>
    %626 = arith.mulf %621, %625 : vector<16x128xf32>
    %cst_180 = arith.constant 1.000000e+00 : f32
    %627 = vector.broadcast %cst_180 : f32 to vector<16x128xf32>
    %628 = arith.subf %627, %626 : vector<16x128xf32>
    %629 = arith.mulf %600, %628 : vector<16x128xf32>
    %cst_181 = arith.constant 1.000000e+00 : f32
    %630 = vector.broadcast %cst_181 : f32 to vector<16x128xf32>
    %631 = arith.addf %630, %629 : vector<16x128xf32>
    %632 = arith.mulf %593, %631 : vector<16x128xf32>
    %c17_i32_182 = arith.constant 17 : i32
    %633 = tpu.dynamic_rotate %553 by %c17_i32_182 dim 1 : vector<16x128xf32>, i32 -> vector<16x128xf32>
    %634 = vector.broadcast %234 : vector<1x128xf32> to vector<16x128xf32>
    %635 = arith.mulf %633, %634 : vector<16x128xf32>
    %636 = arith.truncf %635 : vector<16x128xf32> to vector<16x128xbf16>
    %c16_i32_183 = arith.constant 16 : i32
    %637 = tpu.dynamic_rotate %553 by %c16_i32_183 dim 1 : vector<16x128xf32>, i32 -> vector<16x128xf32>
    %638 = vector.broadcast %255 : vector<1x128xf32> to vector<16x128xf32>
    %639 = arith.mulf %637, %638 : vector<16x128xf32>
    %640 = arith.truncf %639 : vector<16x128xf32> to vector<16x128xbf16>
    %c15_i32_184 = arith.constant 15 : i32
    %641 = tpu.dynamic_rotate %553 by %c15_i32_184 dim 1 : vector<16x128xf32>, i32 -> vector<16x128xf32>
    %642 = vector.broadcast %276 : vector<1x128xf32> to vector<16x128xf32>
    %643 = arith.mulf %641, %642 : vector<16x128xf32>
    %644 = arith.truncf %643 : vector<16x128xf32> to vector<16x128xbf16>
    %c1_i32_185 = arith.constant 1 : i32
    %645 = tpu.dynamic_rotate %553 by %c1_i32_185 dim 1 : vector<16x128xf32>, i32 -> vector<16x128xf32>
    %646 = vector.broadcast %297 : vector<1x128xf32> to vector<16x128xf32>
    %647 = arith.mulf %645, %646 : vector<16x128xf32>
    %648 = arith.truncf %647 : vector<16x128xf32> to vector<16x128xbf16>
    %649 = arith.truncf %553 : vector<16x128xf32> to vector<16x128xbf16>
    %c127_i32_186 = arith.constant 127 : i32
    %650 = tpu.dynamic_rotate %553 by %c127_i32_186 dim 1 : vector<16x128xf32>, i32 -> vector<16x128xf32>
    %651 = vector.broadcast %318 : vector<1x128xf32> to vector<16x128xf32>
    %652 = arith.mulf %650, %651 : vector<16x128xf32>
    %653 = arith.truncf %652 : vector<16x128xf32> to vector<16x128xbf16>
    %c113_i32_187 = arith.constant 113 : i32
    %654 = tpu.dynamic_rotate %553 by %c113_i32_187 dim 1 : vector<16x128xf32>, i32 -> vector<16x128xf32>
    %655 = vector.broadcast %339 : vector<1x128xf32> to vector<16x128xf32>
    %656 = arith.mulf %654, %655 : vector<16x128xf32>
    %657 = arith.truncf %656 : vector<16x128xf32> to vector<16x128xbf16>
    %c112_i32_188 = arith.constant 112 : i32
    %658 = tpu.dynamic_rotate %553 by %c112_i32_188 dim 1 : vector<16x128xf32>, i32 -> vector<16x128xf32>
    %659 = vector.broadcast %360 : vector<1x128xf32> to vector<16x128xf32>
    %660 = arith.mulf %658, %659 : vector<16x128xf32>
    %661 = arith.truncf %660 : vector<16x128xf32> to vector<16x128xbf16>
    %c111_i32_189 = arith.constant 111 : i32
    %662 = tpu.dynamic_rotate %553 by %c111_i32_189 dim 1 : vector<16x128xf32>, i32 -> vector<16x128xf32>
    %663 = vector.broadcast %381 : vector<1x128xf32> to vector<16x128xf32>
    %664 = arith.mulf %662, %663 : vector<16x128xf32>
    %665 = arith.truncf %664 : vector<16x128xf32> to vector<16x128xbf16>
    %666 = tpu.concatenate %636, %640, %644, %648, %649, %653, %657, %661, %665 in 0 : vector<16x128xbf16>, vector<16x128xbf16>, vector<16x128xbf16>, vector<16x128xbf16>, vector<16x128xbf16>, vector<16x128xbf16>, vector<16x128xbf16>, vector<16x128xbf16>, vector<16x128xbf16> -> vector<144x128xbf16>
    %c0_190 = arith.constant 0 : index
    %c0_191 = arith.constant 0 : index
    %667 = vector.load %arg7[%c0_190, %c0_191] : memref<16x144xbf16, #tpu.memory_space<vmem>>, vector<16x144xbf16>
    %cst_192 = arith.constant dense<0.000000e+00> : vector<16x128xf32>
    %668 = tpu.matmul %667, %666, %cst_192 {dimension_numbers = #tpu.dot_dimension_numbers<[1], [0], [0], [1], [0, 0, 1, 1], [], []>} : vector<16x144xbf16>, vector<144x128xbf16>, vector<16x128xf32> -> vector<16x128xf32>
    %669 = vector.broadcast %411 : vector<16x1xf32> to vector<16x128xf32>
    %670 = arith.addf %668, %669 : vector<16x128xf32>
    %cst_193 = arith.constant 5.000000e-01 : f32
    %671 = vector.broadcast %cst_193 : f32 to vector<16x128xf32>
    %672 = arith.mulf %671, %670 : vector<16x128xf32>
    %cst_194 = arith.constant 0.707106769 : f32
    %673 = vector.broadcast %cst_194 : f32 to vector<16x128xf32>
    %674 = arith.mulf %670, %673 : vector<16x128xf32>
    %cst_195 = arith.constant 0.000000e+00 : f32
    %675 = vector.broadcast %cst_195 : f32 to vector<16x128xf32>
    %676 = arith.cmpf olt, %674, %675 : vector<16x128xf32>
    %cst_196 = arith.constant -1.000000e+00 : f32
    %cst_197 = arith.constant 1.000000e+00 : f32
    %677 = vector.broadcast %cst_196 : f32 to vector<16x128xf32>
    %678 = vector.broadcast %cst_197 : f32 to vector<16x128xf32>
    %679 = arith.select %676, %677, %678 : vector<16x128xi1>, vector<16x128xf32>
    %680 = math.absf %674 : vector<16x128xf32>
    %cst_198 = arith.constant 0.327591091 : f32
    %681 = vector.broadcast %cst_198 : f32 to vector<16x128xf32>
    %682 = arith.mulf %681, %680 : vector<16x128xf32>
    %cst_199 = arith.constant 1.000000e+00 : f32
    %683 = vector.broadcast %cst_199 : f32 to vector<16x128xf32>
    %684 = arith.addf %683, %682 : vector<16x128xf32>
    %cst_200 = arith.constant 1.000000e+00 : f32
    %685 = vector.broadcast %cst_200 : f32 to vector<16x128xf32>
    %686 = arith.divf %685, %684 : vector<16x128xf32>
    %cst_201 = arith.constant 1.06140542 : f32
    %687 = vector.broadcast %cst_201 : f32 to vector<16x128xf32>
    %688 = arith.mulf %687, %686 : vector<16x128xf32>
    %cst_202 = arith.constant -1.45315206 : f32
    %689 = vector.broadcast %cst_202 : f32 to vector<16x128xf32>
    %690 = arith.addf %688, %689 : vector<16x128xf32>
    %691 = arith.mulf %690, %686 : vector<16x128xf32>
    %cst_203 = arith.constant 1.42141378 : f32
    %692 = vector.broadcast %cst_203 : f32 to vector<16x128xf32>
    %693 = arith.addf %691, %692 : vector<16x128xf32>
    %694 = arith.mulf %693, %686 : vector<16x128xf32>
    %cst_204 = arith.constant -0.284496725 : f32
    %695 = vector.broadcast %cst_204 : f32 to vector<16x128xf32>
    %696 = arith.addf %694, %695 : vector<16x128xf32>
    %697 = arith.mulf %696, %686 : vector<16x128xf32>
    %cst_205 = arith.constant 0.254829586 : f32
    %698 = vector.broadcast %cst_205 : f32 to vector<16x128xf32>
    %699 = arith.addf %697, %698 : vector<16x128xf32>
    %700 = arith.mulf %699, %686 : vector<16x128xf32>
    %cst_206 = arith.constant 0.000000e+00 : f32
    %701 = vector.broadcast %cst_206 : f32 to vector<16x128xf32>
    %702 = arith.subf %701, %680 : vector<16x128xf32>
    %703 = arith.mulf %702, %680 : vector<16x128xf32>
    %704 = math.exp %703 : vector<16x128xf32>
    %705 = arith.mulf %700, %704 : vector<16x128xf32>
    %cst_207 = arith.constant 1.000000e+00 : f32
    %706 = vector.broadcast %cst_207 : f32 to vector<16x128xf32>
    %707 = arith.subf %706, %705 : vector<16x128xf32>
    %708 = arith.mulf %679, %707 : vector<16x128xf32>
    %cst_208 = arith.constant 1.000000e+00 : f32
    %709 = vector.broadcast %cst_208 : f32 to vector<16x128xf32>
    %710 = arith.addf %709, %708 : vector<16x128xf32>
    %711 = arith.mulf %672, %710 : vector<16x128xf32>
    %712 = arith.addf %632, %711 : vector<16x128xf32>
    %713 = vector.shape_cast %712 : vector<16x128xf32> to vector<1x16x128xf32>
    %cst_209 = arith.constant dense<0.000000e+00> : vector<1xf32>
    %714 = vector.multi_reduction <add>, %713, %cst_209 [1, 2] : vector<1x16x128xf32> to vector<1xf32>
    %715 = vector.shape_cast %714 : vector<1xf32> to vector<1x1x1xf32>
    %716 = vector.extract %715[0, 0, 0] : f32 from vector<1x1x1xf32>
    %717 = vector.broadcast %716 : f32 to vector<1x1xf32>
    %cst_210 = arith.constant 2.048000e+03 : f32
    %718 = vector.broadcast %cst_210 : f32 to vector<1x1xf32>
    %719 = arith.divf %717, %718 : vector<1x1xf32>
    %720 = vector.broadcast %719 : vector<1x1xf32> to vector<16x128xf32>
    %721 = arith.subf %712, %720 : vector<16x128xf32>
    %722 = arith.mulf %721, %721 : vector<16x128xf32>
    %723 = vector.shape_cast %722 : vector<16x128xf32> to vector<1x16x128xf32>
    %cst_211 = arith.constant dense<0.000000e+00> : vector<1xf32>
    %724 = vector.multi_reduction <add>, %723, %cst_211 [1, 2] : vector<1x16x128xf32> to vector<1xf32>
    %725 = vector.shape_cast %724 : vector<1xf32> to vector<1x1x1xf32>
    %726 = vector.extract %725[0, 0, 0] : f32 from vector<1x1x1xf32>
    %727 = vector.broadcast %726 : f32 to vector<1x1xf32>
    %cst_212 = arith.constant 2.048000e+03 : f32
    %728 = vector.broadcast %cst_212 : f32 to vector<1x1xf32>
    %729 = arith.divf %727, %728 : vector<1x1xf32>
    %730 = vector.broadcast %719 : vector<1x1xf32> to vector<16x128xf32>
    %731 = arith.subf %712, %730 : vector<16x128xf32>
    %cst_213 = arith.constant 9.99999974E-6 : f32
    %732 = vector.broadcast %cst_213 : f32 to vector<1x1xf32>
    %733 = arith.addf %729, %732 : vector<1x1xf32>
    %734 = math.rsqrt %733 : vector<1x1xf32>
    %735 = vector.broadcast %734 : vector<1x1xf32> to vector<16x128xf32>
    %736 = arith.mulf %731, %735 : vector<16x128xf32>
    %737 = vector.broadcast %415 : vector<16x1xf32> to vector<16x128xf32>
    %738 = arith.mulf %736, %737 : vector<16x128xf32>
    %739 = vector.broadcast %416 : vector<16x1xf32> to vector<16x128xf32>
    %740 = arith.addf %738, %739 : vector<16x128xf32>
    %c0_214 = arith.constant 0 : index
    %c0_215 = arith.constant 0 : index
    %741 = vector.load %arg8[%c0_214, %c0_215] : memref<16x16xbf16, #tpu.memory_space<vmem>>, vector<16x16xbf16>
    %742 = arith.truncf %740 : vector<16x128xf32> to vector<16x128xbf16>
    %cst_216 = arith.constant dense<0.000000e+00> : vector<16x128xf32>
    %743 = tpu.matmul %741, %742, %cst_216 {dimension_numbers = #tpu.dot_dimension_numbers<[1], [0], [0], [1], [0, 0, 1, 1], [], []>} : vector<16x16xbf16>, vector<16x128xbf16>, vector<16x128xf32> -> vector<16x128xf32>
    %744 = vector.broadcast %412 : vector<16x1xf32> to vector<16x128xf32>
    %745 = arith.addf %743, %744 : vector<16x128xf32>
    %746 = vector.extract_strided_slice %405 {offsets = [16, 0], sizes = [16, 128], strides = [1, 1]} : vector<32x128xf32> to vector<16x128xf32>
    %747 = vector.extract_strided_slice %5 {offsets = [0, 1], sizes = [16, 1], strides = [1, 1]} : vector<16x17xf32> to vector<16x1xf32>
    %748 = vector.broadcast %747 : vector<16x1xf32> to vector<16x128xf32>
    %749 = arith.addf %746, %748 : vector<16x128xf32>
    %750 = vector.extract_strided_slice %5 {offsets = [0, 9], sizes = [16, 1], strides = [1, 1]} : vector<16x17xf32> to vector<16x1xf32>
    %751 = vector.extract_strided_slice %5 {offsets = [0, 10], sizes = [16, 1], strides = [1, 1]} : vector<16x17xf32> to vector<16x1xf32>
    %752 = vector.extract_strided_slice %5 {offsets = [0, 11], sizes = [16, 1], strides = [1, 1]} : vector<16x17xf32> to vector<16x1xf32>
    %753 = vector.extract_strided_slice %5 {offsets = [0, 12], sizes = [16, 1], strides = [1, 1]} : vector<16x17xf32> to vector<16x1xf32>
    %754 = vector.extract_strided_slice %5 {offsets = [0, 13], sizes = [16, 1], strides = [1, 1]} : vector<16x17xf32> to vector<16x1xf32>
    %755 = vector.extract_strided_slice %5 {offsets = [0, 14], sizes = [16, 1], strides = [1, 1]} : vector<16x17xf32> to vector<16x1xf32>
    %756 = vector.extract_strided_slice %5 {offsets = [0, 15], sizes = [16, 1], strides = [1, 1]} : vector<16x17xf32> to vector<16x1xf32>
    %757 = vector.shape_cast %749 : vector<16x128xf32> to vector<1x16x128xf32>
    %cst_217 = arith.constant dense<0.000000e+00> : vector<1xf32>
    %758 = vector.multi_reduction <add>, %757, %cst_217 [1, 2] : vector<1x16x128xf32> to vector<1xf32>
    %759 = vector.shape_cast %758 : vector<1xf32> to vector<1x1x1xf32>
    %760 = vector.extract %759[0, 0, 0] : f32 from vector<1x1x1xf32>
    %761 = vector.broadcast %760 : f32 to vector<1x1xf32>
    %cst_218 = arith.constant 2.048000e+03 : f32
    %762 = vector.broadcast %cst_218 : f32 to vector<1x1xf32>
    %763 = arith.divf %761, %762 : vector<1x1xf32>
    %764 = vector.broadcast %763 : vector<1x1xf32> to vector<16x128xf32>
    %765 = arith.subf %749, %764 : vector<16x128xf32>
    %766 = arith.mulf %765, %765 : vector<16x128xf32>
    %767 = vector.shape_cast %766 : vector<16x128xf32> to vector<1x16x128xf32>
    %cst_219 = arith.constant dense<0.000000e+00> : vector<1xf32>
    %768 = vector.multi_reduction <add>, %767, %cst_219 [1, 2] : vector<1x16x128xf32> to vector<1xf32>
    %769 = vector.shape_cast %768 : vector<1xf32> to vector<1x1x1xf32>
    %770 = vector.extract %769[0, 0, 0] : f32 from vector<1x1x1xf32>
    %771 = vector.broadcast %770 : f32 to vector<1x1xf32>
    %cst_220 = arith.constant 2.048000e+03 : f32
    %772 = vector.broadcast %cst_220 : f32 to vector<1x1xf32>
    %773 = arith.divf %771, %772 : vector<1x1xf32>
    %774 = vector.broadcast %763 : vector<1x1xf32> to vector<16x128xf32>
    %775 = arith.subf %749, %774 : vector<16x128xf32>
    %cst_221 = arith.constant 9.99999974E-6 : f32
    %776 = vector.broadcast %cst_221 : f32 to vector<1x1xf32>
    %777 = arith.addf %773, %776 : vector<1x1xf32>
    %778 = math.rsqrt %777 : vector<1x1xf32>
    %779 = vector.broadcast %778 : vector<1x1xf32> to vector<16x128xf32>
    %780 = arith.mulf %775, %779 : vector<16x128xf32>
    %781 = vector.broadcast %753 : vector<16x1xf32> to vector<16x128xf32>
    %782 = arith.mulf %780, %781 : vector<16x128xf32>
    %783 = vector.broadcast %754 : vector<16x1xf32> to vector<16x128xf32>
    %784 = arith.addf %782, %783 : vector<16x128xf32>
    %cst_222 = arith.constant 5.000000e-01 : f32
    %785 = vector.broadcast %cst_222 : f32 to vector<16x128xf32>
    %786 = arith.mulf %785, %784 : vector<16x128xf32>
    %cst_223 = arith.constant 0.707106769 : f32
    %787 = vector.broadcast %cst_223 : f32 to vector<16x128xf32>
    %788 = arith.mulf %784, %787 : vector<16x128xf32>
    %cst_224 = arith.constant 0.000000e+00 : f32
    %789 = vector.broadcast %cst_224 : f32 to vector<16x128xf32>
    %790 = arith.cmpf olt, %788, %789 : vector<16x128xf32>
    %cst_225 = arith.constant -1.000000e+00 : f32
    %cst_226 = arith.constant 1.000000e+00 : f32
    %791 = vector.broadcast %cst_225 : f32 to vector<16x128xf32>
    %792 = vector.broadcast %cst_226 : f32 to vector<16x128xf32>
    %793 = arith.select %790, %791, %792 : vector<16x128xi1>, vector<16x128xf32>
    %794 = math.absf %788 : vector<16x128xf32>
    %cst_227 = arith.constant 0.327591091 : f32
    %795 = vector.broadcast %cst_227 : f32 to vector<16x128xf32>
    %796 = arith.mulf %795, %794 : vector<16x128xf32>
    %cst_228 = arith.constant 1.000000e+00 : f32
    %797 = vector.broadcast %cst_228 : f32 to vector<16x128xf32>
    %798 = arith.addf %797, %796 : vector<16x128xf32>
    %cst_229 = arith.constant 1.000000e+00 : f32
    %799 = vector.broadcast %cst_229 : f32 to vector<16x128xf32>
    %800 = arith.divf %799, %798 : vector<16x128xf32>
    %cst_230 = arith.constant 1.06140542 : f32
    %801 = vector.broadcast %cst_230 : f32 to vector<16x128xf32>
    %802 = arith.mulf %801, %800 : vector<16x128xf32>
    %cst_231 = arith.constant -1.45315206 : f32
    %803 = vector.broadcast %cst_231 : f32 to vector<16x128xf32>
    %804 = arith.addf %802, %803 : vector<16x128xf32>
    %805 = arith.mulf %804, %800 : vector<16x128xf32>
    %cst_232 = arith.constant 1.42141378 : f32
    %806 = vector.broadcast %cst_232 : f32 to vector<16x128xf32>
    %807 = arith.addf %805, %806 : vector<16x128xf32>
    %808 = arith.mulf %807, %800 : vector<16x128xf32>
    %cst_233 = arith.constant -0.284496725 : f32
    %809 = vector.broadcast %cst_233 : f32 to vector<16x128xf32>
    %810 = arith.addf %808, %809 : vector<16x128xf32>
    %811 = arith.mulf %810, %800 : vector<16x128xf32>
    %cst_234 = arith.constant 0.254829586 : f32
    %812 = vector.broadcast %cst_234 : f32 to vector<16x128xf32>
    %813 = arith.addf %811, %812 : vector<16x128xf32>
    %814 = arith.mulf %813, %800 : vector<16x128xf32>
    %cst_235 = arith.constant 0.000000e+00 : f32
    %815 = vector.broadcast %cst_235 : f32 to vector<16x128xf32>
    %816 = arith.subf %815, %794 : vector<16x128xf32>
    %817 = arith.mulf %816, %794 : vector<16x128xf32>
    %818 = math.exp %817 : vector<16x128xf32>
    %819 = arith.mulf %814, %818 : vector<16x128xf32>
    %cst_236 = arith.constant 1.000000e+00 : f32
    %820 = vector.broadcast %cst_236 : f32 to vector<16x128xf32>
    %821 = arith.subf %820, %819 : vector<16x128xf32>
    %822 = arith.mulf %793, %821 : vector<16x128xf32>
    %cst_237 = arith.constant 1.000000e+00 : f32
    %823 = vector.broadcast %cst_237 : f32 to vector<16x128xf32>
    %824 = arith.addf %823, %822 : vector<16x128xf32>
    %825 = arith.mulf %786, %824 : vector<16x128xf32>
    %c125_i32_238 = arith.constant 125 : i32
    %826 = tpu.dynamic_rotate %825 by %c125_i32_238 dim 1 : vector<16x128xf32>, i32 -> vector<16x128xf32>
    %827 = vector.broadcast %46 : vector<16x1xf32> to vector<16x128xf32>
    %828 = vector.broadcast %57 : vector<1x128xf32> to vector<16x128xf32>
    %829 = arith.mulf %827, %828 : vector<16x128xf32>
    %830 = arith.mulf %826, %829 : vector<16x128xf32>
    %c126_i32_239 = arith.constant 126 : i32
    %831 = tpu.dynamic_rotate %825 by %c126_i32_239 dim 1 : vector<16x128xf32>, i32 -> vector<16x128xf32>
    %832 = vector.broadcast %75 : vector<16x1xf32> to vector<16x128xf32>
    %833 = vector.broadcast %86 : vector<1x128xf32> to vector<16x128xf32>
    %834 = arith.mulf %832, %833 : vector<16x128xf32>
    %835 = arith.mulf %831, %834 : vector<16x128xf32>
    %836 = arith.addf %830, %835 : vector<16x128xf32>
    %c127_i32_240 = arith.constant 127 : i32
    %837 = tpu.dynamic_rotate %825 by %c127_i32_240 dim 1 : vector<16x128xf32>, i32 -> vector<16x128xf32>
    %838 = vector.broadcast %104 : vector<16x1xf32> to vector<16x128xf32>
    %839 = vector.broadcast %115 : vector<1x128xf32> to vector<16x128xf32>
    %840 = arith.mulf %838, %839 : vector<16x128xf32>
    %841 = arith.mulf %837, %840 : vector<16x128xf32>
    %842 = arith.addf %836, %841 : vector<16x128xf32>
    %843 = vector.broadcast %133 : vector<16x1xf32> to vector<16x128xf32>
    %844 = vector.broadcast %144 : vector<1x128xf32> to vector<16x128xf32>
    %845 = arith.mulf %843, %844 : vector<16x128xf32>
    %846 = arith.mulf %825, %845 : vector<16x128xf32>
    %847 = arith.addf %842, %846 : vector<16x128xf32>
    %c1_i32_241 = arith.constant 1 : i32
    %848 = tpu.dynamic_rotate %825 by %c1_i32_241 dim 1 : vector<16x128xf32>, i32 -> vector<16x128xf32>
    %849 = vector.broadcast %162 : vector<16x1xf32> to vector<16x128xf32>
    %850 = vector.broadcast %173 : vector<1x128xf32> to vector<16x128xf32>
    %851 = arith.mulf %849, %850 : vector<16x128xf32>
    %852 = arith.mulf %848, %851 : vector<16x128xf32>
    %853 = arith.addf %847, %852 : vector<16x128xf32>
    %c2_i32_242 = arith.constant 2 : i32
    %854 = tpu.dynamic_rotate %825 by %c2_i32_242 dim 1 : vector<16x128xf32>, i32 -> vector<16x128xf32>
    %855 = vector.broadcast %191 : vector<16x1xf32> to vector<16x128xf32>
    %856 = vector.broadcast %202 : vector<1x128xf32> to vector<16x128xf32>
    %857 = arith.mulf %855, %856 : vector<16x128xf32>
    %858 = arith.mulf %854, %857 : vector<16x128xf32>
    %859 = arith.addf %853, %858 : vector<16x128xf32>
    %c80_i32_243 = arith.constant 80 : i32
    %860 = tpu.dynamic_rotate %825 by %c80_i32_243 dim 1 : vector<16x128xf32>, i32 -> vector<16x128xf32>
    %861 = vector.broadcast %46 : vector<16x1xf32> to vector<16x128xf32>
    %862 = vector.broadcast %68 : vector<1x128xf32> to vector<16x128xf32>
    %863 = arith.mulf %861, %862 : vector<16x128xf32>
    %864 = arith.mulf %860, %863 : vector<16x128xf32>
    %c96_i32_244 = arith.constant 96 : i32
    %865 = tpu.dynamic_rotate %825 by %c96_i32_244 dim 1 : vector<16x128xf32>, i32 -> vector<16x128xf32>
    %866 = vector.broadcast %75 : vector<16x1xf32> to vector<16x128xf32>
    %867 = vector.broadcast %97 : vector<1x128xf32> to vector<16x128xf32>
    %868 = arith.mulf %866, %867 : vector<16x128xf32>
    %869 = arith.mulf %865, %868 : vector<16x128xf32>
    %870 = arith.addf %864, %869 : vector<16x128xf32>
    %c112_i32_245 = arith.constant 112 : i32
    %871 = tpu.dynamic_rotate %825 by %c112_i32_245 dim 1 : vector<16x128xf32>, i32 -> vector<16x128xf32>
    %872 = vector.broadcast %104 : vector<16x1xf32> to vector<16x128xf32>
    %873 = vector.broadcast %126 : vector<1x128xf32> to vector<16x128xf32>
    %874 = arith.mulf %872, %873 : vector<16x128xf32>
    %875 = arith.mulf %871, %874 : vector<16x128xf32>
    %876 = arith.addf %870, %875 : vector<16x128xf32>
    %877 = vector.broadcast %133 : vector<16x1xf32> to vector<16x128xf32>
    %878 = vector.broadcast %155 : vector<1x128xf32> to vector<16x128xf32>
    %879 = arith.mulf %877, %878 : vector<16x128xf32>
    %880 = arith.mulf %825, %879 : vector<16x128xf32>
    %881 = arith.addf %876, %880 : vector<16x128xf32>
    %c16_i32_246 = arith.constant 16 : i32
    %882 = tpu.dynamic_rotate %825 by %c16_i32_246 dim 1 : vector<16x128xf32>, i32 -> vector<16x128xf32>
    %883 = vector.broadcast %162 : vector<16x1xf32> to vector<16x128xf32>
    %884 = vector.broadcast %184 : vector<1x128xf32> to vector<16x128xf32>
    %885 = arith.mulf %883, %884 : vector<16x128xf32>
    %886 = arith.mulf %882, %885 : vector<16x128xf32>
    %887 = arith.addf %881, %886 : vector<16x128xf32>
    %c32_i32_247 = arith.constant 32 : i32
    %888 = tpu.dynamic_rotate %825 by %c32_i32_247 dim 1 : vector<16x128xf32>, i32 -> vector<16x128xf32>
    %889 = vector.broadcast %191 : vector<16x1xf32> to vector<16x128xf32>
    %890 = vector.broadcast %213 : vector<1x128xf32> to vector<16x128xf32>
    %891 = arith.mulf %889, %890 : vector<16x128xf32>
    %892 = arith.mulf %888, %891 : vector<16x128xf32>
    %893 = arith.addf %887, %892 : vector<16x128xf32>
    %894 = arith.truncf %859 : vector<16x128xf32> to vector<16x128xbf16>
    %c0_248 = arith.constant 0 : index
    %c0_249 = arith.constant 0 : index
    %895 = vector.load %arg9[%c0_248, %c0_249] : memref<16x16xbf16, #tpu.memory_space<vmem>>, vector<16x16xbf16>
    %cst_250 = arith.constant dense<0.000000e+00> : vector<16x128xf32>
    %896 = tpu.matmul %895, %894, %cst_250 {dimension_numbers = #tpu.dot_dimension_numbers<[1], [0], [0], [1], [0, 0, 1, 1], [], []>} : vector<16x16xbf16>, vector<16x128xbf16>, vector<16x128xf32> -> vector<16x128xf32>
    %897 = vector.broadcast %750 : vector<16x1xf32> to vector<16x128xf32>
    %898 = arith.addf %896, %897 : vector<16x128xf32>
    %cst_251 = arith.constant 5.000000e-01 : f32
    %899 = vector.broadcast %cst_251 : f32 to vector<16x128xf32>
    %900 = arith.mulf %899, %898 : vector<16x128xf32>
    %cst_252 = arith.constant 0.707106769 : f32
    %901 = vector.broadcast %cst_252 : f32 to vector<16x128xf32>
    %902 = arith.mulf %898, %901 : vector<16x128xf32>
    %cst_253 = arith.constant 0.000000e+00 : f32
    %903 = vector.broadcast %cst_253 : f32 to vector<16x128xf32>
    %904 = arith.cmpf olt, %902, %903 : vector<16x128xf32>
    %cst_254 = arith.constant -1.000000e+00 : f32
    %cst_255 = arith.constant 1.000000e+00 : f32
    %905 = vector.broadcast %cst_254 : f32 to vector<16x128xf32>
    %906 = vector.broadcast %cst_255 : f32 to vector<16x128xf32>
    %907 = arith.select %904, %905, %906 : vector<16x128xi1>, vector<16x128xf32>
    %908 = math.absf %902 : vector<16x128xf32>
    %cst_256 = arith.constant 0.327591091 : f32
    %909 = vector.broadcast %cst_256 : f32 to vector<16x128xf32>
    %910 = arith.mulf %909, %908 : vector<16x128xf32>
    %cst_257 = arith.constant 1.000000e+00 : f32
    %911 = vector.broadcast %cst_257 : f32 to vector<16x128xf32>
    %912 = arith.addf %911, %910 : vector<16x128xf32>
    %cst_258 = arith.constant 1.000000e+00 : f32
    %913 = vector.broadcast %cst_258 : f32 to vector<16x128xf32>
    %914 = arith.divf %913, %912 : vector<16x128xf32>
    %cst_259 = arith.constant 1.06140542 : f32
    %915 = vector.broadcast %cst_259 : f32 to vector<16x128xf32>
    %916 = arith.mulf %915, %914 : vector<16x128xf32>
    %cst_260 = arith.constant -1.45315206 : f32
    %917 = vector.broadcast %cst_260 : f32 to vector<16x128xf32>
    %918 = arith.addf %916, %917 : vector<16x128xf32>
    %919 = arith.mulf %918, %914 : vector<16x128xf32>
    %cst_261 = arith.constant 1.42141378 : f32
    %920 = vector.broadcast %cst_261 : f32 to vector<16x128xf32>
    %921 = arith.addf %919, %920 : vector<16x128xf32>
    %922 = arith.mulf %921, %914 : vector<16x128xf32>
    %cst_262 = arith.constant -0.284496725 : f32
    %923 = vector.broadcast %cst_262 : f32 to vector<16x128xf32>
    %924 = arith.addf %922, %923 : vector<16x128xf32>
    %925 = arith.mulf %924, %914 : vector<16x128xf32>
    %cst_263 = arith.constant 0.254829586 : f32
    %926 = vector.broadcast %cst_263 : f32 to vector<16x128xf32>
    %927 = arith.addf %925, %926 : vector<16x128xf32>
    %928 = arith.mulf %927, %914 : vector<16x128xf32>
    %cst_264 = arith.constant 0.000000e+00 : f32
    %929 = vector.broadcast %cst_264 : f32 to vector<16x128xf32>
    %930 = arith.subf %929, %908 : vector<16x128xf32>
    %931 = arith.mulf %930, %908 : vector<16x128xf32>
    %932 = math.exp %931 : vector<16x128xf32>
    %933 = arith.mulf %928, %932 : vector<16x128xf32>
    %cst_265 = arith.constant 1.000000e+00 : f32
    %934 = vector.broadcast %cst_265 : f32 to vector<16x128xf32>
    %935 = arith.subf %934, %933 : vector<16x128xf32>
    %936 = arith.mulf %907, %935 : vector<16x128xf32>
    %cst_266 = arith.constant 1.000000e+00 : f32
    %937 = vector.broadcast %cst_266 : f32 to vector<16x128xf32>
    %938 = arith.addf %937, %936 : vector<16x128xf32>
    %939 = arith.mulf %900, %938 : vector<16x128xf32>
    %940 = arith.truncf %893 : vector<16x128xf32> to vector<16x128xbf16>
    %c0_267 = arith.constant 0 : index
    %c0_268 = arith.constant 0 : index
    %941 = vector.load %arg10[%c0_267, %c0_268] : memref<16x16xbf16, #tpu.memory_space<vmem>>, vector<16x16xbf16>
    %cst_269 = arith.constant dense<0.000000e+00> : vector<16x128xf32>
    %942 = tpu.matmul %941, %940, %cst_269 {dimension_numbers = #tpu.dot_dimension_numbers<[1], [0], [0], [1], [0, 0, 1, 1], [], []>} : vector<16x16xbf16>, vector<16x128xbf16>, vector<16x128xf32> -> vector<16x128xf32>
    %943 = vector.broadcast %751 : vector<16x1xf32> to vector<16x128xf32>
    %944 = arith.addf %942, %943 : vector<16x128xf32>
    %cst_270 = arith.constant 5.000000e-01 : f32
    %945 = vector.broadcast %cst_270 : f32 to vector<16x128xf32>
    %946 = arith.mulf %945, %944 : vector<16x128xf32>
    %cst_271 = arith.constant 0.707106769 : f32
    %947 = vector.broadcast %cst_271 : f32 to vector<16x128xf32>
    %948 = arith.mulf %944, %947 : vector<16x128xf32>
    %cst_272 = arith.constant 0.000000e+00 : f32
    %949 = vector.broadcast %cst_272 : f32 to vector<16x128xf32>
    %950 = arith.cmpf olt, %948, %949 : vector<16x128xf32>
    %cst_273 = arith.constant -1.000000e+00 : f32
    %cst_274 = arith.constant 1.000000e+00 : f32
    %951 = vector.broadcast %cst_273 : f32 to vector<16x128xf32>
    %952 = vector.broadcast %cst_274 : f32 to vector<16x128xf32>
    %953 = arith.select %950, %951, %952 : vector<16x128xi1>, vector<16x128xf32>
    %954 = math.absf %948 : vector<16x128xf32>
    %cst_275 = arith.constant 0.327591091 : f32
    %955 = vector.broadcast %cst_275 : f32 to vector<16x128xf32>
    %956 = arith.mulf %955, %954 : vector<16x128xf32>
    %cst_276 = arith.constant 1.000000e+00 : f32
    %957 = vector.broadcast %cst_276 : f32 to vector<16x128xf32>
    %958 = arith.addf %957, %956 : vector<16x128xf32>
    %cst_277 = arith.constant 1.000000e+00 : f32
    %959 = vector.broadcast %cst_277 : f32 to vector<16x128xf32>
    %960 = arith.divf %959, %958 : vector<16x128xf32>
    %cst_278 = arith.constant 1.06140542 : f32
    %961 = vector.broadcast %cst_278 : f32 to vector<16x128xf32>
    %962 = arith.mulf %961, %960 : vector<16x128xf32>
    %cst_279 = arith.constant -1.45315206 : f32
    %963 = vector.broadcast %cst_279 : f32 to vector<16x128xf32>
    %964 = arith.addf %962, %963 : vector<16x128xf32>
    %965 = arith.mulf %964, %960 : vector<16x128xf32>
    %cst_280 = arith.constant 1.42141378 : f32
    %966 = vector.broadcast %cst_280 : f32 to vector<16x128xf32>
    %967 = arith.addf %965, %966 : vector<16x128xf32>
    %968 = arith.mulf %967, %960 : vector<16x128xf32>
    %cst_281 = arith.constant -0.284496725 : f32
    %969 = vector.broadcast %cst_281 : f32 to vector<16x128xf32>
    %970 = arith.addf %968, %969 : vector<16x128xf32>
    %971 = arith.mulf %970, %960 : vector<16x128xf32>
    %cst_282 = arith.constant 0.254829586 : f32
    %972 = vector.broadcast %cst_282 : f32 to vector<16x128xf32>
    %973 = arith.addf %971, %972 : vector<16x128xf32>
    %974 = arith.mulf %973, %960 : vector<16x128xf32>
    %cst_283 = arith.constant 0.000000e+00 : f32
    %975 = vector.broadcast %cst_283 : f32 to vector<16x128xf32>
    %976 = arith.subf %975, %954 : vector<16x128xf32>
    %977 = arith.mulf %976, %954 : vector<16x128xf32>
    %978 = math.exp %977 : vector<16x128xf32>
    %979 = arith.mulf %974, %978 : vector<16x128xf32>
    %cst_284 = arith.constant 1.000000e+00 : f32
    %980 = vector.broadcast %cst_284 : f32 to vector<16x128xf32>
    %981 = arith.subf %980, %979 : vector<16x128xf32>
    %982 = arith.mulf %953, %981 : vector<16x128xf32>
    %cst_285 = arith.constant 1.000000e+00 : f32
    %983 = vector.broadcast %cst_285 : f32 to vector<16x128xf32>
    %984 = arith.addf %983, %982 : vector<16x128xf32>
    %985 = arith.mulf %946, %984 : vector<16x128xf32>
    %986 = arith.addf %939, %985 : vector<16x128xf32>
    %987 = vector.shape_cast %986 : vector<16x128xf32> to vector<1x16x128xf32>
    %cst_286 = arith.constant dense<0.000000e+00> : vector<1xf32>
    %988 = vector.multi_reduction <add>, %987, %cst_286 [1, 2] : vector<1x16x128xf32> to vector<1xf32>
    %989 = vector.shape_cast %988 : vector<1xf32> to vector<1x1x1xf32>
    %990 = vector.extract %989[0, 0, 0] : f32 from vector<1x1x1xf32>
    %991 = vector.broadcast %990 : f32 to vector<1x1xf32>
    %cst_287 = arith.constant 2.048000e+03 : f32
    %992 = vector.broadcast %cst_287 : f32 to vector<1x1xf32>
    %993 = arith.divf %991, %992 : vector<1x1xf32>
    %994 = vector.broadcast %993 : vector<1x1xf32> to vector<16x128xf32>
    %995 = arith.subf %986, %994 : vector<16x128xf32>
    %996 = arith.mulf %995, %995 : vector<16x128xf32>
    %997 = vector.shape_cast %996 : vector<16x128xf32> to vector<1x16x128xf32>
    %cst_288 = arith.constant dense<0.000000e+00> : vector<1xf32>
    %998 = vector.multi_reduction <add>, %997, %cst_288 [1, 2] : vector<1x16x128xf32> to vector<1xf32>
    %999 = vector.shape_cast %998 : vector<1xf32> to vector<1x1x1xf32>
    %1000 = vector.extract %999[0, 0, 0] : f32 from vector<1x1x1xf32>
    %1001 = vector.broadcast %1000 : f32 to vector<1x1xf32>
    %cst_289 = arith.constant 2.048000e+03 : f32
    %1002 = vector.broadcast %cst_289 : f32 to vector<1x1xf32>
    %1003 = arith.divf %1001, %1002 : vector<1x1xf32>
    %1004 = vector.broadcast %993 : vector<1x1xf32> to vector<16x128xf32>
    %1005 = arith.subf %986, %1004 : vector<16x128xf32>
    %cst_290 = arith.constant 9.99999974E-6 : f32
    %1006 = vector.broadcast %cst_290 : f32 to vector<1x1xf32>
    %1007 = arith.addf %1003, %1006 : vector<1x1xf32>
    %1008 = math.rsqrt %1007 : vector<1x1xf32>
    %1009 = vector.broadcast %1008 : vector<1x1xf32> to vector<16x128xf32>
    %1010 = arith.mulf %1005, %1009 : vector<16x128xf32>
    %1011 = vector.broadcast %755 : vector<16x1xf32> to vector<16x128xf32>
    %1012 = arith.mulf %1010, %1011 : vector<16x128xf32>
    %1013 = vector.broadcast %756 : vector<16x1xf32> to vector<16x128xf32>
    %1014 = arith.addf %1012, %1013 : vector<16x128xf32>
    %c0_291 = arith.constant 0 : index
    %c0_292 = arith.constant 0 : index
    %1015 = vector.load %arg11[%c0_291, %c0_292] : memref<16x16xbf16, #tpu.memory_space<vmem>>, vector<16x16xbf16>
    %1016 = arith.truncf %1014 : vector<16x128xf32> to vector<16x128xbf16>
    %cst_293 = arith.constant dense<0.000000e+00> : vector<16x128xf32>
    %1017 = tpu.matmul %1015, %1016, %cst_293 {dimension_numbers = #tpu.dot_dimension_numbers<[1], [0], [0], [1], [0, 0, 1, 1], [], []>} : vector<16x16xbf16>, vector<16x128xbf16>, vector<16x128xf32> -> vector<16x128xf32>
    %1018 = vector.broadcast %752 : vector<16x1xf32> to vector<16x128xf32>
    %1019 = arith.addf %1017, %1018 : vector<16x128xf32>
    %1020 = arith.addf %1, %745 : vector<16x128xf32>
    %1021 = arith.addf %1020, %1019 : vector<16x128xf32>
    %1022 = vector.extract_strided_slice %4 {offsets = [2, 0], sizes = [1, 128], strides = [1, 1]} : vector<4x128xf32> to vector<1x128xf32>
    %1023 = vector.extract_strided_slice %4 {offsets = [3, 0], sizes = [1, 128], strides = [1, 1]} : vector<4x128xf32> to vector<1x128xf32>
    %1024 = arith.mulf %1021, %1021 : vector<16x128xf32>
    %1025 = tpu.concatenate %1021, %1024 in 0 : vector<16x128xf32>, vector<16x128xf32> -> vector<32x128xf32>
    %cst_294 = arith.constant dense<0.000000e+00> : vector<32x8xf32>
    %1026 = tpu.matmul %1025, %2, %cst_294 {dimension_numbers = #tpu.dot_dimension_numbers<[1], [0], [0], [1], [0, 0, 1, 1], [], []>} : vector<32x128xf32>, vector<128x8xf32>, vector<32x8xf32> -> vector<32x8xf32>
    %cst_295 = arith.constant dense<0.000000e+00> : vector<32x128xf32>
    %1027 = tpu.matmul %1026, %3, %cst_295 {dimension_numbers = #tpu.dot_dimension_numbers<[1], [0], [0], [1], [0, 0, 1, 1], [], []>} : vector<32x8xf32>, vector<8x128xf32>, vector<32x128xf32> -> vector<32x128xf32>
    %1028 = vector.extract_strided_slice %1027 {offsets = [0, 0], sizes = [16, 128], strides = [1, 1]} : vector<32x128xf32> to vector<16x128xf32>
    %1029 = vector.extract_strided_slice %1027 {offsets = [16, 0], sizes = [16, 128], strides = [1, 1]} : vector<32x128xf32> to vector<16x128xf32>
    %1030 = arith.mulf %1028, %1028 : vector<16x128xf32>
    %1031 = arith.subf %1029, %1030 : vector<16x128xf32>
    %cst_296 = arith.constant 0.000000e+00 : f32
    %1032 = vector.broadcast %cst_296 : f32 to vector<16x128xf32>
    %1033 = arith.maximumf %1031, %1032 : vector<16x128xf32>
    %1034 = arith.subf %1021, %1028 : vector<16x128xf32>
    %cst_297 = arith.constant 9.99999974E-6 : f32
    %1035 = vector.broadcast %cst_297 : f32 to vector<16x128xf32>
    %1036 = arith.addf %1033, %1035 : vector<16x128xf32>
    %1037 = math.rsqrt %1036 : vector<16x128xf32>
    %1038 = arith.mulf %1034, %1037 : vector<16x128xf32>
    %1039 = vector.broadcast %1022 : vector<1x128xf32> to vector<16x128xf32>
    %1040 = arith.mulf %1038, %1039 : vector<16x128xf32>
    %1041 = vector.broadcast %1023 : vector<1x128xf32> to vector<16x128xf32>
    %1042 = arith.addf %1040, %1041 : vector<16x128xf32>
    %c0_298 = arith.constant 0 : index
    %c0_299 = arith.constant 0 : index
    %1043 = vector.load %arg13[%c0_298, %c0_299] : memref<64x16xbf16, #tpu.memory_space<vmem>>, vector<64x16xbf16>
    %1044 = arith.truncf %1042 : vector<16x128xf32> to vector<16x128xbf16>
    %cst_300 = arith.constant dense<0.000000e+00> : vector<64x128xf32>
    %1045 = tpu.matmul %1043, %1044, %cst_300 {dimension_numbers = #tpu.dot_dimension_numbers<[1], [0], [0], [1], [0, 0, 1, 1], [], []>} : vector<64x16xbf16>, vector<16x128xbf16>, vector<64x128xf32> -> vector<64x128xf32>
    %c0_301 = arith.constant 0 : index
    %c0_302 = arith.constant 0 : index
    %1046 = vector.load %arg14[%c0_301, %c0_302] : memref<64x1xf32, #tpu.memory_space<vmem>>, vector<64x1xf32>
    %1047 = vector.broadcast %1046 : vector<64x1xf32> to vector<64x128xf32>
    %1048 = arith.addf %1045, %1047 : vector<64x128xf32>
    %cst_303 = arith.constant 5.000000e-01 : f32
    %1049 = vector.broadcast %cst_303 : f32 to vector<64x128xf32>
    %1050 = arith.mulf %1049, %1048 : vector<64x128xf32>
    %cst_304 = arith.constant 0.707106769 : f32
    %1051 = vector.broadcast %cst_304 : f32 to vector<64x128xf32>
    %1052 = arith.mulf %1048, %1051 : vector<64x128xf32>
    %cst_305 = arith.constant 0.000000e+00 : f32
    %1053 = vector.broadcast %cst_305 : f32 to vector<64x128xf32>
    %1054 = arith.cmpf olt, %1052, %1053 : vector<64x128xf32>
    %cst_306 = arith.constant -1.000000e+00 : f32
    %cst_307 = arith.constant 1.000000e+00 : f32
    %1055 = vector.broadcast %cst_306 : f32 to vector<64x128xf32>
    %1056 = vector.broadcast %cst_307 : f32 to vector<64x128xf32>
    %1057 = arith.select %1054, %1055, %1056 : vector<64x128xi1>, vector<64x128xf32>
    %1058 = math.absf %1052 : vector<64x128xf32>
    %cst_308 = arith.constant 0.327591091 : f32
    %1059 = vector.broadcast %cst_308 : f32 to vector<64x128xf32>
    %1060 = arith.mulf %1059, %1058 : vector<64x128xf32>
    %cst_309 = arith.constant 1.000000e+00 : f32
    %1061 = vector.broadcast %cst_309 : f32 to vector<64x128xf32>
    %1062 = arith.addf %1061, %1060 : vector<64x128xf32>
    %cst_310 = arith.constant 1.000000e+00 : f32
    %1063 = vector.broadcast %cst_310 : f32 to vector<64x128xf32>
    %1064 = arith.divf %1063, %1062 : vector<64x128xf32>
    %cst_311 = arith.constant 1.06140542 : f32
    %1065 = vector.broadcast %cst_311 : f32 to vector<64x128xf32>
    %1066 = arith.mulf %1065, %1064 : vector<64x128xf32>
    %cst_312 = arith.constant -1.45315206 : f32
    %1067 = vector.broadcast %cst_312 : f32 to vector<64x128xf32>
    %1068 = arith.addf %1066, %1067 : vector<64x128xf32>
    %1069 = arith.mulf %1068, %1064 : vector<64x128xf32>
    %cst_313 = arith.constant 1.42141378 : f32
    %1070 = vector.broadcast %cst_313 : f32 to vector<64x128xf32>
    %1071 = arith.addf %1069, %1070 : vector<64x128xf32>
    %1072 = arith.mulf %1071, %1064 : vector<64x128xf32>
    %cst_314 = arith.constant -0.284496725 : f32
    %1073 = vector.broadcast %cst_314 : f32 to vector<64x128xf32>
    %1074 = arith.addf %1072, %1073 : vector<64x128xf32>
    %1075 = arith.mulf %1074, %1064 : vector<64x128xf32>
    %cst_315 = arith.constant 0.254829586 : f32
    %1076 = vector.broadcast %cst_315 : f32 to vector<64x128xf32>
    %1077 = arith.addf %1075, %1076 : vector<64x128xf32>
    %1078 = arith.mulf %1077, %1064 : vector<64x128xf32>
    %cst_316 = arith.constant 0.000000e+00 : f32
    %1079 = vector.broadcast %cst_316 : f32 to vector<64x128xf32>
    %1080 = arith.subf %1079, %1058 : vector<64x128xf32>
    %1081 = arith.mulf %1080, %1058 : vector<64x128xf32>
    %1082 = math.exp %1081 : vector<64x128xf32>
    %1083 = arith.mulf %1078, %1082 : vector<64x128xf32>
    %cst_317 = arith.constant 1.000000e+00 : f32
    %1084 = vector.broadcast %cst_317 : f32 to vector<64x128xf32>
    %1085 = arith.subf %1084, %1083 : vector<64x128xf32>
    %1086 = arith.mulf %1057, %1085 : vector<64x128xf32>
    %cst_318 = arith.constant 1.000000e+00 : f32
    %1087 = vector.broadcast %cst_318 : f32 to vector<64x128xf32>
    %1088 = arith.addf %1087, %1086 : vector<64x128xf32>
    %1089 = arith.mulf %1050, %1088 : vector<64x128xf32>
    %c0_319 = arith.constant 0 : index
    %c0_320 = arith.constant 0 : index
    %1090 = vector.load %arg15[%c0_319, %c0_320] : memref<16x64xbf16, #tpu.memory_space<vmem>>, vector<16x64xbf16>
    %1091 = arith.truncf %1089 : vector<64x128xf32> to vector<64x128xbf16>
    %cst_321 = arith.constant dense<0.000000e+00> : vector<16x128xf32>
    %1092 = tpu.matmul %1090, %1091, %cst_321 {dimension_numbers = #tpu.dot_dimension_numbers<[1], [0], [0], [1], [0, 0, 1, 1], [], []>} : vector<16x64xbf16>, vector<64x128xbf16>, vector<16x128xf32> -> vector<16x128xf32>
    %1093 = vector.extract_strided_slice %5 {offsets = [0, 16], sizes = [16, 1], strides = [1, 1]} : vector<16x17xf32> to vector<16x1xf32>
    %1094 = vector.broadcast %1093 : vector<16x1xf32> to vector<16x128xf32>
    %1095 = arith.addf %1092, %1094 : vector<16x128xf32>
    %1096 = arith.addf %1021, %1095 : vector<16x128xf32>
    %c0_322 = arith.constant 0 : index
    %c0_323 = arith.constant 0 : index
    %c0_324 = arith.constant 0 : index
    %1097 = vector.load %arg16[%c0_322, %c0_323, %c0_324] : memref<1x16x128xf32, #tpu.memory_space<vmem>>, vector<1x16x128xf32>
    %1098 = vector.shape_cast %1097 : vector<1x16x128xf32> to vector<16x128xf32>
    %1099 = vector.shape_cast %1096 : vector<16x128xf32> to vector<1x16x128xf32>
    tpu.vector_store %arg16[%c0_322, %c0_323, %c0_324], %1099 {strides = array<i32>} : memref<1x16x128xf32, #tpu.memory_space<vmem>>, vector<1x16x128xf32>,
    return
  }
  func.func @transform_0(%arg0: i32) -> (i32, i32, i32) {
    %c0_i32 = arith.constant 0 : i32
    %c0_i32_0 = arith.constant 0 : i32
    %c0_i32_1 = arith.constant 0 : i32
    return %arg0, %c0_i32, %c0_i32_0 : i32, i32, i32
  }
  func.func @transform_1(%arg0: i32) -> (i32, i32) {
    %c0_i32 = arith.constant 0 : i32
    %c0_i32_0 = arith.constant 0 : i32
    %c0_i32_1 = arith.constant 0 : i32
    return %c0_i32, %c0_i32_0 : i32, i32
  }
  func.func @transform_2(%arg0: i32) -> (i32, i32) {
    %c0_i32 = arith.constant 0 : i32
    %c0_i32_0 = arith.constant 0 : i32
    %c0_i32_1 = arith.constant 0 : i32
    return %c0_i32, %c0_i32_0 : i32, i32
  }
  func.func @transform_3(%arg0: i32) -> (i32, i32) {
    %c0_i32 = arith.constant 0 : i32
    %c0_i32_0 = arith.constant 0 : i32
    %c0_i32_1 = arith.constant 0 : i32
    return %c0_i32, %c0_i32_0 : i32, i32
  }
  func.func @transform_4(%arg0: i32) -> (i32, i32) {
    %c0_i32 = arith.constant 0 : i32
    %c0_i32_0 = arith.constant 0 : i32
    %c0_i32_1 = arith.constant 0 : i32
    return %c0_i32, %c0_i32_0 : i32, i32
  }
  func.func @transform_5(%arg0: i32) -> (i32, i32) {
    %c0_i32 = arith.constant 0 : i32
    %c0_i32_0 = arith.constant 0 : i32
    %c0_i32_1 = arith.constant 0 : i32
    return %c0_i32, %c0_i32_0 : i32, i32
  }
  func.func @transform_6(%arg0: i32) -> (i32, i32) {
    %c0_i32 = arith.constant 0 : i32
    %c0_i32_0 = arith.constant 0 : i32
    %c0_i32_1 = arith.constant 0 : i32
    return %c0_i32, %c0_i32_0 : i32, i32
  }
  func.func @transform_7(%arg0: i32) -> (i32, i32) {
    %c0_i32 = arith.constant 0 : i32
    %c0_i32_0 = arith.constant 0 : i32
    %c0_i32_1 = arith.constant 0 : i32
    return %c0_i32, %c0_i32_0 : i32, i32
  }
  func.func @transform_8(%arg0: i32) -> (i32, i32) {
    %c0_i32 = arith.constant 0 : i32
    %c0_i32_0 = arith.constant 0 : i32
    %c0_i32_1 = arith.constant 0 : i32
    return %c0_i32, %c0_i32_0 : i32, i32
  }
  func.func @transform_9(%arg0: i32) -> (i32, i32) {
    %c0_i32 = arith.constant 0 : i32
    %c0_i32_0 = arith.constant 0 : i32
    %c0_i32_1 = arith.constant 0 : i32
    return %c0_i32, %c0_i32_0 : i32, i32
  }
  func.func @transform_10(%arg0: i32) -> (i32, i32) {
    %c0_i32 = arith.constant 0 : i32
    %c0_i32_0 = arith.constant 0 : i32
    %c0_i32_1 = arith.constant 0 : i32
    return %c0_i32, %c0_i32_0 : i32, i32
  }
  func.func @transform_11(%arg0: i32) -> (i32, i32) {
    %c0_i32 = arith.constant 0 : i32
    %c0_i32_0 = arith.constant 0 : i32
    %c0_i32_1 = arith.constant 0 : i32
    return %c0_i32, %c0_i32_0 : i32, i32
  }
  func.func @transform_12(%arg0: i32) -> (i32, i32) {
    %c0_i32 = arith.constant 0 : i32
    %c0_i32_0 = arith.constant 0 : i32
    %c0_i32_1 = arith.constant 0 : i32
    return %c0_i32, %c0_i32_0 : i32, i32
  }
  func.func @transform_13(%arg0: i32) -> (i32, i32) {
    %c0_i32 = arith.constant 0 : i32
    %c0_i32_0 = arith.constant 0 : i32
    %c0_i32_1 = arith.constant 0 : i32
    return %c0_i32, %c0_i32_0 : i32, i32
  }
  func.func @transform_14(%arg0: i32) -> (i32, i32) {
    %c0_i32 = arith.constant 0 : i32
    %c0_i32_0 = arith.constant 0 : i32
    %c0_i32_1 = arith.constant 0 : i32
    return %c0_i32, %c0_i32_0 : i32, i32
  }
  func.func @transform_15(%arg0: i32) -> (i32, i32, i32) {
    %c0_i32 = arith.constant 0 : i32
    %c0_i32_0 = arith.constant 0 : i32
    %c0_i32_1 = arith.constant 0 : i32
    return %arg0, %c0_i32, %c0_i32_0 : i32, i32, i32
  }
}

module attributes {stable_mosaic.version = 11 : i64} {
  func.func @_block_kernel(%arg0: i32, %arg1: memref<1x16x128xf32, #tpu.memory_space<vmem>>, %arg2: memref<128x8xf32, #tpu.memory_space<vmem>>, %arg3: memref<8x128xf32, #tpu.memory_space<vmem>>, %arg4: memref<4x128xf32, #tpu.memory_space<vmem>>, %arg5: memref<32x16xbf16, #tpu.memory_space<vmem>>, %arg6: memref<16x144xbf16, #tpu.memory_space<vmem>>, %arg7: memref<16x144xbf16, #tpu.memory_space<vmem>>, %arg8: memref<16x16xbf16, #tpu.memory_space<vmem>>, %arg9: memref<16x16xbf16, #tpu.memory_space<vmem>>, %arg10: memref<16x16xbf16, #tpu.memory_space<vmem>>, %arg11: memref<16x16xbf16, #tpu.memory_space<vmem>>, %arg12: memref<16x17xf32, #tpu.memory_space<vmem>>, %arg13: memref<64x16xbf16, #tpu.memory_space<vmem>>, %arg14: memref<64x1xf32, #tpu.memory_space<vmem>>, %arg15: memref<16x64xbf16, #tpu.memory_space<vmem>>, %arg16: memref<1x16x128xf32, #tpu.memory_space<vmem>>) attributes {dimension_semantics = [#tpu.dimension_semantics<parallel>], iteration_bounds = array<i64: 2>, scalar_prefetch = 0 : i64, scratch_operands = 0 : i64, tpu.core_type = #tpu.core_type<tc>, window_params = [{transform_indices = @transform_0, window_bounds = array<i64: 1, 16, 128>}, {pipeline_mode = #tpu.pipeline_mode<synchronous>, transform_indices = @transform_1, window_bounds = array<i64: 128, 8>}, {pipeline_mode = #tpu.pipeline_mode<synchronous>, transform_indices = @transform_2, window_bounds = array<i64: 8, 128>}, {pipeline_mode = #tpu.pipeline_mode<synchronous>, transform_indices = @transform_3, window_bounds = array<i64: 4, 128>}, {pipeline_mode = #tpu.pipeline_mode<synchronous>, transform_indices = @transform_4, window_bounds = array<i64: 32, 16>}, {pipeline_mode = #tpu.pipeline_mode<synchronous>, transform_indices = @transform_5, window_bounds = array<i64: 16, 144>}, {pipeline_mode = #tpu.pipeline_mode<synchronous>, transform_indices = @transform_6, window_bounds = array<i64: 16, 144>}, {pipeline_mode = #tpu.pipeline_mode<synchronous>, transform_indices = @transform_7, window_bounds = array<i64: 16, 16>}, {pipeline_mode = #tpu.pipeline_mode<synchronous>, transform_indices = @transform_8, window_bounds = array<i64: 16, 16>}, {pipeline_mode = #tpu.pipeline_mode<synchronous>, transform_indices = @transform_9, window_bounds = array<i64: 16, 16>}, {pipeline_mode = #tpu.pipeline_mode<synchronous>, transform_indices = @transform_10, window_bounds = array<i64: 16, 16>}, {pipeline_mode = #tpu.pipeline_mode<synchronous>, transform_indices = @transform_11, window_bounds = array<i64: 16, 17>}, {pipeline_mode = #tpu.pipeline_mode<synchronous>, transform_indices = @transform_12, window_bounds = array<i64: 64, 16>}, {pipeline_mode = #tpu.pipeline_mode<synchronous>, transform_indices = @transform_13, window_bounds = array<i64: 64, 1>}, {pipeline_mode = #tpu.pipeline_mode<synchronous>, transform_indices = @transform_14, window_bounds = array<i64: 16, 64>}, {transform_indices = @transform_15, window_bounds = array<i64: 1, 16, 128>}]} {
    %c0 = arith.constant 0 : index
    %c0_0 = arith.constant 0 : index
    %c0_1 = arith.constant 0 : index
    %0 = vector.load %arg1[%c0, %c0_0, %c0_1] : memref<1x16x128xf32, #tpu.memory_space<vmem>>, vector<1x16x128xf32>
    %1 = vector.shape_cast %0 : vector<1x16x128xf32> to vector<16x128xf32>
    %c0_2 = arith.constant 0 : index
    %c0_3 = arith.constant 0 : index
    %2 = vector.load %arg2[%c0_2, %c0_3] : memref<128x8xf32, #tpu.memory_space<vmem>>, vector<128x8xf32>
    %c0_4 = arith.constant 0 : index
    %c0_5 = arith.constant 0 : index
    %3 = vector.load %arg3[%c0_4, %c0_5] : memref<8x128xf32, #tpu.memory_space<vmem>>, vector<8x128xf32>
    %c0_6 = arith.constant 0 : index
    %c0_7 = arith.constant 0 : index
    %4 = vector.load %arg4[%c0_6, %c0_7] : memref<4x128xf32, #tpu.memory_space<vmem>>, vector<4x128xf32>
    %c0_8 = arith.constant 0 : index
    %c0_9 = arith.constant 0 : index
    %5 = vector.load %arg12[%c0_8, %c0_9] : memref<16x17xf32, #tpu.memory_space<vmem>>, vector<16x17xf32>
    %6 = tpu.iota {dimensions = array<i32: 1>} : vector<1x128xi32>
    %c0_i32 = arith.constant 0 : i32
    %7 = vector.broadcast %c0_i32 : i32 to vector<1x128xi32>
    %c16_i32 = arith.constant 16 : i32
    %8 = vector.broadcast %c16_i32 : i32 to vector<1x128xi32>
    %9 = arith.cmpi sge, %6, %8 : vector<1x128xi32>
    %10 = arith.extui %9 : vector<1x128xi1> to vector<1x128xi32>
    %11 = arith.addi %7, %10 : vector<1x128xi32>
    %c32_i32 = arith.constant 32 : i32
    %12 = vector.broadcast %c32_i32 : i32 to vector<1x128xi32>
    %13 = arith.cmpi sge, %6, %12 : vector<1x128xi32>
    %14 = arith.extui %13 : vector<1x128xi1> to vector<1x128xi32>
    %15 = arith.addi %11, %14 : vector<1x128xi32>
    %c48_i32 = arith.constant 48 : i32
    %16 = vector.broadcast %c48_i32 : i32 to vector<1x128xi32>
    %17 = arith.cmpi sge, %6, %16 : vector<1x128xi32>
    %18 = arith.extui %17 : vector<1x128xi1> to vector<1x128xi32>
    %19 = arith.addi %15, %18 : vector<1x128xi32>
    %c64_i32 = arith.constant 64 : i32
    %20 = vector.broadcast %c64_i32 : i32 to vector<1x128xi32>
    %21 = arith.cmpi sge, %6, %20 : vector<1x128xi32>
    %22 = arith.extui %21 : vector<1x128xi1> to vector<1x128xi32>
    %23 = arith.addi %19, %22 : vector<1x128xi32>
    %c80_i32 = arith.constant 80 : i32
    %24 = vector.broadcast %c80_i32 : i32 to vector<1x128xi32>
    %25 = arith.cmpi sge, %6, %24 : vector<1x128xi32>
    %26 = arith.extui %25 : vector<1x128xi1> to vector<1x128xi32>
    %27 = arith.addi %23, %26 : vector<1x128xi32>
    %c96_i32 = arith.constant 96 : i32
    %28 = vector.broadcast %c96_i32 : i32 to vector<1x128xi32>
    %29 = arith.cmpi sge, %6, %28 : vector<1x128xi32>
    %30 = arith.extui %29 : vector<1x128xi1> to vector<1x128xi32>
    %31 = arith.addi %27, %30 : vector<1x128xi32>
    %c112_i32 = arith.constant 112 : i32
    %32 = vector.broadcast %c112_i32 : i32 to vector<1x128xi32>
    %33 = arith.cmpi sge, %6, %32 : vector<1x128xi32>
    %34 = arith.extui %33 : vector<1x128xi1> to vector<1x128xi32>
    %35 = arith.addi %31, %34 : vector<1x128xi32>
    %c16_i32_10 = arith.constant 16 : i32
    %36 = vector.broadcast %c16_i32_10 : i32 to vector<1x128xi32>
    %37 = arith.muli %35, %36 : vector<1x128xi32>
    %38 = arith.subi %6, %37 : vector<1x128xi32>
    %39 = tpu.iota {dimensions = array<i32: 0>} : vector<16x1xi32>
    %c0_i32_11 = arith.constant 0 : i32
    %40 = vector.broadcast %c0_i32_11 : i32 to vector<16x1xi32>
    %41 = arith.cmpi sge, %39, %40 : vector<16x1xi32>
    %c3_i32 = arith.constant 3 : i32
    %42 = vector.broadcast %c3_i32 : i32 to vector<16x1xi32>
    %43 = arith.cmpi slt, %39, %42 : vector<16x1xi32>
    %44 = arith.andi %41, %43 : vector<16x1xi1>
    %45 = arith.extui %44 : vector<16x1xi1> to vector<16x1xi32>
    %46 = arith.sitofp %45 : vector<16x1xi32> to vector<16x1xf32>
    %c3_i32_12 = arith.constant 3 : i32
    %47 = vector.broadcast %c3_i32_12 : i32 to vector<1x128xi32>
    %48 = arith.addi %38, %47 : vector<1x128xi32>
    %c0_i32_13 = arith.constant 0 : i32
    %49 = vector.broadcast %c0_i32_13 : i32 to vector<1x128xi32>
    %50 = arith.cmpi sge, %48, %49 : vector<1x128xi32>
    %c3_i32_14 = arith.constant 3 : i32
    %51 = vector.broadcast %c3_i32_14 : i32 to vector<1x128xi32>
    %52 = arith.addi %38, %51 : vector<1x128xi32>
    %c16_i32_15 = arith.constant 16 : i32
    %53 = vector.broadcast %c16_i32_15 : i32 to vector<1x128xi32>
    %54 = arith.cmpi slt, %52, %53 : vector<1x128xi32>
    %55 = arith.andi %50, %54 : vector<1x128xi1>
    %56 = arith.extui %55 : vector<1x128xi1> to vector<1x128xi32>
    %57 = arith.sitofp %56 : vector<1x128xi32> to vector<1x128xf32>
    %c3_i32_16 = arith.constant 3 : i32
    %58 = vector.broadcast %c3_i32_16 : i32 to vector<1x128xi32>
    %59 = arith.addi %35, %58 : vector<1x128xi32>
    %c0_i32_17 = arith.constant 0 : i32
    %60 = vector.broadcast %c0_i32_17 : i32 to vector<1x128xi32>
    %61 = arith.cmpi sge, %59, %60 : vector<1x128xi32>
    %c3_i32_18 = arith.constant 3 : i32
    %62 = vector.broadcast %c3_i32_18 : i32 to vector<1x128xi32>
    %63 = arith.addi %35, %62 : vector<1x128xi32>
    %c8_i32 = arith.constant 8 : i32
    %64 = vector.broadcast %c8_i32 : i32 to vector<1x128xi32>
    %65 = arith.cmpi slt, %63, %64 : vector<1x128xi32>
    %66 = arith.andi %61, %65 : vector<1x128xi1>
    %67 = arith.extui %66 : vector<1x128xi1> to vector<1x128xi32>
    %68 = arith.sitofp %67 : vector<1x128xi32> to vector<1x128xf32>
    %c3_i32_19 = arith.constant 3 : i32
    %69 = vector.broadcast %c3_i32_19 : i32 to vector<16x1xi32>
    %70 = arith.cmpi sge, %39, %69 : vector<16x1xi32>
    %c6_i32 = arith.constant 6 : i32
    %71 = vector.broadcast %c6_i32 : i32 to vector<16x1xi32>
    %72 = arith.cmpi slt, %39, %71 : vector<16x1xi32>
    %73 = arith.andi %70, %72 : vector<16x1xi1>
    %74 = arith.extui %73 : vector<16x1xi1> to vector<16x1xi32>
    %75 = arith.sitofp %74 : vector<16x1xi32> to vector<16x1xf32>
    %c2_i32 = arith.constant 2 : i32
    %76 = vector.broadcast %c2_i32 : i32 to vector<1x128xi32>
    %77 = arith.addi %38, %76 : vector<1x128xi32>
    %c0_i32_20 = arith.constant 0 : i32
    %78 = vector.broadcast %c0_i32_20 : i32 to vector<1x128xi32>
    %79 = arith.cmpi sge, %77, %78 : vector<1x128xi32>
    %c2_i32_21 = arith.constant 2 : i32
    %80 = vector.broadcast %c2_i32_21 : i32 to vector<1x128xi32>
    %81 = arith.addi %38, %80 : vector<1x128xi32>
    %c16_i32_22 = arith.constant 16 : i32
    %82 = vector.broadcast %c16_i32_22 : i32 to vector<1x128xi32>
    %83 = arith.cmpi slt, %81, %82 : vector<1x128xi32>
    %84 = arith.andi %79, %83 : vector<1x128xi1>
    %85 = arith.extui %84 : vector<1x128xi1> to vector<1x128xi32>
    %86 = arith.sitofp %85 : vector<1x128xi32> to vector<1x128xf32>
    %c2_i32_23 = arith.constant 2 : i32
    %87 = vector.broadcast %c2_i32_23 : i32 to vector<1x128xi32>
    %88 = arith.addi %35, %87 : vector<1x128xi32>
    %c0_i32_24 = arith.constant 0 : i32
    %89 = vector.broadcast %c0_i32_24 : i32 to vector<1x128xi32>
    %90 = arith.cmpi sge, %88, %89 : vector<1x128xi32>
    %c2_i32_25 = arith.constant 2 : i32
    %91 = vector.broadcast %c2_i32_25 : i32 to vector<1x128xi32>
    %92 = arith.addi %35, %91 : vector<1x128xi32>
    %c8_i32_26 = arith.constant 8 : i32
    %93 = vector.broadcast %c8_i32_26 : i32 to vector<1x128xi32>
    %94 = arith.cmpi slt, %92, %93 : vector<1x128xi32>
    %95 = arith.andi %90, %94 : vector<1x128xi1>
    %96 = arith.extui %95 : vector<1x128xi1> to vector<1x128xi32>
    %97 = arith.sitofp %96 : vector<1x128xi32> to vector<1x128xf32>
    %c6_i32_27 = arith.constant 6 : i32
    %98 = vector.broadcast %c6_i32_27 : i32 to vector<16x1xi32>
    %99 = arith.cmpi sge, %39, %98 : vector<16x1xi32>
    %c9_i32 = arith.constant 9 : i32
    %100 = vector.broadcast %c9_i32 : i32 to vector<16x1xi32>
    %101 = arith.cmpi slt, %39, %100 : vector<16x1xi32>
    %102 = arith.andi %99, %101 : vector<16x1xi1>
    %103 = arith.extui %102 : vector<16x1xi1> to vector<16x1xi32>
    %104 = arith.sitofp %103 : vector<16x1xi32> to vector<16x1xf32>
    %c1_i32 = arith.constant 1 : i32
    %105 = vector.broadcast %c1_i32 : i32 to vector<1x128xi32>
    %106 = arith.addi %38, %105 : vector<1x128xi32>
    %c0_i32_28 = arith.constant 0 : i32
    %107 = vector.broadcast %c0_i32_28 : i32 to vector<1x128xi32>
    %108 = arith.cmpi sge, %106, %107 : vector<1x128xi32>
    %c1_i32_29 = arith.constant 1 : i32
    %109 = vector.broadcast %c1_i32_29 : i32 to vector<1x128xi32>
    %110 = arith.addi %38, %109 : vector<1x128xi32>
    %c16_i32_30 = arith.constant 16 : i32
    %111 = vector.broadcast %c16_i32_30 : i32 to vector<1x128xi32>
    %112 = arith.cmpi slt, %110, %111 : vector<1x128xi32>
    %113 = arith.andi %108, %112 : vector<1x128xi1>
    %114 = arith.extui %113 : vector<1x128xi1> to vector<1x128xi32>
    %115 = arith.sitofp %114 : vector<1x128xi32> to vector<1x128xf32>
    %c1_i32_31 = arith.constant 1 : i32
    %116 = vector.broadcast %c1_i32_31 : i32 to vector<1x128xi32>
    %117 = arith.addi %35, %116 : vector<1x128xi32>
    %c0_i32_32 = arith.constant 0 : i32
    %118 = vector.broadcast %c0_i32_32 : i32 to vector<1x128xi32>
    %119 = arith.cmpi sge, %117, %118 : vector<1x128xi32>
    %c1_i32_33 = arith.constant 1 : i32
    %120 = vector.broadcast %c1_i32_33 : i32 to vector<1x128xi32>
    %121 = arith.addi %35, %120 : vector<1x128xi32>
    %c8_i32_34 = arith.constant 8 : i32
    %122 = vector.broadcast %c8_i32_34 : i32 to vector<1x128xi32>
    %123 = arith.cmpi slt, %121, %122 : vector<1x128xi32>
    %124 = arith.andi %119, %123 : vector<1x128xi1>
    %125 = arith.extui %124 : vector<1x128xi1> to vector<1x128xi32>
    %126 = arith.sitofp %125 : vector<1x128xi32> to vector<1x128xf32>
    %c9_i32_35 = arith.constant 9 : i32
    %127 = vector.broadcast %c9_i32_35 : i32 to vector<16x1xi32>
    %128 = arith.cmpi sge, %39, %127 : vector<16x1xi32>
    %c12_i32 = arith.constant 12 : i32
    %129 = vector.broadcast %c12_i32 : i32 to vector<16x1xi32>
    %130 = arith.cmpi slt, %39, %129 : vector<16x1xi32>
    %131 = arith.andi %128, %130 : vector<16x1xi1>
    %132 = arith.extui %131 : vector<16x1xi1> to vector<16x1xi32>
    %133 = arith.sitofp %132 : vector<16x1xi32> to vector<16x1xf32>
    %c0_i32_36 = arith.constant 0 : i32
    %134 = vector.broadcast %c0_i32_36 : i32 to vector<1x128xi32>
    %135 = arith.addi %38, %134 : vector<1x128xi32>
    %c0_i32_37 = arith.constant 0 : i32
    %136 = vector.broadcast %c0_i32_37 : i32 to vector<1x128xi32>
    %137 = arith.cmpi sge, %135, %136 : vector<1x128xi32>
    %c0_i32_38 = arith.constant 0 : i32
    %138 = vector.broadcast %c0_i32_38 : i32 to vector<1x128xi32>
    %139 = arith.addi %38, %138 : vector<1x128xi32>
    %c16_i32_39 = arith.constant 16 : i32
    %140 = vector.broadcast %c16_i32_39 : i32 to vector<1x128xi32>
    %141 = arith.cmpi slt, %139, %140 : vector<1x128xi32>
    %142 = arith.andi %137, %141 : vector<1x128xi1>
    %143 = arith.extui %142 : vector<1x128xi1> to vector<1x128xi32>
    %144 = arith.sitofp %143 : vector<1x128xi32> to vector<1x128xf32>
    %c0_i32_40 = arith.constant 0 : i32
    %145 = vector.broadcast %c0_i32_40 : i32 to vector<1x128xi32>
    %146 = arith.addi %35, %145 : vector<1x128xi32>
    %c0_i32_41 = arith.constant 0 : i32
    %147 = vector.broadcast %c0_i32_41 : i32 to vector<1x128xi32>
    %148 = arith.cmpi sge, %146, %147 : vector<1x128xi32>
    %c0_i32_42 = arith.constant 0 : i32
    %149 = vector.broadcast %c0_i32_42 : i32 to vector<1x128xi32>
    %150 = arith.addi %35, %149 : vector<1x128xi32>
    %c8_i32_43 = arith.constant 8 : i32
    %151 = vector.broadcast %c8_i32_43 : i32 to vector<1x128xi32>
    %152 = arith.cmpi slt, %150, %151 : vector<1x128xi32>
    %153 = arith.andi %148, %152 : vector<1x128xi1>
    %154 = arith.extui %153 : vector<1x128xi1> to vector<1x128xi32>
    %155 = arith.sitofp %154 : vector<1x128xi32> to vector<1x128xf32>
    %c12_i32_44 = arith.constant 12 : i32
    %156 = vector.broadcast %c12_i32_44 : i32 to vector<16x1xi32>
    %157 = arith.cmpi sge, %39, %156 : vector<16x1xi32>
    %c15_i32 = arith.constant 15 : i32
    %158 = vector.broadcast %c15_i32 : i32 to vector<16x1xi32>
    %159 = arith.cmpi slt, %39, %158 : vector<16x1xi32>
    %160 = arith.andi %157, %159 : vector<16x1xi1>
    %161 = arith.extui %160 : vector<16x1xi1> to vector<16x1xi32>
    %162 = arith.sitofp %161 : vector<16x1xi32> to vector<16x1xf32>
    %c-1_i32 = arith.constant -1 : i32
    %163 = vector.broadcast %c-1_i32 : i32 to vector<1x128xi32>
    %164 = arith.addi %38, %163 : vector<1x128xi32>
    %c0_i32_45 = arith.constant 0 : i32
    %165 = vector.broadcast %c0_i32_45 : i32 to vector<1x128xi32>
    %166 = arith.cmpi sge, %164, %165 : vector<1x128xi32>
    %c-1_i32_46 = arith.constant -1 : i32
    %167 = vector.broadcast %c-1_i32_46 : i32 to vector<1x128xi32>
    %168 = arith.addi %38, %167 : vector<1x128xi32>
    %c16_i32_47 = arith.constant 16 : i32
    %169 = vector.broadcast %c16_i32_47 : i32 to vector<1x128xi32>
    %170 = arith.cmpi slt, %168, %169 : vector<1x128xi32>
    %171 = arith.andi %166, %170 : vector<1x128xi1>
    %172 = arith.extui %171 : vector<1x128xi1> to vector<1x128xi32>
    %173 = arith.sitofp %172 : vector<1x128xi32> to vector<1x128xf32>
    %c-1_i32_48 = arith.constant -1 : i32
    %174 = vector.broadcast %c-1_i32_48 : i32 to vector<1x128xi32>
    %175 = arith.addi %35, %174 : vector<1x128xi32>
    %c0_i32_49 = arith.constant 0 : i32
    %176 = vector.broadcast %c0_i32_49 : i32 to vector<1x128xi32>
    %177 = arith.cmpi sge, %175, %176 : vector<1x128xi32>
    %c-1_i32_50 = arith.constant -1 : i32
    %178 = vector.broadcast %c-1_i32_50 : i32 to vector<1x128xi32>
    %179 = arith.addi %35, %178 : vector<1x128xi32>
    %c8_i32_51 = arith.constant 8 : i32
    %180 = vector.broadcast %c8_i32_51 : i32 to vector<1x128xi32>
    %181 = arith.cmpi slt, %179, %180 : vector<1x128xi32>
    %182 = arith.andi %177, %181 : vector<1x128xi1>
    %183 = arith.extui %182 : vector<1x128xi1> to vector<1x128xi32>
    %184 = arith.sitofp %183 : vector<1x128xi32> to vector<1x128xf32>
    %c15_i32_52 = arith.constant 15 : i32
    %185 = vector.broadcast %c15_i32_52 : i32 to vector<16x1xi32>
    %186 = arith.cmpi sge, %39, %185 : vector<16x1xi32>
    %c18_i32 = arith.constant 18 : i32
    %187 = vector.broadcast %c18_i32 : i32 to vector<16x1xi32>
    %188 = arith.cmpi slt, %39, %187 : vector<16x1xi32>
    %189 = arith.andi %186, %188 : vector<16x1xi1>
    %190 = arith.extui %189 : vector<16x1xi1> to vector<16x1xi32>
    %191 = arith.sitofp %190 : vector<16x1xi32> to vector<16x1xf32>
    %c-2_i32 = arith.constant -2 : i32
    %192 = vector.broadcast %c-2_i32 : i32 to vector<1x128xi32>
    %193 = arith.addi %38, %192 : vector<1x128xi32>
    %c0_i32_53 = arith.constant 0 : i32
    %194 = vector.broadcast %c0_i32_53 : i32 to vector<1x128xi32>
    %195 = arith.cmpi sge, %193, %194 : vector<1x128xi32>
    %c-2_i32_54 = arith.constant -2 : i32
    %196 = vector.broadcast %c-2_i32_54 : i32 to vector<1x128xi32>
    %197 = arith.addi %38, %196 : vector<1x128xi32>
    %c16_i32_55 = arith.constant 16 : i32
    %198 = vector.broadcast %c16_i32_55 : i32 to vector<1x128xi32>
    %199 = arith.cmpi slt, %197, %198 : vector<1x128xi32>
    %200 = arith.andi %195, %199 : vector<1x128xi1>
    %201 = arith.extui %200 : vector<1x128xi1> to vector<1x128xi32>
    %202 = arith.sitofp %201 : vector<1x128xi32> to vector<1x128xf32>
    %c-2_i32_56 = arith.constant -2 : i32
    %203 = vector.broadcast %c-2_i32_56 : i32 to vector<1x128xi32>
    %204 = arith.addi %35, %203 : vector<1x128xi32>
    %c0_i32_57 = arith.constant 0 : i32
    %205 = vector.broadcast %c0_i32_57 : i32 to vector<1x128xi32>
    %206 = arith.cmpi sge, %204, %205 : vector<1x128xi32>
    %c-2_i32_58 = arith.constant -2 : i32
    %207 = vector.broadcast %c-2_i32_58 : i32 to vector<1x128xi32>
    %208 = arith.addi %35, %207 : vector<1x128xi32>
    %c8_i32_59 = arith.constant 8 : i32
    %209 = vector.broadcast %c8_i32_59 : i32 to vector<1x128xi32>
    %210 = arith.cmpi slt, %208, %209 : vector<1x128xi32>
    %211 = arith.andi %206, %210 : vector<1x128xi1>
    %212 = arith.extui %211 : vector<1x128xi1> to vector<1x128xi32>
    %213 = arith.sitofp %212 : vector<1x128xi32> to vector<1x128xf32>
    %c-1_i32_60 = arith.constant -1 : i32
    %214 = vector.broadcast %c-1_i32_60 : i32 to vector<1x128xi32>
    %215 = arith.addi %35, %214 : vector<1x128xi32>
    %c0_i32_61 = arith.constant 0 : i32
    %216 = vector.broadcast %c0_i32_61 : i32 to vector<1x128xi32>
    %217 = arith.cmpi sge, %215, %216 : vector<1x128xi32>
    %c-1_i32_62 = arith.constant -1 : i32
    %218 = vector.broadcast %c-1_i32_62 : i32 to vector<1x128xi32>
    %219 = arith.addi %35, %218 : vector<1x128xi32>
    %c8_i32_63 = arith.constant 8 : i32
    %220 = vector.broadcast %c8_i32_63 : i32 to vector<1x128xi32>
    %221 = arith.cmpi slt, %219, %220 : vector<1x128xi32>
    %222 = arith.andi %217, %221 : vector<1x128xi1>
    %c-1_i32_64 = arith.constant -1 : i32
    %223 = vector.broadcast %c-1_i32_64 : i32 to vector<1x128xi32>
    %224 = arith.addi %38, %223 : vector<1x128xi32>
    %c0_i32_65 = arith.constant 0 : i32
    %225 = vector.broadcast %c0_i32_65 : i32 to vector<1x128xi32>
    %226 = arith.cmpi sge, %224, %225 : vector<1x128xi32>
    %c-1_i32_66 = arith.constant -1 : i32
    %227 = vector.broadcast %c-1_i32_66 : i32 to vector<1x128xi32>
    %228 = arith.addi %38, %227 : vector<1x128xi32>
    %c16_i32_67 = arith.constant 16 : i32
    %229 = vector.broadcast %c16_i32_67 : i32 to vector<1x128xi32>
    %230 = arith.cmpi slt, %228, %229 : vector<1x128xi32>
    %231 = arith.andi %226, %230 : vector<1x128xi1>
    %232 = arith.andi %222, %231 : vector<1x128xi1>
    %233 = arith.extui %232 : vector<1x128xi1> to vector<1x128xi32>
    %234 = arith.sitofp %233 : vector<1x128xi32> to vector<1x128xf32>
    %c-1_i32_68 = arith.constant -1 : i32
    %235 = vector.broadcast %c-1_i32_68 : i32 to vector<1x128xi32>
    %236 = arith.addi %35, %235 : vector<1x128xi32>
    %c0_i32_69 = arith.constant 0 : i32
    %237 = vector.broadcast %c0_i32_69 : i32 to vector<1x128xi32>
    %238 = arith.cmpi sge, %236, %237 : vector<1x128xi32>
    %c-1_i32_70 = arith.constant -1 : i32
    %239 = vector.broadcast %c-1_i32_70 : i32 to vector<1x128xi32>
    %240 = arith.addi %35, %239 : vector<1x128xi32>
    %c8_i32_71 = arith.constant 8 : i32
    %241 = vector.broadcast %c8_i32_71 : i32 to vector<1x128xi32>
    %242 = arith.cmpi slt, %240, %241 : vector<1x128xi32>
    %243 = arith.andi %238, %242 : vector<1x128xi1>
    %c0_i32_72 = arith.constant 0 : i32
    %244 = vector.broadcast %c0_i32_72 : i32 to vector<1x128xi32>
    %245 = arith.addi %38, %244 : vector<1x128xi32>
    %c0_i32_73 = arith.constant 0 : i32
    %246 = vector.broadcast %c0_i32_73 : i32 to vector<1x128xi32>
    %247 = arith.cmpi sge, %245, %246 : vector<1x128xi32>
    %c0_i32_74 = arith.constant 0 : i32
    %248 = vector.broadcast %c0_i32_74 : i32 to vector<1x128xi32>
    %249 = arith.addi %38, %248 : vector<1x128xi32>
    %c16_i32_75 = arith.constant 16 : i32
    %250 = vector.broadcast %c16_i32_75 : i32 to vector<1x128xi32>
    %251 = arith.cmpi slt, %249, %250 : vector<1x128xi32>
    %252 = arith.andi %247, %251 : vector<1x128xi1>
    %253 = arith.andi %243, %252 : vector<1x128xi1>
    %254 = arith.extui %253 : vector<1x128xi1> to vector<1x128xi32>
    %255 = arith.sitofp %254 : vector<1x128xi32> to vector<1x128xf32>
    %c-1_i32_76 = arith.constant -1 : i32
    %256 = vector.broadcast %c-1_i32_76 : i32 to vector<1x128xi32>
    %257 = arith.addi %35, %256 : vector<1x128xi32>
    %c0_i32_77 = arith.constant 0 : i32
    %258 = vector.broadcast %c0_i32_77 : i32 to vector<1x128xi32>
    %259 = arith.cmpi sge, %257, %258 : vector<1x128xi32>
    %c-1_i32_78 = arith.constant -1 : i32
    %260 = vector.broadcast %c-1_i32_78 : i32 to vector<1x128xi32>
    %261 = arith.addi %35, %260 : vector<1x128xi32>
    %c8_i32_79 = arith.constant 8 : i32
    %262 = vector.broadcast %c8_i32_79 : i32 to vector<1x128xi32>
    %263 = arith.cmpi slt, %261, %262 : vector<1x128xi32>
    %264 = arith.andi %259, %263 : vector<1x128xi1>
    %c1_i32_80 = arith.constant 1 : i32
    %265 = vector.broadcast %c1_i32_80 : i32 to vector<1x128xi32>
    %266 = arith.addi %38, %265 : vector<1x128xi32>
    %c0_i32_81 = arith.constant 0 : i32
    %267 = vector.broadcast %c0_i32_81 : i32 to vector<1x128xi32>
    %268 = arith.cmpi sge, %266, %267 : vector<1x128xi32>
    %c1_i32_82 = arith.constant 1 : i32
    %269 = vector.broadcast %c1_i32_82 : i32 to vector<1x128xi32>
    %270 = arith.addi %38, %269 : vector<1x128xi32>
    %c16_i32_83 = arith.constant 16 : i32
    %271 = vector.broadcast %c16_i32_83 : i32 to vector<1x128xi32>
    %272 = arith.cmpi slt, %270, %271 : vector<1x128xi32>
    %273 = arith.andi %268, %272 : vector<1x128xi1>
    %274 = arith.andi %264, %273 : vector<1x128xi1>
    %275 = arith.extui %274 : vector<1x128xi1> to vector<1x128xi32>
    %276 = arith.sitofp %275 : vector<1x128xi32> to vector<1x128xf32>
    %c0_i32_84 = arith.constant 0 : i32
    %277 = vector.broadcast %c0_i32_84 : i32 to vector<1x128xi32>
    %278 = arith.addi %35, %277 : vector<1x128xi32>
    %c0_i32_85 = arith.constant 0 : i32
    %279 = vector.broadcast %c0_i32_85 : i32 to vector<1x128xi32>
    %280 = arith.cmpi sge, %278, %279 : vector<1x128xi32>
    %c0_i32_86 = arith.constant 0 : i32
    %281 = vector.broadcast %c0_i32_86 : i32 to vector<1x128xi32>
    %282 = arith.addi %35, %281 : vector<1x128xi32>
    %c8_i32_87 = arith.constant 8 : i32
    %283 = vector.broadcast %c8_i32_87 : i32 to vector<1x128xi32>
    %284 = arith.cmpi slt, %282, %283 : vector<1x128xi32>
    %285 = arith.andi %280, %284 : vector<1x128xi1>
    %c-1_i32_88 = arith.constant -1 : i32
    %286 = vector.broadcast %c-1_i32_88 : i32 to vector<1x128xi32>
    %287 = arith.addi %38, %286 : vector<1x128xi32>
    %c0_i32_89 = arith.constant 0 : i32
    %288 = vector.broadcast %c0_i32_89 : i32 to vector<1x128xi32>
    %289 = arith.cmpi sge, %287, %288 : vector<1x128xi32>
    %c-1_i32_90 = arith.constant -1 : i32
    %290 = vector.broadcast %c-1_i32_90 : i32 to vector<1x128xi32>
    %291 = arith.addi %38, %290 : vector<1x128xi32>
    %c16_i32_91 = arith.constant 16 : i32
    %292 = vector.broadcast %c16_i32_91 : i32 to vector<1x128xi32>
    %293 = arith.cmpi slt, %291, %292 : vector<1x128xi32>
    %294 = arith.andi %289, %293 : vector<1x128xi1>
    %295 = arith.andi %285, %294 : vector<1x128xi1>
    %296 = arith.extui %295 : vector<1x128xi1> to vector<1x128xi32>
    %297 = arith.sitofp %296 : vector<1x128xi32> to vector<1x128xf32>
    %c0_i32_92 = arith.constant 0 : i32
    %298 = vector.broadcast %c0_i32_92 : i32 to vector<1x128xi32>
    %299 = arith.addi %35, %298 : vector<1x128xi32>
    %c0_i32_93 = arith.constant 0 : i32
    %300 = vector.broadcast %c0_i32_93 : i32 to vector<1x128xi32>
    %301 = arith.cmpi sge, %299, %300 : vector<1x128xi32>
    %c0_i32_94 = arith.constant 0 : i32
    %302 = vector.broadcast %c0_i32_94 : i32 to vector<1x128xi32>
    %303 = arith.addi %35, %302 : vector<1x128xi32>
    %c8_i32_95 = arith.constant 8 : i32
    %304 = vector.broadcast %c8_i32_95 : i32 to vector<1x128xi32>
    %305 = arith.cmpi slt, %303, %304 : vector<1x128xi32>
    %306 = arith.andi %301, %305 : vector<1x128xi1>
    %c1_i32_96 = arith.constant 1 : i32
    %307 = vector.broadcast %c1_i32_96 : i32 to vector<1x128xi32>
    %308 = arith.addi %38, %307 : vector<1x128xi32>
    %c0_i32_97 = arith.constant 0 : i32
    %309 = vector.broadcast %c0_i32_97 : i32 to vector<1x128xi32>
    %310 = arith.cmpi sge, %308, %309 : vector<1x128xi32>
    %c1_i32_98 = arith.constant 1 : i32
    %311 = vector.broadcast %c1_i32_98 : i32 to vector<1x128xi32>
    %312 = arith.addi %38, %311 : vector<1x128xi32>
    %c16_i32_99 = arith.constant 16 : i32
    %313 = vector.broadcast %c16_i32_99 : i32 to vector<1x128xi32>
    %314 = arith.cmpi slt, %312, %313 : vector<1x128xi32>
    %315 = arith.andi %310, %314 : vector<1x128xi1>
    %316 = arith.andi %306, %315 : vector<1x128xi1>
    %317 = arith.extui %316 : vector<1x128xi1> to vector<1x128xi32>
    %318 = arith.sitofp %317 : vector<1x128xi32> to vector<1x128xf32>
    %c1_i32_100 = arith.constant 1 : i32
    %319 = vector.broadcast %c1_i32_100 : i32 to vector<1x128xi32>
    %320 = arith.addi %35, %319 : vector<1x128xi32>
    %c0_i32_101 = arith.constant 0 : i32
    %321 = vector.broadcast %c0_i32_101 : i32 to vector<1x128xi32>
    %322 = arith.cmpi sge, %320, %321 : vector<1x128xi32>
    %c1_i32_102 = arith.constant 1 : i32
    %323 = vector.broadcast %c1_i32_102 : i32 to vector<1x128xi32>
    %324 = arith.addi %35, %323 : vector<1x128xi32>
    %c8_i32_103 = arith.constant 8 : i32
    %325 = vector.broadcast %c8_i32_103 : i32 to vector<1x128xi32>
    %326 = arith.cmpi slt, %324, %325 : vector<1x128xi32>
    %327 = arith.andi %322, %326 : vector<1x128xi1>
    %c-1_i32_104 = arith.constant -1 : i32
    %328 = vector.broadcast %c-1_i32_104 : i32 to vector<1x128xi32>
    %329 = arith.addi %38, %328 : vector<1x128xi32>
    %c0_i32_105 = arith.constant 0 : i32
    %330 = vector.broadcast %c0_i32_105 : i32 to vector<1x128xi32>
    %331 = arith.cmpi sge, %329, %330 : vector<1x128xi32>
    %c-1_i32_106 = arith.constant -1 : i32
    %332 = vector.broadcast %c-1_i32_106 : i32 to vector<1x128xi32>
    %333 = arith.addi %38, %332 : vector<1x128xi32>
    %c16_i32_107 = arith.constant 16 : i32
    %334 = vector.broadcast %c16_i32_107 : i32 to vector<1x128xi32>
    %335 = arith.cmpi slt, %333, %334 : vector<1x128xi32>
    %336 = arith.andi %331, %335 : vector<1x128xi1>
    %337 = arith.andi %327, %336 : vector<1x128xi1>
    %338 = arith.extui %337 : vector<1x128xi1> to vector<1x128xi32>
    %339 = arith.sitofp %338 : vector<1x128xi32> to vector<1x128xf32>
    %c1_i32_108 = arith.constant 1 : i32
    %340 = vector.broadcast %c1_i32_108 : i32 to vector<1x128xi32>
    %341 = arith.addi %35, %340 : vector<1x128xi32>
    %c0_i32_109 = arith.constant 0 : i32
    %342 = vector.broadcast %c0_i32_109 : i32 to vector<1x128xi32>
    %343 = arith.cmpi sge, %341, %342 : vector<1x128xi32>
    %c1_i32_110 = arith.constant 1 : i32
    %344 = vector.broadcast %c1_i32_110 : i32 to vector<1x128xi32>
    %345 = arith.addi %35, %344 : vector<1x128xi32>
    %c8_i32_111 = arith.constant 8 : i32
    %346 = vector.broadcast %c8_i32_111 : i32 to vector<1x128xi32>
    %347 = arith.cmpi slt, %345, %346 : vector<1x128xi32>
    %348 = arith.andi %343, %347 : vector<1x128xi1>
    %c0_i32_112 = arith.constant 0 : i32
    %349 = vector.broadcast %c0_i32_112 : i32 to vector<1x128xi32>
    %350 = arith.addi %38, %349 : vector<1x128xi32>
    %c0_i32_113 = arith.constant 0 : i32
    %351 = vector.broadcast %c0_i32_113 : i32 to vector<1x128xi32>
    %352 = arith.cmpi sge, %350, %351 : vector<1x128xi32>
    %c0_i32_114 = arith.constant 0 : i32
    %353 = vector.broadcast %c0_i32_114 : i32 to vector<1x128xi32>
    %354 = arith.addi %38, %353 : vector<1x128xi32>
    %c16_i32_115 = arith.constant 16 : i32
    %355 = vector.broadcast %c16_i32_115 : i32 to vector<1x128xi32>
    %356 = arith.cmpi slt, %354, %355 : vector<1x128xi32>
    %357 = arith.andi %352, %356 : vector<1x128xi1>
    %358 = arith.andi %348, %357 : vector<1x128xi1>
    %359 = arith.extui %358 : vector<1x128xi1> to vector<1x128xi32>
    %360 = arith.sitofp %359 : vector<1x128xi32> to vector<1x128xf32>
    %c1_i32_116 = arith.constant 1 : i32
    %361 = vector.broadcast %c1_i32_116 : i32 to vector<1x128xi32>
    %362 = arith.addi %35, %361 : vector<1x128xi32>
    %c0_i32_117 = arith.constant 0 : i32
    %363 = vector.broadcast %c0_i32_117 : i32 to vector<1x128xi32>
    %364 = arith.cmpi sge, %362, %363 : vector<1x128xi32>
    %c1_i32_118 = arith.constant 1 : i32
    %365 = vector.broadcast %c1_i32_118 : i32 to vector<1x128xi32>
    %366 = arith.addi %35, %365 : vector<1x128xi32>
    %c8_i32_119 = arith.constant 8 : i32
    %367 = vector.broadcast %c8_i32_119 : i32 to vector<1x128xi32>
    %368 = arith.cmpi slt, %366, %367 : vector<1x128xi32>
    %369 = arith.andi %364, %368 : vector<1x128xi1>
    %c1_i32_120 = arith.constant 1 : i32
    %370 = vector.broadcast %c1_i32_120 : i32 to vector<1x128xi32>
    %371 = arith.addi %38, %370 : vector<1x128xi32>
    %c0_i32_121 = arith.constant 0 : i32
    %372 = vector.broadcast %c0_i32_121 : i32 to vector<1x128xi32>
    %373 = arith.cmpi sge, %371, %372 : vector<1x128xi32>
    %c1_i32_122 = arith.constant 1 : i32
    %374 = vector.broadcast %c1_i32_122 : i32 to vector<1x128xi32>
    %375 = arith.addi %38, %374 : vector<1x128xi32>
    %c16_i32_123 = arith.constant 16 : i32
    %376 = vector.broadcast %c16_i32_123 : i32 to vector<1x128xi32>
    %377 = arith.cmpi slt, %375, %376 : vector<1x128xi32>
    %378 = arith.andi %373, %377 : vector<1x128xi1>
    %379 = arith.andi %369, %378 : vector<1x128xi1>
    %380 = arith.extui %379 : vector<1x128xi1> to vector<1x128xi32>
    %381 = arith.sitofp %380 : vector<1x128xi32> to vector<1x128xf32>
    %382 = vector.extract_strided_slice %4 {offsets = [0, 0], sizes = [1, 128], strides = [1, 1]} : vector<4x128xf32> to vector<1x128xf32>
    %383 = vector.extract_strided_slice %4 {offsets = [1, 0], sizes = [1, 128], strides = [1, 1]} : vector<4x128xf32> to vector<1x128xf32>
    %384 = arith.mulf %1, %1 : vector<16x128xf32>
    %385 = tpu.concatenate %1, %384 in 0 : vector<16x128xf32>, vector<16x128xf32> -> vector<32x128xf32>
    %cst = arith.constant dense<0.000000e+00> : vector<32x8xf32>
    %386 = tpu.matmul %385, %2, %cst {dimension_numbers = #tpu.dot_dimension_numbers<[1], [0], [0], [1], [0, 0, 1, 1], [], []>} : vector<32x128xf32>, vector<128x8xf32>, vector<32x8xf32> -> vector<32x8xf32>
    %cst_124 = arith.constant dense<0.000000e+00> : vector<32x128xf32>
    %387 = tpu.matmul %386, %3, %cst_124 {dimension_numbers = #tpu.dot_dimension_numbers<[1], [0], [0], [1], [0, 0, 1, 1], [], []>} : vector<32x8xf32>, vector<8x128xf32>, vector<32x128xf32> -> vector<32x128xf32>
    %388 = vector.extract_strided_slice %387 {offsets = [0, 0], sizes = [16, 128], strides = [1, 1]} : vector<32x128xf32> to vector<16x128xf32>
    %389 = vector.extract_strided_slice %387 {offsets = [16, 0], sizes = [16, 128], strides = [1, 1]} : vector<32x128xf32> to vector<16x128xf32>
    %390 = arith.mulf %388, %388 : vector<16x128xf32>
    %391 = arith.subf %389, %390 : vector<16x128xf32>
    %cst_125 = arith.constant 0.000000e+00 : f32
    %392 = vector.broadcast %cst_125 : f32 to vector<16x128xf32>
    %393 = arith.maximumf %391, %392 : vector<16x128xf32>
    %394 = arith.subf %1, %388 : vector<16x128xf32>
    %cst_126 = arith.constant 9.99999974E-6 : f32
    %395 = vector.broadcast %cst_126 : f32 to vector<16x128xf32>
    %396 = arith.addf %393, %395 : vector<16x128xf32>
    %397 = math.rsqrt %396 : vector<16x128xf32>
    %398 = arith.mulf %394, %397 : vector<16x128xf32>
    %399 = vector.broadcast %382 : vector<1x128xf32> to vector<16x128xf32>
    %400 = arith.mulf %398, %399 : vector<16x128xf32>
    %401 = vector.broadcast %383 : vector<1x128xf32> to vector<16x128xf32>
    %402 = arith.addf %400, %401 : vector<16x128xf32>
    %c0_127 = arith.constant 0 : index
    %c0_128 = arith.constant 0 : index
    %403 = vector.load %arg5[%c0_127, %c0_128] : memref<32x16xbf16, #tpu.memory_space<vmem>>, vector<32x16xbf16>
    %404 = arith.truncf %402 : vector<16x128xf32> to vector<16x128xbf16>
    %cst_129 = arith.constant dense<0.000000e+00> : vector<32x128xf32>
    %405 = tpu.matmul %403, %404, %cst_129 {dimension_numbers = #tpu.dot_dimension_numbers<[1], [0], [0], [1], [0, 0, 1, 1], [], []>} : vector<32x16xbf16>, vector<16x128xbf16>, vector<32x128xf32> -> vector<32x128xf32>
    %406 = vector.extract_strided_slice %405 {offsets = [0, 0], sizes = [16, 128], strides = [1, 1]} : vector<32x128xf32> to vector<16x128xf32>
    %407 = vector.extract_strided_slice %5 {offsets = [0, 0], sizes = [16, 1], strides = [1, 1]} : vector<16x17xf32> to vector<16x1xf32>
    %408 = vector.broadcast %407 : vector<16x1xf32> to vector<16x128xf32>
    %409 = arith.addf %406, %408 : vector<16x128xf32>
    %410 = vector.extract_strided_slice %5 {offsets = [0, 2], sizes = [16, 1], strides = [1, 1]} : vector<16x17xf32> to vector<16x1xf32>
    %411 = vector.extract_strided_slice %5 {offsets = [0, 3], sizes = [16, 1], strides = [1, 1]} : vector<16x17xf32> to vector<16x1xf32>
    %412 = vector.extract_strided_slice %5 {offsets = [0, 4], sizes = [16, 1], strides = [1, 1]} : vector<16x17xf32> to vector<16x1xf32>
    %413 = vector.extract_strided_slice %5 {offsets = [0, 5], sizes = [16, 1], strides = [1, 1]} : vector<16x17xf32> to vector<16x1xf32>
    %414 = vector.extract_strided_slice %5 {offsets = [0, 6], sizes = [16, 1], strides = [1, 1]} : vector<16x17xf32> to vector<16x1xf32>
    %415 = vector.extract_strided_slice %5 {offsets = [0, 7], sizes = [16, 1], strides = [1, 1]} : vector<16x17xf32> to vector<16x1xf32>
    %416 = vector.extract_strided_slice %5 {offsets = [0, 8], sizes = [16, 1], strides = [1, 1]} : vector<16x17xf32> to vector<16x1xf32>
    %417 = vector.shape_cast %409 : vector<16x128xf32> to vector<1x16x128xf32>
    %cst_130 = arith.constant dense<0.000000e+00> : vector<1xf32>
    %418 = vector.multi_reduction <add>, %417, %cst_130 [1, 2] : vector<1x16x128xf32> to vector<1xf32>
    %419 = vector.shape_cast %418 : vector<1xf32> to vector<1x1x1xf32>
    %420 = vector.extract %419[0, 0, 0] : f32 from vector<1x1x1xf32>
    %421 = vector.broadcast %420 : f32 to vector<1x1xf32>
    %cst_131 = arith.constant 2.048000e+03 : f32
    %422 = vector.broadcast %cst_131 : f32 to vector<1x1xf32>
    %423 = arith.divf %421, %422 : vector<1x1xf32>
    %424 = vector.broadcast %423 : vector<1x1xf32> to vector<16x128xf32>
    %425 = arith.subf %409, %424 : vector<16x128xf32>
    %426 = arith.mulf %425, %425 : vector<16x128xf32>
    %427 = vector.shape_cast %426 : vector<16x128xf32> to vector<1x16x128xf32>
    %cst_132 = arith.constant dense<0.000000e+00> : vector<1xf32>
    %428 = vector.multi_reduction <add>, %427, %cst_132 [1, 2] : vector<1x16x128xf32> to vector<1xf32>
    %429 = vector.shape_cast %428 : vector<1xf32> to vector<1x1x1xf32>
    %430 = vector.extract %429[0, 0, 0] : f32 from vector<1x1x1xf32>
    %431 = vector.broadcast %430 : f32 to vector<1x1xf32>
    %cst_133 = arith.constant 2.048000e+03 : f32
    %432 = vector.broadcast %cst_133 : f32 to vector<1x1xf32>
    %433 = arith.divf %431, %432 : vector<1x1xf32>
    %434 = vector.broadcast %423 : vector<1x1xf32> to vector<16x128xf32>
    %435 = arith.subf %409, %434 : vector<16x128xf32>
    %cst_134 = arith.constant 9.99999974E-6 : f32
    %436 = vector.broadcast %cst_134 : f32 to vector<1x1xf32>
    %437 = arith.addf %433, %436 : vector<1x1xf32>
    %438 = math.rsqrt %437 : vector<1x1xf32>
    %439 = vector.broadcast %438 : vector<1x1xf32> to vector<16x128xf32>
    %440 = arith.mulf %435, %439 : vector<16x128xf32>
    %441 = vector.broadcast %413 : vector<16x1xf32> to vector<16x128xf32>
    %442 = arith.mulf %440, %441 : vector<16x128xf32>
    %443 = vector.broadcast %414 : vector<16x1xf32> to vector<16x128xf32>
    %444 = arith.addf %442, %443 : vector<16x128xf32>
    %cst_135 = arith.constant 5.000000e-01 : f32
    %445 = vector.broadcast %cst_135 : f32 to vector<16x128xf32>
    %446 = arith.mulf %445, %444 : vector<16x128xf32>
    %cst_136 = arith.constant 0.707106769 : f32
    %447 = vector.broadcast %cst_136 : f32 to vector<16x128xf32>
    %448 = arith.mulf %444, %447 : vector<16x128xf32>
    %cst_137 = arith.constant 0.000000e+00 : f32
    %449 = vector.broadcast %cst_137 : f32 to vector<16x128xf32>
    %450 = arith.cmpf olt, %448, %449 : vector<16x128xf32>
    %cst_138 = arith.constant -1.000000e+00 : f32
    %cst_139 = arith.constant 1.000000e+00 : f32
    %451 = vector.broadcast %cst_138 : f32 to vector<16x128xf32>
    %452 = vector.broadcast %cst_139 : f32 to vector<16x128xf32>
    %453 = arith.select %450, %451, %452 : vector<16x128xi1>, vector<16x128xf32>
    %454 = math.absf %448 : vector<16x128xf32>
    %cst_140 = arith.constant 0.327591091 : f32
    %455 = vector.broadcast %cst_140 : f32 to vector<16x128xf32>
    %456 = arith.mulf %455, %454 : vector<16x128xf32>
    %cst_141 = arith.constant 1.000000e+00 : f32
    %457 = vector.broadcast %cst_141 : f32 to vector<16x128xf32>
    %458 = arith.addf %457, %456 : vector<16x128xf32>
    %cst_142 = arith.constant 1.000000e+00 : f32
    %459 = vector.broadcast %cst_142 : f32 to vector<16x128xf32>
    %460 = arith.divf %459, %458 : vector<16x128xf32>
    %cst_143 = arith.constant 1.06140542 : f32
    %461 = vector.broadcast %cst_143 : f32 to vector<16x128xf32>
    %462 = arith.mulf %461, %460 : vector<16x128xf32>
    %cst_144 = arith.constant -1.45315206 : f32
    %463 = vector.broadcast %cst_144 : f32 to vector<16x128xf32>
    %464 = arith.addf %462, %463 : vector<16x128xf32>
    %465 = arith.mulf %464, %460 : vector<16x128xf32>
    %cst_145 = arith.constant 1.42141378 : f32
    %466 = vector.broadcast %cst_145 : f32 to vector<16x128xf32>
    %467 = arith.addf %465, %466 : vector<16x128xf32>
    %468 = arith.mulf %467, %460 : vector<16x128xf32>
    %cst_146 = arith.constant -0.284496725 : f32
    %469 = vector.broadcast %cst_146 : f32 to vector<16x128xf32>
    %470 = arith.addf %468, %469 : vector<16x128xf32>
    %471 = arith.mulf %470, %460 : vector<16x128xf32>
    %cst_147 = arith.constant 0.254829586 : f32
    %472 = vector.broadcast %cst_147 : f32 to vector<16x128xf32>
    %473 = arith.addf %471, %472 : vector<16x128xf32>
    %474 = arith.mulf %473, %460 : vector<16x128xf32>
    %cst_148 = arith.constant 0.000000e+00 : f32
    %475 = vector.broadcast %cst_148 : f32 to vector<16x128xf32>
    %476 = arith.subf %475, %454 : vector<16x128xf32>
    %477 = arith.mulf %476, %454 : vector<16x128xf32>
    %478 = math.exp %477 : vector<16x128xf32>
    %479 = arith.mulf %474, %478 : vector<16x128xf32>
    %cst_149 = arith.constant 1.000000e+00 : f32
    %480 = vector.broadcast %cst_149 : f32 to vector<16x128xf32>
    %481 = arith.subf %480, %479 : vector<16x128xf32>
    %482 = arith.mulf %453, %481 : vector<16x128xf32>
    %cst_150 = arith.constant 1.000000e+00 : f32
    %483 = vector.broadcast %cst_150 : f32 to vector<16x128xf32>
    %484 = arith.addf %483, %482 : vector<16x128xf32>
    %485 = arith.mulf %446, %484 : vector<16x128xf32>
    %c125_i32 = arith.constant 125 : i32
    %486 = tpu.dynamic_rotate %485 by %c125_i32 dim 1 : vector<16x128xf32>, i32 -> vector<16x128xf32>
    %487 = vector.broadcast %46 : vector<16x1xf32> to vector<16x128xf32>
    %488 = vector.broadcast %57 : vector<1x128xf32> to vector<16x128xf32>
    %489 = arith.mulf %487, %488 : vector<16x128xf32>
    %490 = arith.mulf %486, %489 : vector<16x128xf32>
    %c126_i32 = arith.constant 126 : i32
    %491 = tpu.dynamic_rotate %485 by %c126_i32 dim 1 : vector<16x128xf32>, i32 -> vector<16x128xf32>
    %492 = vector.broadcast %75 : vector<16x1xf32> to vector<16x128xf32>
    %493 = vector.broadcast %86 : vector<1x128xf32> to vector<16x128xf32>
    %494 = arith.mulf %492, %493 : vector<16x128xf32>
    %495 = arith.mulf %491, %494 : vector<16x128xf32>
    %496 = arith.addf %490, %495 : vector<16x128xf32>
    %c127_i32 = arith.constant 127 : i32
    %497 = tpu.dynamic_rotate %485 by %c127_i32 dim 1 : vector<16x128xf32>, i32 -> vector<16x128xf32>
    %498 = vector.broadcast %104 : vector<16x1xf32> to vector<16x128xf32>
    %499 = vector.broadcast %115 : vector<1x128xf32> to vector<16x128xf32>
    %500 = arith.mulf %498, %499 : vector<16x128xf32>
    %501 = arith.mulf %497, %500 : vector<16x128xf32>
    %502 = arith.addf %496, %501 : vector<16x128xf32>
    %503 = vector.broadcast %133 : vector<16x1xf32> to vector<16x128xf32>
    %504 = vector.broadcast %144 : vector<1x128xf32> to vector<16x128xf32>
    %505 = arith.mulf %503, %504 : vector<16x128xf32>
    %506 = arith.mulf %485, %505 : vector<16x128xf32>
    %507 = arith.addf %502, %506 : vector<16x128xf32>
    %c1_i32_151 = arith.constant 1 : i32
    %508 = tpu.dynamic_rotate %485 by %c1_i32_151 dim 1 : vector<16x128xf32>, i32 -> vector<16x128xf32>
    %509 = vector.broadcast %162 : vector<16x1xf32> to vector<16x128xf32>
    %510 = vector.broadcast %173 : vector<1x128xf32> to vector<16x128xf32>
    %511 = arith.mulf %509, %510 : vector<16x128xf32>
    %512 = arith.mulf %508, %511 : vector<16x128xf32>
    %513 = arith.addf %507, %512 : vector<16x128xf32>
    %c2_i32_152 = arith.constant 2 : i32
    %514 = tpu.dynamic_rotate %485 by %c2_i32_152 dim 1 : vector<16x128xf32>, i32 -> vector<16x128xf32>
    %515 = vector.broadcast %191 : vector<16x1xf32> to vector<16x128xf32>
    %516 = vector.broadcast %202 : vector<1x128xf32> to vector<16x128xf32>
    %517 = arith.mulf %515, %516 : vector<16x128xf32>
    %518 = arith.mulf %514, %517 : vector<16x128xf32>
    %519 = arith.addf %513, %518 : vector<16x128xf32>
    %c80_i32_153 = arith.constant 80 : i32
    %520 = tpu.dynamic_rotate %485 by %c80_i32_153 dim 1 : vector<16x128xf32>, i32 -> vector<16x128xf32>
    %521 = vector.broadcast %46 : vector<16x1xf32> to vector<16x128xf32>
    %522 = vector.broadcast %68 : vector<1x128xf32> to vector<16x128xf32>
    %523 = arith.mulf %521, %522 : vector<16x128xf32>
    %524 = arith.mulf %520, %523 : vector<16x128xf32>
    %c96_i32_154 = arith.constant 96 : i32
    %525 = tpu.dynamic_rotate %485 by %c96_i32_154 dim 1 : vector<16x128xf32>, i32 -> vector<16x128xf32>
    %526 = vector.broadcast %75 : vector<16x1xf32> to vector<16x128xf32>
    %527 = vector.broadcast %97 : vector<1x128xf32> to vector<16x128xf32>
    %528 = arith.mulf %526, %527 : vector<16x128xf32>
    %529 = arith.mulf %525, %528 : vector<16x128xf32>
    %530 = arith.addf %524, %529 : vector<16x128xf32>
    %c112_i32_155 = arith.constant 112 : i32
    %531 = tpu.dynamic_rotate %485 by %c112_i32_155 dim 1 : vector<16x128xf32>, i32 -> vector<16x128xf32>
    %532 = vector.broadcast %104 : vector<16x1xf32> to vector<16x128xf32>
    %533 = vector.broadcast %126 : vector<1x128xf32> to vector<16x128xf32>
    %534 = arith.mulf %532, %533 : vector<16x128xf32>
    %535 = arith.mulf %531, %534 : vector<16x128xf32>
    %536 = arith.addf %530, %535 : vector<16x128xf32>
    %537 = vector.broadcast %133 : vector<16x1xf32> to vector<16x128xf32>
    %538 = vector.broadcast %155 : vector<1x128xf32> to vector<16x128xf32>
    %539 = arith.mulf %537, %538 : vector<16x128xf32>
    %540 = arith.mulf %485, %539 : vector<16x128xf32>
    %541 = arith.addf %536, %540 : vector<16x128xf32>
    %c16_i32_156 = arith.constant 16 : i32
    %542 = tpu.dynamic_rotate %485 by %c16_i32_156 dim 1 : vector<16x128xf32>, i32 -> vector<16x128xf32>
    %543 = vector.broadcast %162 : vector<16x1xf32> to vector<16x128xf32>
    %544 = vector.broadcast %184 : vector<1x128xf32> to vector<16x128xf32>
    %545 = arith.mulf %543, %544 : vector<16x128xf32>
    %546 = arith.mulf %542, %545 : vector<16x128xf32>
    %547 = arith.addf %541, %546 : vector<16x128xf32>
    %c32_i32_157 = arith.constant 32 : i32
    %548 = tpu.dynamic_rotate %485 by %c32_i32_157 dim 1 : vector<16x128xf32>, i32 -> vector<16x128xf32>
    %549 = vector.broadcast %191 : vector<16x1xf32> to vector<16x128xf32>
    %550 = vector.broadcast %213 : vector<1x128xf32> to vector<16x128xf32>
    %551 = arith.mulf %549, %550 : vector<16x128xf32>
    %552 = arith.mulf %548, %551 : vector<16x128xf32>
    %553 = arith.addf %547, %552 : vector<16x128xf32>
    %c17_i32 = arith.constant 17 : i32
    %554 = tpu.dynamic_rotate %519 by %c17_i32 dim 1 : vector<16x128xf32>, i32 -> vector<16x128xf32>
    %555 = vector.broadcast %234 : vector<1x128xf32> to vector<16x128xf32>
    %556 = arith.mulf %554, %555 : vector<16x128xf32>
    %557 = arith.truncf %556 : vector<16x128xf32> to vector<16x128xbf16>
    %c16_i32_158 = arith.constant 16 : i32
    %558 = tpu.dynamic_rotate %519 by %c16_i32_158 dim 1 : vector<16x128xf32>, i32 -> vector<16x128xf32>
    %559 = vector.broadcast %255 : vector<1x128xf32> to vector<16x128xf32>
    %560 = arith.mulf %558, %559 : vector<16x128xf32>
    %561 = arith.truncf %560 : vector<16x128xf32> to vector<16x128xbf16>
    %c15_i32_159 = arith.constant 15 : i32
    %562 = tpu.dynamic_rotate %519 by %c15_i32_159 dim 1 : vector<16x128xf32>, i32 -> vector<16x128xf32>
    %563 = vector.broadcast %276 : vector<1x128xf32> to vector<16x128xf32>
    %564 = arith.mulf %562, %563 : vector<16x128xf32>
    %565 = arith.truncf %564 : vector<16x128xf32> to vector<16x128xbf16>
    %c1_i32_160 = arith.constant 1 : i32
    %566 = tpu.dynamic_rotate %519 by %c1_i32_160 dim 1 : vector<16x128xf32>, i32 -> vector<16x128xf32>
    %567 = vector.broadcast %297 : vector<1x128xf32> to vector<16x128xf32>
    %568 = arith.mulf %566, %567 : vector<16x128xf32>
    %569 = arith.truncf %568 : vector<16x128xf32> to vector<16x128xbf16>
    %570 = arith.truncf %519 : vector<16x128xf32> to vector<16x128xbf16>
    %c127_i32_161 = arith.constant 127 : i32
    %571 = tpu.dynamic_rotate %519 by %c127_i32_161 dim 1 : vector<16x128xf32>, i32 -> vector<16x128xf32>
    %572 = vector.broadcast %318 : vector<1x128xf32> to vector<16x128xf32>
    %573 = arith.mulf %571, %572 : vector<16x128xf32>
    %574 = arith.truncf %573 : vector<16x128xf32> to vector<16x128xbf16>
    %c113_i32 = arith.constant 113 : i32
    %575 = tpu.dynamic_rotate %519 by %c113_i32 dim 1 : vector<16x128xf32>, i32 -> vector<16x128xf32>
    %576 = vector.broadcast %339 : vector<1x128xf32> to vector<16x128xf32>
    %577 = arith.mulf %575, %576 : vector<16x128xf32>
    %578 = arith.truncf %577 : vector<16x128xf32> to vector<16x128xbf16>
    %c112_i32_162 = arith.constant 112 : i32
    %579 = tpu.dynamic_rotate %519 by %c112_i32_162 dim 1 : vector<16x128xf32>, i32 -> vector<16x128xf32>
    %580 = vector.broadcast %360 : vector<1x128xf32> to vector<16x128xf32>
    %581 = arith.mulf %579, %580 : vector<16x128xf32>
    %582 = arith.truncf %581 : vector<16x128xf32> to vector<16x128xbf16>
    %c111_i32 = arith.constant 111 : i32
    %583 = tpu.dynamic_rotate %519 by %c111_i32 dim 1 : vector<16x128xf32>, i32 -> vector<16x128xf32>
    %584 = vector.broadcast %381 : vector<1x128xf32> to vector<16x128xf32>
    %585 = arith.mulf %583, %584 : vector<16x128xf32>
    %586 = arith.truncf %585 : vector<16x128xf32> to vector<16x128xbf16>
    %587 = tpu.concatenate %557, %561, %565, %569, %570, %574, %578, %582, %586 in 0 : vector<16x128xbf16>, vector<16x128xbf16>, vector<16x128xbf16>, vector<16x128xbf16>, vector<16x128xbf16>, vector<16x128xbf16>, vector<16x128xbf16>, vector<16x128xbf16>, vector<16x128xbf16> -> vector<144x128xbf16>
    %c0_163 = arith.constant 0 : index
    %c0_164 = arith.constant 0 : index
    %588 = vector.load %arg6[%c0_163, %c0_164] : memref<16x144xbf16, #tpu.memory_space<vmem>>, vector<16x144xbf16>
    %cst_165 = arith.constant dense<0.000000e+00> : vector<16x128xf32>
    %589 = tpu.matmul %588, %587, %cst_165 {dimension_numbers = #tpu.dot_dimension_numbers<[1], [0], [0], [1], [0, 0, 1, 1], [], []>} : vector<16x144xbf16>, vector<144x128xbf16>, vector<16x128xf32> -> vector<16x128xf32>
    %590 = vector.broadcast %410 : vector<16x1xf32> to vector<16x128xf32>
    %591 = arith.addf %589, %590 : vector<16x128xf32>
    %cst_166 = arith.constant 5.000000e-01 : f32
    %592 = vector.broadcast %cst_166 : f32 to vector<16x128xf32>
    %593 = arith.mulf %592, %591 : vector<16x128xf32>
    %cst_167 = arith.constant 0.707106769 : f32
    %594 = vector.broadcast %cst_167 : f32 to vector<16x128xf32>
    %595 = arith.mulf %591, %594 : vector<16x128xf32>
    %cst_168 = arith.constant 0.000000e+00 : f32
    %596 = vector.broadcast %cst_168 : f32 to vector<16x128xf32>
    %597 = arith.cmpf olt, %595, %596 : vector<16x128xf32>
    %cst_169 = arith.constant -1.000000e+00 : f32
    %cst_170 = arith.constant 1.000000e+00 : f32
    %598 = vector.broadcast %cst_169 : f32 to vector<16x128xf32>
    %599 = vector.broadcast %cst_170 : f32 to vector<16x128xf32>
    %600 = arith.select %597, %598, %599 : vector<16x128xi1>, vector<16x128xf32>
    %601 = math.absf %595 : vector<16x128xf32>
    %cst_171 = arith.constant 0.327591091 : f32
    %602 = vector.broadcast %cst_171 : f32 to vector<16x128xf32>
    %603 = arith.mulf %602, %601 : vector<16x128xf32>
    %cst_172 = arith.constant 1.000000e+00 : f32
    %604 = vector.broadcast %cst_172 : f32 to vector<16x128xf32>
    %605 = arith.addf %604, %603 : vector<16x128xf32>
    %cst_173 = arith.constant 1.000000e+00 : f32
    %606 = vector.broadcast %cst_173 : f32 to vector<16x128xf32>
    %607 = arith.divf %606, %605 : vector<16x128xf32>
    %cst_174 = arith.constant 1.06140542 : f32
    %608 = vector.broadcast %cst_174 : f32 to vector<16x128xf32>
    %609 = arith.mulf %608, %607 : vector<16x128xf32>
    %cst_175 = arith.constant -1.45315206 : f32
    %610 = vector.broadcast %cst_175 : f32 to vector<16x128xf32>
    %611 = arith.addf %609, %610 : vector<16x128xf32>
    %612 = arith.mulf %611, %607 : vector<16x128xf32>
    %cst_176 = arith.constant 1.42141378 : f32
    %613 = vector.broadcast %cst_176 : f32 to vector<16x128xf32>
    %614 = arith.addf %612, %613 : vector<16x128xf32>
    %615 = arith.mulf %614, %607 : vector<16x128xf32>
    %cst_177 = arith.constant -0.284496725 : f32
    %616 = vector.broadcast %cst_177 : f32 to vector<16x128xf32>
    %617 = arith.addf %615, %616 : vector<16x128xf32>
    %618 = arith.mulf %617, %607 : vector<16x128xf32>
    %cst_178 = arith.constant 0.254829586 : f32
    %619 = vector.broadcast %cst_178 : f32 to vector<16x128xf32>
    %620 = arith.addf %618, %619 : vector<16x128xf32>
    %621 = arith.mulf %620, %607 : vector<16x128xf32>
    %cst_179 = arith.constant 0.000000e+00 : f32
    %622 = vector.broadcast %cst_179 : f32 to vector<16x128xf32>
    %623 = arith.subf %622, %601 : vector<16x128xf32>
    %624 = arith.mulf %623, %601 : vector<16x128xf32>
    %625 = math.exp %624 : vector<16x128xf32>
    %626 = arith.mulf %621, %625 : vector<16x128xf32>
    %cst_180 = arith.constant 1.000000e+00 : f32
    %627 = vector.broadcast %cst_180 : f32 to vector<16x128xf32>
    %628 = arith.subf %627, %626 : vector<16x128xf32>
    %629 = arith.mulf %600, %628 : vector<16x128xf32>
    %cst_181 = arith.constant 1.000000e+00 : f32
    %630 = vector.broadcast %cst_181 : f32 to vector<16x128xf32>
    %631 = arith.addf %630, %629 : vector<16x128xf32>
    %632 = arith.mulf %593, %631 : vector<16x128xf32>
    %c17_i32_182 = arith.constant 17 : i32
    %633 = tpu.dynamic_rotate %553 by %c17_i32_182 dim 1 : vector<16x128xf32>, i32 -> vector<16x128xf32>
    %634 = vector.broadcast %234 : vector<1x128xf32> to vector<16x128xf32>
    %635 = arith.mulf %633, %634 : vector<16x128xf32>
    %636 = arith.truncf %635 : vector<16x128xf32> to vector<16x128xbf16>
    %c16_i32_183 = arith.constant 16 : i32
    %637 = tpu.dynamic_rotate %553 by %c16_i32_183 dim 1 : vector<16x128xf32>, i32 -> vector<16x128xf32>
    %638 = vector.broadcast %255 : vector<1x128xf32> to vector<16x128xf32>
    %639 = arith.mulf %637, %638 : vector<16x128xf32>
    %640 = arith.truncf %639 : vector<16x128xf32> to vector<16x128xbf16>
    %c15_i32_184 = arith.constant 15 : i32
    %641 = tpu.dynamic_rotate %553 by %c15_i32_184 dim 1 : vector<16x128xf32>, i32 -> vector<16x128xf32>
    %642 = vector.broadcast %276 : vector<1x128xf32> to vector<16x128xf32>
    %643 = arith.mulf %641, %642 : vector<16x128xf32>
    %644 = arith.truncf %643 : vector<16x128xf32> to vector<16x128xbf16>
    %c1_i32_185 = arith.constant 1 : i32
    %645 = tpu.dynamic_rotate %553 by %c1_i32_185 dim 1 : vector<16x128xf32>, i32 -> vector<16x128xf32>
    %646 = vector.broadcast %297 : vector<1x128xf32> to vector<16x128xf32>
    %647 = arith.mulf %645, %646 : vector<16x128xf32>
    %648 = arith.truncf %647 : vector<16x128xf32> to vector<16x128xbf16>
    %649 = arith.truncf %553 : vector<16x128xf32> to vector<16x128xbf16>
    %c127_i32_186 = arith.constant 127 : i32
    %650 = tpu.dynamic_rotate %553 by %c127_i32_186 dim 1 : vector<16x128xf32>, i32 -> vector<16x128xf32>
    %651 = vector.broadcast %318 : vector<1x128xf32> to vector<16x128xf32>
    %652 = arith.mulf %650, %651 : vector<16x128xf32>
    %653 = arith.truncf %652 : vector<16x128xf32> to vector<16x128xbf16>
    %c113_i32_187 = arith.constant 113 : i32
    %654 = tpu.dynamic_rotate %553 by %c113_i32_187 dim 1 : vector<16x128xf32>, i32 -> vector<16x128xf32>
    %655 = vector.broadcast %339 : vector<1x128xf32> to vector<16x128xf32>
    %656 = arith.mulf %654, %655 : vector<16x128xf32>
    %657 = arith.truncf %656 : vector<16x128xf32> to vector<16x128xbf16>
    %c112_i32_188 = arith.constant 112 : i32
    %658 = tpu.dynamic_rotate %553 by %c112_i32_188 dim 1 : vector<16x128xf32>, i32 -> vector<16x128xf32>
    %659 = vector.broadcast %360 : vector<1x128xf32> to vector<16x128xf32>
    %660 = arith.mulf %658, %659 : vector<16x128xf32>
    %661 = arith.truncf %660 : vector<16x128xf32> to vector<16x128xbf16>
    %c111_i32_189 = arith.constant 111 : i32
    %662 = tpu.dynamic_rotate %553 by %c111_i32_189 dim 1 : vector<16x128xf32>, i32 -> vector<16x128xf32>
    %663 = vector.broadcast %381 : vector<1x128xf32> to vector<16x128xf32>
    %664 = arith.mulf %662, %663 : vector<16x128xf32>
    %665 = arith.truncf %664 : vector<16x128xf32> to vector<16x128xbf16>
    %666 = tpu.concatenate %636, %640, %644, %648, %649, %653, %657, %661, %665 in 0 : vector<16x128xbf16>, vector<16x128xbf16>, vector<16x128xbf16>, vector<16x128xbf16>, vector<16x128xbf16>, vector<16x128xbf16>, vector<16x128xbf16>, vector<16x128xbf16>, vector<16x128xbf16> -> vector<144x128xbf16>
    %c0_190 = arith.constant 0 : index
    %c0_191 = arith.constant 0 : index
    %667 = vector.load %arg7[%c0_190, %c0_191] : memref<16x144xbf16, #tpu.memory_space<vmem>>, vector<16x144xbf16>
    %cst_192 = arith.constant dense<0.000000e+00> : vector<16x128xf32>
    %668 = tpu.matmul %667, %666, %cst_192 {dimension_numbers = #tpu.dot_dimension_numbers<[1], [0], [0], [1], [0, 0, 1, 1], [], []>} : vector<16x144xbf16>, vector<144x128xbf16>, vector<16x128xf32> -> vector<16x128xf32>
    %669 = vector.broadcast %411 : vector<16x1xf32> to vector<16x128xf32>
    %670 = arith.addf %668, %669 : vector<16x128xf32>
    %cst_193 = arith.constant 5.000000e-01 : f32
    %671 = vector.broadcast %cst_193 : f32 to vector<16x128xf32>
    %672 = arith.mulf %671, %670 : vector<16x128xf32>
    %cst_194 = arith.constant 0.707106769 : f32
    %673 = vector.broadcast %cst_194 : f32 to vector<16x128xf32>
    %674 = arith.mulf %670, %673 : vector<16x128xf32>
    %cst_195 = arith.constant 0.000000e+00 : f32
    %675 = vector.broadcast %cst_195 : f32 to vector<16x128xf32>
    %676 = arith.cmpf olt, %674, %675 : vector<16x128xf32>
    %cst_196 = arith.constant -1.000000e+00 : f32
    %cst_197 = arith.constant 1.000000e+00 : f32
    %677 = vector.broadcast %cst_196 : f32 to vector<16x128xf32>
    %678 = vector.broadcast %cst_197 : f32 to vector<16x128xf32>
    %679 = arith.select %676, %677, %678 : vector<16x128xi1>, vector<16x128xf32>
    %680 = math.absf %674 : vector<16x128xf32>
    %cst_198 = arith.constant 0.327591091 : f32
    %681 = vector.broadcast %cst_198 : f32 to vector<16x128xf32>
    %682 = arith.mulf %681, %680 : vector<16x128xf32>
    %cst_199 = arith.constant 1.000000e+00 : f32
    %683 = vector.broadcast %cst_199 : f32 to vector<16x128xf32>
    %684 = arith.addf %683, %682 : vector<16x128xf32>
    %cst_200 = arith.constant 1.000000e+00 : f32
    %685 = vector.broadcast %cst_200 : f32 to vector<16x128xf32>
    %686 = arith.divf %685, %684 : vector<16x128xf32>
    %cst_201 = arith.constant 1.06140542 : f32
    %687 = vector.broadcast %cst_201 : f32 to vector<16x128xf32>
    %688 = arith.mulf %687, %686 : vector<16x128xf32>
    %cst_202 = arith.constant -1.45315206 : f32
    %689 = vector.broadcast %cst_202 : f32 to vector<16x128xf32>
    %690 = arith.addf %688, %689 : vector<16x128xf32>
    %691 = arith.mulf %690, %686 : vector<16x128xf32>
    %cst_203 = arith.constant 1.42141378 : f32
    %692 = vector.broadcast %cst_203 : f32 to vector<16x128xf32>
    %693 = arith.addf %691, %692 : vector<16x128xf32>
    %694 = arith.mulf %693, %686 : vector<16x128xf32>
    %cst_204 = arith.constant -0.284496725 : f32
    %695 = vector.broadcast %cst_204 : f32 to vector<16x128xf32>
    %696 = arith.addf %694, %695 : vector<16x128xf32>
    %697 = arith.mulf %696, %686 : vector<16x128xf32>
    %cst_205 = arith.constant 0.254829586 : f32
    %698 = vector.broadcast %cst_205 : f32 to vector<16x128xf32>
    %699 = arith.addf %697, %698 : vector<16x128xf32>
    %700 = arith.mulf %699, %686 : vector<16x128xf32>
    %cst_206 = arith.constant 0.000000e+00 : f32
    %701 = vector.broadcast %cst_206 : f32 to vector<16x128xf32>
    %702 = arith.subf %701, %680 : vector<16x128xf32>
    %703 = arith.mulf %702, %680 : vector<16x128xf32>
    %704 = math.exp %703 : vector<16x128xf32>
    %705 = arith.mulf %700, %704 : vector<16x128xf32>
    %cst_207 = arith.constant 1.000000e+00 : f32
    %706 = vector.broadcast %cst_207 : f32 to vector<16x128xf32>
    %707 = arith.subf %706, %705 : vector<16x128xf32>
    %708 = arith.mulf %679, %707 : vector<16x128xf32>
    %cst_208 = arith.constant 1.000000e+00 : f32
    %709 = vector.broadcast %cst_208 : f32 to vector<16x128xf32>
    %710 = arith.addf %709, %708 : vector<16x128xf32>
    %711 = arith.mulf %672, %710 : vector<16x128xf32>
    %712 = arith.addf %632, %711 : vector<16x128xf32>
    %713 = vector.shape_cast %712 : vector<16x128xf32> to vector<1x16x128xf32>
    %cst_209 = arith.constant dense<0.000000e+00> : vector<1xf32>
    %714 = vector.multi_reduction <add>, %713, %cst_209 [1, 2] : vector<1x16x128xf32> to vector<1xf32>
    %715 = vector.shape_cast %714 : vector<1xf32> to vector<1x1x1xf32>
    %716 = vector.extract %715[0, 0, 0] : f32 from vector<1x1x1xf32>
    %717 = vector.broadcast %716 : f32 to vector<1x1xf32>
    %cst_210 = arith.constant 2.048000e+03 : f32
    %718 = vector.broadcast %cst_210 : f32 to vector<1x1xf32>
    %719 = arith.divf %717, %718 : vector<1x1xf32>
    %720 = vector.broadcast %719 : vector<1x1xf32> to vector<16x128xf32>
    %721 = arith.subf %712, %720 : vector<16x128xf32>
    %722 = arith.mulf %721, %721 : vector<16x128xf32>
    %723 = vector.shape_cast %722 : vector<16x128xf32> to vector<1x16x128xf32>
    %cst_211 = arith.constant dense<0.000000e+00> : vector<1xf32>
    %724 = vector.multi_reduction <add>, %723, %cst_211 [1, 2] : vector<1x16x128xf32> to vector<1xf32>
    %725 = vector.shape_cast %724 : vector<1xf32> to vector<1x1x1xf32>
    %726 = vector.extract %725[0, 0, 0] : f32 from vector<1x1x1xf32>
    %727 = vector.broadcast %726 : f32 to vector<1x1xf32>
    %cst_212 = arith.constant 2.048000e+03 : f32
    %728 = vector.broadcast %cst_212 : f32 to vector<1x1xf32>
    %729 = arith.divf %727, %728 : vector<1x1xf32>
    %730 = vector.broadcast %719 : vector<1x1xf32> to vector<16x128xf32>
    %731 = arith.subf %712, %730 : vector<16x128xf32>
    %cst_213 = arith.constant 9.99999974E-6 : f32
    %732 = vector.broadcast %cst_213 : f32 to vector<1x1xf32>
    %733 = arith.addf %729, %732 : vector<1x1xf32>
    %734 = math.rsqrt %733 : vector<1x1xf32>
    %735 = vector.broadcast %734 : vector<1x1xf32> to vector<16x128xf32>
    %736 = arith.mulf %731, %735 : vector<16x128xf32>
    %737 = vector.broadcast %415 : vector<16x1xf32> to vector<16x128xf32>
    %738 = arith.mulf %736, %737 : vector<16x128xf32>
    %739 = vector.broadcast %416 : vector<16x1xf32> to vector<16x128xf32>
    %740 = arith.addf %738, %739 : vector<16x128xf32>
    %c0_214 = arith.constant 0 : index
    %c0_215 = arith.constant 0 : index
    %741 = vector.load %arg8[%c0_214, %c0_215] : memref<16x16xbf16, #tpu.memory_space<vmem>>, vector<16x16xbf16>
    %742 = arith.truncf %740 : vector<16x128xf32> to vector<16x128xbf16>
    %cst_216 = arith.constant dense<0.000000e+00> : vector<16x128xf32>
    %743 = tpu.matmul %741, %742, %cst_216 {dimension_numbers = #tpu.dot_dimension_numbers<[1], [0], [0], [1], [0, 0, 1, 1], [], []>} : vector<16x16xbf16>, vector<16x128xbf16>, vector<16x128xf32> -> vector<16x128xf32>
    %744 = vector.broadcast %412 : vector<16x1xf32> to vector<16x128xf32>
    %745 = arith.addf %743, %744 : vector<16x128xf32>
    %746 = vector.extract_strided_slice %405 {offsets = [16, 0], sizes = [16, 128], strides = [1, 1]} : vector<32x128xf32> to vector<16x128xf32>
    %747 = vector.extract_strided_slice %5 {offsets = [0, 1], sizes = [16, 1], strides = [1, 1]} : vector<16x17xf32> to vector<16x1xf32>
    %748 = vector.broadcast %747 : vector<16x1xf32> to vector<16x128xf32>
    %749 = arith.addf %746, %748 : vector<16x128xf32>
    %750 = vector.extract_strided_slice %5 {offsets = [0, 9], sizes = [16, 1], strides = [1, 1]} : vector<16x17xf32> to vector<16x1xf32>
    %751 = vector.extract_strided_slice %5 {offsets = [0, 10], sizes = [16, 1], strides = [1, 1]} : vector<16x17xf32> to vector<16x1xf32>
    %752 = vector.extract_strided_slice %5 {offsets = [0, 11], sizes = [16, 1], strides = [1, 1]} : vector<16x17xf32> to vector<16x1xf32>
    %753 = vector.extract_strided_slice %5 {offsets = [0, 12], sizes = [16, 1], strides = [1, 1]} : vector<16x17xf32> to vector<16x1xf32>
    %754 = vector.extract_strided_slice %5 {offsets = [0, 13], sizes = [16, 1], strides = [1, 1]} : vector<16x17xf32> to vector<16x1xf32>
    %755 = vector.extract_strided_slice %5 {offsets = [0, 14], sizes = [16, 1], strides = [1, 1]} : vector<16x17xf32> to vector<16x1xf32>
    %756 = vector.extract_strided_slice %5 {offsets = [0, 15], sizes = [16, 1], strides = [1, 1]} : vector<16x17xf32> to vector<16x1xf32>
    %757 = vector.shape_cast %749 : vector<16x128xf32> to vector<1x16x128xf32>
    %cst_217 = arith.constant dense<0.000000e+00> : vector<1xf32>
    %758 = vector.multi_reduction <add>, %757, %cst_217 [1, 2] : vector<1x16x128xf32> to vector<1xf32>
    %759 = vector.shape_cast %758 : vector<1xf32> to vector<1x1x1xf32>
    %760 = vector.extract %759[0, 0, 0] : f32 from vector<1x1x1xf32>
    %761 = vector.broadcast %760 : f32 to vector<1x1xf32>
    %cst_218 = arith.constant 2.048000e+03 : f32
    %762 = vector.broadcast %cst_218 : f32 to vector<1x1xf32>
    %763 = arith.divf %761, %762 : vector<1x1xf32>
    %764 = vector.broadcast %763 : vector<1x1xf32> to vector<16x128xf32>
    %765 = arith.subf %749, %764 : vector<16x128xf32>
    %766 = arith.mulf %765, %765 : vector<16x128xf32>
    %767 = vector.shape_cast %766 : vector<16x128xf32> to vector<1x16x128xf32>
    %cst_219 = arith.constant dense<0.000000e+00> : vector<1xf32>
    %768 = vector.multi_reduction <add>, %767, %cst_219 [1, 2] : vector<1x16x128xf32> to vector<1xf32>
    %769 = vector.shape_cast %768 : vector<1xf32> to vector<1x1x1xf32>
    %770 = vector.extract %769[0, 0, 0] : f32 from vector<1x1x1xf32>
    %771 = vector.broadcast %770 : f32 to vector<1x1xf32>
    %cst_220 = arith.constant 2.048000e+03 : f32
    %772 = vector.broadcast %cst_220 : f32 to vector<1x1xf32>
    %773 = arith.divf %771, %772 : vector<1x1xf32>
    %774 = vector.broadcast %763 : vector<1x1xf32> to vector<16x128xf32>
    %775 = arith.subf %749, %774 : vector<16x128xf32>
    %cst_221 = arith.constant 9.99999974E-6 : f32
    %776 = vector.broadcast %cst_221 : f32 to vector<1x1xf32>
    %777 = arith.addf %773, %776 : vector<1x1xf32>
    %778 = math.rsqrt %777 : vector<1x1xf32>
    %779 = vector.broadcast %778 : vector<1x1xf32> to vector<16x128xf32>
    %780 = arith.mulf %775, %779 : vector<16x128xf32>
    %781 = vector.broadcast %753 : vector<16x1xf32> to vector<16x128xf32>
    %782 = arith.mulf %780, %781 : vector<16x128xf32>
    %783 = vector.broadcast %754 : vector<16x1xf32> to vector<16x128xf32>
    %784 = arith.addf %782, %783 : vector<16x128xf32>
    %cst_222 = arith.constant 5.000000e-01 : f32
    %785 = vector.broadcast %cst_222 : f32 to vector<16x128xf32>
    %786 = arith.mulf %785, %784 : vector<16x128xf32>
    %cst_223 = arith.constant 0.707106769 : f32
    %787 = vector.broadcast %cst_223 : f32 to vector<16x128xf32>
    %788 = arith.mulf %784, %787 : vector<16x128xf32>
    %cst_224 = arith.constant 0.000000e+00 : f32
    %789 = vector.broadcast %cst_224 : f32 to vector<16x128xf32>
    %790 = arith.cmpf olt, %788, %789 : vector<16x128xf32>
    %cst_225 = arith.constant -1.000000e+00 : f32
    %cst_226 = arith.constant 1.000000e+00 : f32
    %791 = vector.broadcast %cst_225 : f32 to vector<16x128xf32>
    %792 = vector.broadcast %cst_226 : f32 to vector<16x128xf32>
    %793 = arith.select %790, %791, %792 : vector<16x128xi1>, vector<16x128xf32>
    %794 = math.absf %788 : vector<16x128xf32>
    %cst_227 = arith.constant 0.327591091 : f32
    %795 = vector.broadcast %cst_227 : f32 to vector<16x128xf32>
    %796 = arith.mulf %795, %794 : vector<16x128xf32>
    %cst_228 = arith.constant 1.000000e+00 : f32
    %797 = vector.broadcast %cst_228 : f32 to vector<16x128xf32>
    %798 = arith.addf %797, %796 : vector<16x128xf32>
    %cst_229 = arith.constant 1.000000e+00 : f32
    %799 = vector.broadcast %cst_229 : f32 to vector<16x128xf32>
    %800 = arith.divf %799, %798 : vector<16x128xf32>
    %cst_230 = arith.constant 1.06140542 : f32
    %801 = vector.broadcast %cst_230 : f32 to vector<16x128xf32>
    %802 = arith.mulf %801, %800 : vector<16x128xf32>
    %cst_231 = arith.constant -1.45315206 : f32
    %803 = vector.broadcast %cst_231 : f32 to vector<16x128xf32>
    %804 = arith.addf %802, %803 : vector<16x128xf32>
    %805 = arith.mulf %804, %800 : vector<16x128xf32>
    %cst_232 = arith.constant 1.42141378 : f32
    %806 = vector.broadcast %cst_232 : f32 to vector<16x128xf32>
    %807 = arith.addf %805, %806 : vector<16x128xf32>
    %808 = arith.mulf %807, %800 : vector<16x128xf32>
    %cst_233 = arith.constant -0.284496725 : f32
    %809 = vector.broadcast %cst_233 : f32 to vector<16x128xf32>
    %810 = arith.addf %808, %809 : vector<16x128xf32>
    %811 = arith.mulf %810, %800 : vector<16x128xf32>
    %cst_234 = arith.constant 0.254829586 : f32
    %812 = vector.broadcast %cst_234 : f32 to vector<16x128xf32>
    %813 = arith.addf %811, %812 : vector<16x128xf32>
    %814 = arith.mulf %813, %800 : vector<16x128xf32>
    %cst_235 = arith.constant 0.000000e+00 : f32
    %815 = vector.broadcast %cst_235 : f32 to vector<16x128xf32>
    %816 = arith.subf %815, %794 : vector<16x128xf32>
    %817 = arith.mulf %816, %794 : vector<16x128xf32>
    %818 = math.exp %817 : vector<16x128xf32>
    %819 = arith.mulf %814, %818 : vector<16x128xf32>
    %cst_236 = arith.constant 1.000000e+00 : f32
    %820 = vector.broadcast %cst_236 : f32 to vector<16x128xf32>
    %821 = arith.subf %820, %819 : vector<16x128xf32>
    %822 = arith.mulf %793, %821 : vector<16x128xf32>
    %cst_237 = arith.constant 1.000000e+00 : f32
    %823 = vector.broadcast %cst_237 : f32 to vector<16x128xf32>
    %824 = arith.addf %823, %822 : vector<16x128xf32>
    %825 = arith.mulf %786, %824 : vector<16x128xf32>
    %c125_i32_238 = arith.constant 125 : i32
    %826 = tpu.dynamic_rotate %825 by %c125_i32_238 dim 1 : vector<16x128xf32>, i32 -> vector<16x128xf32>
    %827 = vector.broadcast %46 : vector<16x1xf32> to vector<16x128xf32>
    %828 = vector.broadcast %57 : vector<1x128xf32> to vector<16x128xf32>
    %829 = arith.mulf %827, %828 : vector<16x128xf32>
    %830 = arith.mulf %826, %829 : vector<16x128xf32>
    %c126_i32_239 = arith.constant 126 : i32
    %831 = tpu.dynamic_rotate %825 by %c126_i32_239 dim 1 : vector<16x128xf32>, i32 -> vector<16x128xf32>
    %832 = vector.broadcast %75 : vector<16x1xf32> to vector<16x128xf32>
    %833 = vector.broadcast %86 : vector<1x128xf32> to vector<16x128xf32>
    %834 = arith.mulf %832, %833 : vector<16x128xf32>
    %835 = arith.mulf %831, %834 : vector<16x128xf32>
    %836 = arith.addf %830, %835 : vector<16x128xf32>
    %c127_i32_240 = arith.constant 127 : i32
    %837 = tpu.dynamic_rotate %825 by %c127_i32_240 dim 1 : vector<16x128xf32>, i32 -> vector<16x128xf32>
    %838 = vector.broadcast %104 : vector<16x1xf32> to vector<16x128xf32>
    %839 = vector.broadcast %115 : vector<1x128xf32> to vector<16x128xf32>
    %840 = arith.mulf %838, %839 : vector<16x128xf32>
    %841 = arith.mulf %837, %840 : vector<16x128xf32>
    %842 = arith.addf %836, %841 : vector<16x128xf32>
    %843 = vector.broadcast %133 : vector<16x1xf32> to vector<16x128xf32>
    %844 = vector.broadcast %144 : vector<1x128xf32> to vector<16x128xf32>
    %845 = arith.mulf %843, %844 : vector<16x128xf32>
    %846 = arith.mulf %825, %845 : vector<16x128xf32>
    %847 = arith.addf %842, %846 : vector<16x128xf32>
    %c1_i32_241 = arith.constant 1 : i32
    %848 = tpu.dynamic_rotate %825 by %c1_i32_241 dim 1 : vector<16x128xf32>, i32 -> vector<16x128xf32>
    %849 = vector.broadcast %162 : vector<16x1xf32> to vector<16x128xf32>
    %850 = vector.broadcast %173 : vector<1x128xf32> to vector<16x128xf32>
    %851 = arith.mulf %849, %850 : vector<16x128xf32>
    %852 = arith.mulf %848, %851 : vector<16x128xf32>
    %853 = arith.addf %847, %852 : vector<16x128xf32>
    %c2_i32_242 = arith.constant 2 : i32
    %854 = tpu.dynamic_rotate %825 by %c2_i32_242 dim 1 : vector<16x128xf32>, i32 -> vector<16x128xf32>
    %855 = vector.broadcast %191 : vector<16x1xf32> to vector<16x128xf32>
    %856 = vector.broadcast %202 : vector<1x128xf32> to vector<16x128xf32>
    %857 = arith.mulf %855, %856 : vector<16x128xf32>
    %858 = arith.mulf %854, %857 : vector<16x128xf32>
    %859 = arith.addf %853, %858 : vector<16x128xf32>
    %c80_i32_243 = arith.constant 80 : i32
    %860 = tpu.dynamic_rotate %825 by %c80_i32_243 dim 1 : vector<16x128xf32>, i32 -> vector<16x128xf32>
    %861 = vector.broadcast %46 : vector<16x1xf32> to vector<16x128xf32>
    %862 = vector.broadcast %68 : vector<1x128xf32> to vector<16x128xf32>
    %863 = arith.mulf %861, %862 : vector<16x128xf32>
    %864 = arith.mulf %860, %863 : vector<16x128xf32>
    %c96_i32_244 = arith.constant 96 : i32
    %865 = tpu.dynamic_rotate %825 by %c96_i32_244 dim 1 : vector<16x128xf32>, i32 -> vector<16x128xf32>
    %866 = vector.broadcast %75 : vector<16x1xf32> to vector<16x128xf32>
    %867 = vector.broadcast %97 : vector<1x128xf32> to vector<16x128xf32>
    %868 = arith.mulf %866, %867 : vector<16x128xf32>
    %869 = arith.mulf %865, %868 : vector<16x128xf32>
    %870 = arith.addf %864, %869 : vector<16x128xf32>
    %c112_i32_245 = arith.constant 112 : i32
    %871 = tpu.dynamic_rotate %825 by %c112_i32_245 dim 1 : vector<16x128xf32>, i32 -> vector<16x128xf32>
    %872 = vector.broadcast %104 : vector<16x1xf32> to vector<16x128xf32>
    %873 = vector.broadcast %126 : vector<1x128xf32> to vector<16x128xf32>
    %874 = arith.mulf %872, %873 : vector<16x128xf32>
    %875 = arith.mulf %871, %874 : vector<16x128xf32>
    %876 = arith.addf %870, %875 : vector<16x128xf32>
    %877 = vector.broadcast %133 : vector<16x1xf32> to vector<16x128xf32>
    %878 = vector.broadcast %155 : vector<1x128xf32> to vector<16x128xf32>
    %879 = arith.mulf %877, %878 : vector<16x128xf32>
    %880 = arith.mulf %825, %879 : vector<16x128xf32>
    %881 = arith.addf %876, %880 : vector<16x128xf32>
    %c16_i32_246 = arith.constant 16 : i32
    %882 = tpu.dynamic_rotate %825 by %c16_i32_246 dim 1 : vector<16x128xf32>, i32 -> vector<16x128xf32>
    %883 = vector.broadcast %162 : vector<16x1xf32> to vector<16x128xf32>
    %884 = vector.broadcast %184 : vector<1x128xf32> to vector<16x128xf32>
    %885 = arith.mulf %883, %884 : vector<16x128xf32>
    %886 = arith.mulf %882, %885 : vector<16x128xf32>
    %887 = arith.addf %881, %886 : vector<16x128xf32>
    %c32_i32_247 = arith.constant 32 : i32
    %888 = tpu.dynamic_rotate %825 by %c32_i32_247 dim 1 : vector<16x128xf32>, i32 -> vector<16x128xf32>
    %889 = vector.broadcast %191 : vector<16x1xf32> to vector<16x128xf32>
    %890 = vector.broadcast %213 : vector<1x128xf32> to vector<16x128xf32>
    %891 = arith.mulf %889, %890 : vector<16x128xf32>
    %892 = arith.mulf %888, %891 : vector<16x128xf32>
    %893 = arith.addf %887, %892 : vector<16x128xf32>
    %894 = arith.truncf %859 : vector<16x128xf32> to vector<16x128xbf16>
    %c0_248 = arith.constant 0 : index
    %c0_249 = arith.constant 0 : index
    %895 = vector.load %arg9[%c0_248, %c0_249] : memref<16x16xbf16, #tpu.memory_space<vmem>>, vector<16x16xbf16>
    %cst_250 = arith.constant dense<0.000000e+00> : vector<16x128xf32>
    %896 = tpu.matmul %895, %894, %cst_250 {dimension_numbers = #tpu.dot_dimension_numbers<[1], [0], [0], [1], [0, 0, 1, 1], [], []>} : vector<16x16xbf16>, vector<16x128xbf16>, vector<16x128xf32> -> vector<16x128xf32>
    %897 = vector.broadcast %750 : vector<16x1xf32> to vector<16x128xf32>
    %898 = arith.addf %896, %897 : vector<16x128xf32>
    %cst_251 = arith.constant 5.000000e-01 : f32
    %899 = vector.broadcast %cst_251 : f32 to vector<16x128xf32>
    %900 = arith.mulf %899, %898 : vector<16x128xf32>
    %cst_252 = arith.constant 0.707106769 : f32
    %901 = vector.broadcast %cst_252 : f32 to vector<16x128xf32>
    %902 = arith.mulf %898, %901 : vector<16x128xf32>
    %cst_253 = arith.constant 0.000000e+00 : f32
    %903 = vector.broadcast %cst_253 : f32 to vector<16x128xf32>
    %904 = arith.cmpf olt, %902, %903 : vector<16x128xf32>
    %cst_254 = arith.constant -1.000000e+00 : f32
    %cst_255 = arith.constant 1.000000e+00 : f32
    %905 = vector.broadcast %cst_254 : f32 to vector<16x128xf32>
    %906 = vector.broadcast %cst_255 : f32 to vector<16x128xf32>
    %907 = arith.select %904, %905, %906 : vector<16x128xi1>, vector<16x128xf32>
    %908 = math.absf %902 : vector<16x128xf32>
    %cst_256 = arith.constant 0.327591091 : f32
    %909 = vector.broadcast %cst_256 : f32 to vector<16x128xf32>
    %910 = arith.mulf %909, %908 : vector<16x128xf32>
    %cst_257 = arith.constant 1.000000e+00 : f32
    %911 = vector.broadcast %cst_257 : f32 to vector<16x128xf32>
    %912 = arith.addf %911, %910 : vector<16x128xf32>
    %cst_258 = arith.constant 1.000000e+00 : f32
    %913 = vector.broadcast %cst_258 : f32 to vector<16x128xf32>
    %914 = arith.divf %913, %912 : vector<16x128xf32>
    %cst_259 = arith.constant 1.06140542 : f32
    %915 = vector.broadcast %cst_259 : f32 to vector<16x128xf32>
    %916 = arith.mulf %915, %914 : vector<16x128xf32>
    %cst_260 = arith.constant -1.45315206 : f32
    %917 = vector.broadcast %cst_260 : f32 to vector<16x128xf32>
    %918 = arith.addf %916, %917 : vector<16x128xf32>
    %919 = arith.mulf %918, %914 : vector<16x128xf32>
    %cst_261 = arith.constant 1.42141378 : f32
    %920 = vector.broadcast %cst_261 : f32 to vector<16x128xf32>
    %921 = arith.addf %919, %920 : vector<16x128xf32>
    %922 = arith.mulf %921, %914 : vector<16x128xf32>
    %cst_262 = arith.constant -0.284496725 : f32
    %923 = vector.broadcast %cst_262 : f32 to vector<16x128xf32>
    %924 = arith.addf %922, %923 : vector<16x128xf32>
    %925 = arith.mulf %924, %914 : vector<16x128xf32>
    %cst_263 = arith.constant 0.254829586 : f32
    %926 = vector.broadcast %cst_263 : f32 to vector<16x128xf32>
    %927 = arith.addf %925, %926 : vector<16x128xf32>
    %928 = arith.mulf %927, %914 : vector<16x128xf32>
    %cst_264 = arith.constant 0.000000e+00 : f32
    %929 = vector.broadcast %cst_264 : f32 to vector<16x128xf32>
    %930 = arith.subf %929, %908 : vector<16x128xf32>
    %931 = arith.mulf %930, %908 : vector<16x128xf32>
    %932 = math.exp %931 : vector<16x128xf32>
    %933 = arith.mulf %928, %932 : vector<16x128xf32>
    %cst_265 = arith.constant 1.000000e+00 : f32
    %934 = vector.broadcast %cst_265 : f32 to vector<16x128xf32>
    %935 = arith.subf %934, %933 : vector<16x128xf32>
    %936 = arith.mulf %907, %935 : vector<16x128xf32>
    %cst_266 = arith.constant 1.000000e+00 : f32
    %937 = vector.broadcast %cst_266 : f32 to vector<16x128xf32>
    %938 = arith.addf %937, %936 : vector<16x128xf32>
    %939 = arith.mulf %900, %938 : vector<16x128xf32>
    %940 = arith.truncf %893 : vector<16x128xf32> to vector<16x128xbf16>
    %c0_267 = arith.constant 0 : index
    %c0_268 = arith.constant 0 : index
    %941 = vector.load %arg10[%c0_267, %c0_268] : memref<16x16xbf16, #tpu.memory_space<vmem>>, vector<16x16xbf16>
    %cst_269 = arith.constant dense<0.000000e+00> : vector<16x128xf32>
    %942 = tpu.matmul %941, %940, %cst_269 {dimension_numbers = #tpu.dot_dimension_numbers<[1], [0], [0], [1], [0, 0, 1, 1], [], []>} : vector<16x16xbf16>, vector<16x128xbf16>, vector<16x128xf32> -> vector<16x128xf32>
    %943 = vector.broadcast %751 : vector<16x1xf32> to vector<16x128xf32>
    %944 = arith.addf %942, %943 : vector<16x128xf32>
    %cst_270 = arith.constant 5.000000e-01 : f32
    %945 = vector.broadcast %cst_270 : f32 to vector<16x128xf32>
    %946 = arith.mulf %945, %944 : vector<16x128xf32>
    %cst_271 = arith.constant 0.707106769 : f32
    %947 = vector.broadcast %cst_271 : f32 to vector<16x128xf32>
    %948 = arith.mulf %944, %947 : vector<16x128xf32>
    %cst_272 = arith.constant 0.000000e+00 : f32
    %949 = vector.broadcast %cst_272 : f32 to vector<16x128xf32>
    %950 = arith.cmpf olt, %948, %949 : vector<16x128xf32>
    %cst_273 = arith.constant -1.000000e+00 : f32
    %cst_274 = arith.constant 1.000000e+00 : f32
    %951 = vector.broadcast %cst_273 : f32 to vector<16x128xf32>
    %952 = vector.broadcast %cst_274 : f32 to vector<16x128xf32>
    %953 = arith.select %950, %951, %952 : vector<16x128xi1>, vector<16x128xf32>
    %954 = math.absf %948 : vector<16x128xf32>
    %cst_275 = arith.constant 0.327591091 : f32
    %955 = vector.broadcast %cst_275 : f32 to vector<16x128xf32>
    %956 = arith.mulf %955, %954 : vector<16x128xf32>
    %cst_276 = arith.constant 1.000000e+00 : f32
    %957 = vector.broadcast %cst_276 : f32 to vector<16x128xf32>
    %958 = arith.addf %957, %956 : vector<16x128xf32>
    %cst_277 = arith.constant 1.000000e+00 : f32
    %959 = vector.broadcast %cst_277 : f32 to vector<16x128xf32>
    %960 = arith.divf %959, %958 : vector<16x128xf32>
    %cst_278 = arith.constant 1.06140542 : f32
    %961 = vector.broadcast %cst_278 : f32 to vector<16x128xf32>
    %962 = arith.mulf %961, %960 : vector<16x128xf32>
    %cst_279 = arith.constant -1.45315206 : f32
    %963 = vector.broadcast %cst_279 : f32 to vector<16x128xf32>
    %964 = arith.addf %962, %963 : vector<16x128xf32>
    %965 = arith.mulf %964, %960 : vector<16x128xf32>
    %cst_280 = arith.constant 1.42141378 : f32
    %966 = vector.broadcast %cst_280 : f32 to vector<16x128xf32>
    %967 = arith.addf %965, %966 : vector<16x128xf32>
    %968 = arith.mulf %967, %960 : vector<16x128xf32>
    %cst_281 = arith.constant -0.284496725 : f32
    %969 = vector.broadcast %cst_281 : f32 to vector<16x128xf32>
    %970 = arith.addf %968, %969 : vector<16x128xf32>
    %971 = arith.mulf %970, %960 : vector<16x128xf32>
    %cst_282 = arith.constant 0.254829586 : f32
    %972 = vector.broadcast %cst_282 : f32 to vector<16x128xf32>
    %973 = arith.addf %971, %972 : vector<16x128xf32>
    %974 = arith.mulf %973, %960 : vector<16x128xf32>
    %cst_283 = arith.constant 0.000000e+00 : f32
    %975 = vector.broadcast %cst_283 : f32 to vector<16x128xf32>
    %976 = arith.subf %975, %954 : vector<16x128xf32>
    %977 = arith.mulf %976, %954 : vector<16x128xf32>
    %978 = math.exp %977 : vector<16x128xf32>
    %979 = arith.mulf %974, %978 : vector<16x128xf32>
    %cst_284 = arith.constant 1.000000e+00 : f32
    %980 = vector.broadcast %cst_284 : f32 to vector<16x128xf32>
    %981 = arith.subf %980, %979 : vector<16x128xf32>
    %982 = arith.mulf %953, %981 : vector<16x128xf32>
    %cst_285 = arith.constant 1.000000e+00 : f32
    %983 = vector.broadcast %cst_285 : f32 to vector<16x128xf32>
    %984 = arith.addf %983, %982 : vector<16x128xf32>
    %985 = arith.mulf %946, %984 : vector<16x128xf32>
    %986 = arith.addf %939, %985 : vector<16x128xf32>
    %987 = vector.shape_cast %986 : vector<16x128xf32> to vector<1x16x128xf32>
    %cst_286 = arith.constant dense<0.000000e+00> : vector<1xf32>
    %988 = vector.multi_reduction <add>, %987, %cst_286 [1, 2] : vector<1x16x128xf32> to vector<1xf32>
    %989 = vector.shape_cast %988 : vector<1xf32> to vector<1x1x1xf32>
    %990 = vector.extract %989[0, 0, 0] : f32 from vector<1x1x1xf32>
    %991 = vector.broadcast %990 : f32 to vector<1x1xf32>
    %cst_287 = arith.constant 2.048000e+03 : f32
    %992 = vector.broadcast %cst_287 : f32 to vector<1x1xf32>
    %993 = arith.divf %991, %992 : vector<1x1xf32>
    %994 = vector.broadcast %993 : vector<1x1xf32> to vector<16x128xf32>
    %995 = arith.subf %986, %994 : vector<16x128xf32>
    %996 = arith.mulf %995, %995 : vector<16x128xf32>
    %997 = vector.shape_cast %996 : vector<16x128xf32> to vector<1x16x128xf32>
    %cst_288 = arith.constant dense<0.000000e+00> : vector<1xf32>
    %998 = vector.multi_reduction <add>, %997, %cst_288 [1, 2] : vector<1x16x128xf32> to vector<1xf32>
    %999 = vector.shape_cast %998 : vector<1xf32> to vector<1x1x1xf32>
    %1000 = vector.extract %999[0, 0, 0] : f32 from vector<1x1x1xf32>
    %1001 = vector.broadcast %1000 : f32 to vector<1x1xf32>
    %cst_289 = arith.constant 2.048000e+03 : f32
    %1002 = vector.broadcast %cst_289 : f32 to vector<1x1xf32>
    %1003 = arith.divf %1001, %1002 : vector<1x1xf32>
    %1004 = vector.broadcast %993 : vector<1x1xf32> to vector<16x128xf32>
    %1005 = arith.subf %986, %1004 : vector<16x128xf32>
    %cst_290 = arith.constant 9.99999974E-6 : f32
    %1006 = vector.broadcast %cst_290 : f32 to vector<1x1xf32>
    %1007 = arith.addf %1003, %1006 : vector<1x1xf32>
    %1008 = math.rsqrt %1007 : vector<1x1xf32>
    %1009 = vector.broadcast %1008 : vector<1x1xf32> to vector<16x128xf32>
    %1010 = arith.mulf %1005, %1009 : vector<16x128xf32>
    %1011 = vector.broadcast %755 : vector<16x1xf32> to vector<16x128xf32>
    %1012 = arith.mulf %1010, %1011 : vector<16x128xf32>
    %1013 = vector.broadcast %756 : vector<16x1xf32> to vector<16x128xf32>
    %1014 = arith.addf %1012, %1013 : vector<16x128xf32>
    %c0_291 = arith.constant 0 : index
    %c0_292 = arith.constant 0 : index
    %1015 = vector.load %arg11[%c0_291, %c0_292] : memref<16x16xbf16, #tpu.memory_space<vmem>>, vector<16x16xbf16>
    %1016 = arith.truncf %1014 : vector<16x128xf32> to vector<16x128xbf16>
    %cst_293 = arith.constant dense<0.000000e+00> : vector<16x128xf32>
    %1017 = tpu.matmul %1015, %1016, %cst_293 {dimension_numbers = #tpu.dot_dimension_numbers<[1], [0], [0], [1], [0, 0, 1, 1], [], []>} : vector<16x16xbf16>, vector<16x128xbf16>, vector<16x128xf32> -> vector<16x128xf32>
    %1018 = vector.broadcast %752 : vector<16x1xf32> to vector<16x128xf32>
    %1019 = arith.addf %1017, %1018 : vector<16x128xf32>
    %1020 = arith.addf %1, %745 : vector<16x128xf32>
    %1021 = arith.addf %1020, %1019 : vector<16x128xf32>
    %1022 = vector.extract_strided_slice %4 {offsets = [2, 0], sizes = [1, 128], strides = [1, 1]} : vector<4x128xf32> to vector<1x128xf32>
    %1023 = vector.extract_strided_slice %4 {offsets = [3, 0], sizes = [1, 128], strides = [1, 1]} : vector<4x128xf32> to vector<1x128xf32>
    %1024 = arith.mulf %1021, %1021 : vector<16x128xf32>
    %1025 = tpu.concatenate %1021, %1024 in 0 : vector<16x128xf32>, vector<16x128xf32> -> vector<32x128xf32>
    %cst_294 = arith.constant dense<0.000000e+00> : vector<32x8xf32>
    %1026 = tpu.matmul %1025, %2, %cst_294 {dimension_numbers = #tpu.dot_dimension_numbers<[1], [0], [0], [1], [0, 0, 1, 1], [], []>} : vector<32x128xf32>, vector<128x8xf32>, vector<32x8xf32> -> vector<32x8xf32>
    %cst_295 = arith.constant dense<0.000000e+00> : vector<32x128xf32>
    %1027 = tpu.matmul %1026, %3, %cst_295 {dimension_numbers = #tpu.dot_dimension_numbers<[1], [0], [0], [1], [0, 0, 1, 1], [], []>} : vector<32x8xf32>, vector<8x128xf32>, vector<32x128xf32> -> vector<32x128xf32>
    %1028 = vector.extract_strided_slice %1027 {offsets = [0, 0], sizes = [16, 128], strides = [1, 1]} : vector<32x128xf32> to vector<16x128xf32>
    %1029 = vector.extract_strided_slice %1027 {offsets = [16, 0], sizes = [16, 128], strides = [1, 1]} : vector<32x128xf32> to vector<16x128xf32>
    %1030 = arith.mulf %1028, %1028 : vector<16x128xf32>
    %1031 = arith.subf %1029, %1030 : vector<16x128xf32>
    %cst_296 = arith.constant 0.000000e+00 : f32
    %1032 = vector.broadcast %cst_296 : f32 to vector<16x128xf32>
    %1033 = arith.maximumf %1031, %1032 : vector<16x128xf32>
    %1034 = arith.subf %1021, %1028 : vector<16x128xf32>
    %cst_297 = arith.constant 9.99999974E-6 : f32
    %1035 = vector.broadcast %cst_297 : f32 to vector<16x128xf32>
    %1036 = arith.addf %1033, %1035 : vector<16x128xf32>
    %1037 = math.rsqrt %1036 : vector<16x128xf32>
    %1038 = arith.mulf %1034, %1037 : vector<16x128xf32>
    %1039 = vector.broadcast %1022 : vector<1x128xf32> to vector<16x128xf32>
    %1040 = arith.mulf %1038, %1039 : vector<16x128xf32>
    %1041 = vector.broadcast %1023 : vector<1x128xf32> to vector<16x128xf32>
    %1042 = arith.addf %1040, %1041 : vector<16x128xf32>
    %c0_298 = arith.constant 0 : index
    %c0_299 = arith.constant 0 : index
    %1043 = vector.load %arg13[%c0_298, %c0_299] : memref<64x16xbf16, #tpu.memory_space<vmem>>, vector<64x16xbf16>
    %1044 = arith.truncf %1042 : vector<16x128xf32> to vector<16x128xbf16>
    %cst_300 = arith.constant dense<0.000000e+00> : vector<64x128xf32>
    %1045 = tpu.matmul %1043, %1044, %cst_300 {dimension_numbers = #tpu.dot_dimension_numbers<[1], [0], [0], [1], [0, 0, 1, 1], [], []>} : vector<64x16xbf16>, vector<16x128xbf16>, vector<64x128xf32> -> vector<64x128xf32>
    %c0_301 = arith.constant 0 : index
    %c0_302 = arith.constant 0 : index
    %1046 = vector.load %arg14[%c0_301, %c0_302] : memref<64x1xf32, #tpu.memory_space<vmem>>, vector<64x1xf32>
    %1047 = vector.broadcast %1046 : vector<64x1xf32> to vector<64x128xf32>
    %1048 = arith.addf %1045, %1047 : vector<64x128xf32>
    %cst_303 = arith.constant 5.000000e-01 : f32
    %1049 = vector.broadcast %cst_303 : f32 to vector<64x128xf32>
    %1050 = arith.mulf %1049, %1048 : vector<64x128xf32>
    %cst_304 = arith.constant 0.707106769 : f32
    %1051 = vector.broadcast %cst_304 : f32 to vector<64x128xf32>
    %1052 = arith.mulf %1048, %1051 : vector<64x128xf32>
    %cst_305 = arith.constant 0.000000e+00 : f32
    %1053 = vector.broadcast %cst_305 : f32 to vector<64x128xf32>
    %1054 = arith.cmpf olt, %1052, %1053 : vector<64x128xf32>
    %cst_306 = arith.constant -1.000000e+00 : f32
    %cst_307 = arith.constant 1.000000e+00 : f32
    %1055 = vector.broadcast %cst_306 : f32 to vector<64x128xf32>
    %1056 = vector.broadcast %cst_307 : f32 to vector<64x128xf32>
    %1057 = arith.select %1054, %1055, %1056 : vector<64x128xi1>, vector<64x128xf32>
    %1058 = math.absf %1052 : vector<64x128xf32>
    %cst_308 = arith.constant 0.327591091 : f32
    %1059 = vector.broadcast %cst_308 : f32 to vector<64x128xf32>
    %1060 = arith.mulf %1059, %1058 : vector<64x128xf32>
    %cst_309 = arith.constant 1.000000e+00 : f32
    %1061 = vector.broadcast %cst_309 : f32 to vector<64x128xf32>
    %1062 = arith.addf %1061, %1060 : vector<64x128xf32>
    %cst_310 = arith.constant 1.000000e+00 : f32
    %1063 = vector.broadcast %cst_310 : f32 to vector<64x128xf32>
    %1064 = arith.divf %1063, %1062 : vector<64x128xf32>
    %cst_311 = arith.constant 1.06140542 : f32
    %1065 = vector.broadcast %cst_311 : f32 to vector<64x128xf32>
    %1066 = arith.mulf %1065, %1064 : vector<64x128xf32>
    %cst_312 = arith.constant -1.45315206 : f32
    %1067 = vector.broadcast %cst_312 : f32 to vector<64x128xf32>
    %1068 = arith.addf %1066, %1067 : vector<64x128xf32>
    %1069 = arith.mulf %1068, %1064 : vector<64x128xf32>
    %cst_313 = arith.constant 1.42141378 : f32
    %1070 = vector.broadcast %cst_313 : f32 to vector<64x128xf32>
    %1071 = arith.addf %1069, %1070 : vector<64x128xf32>
    %1072 = arith.mulf %1071, %1064 : vector<64x128xf32>
    %cst_314 = arith.constant -0.284496725 : f32
    %1073 = vector.broadcast %cst_314 : f32 to vector<64x128xf32>
    %1074 = arith.addf %1072, %1073 : vector<64x128xf32>
    %1075 = arith.mulf %1074, %1064 : vector<64x128xf32>
    %cst_315 = arith.constant 0.254829586 : f32
    %1076 = vector.broadcast %cst_315 : f32 to vector<64x128xf32>
    %1077 = arith.addf %1075, %1076 : vector<64x128xf32>
    %1078 = arith.mulf %1077, %1064 : vector<64x128xf32>
    %cst_316 = arith.constant 0.000000e+00 : f32
    %1079 = vector.broadcast %cst_316 : f32 to vector<64x128xf32>
    %1080 = arith.subf %1079, %1058 : vector<64x128xf32>
    %1081 = arith.mulf %1080, %1058 : vector<64x128xf32>
    %1082 = math.exp %1081 : vector<64x128xf32>
    %1083 = arith.mulf %1078, %1082 : vector<64x128xf32>
    %cst_317 = arith.constant 1.000000e+00 : f32
    %1084 = vector.broadcast %cst_317 : f32 to vector<64x128xf32>
    %1085 = arith.subf %1084, %1083 : vector<64x128xf32>
    %1086 = arith.mulf %1057, %1085 : vector<64x128xf32>
    %cst_318 = arith.constant 1.000000e+00 : f32
    %1087 = vector.broadcast %cst_318 : f32 to vector<64x128xf32>
    %1088 = arith.addf %1087, %1086 : vector<64x128xf32>
    %1089 = arith.mulf %1050, %1088 : vector<64x128xf32>
    %c0_319 = arith.constant 0 : index
    %c0_320 = arith.constant 0 : index
    %1090 = vector.load %arg15[%c0_319, %c0_320] : memref<16x64xbf16, #tpu.memory_space<vmem>>, vector<16x64xbf16>
    %1091 = arith.truncf %1089 : vector<64x128xf32> to vector<64x128xbf16>
    %cst_321 = arith.constant dense<0.000000e+00> : vector<16x128xf32>
    %1092 = tpu.matmul %1090, %1091, %cst_321 {dimension_numbers = #tpu.dot_dimension_numbers<[1], [0], [0], [1], [0, 0, 1, 1], [], []>} : vector<16x64xbf16>, vector<64x128xbf16>, vector<16x128xf32> -> vector<16x128xf32>
    %1093 = vector.extract_strided_slice %5 {offsets = [0, 16], sizes = [16, 1], strides = [1, 1]} : vector<16x17xf32> to vector<16x1xf32>
    %1094 = vector.broadcast %1093 : vector<16x1xf32> to vector<16x128xf32>
    %1095 = arith.addf %1092, %1094 : vector<16x128xf32>
    %1096 = arith.addf %1021, %1095 : vector<16x128xf32>
    %c0_322 = arith.constant 0 : index
    %c0_323 = arith.constant 0 : index
    %c0_324 = arith.constant 0 : index
    %1097 = vector.load %arg16[%c0_322, %c0_323, %c0_324] : memref<1x16x128xf32, #tpu.memory_space<vmem>>, vector<1x16x128xf32>
    %1098 = vector.shape_cast %1097 : vector<1x16x128xf32> to vector<16x128xf32>
    %1099 = vector.shape_cast %1096 : vector<16x128xf32> to vector<1x16x128xf32>
    tpu.vector_store %arg16[%c0_322, %c0_323, %c0_324], %1099 {strides = array<i32>} : memref<1x16x128xf32, #tpu.memory_space<vmem>>, vector<1x16x128xf32>,
    return
  }
  func.func @transform_0(%arg0: i32) -> (i32, i32, i32) {
    %c0_i32 = arith.constant 0 : i32
    %c0_i32_0 = arith.constant 0 : i32
    %c0_i32_1 = arith.constant 0 : i32
    return %arg0, %c0_i32, %c0_i32_0 : i32, i32, i32
  }
  func.func @transform_1(%arg0: i32) -> (i32, i32) {
    %c0_i32 = arith.constant 0 : i32
    %c0_i32_0 = arith.constant 0 : i32
    %c0_i32_1 = arith.constant 0 : i32
    return %c0_i32, %c0_i32_0 : i32, i32
  }
  func.func @transform_2(%arg0: i32) -> (i32, i32) {
    %c0_i32 = arith.constant 0 : i32
    %c0_i32_0 = arith.constant 0 : i32
    %c0_i32_1 = arith.constant 0 : i32
    return %c0_i32, %c0_i32_0 : i32, i32
  }
  func.func @transform_3(%arg0: i32) -> (i32, i32) {
    %c0_i32 = arith.constant 0 : i32
    %c0_i32_0 = arith.constant 0 : i32
    %c0_i32_1 = arith.constant 0 : i32
    return %c0_i32, %c0_i32_0 : i32, i32
  }
  func.func @transform_4(%arg0: i32) -> (i32, i32) {
    %c0_i32 = arith.constant 0 : i32
    %c0_i32_0 = arith.constant 0 : i32
    %c0_i32_1 = arith.constant 0 : i32
    return %c0_i32, %c0_i32_0 : i32, i32
  }
  func.func @transform_5(%arg0: i32) -> (i32, i32) {
    %c0_i32 = arith.constant 0 : i32
    %c0_i32_0 = arith.constant 0 : i32
    %c0_i32_1 = arith.constant 0 : i32
    return %c0_i32, %c0_i32_0 : i32, i32
  }
  func.func @transform_6(%arg0: i32) -> (i32, i32) {
    %c0_i32 = arith.constant 0 : i32
    %c0_i32_0 = arith.constant 0 : i32
    %c0_i32_1 = arith.constant 0 : i32
    return %c0_i32, %c0_i32_0 : i32, i32
  }
  func.func @transform_7(%arg0: i32) -> (i32, i32) {
    %c0_i32 = arith.constant 0 : i32
    %c0_i32_0 = arith.constant 0 : i32
    %c0_i32_1 = arith.constant 0 : i32
    return %c0_i32, %c0_i32_0 : i32, i32
  }
  func.func @transform_8(%arg0: i32) -> (i32, i32) {
    %c0_i32 = arith.constant 0 : i32
    %c0_i32_0 = arith.constant 0 : i32
    %c0_i32_1 = arith.constant 0 : i32
    return %c0_i32, %c0_i32_0 : i32, i32
  }
  func.func @transform_9(%arg0: i32) -> (i32, i32) {
    %c0_i32 = arith.constant 0 : i32
    %c0_i32_0 = arith.constant 0 : i32
    %c0_i32_1 = arith.constant 0 : i32
    return %c0_i32, %c0_i32_0 : i32, i32
  }
  func.func @transform_10(%arg0: i32) -> (i32, i32) {
    %c0_i32 = arith.constant 0 : i32
    %c0_i32_0 = arith.constant 0 : i32
    %c0_i32_1 = arith.constant 0 : i32
    return %c0_i32, %c0_i32_0 : i32, i32
  }
  func.func @transform_11(%arg0: i32) -> (i32, i32) {
    %c0_i32 = arith.constant 0 : i32
    %c0_i32_0 = arith.constant 0 : i32
    %c0_i32_1 = arith.constant 0 : i32
    return %c0_i32, %c0_i32_0 : i32, i32
  }
  func.func @transform_12(%arg0: i32) -> (i32, i32) {
    %c0_i32 = arith.constant 0 : i32
    %c0_i32_0 = arith.constant 0 : i32
    %c0_i32_1 = arith.constant 0 : i32
    return %c0_i32, %c0_i32_0 : i32, i32
  }
  func.func @transform_13(%arg0: i32) -> (i32, i32) {
    %c0_i32 = arith.constant 0 : i32
    %c0_i32_0 = arith.constant 0 : i32
    %c0_i32_1 = arith.constant 0 : i32
    return %c0_i32, %c0_i32_0 : i32, i32
  }
  func.func @transform_14(%arg0: i32) -> (i32, i32) {
    %c0_i32 = arith.constant 0 : i32
    %c0_i32_0 = arith.constant 0 : i32
    %c0_i32_1 = arith.constant 0 : i32
    return %c0_i32, %c0_i32_0 : i32, i32
  }
  func.func @transform_15(%arg0: i32) -> (i32, i32, i32) {
    %c0_i32 = arith.constant 0 : i32
    %c0_i32_0 = arith.constant 0 : i32
    %c0_i32_1 = arith.constant 0 : i32
    return %arg0, %c0_i32, %c0_i32_0 : i32, i32, i32
  }
}

</mosaic_0001>

<bundles_post_ra>
// kernel: tile.27
= control target key start
LH: loop header
LB: loop body
LE: loop exit
PB: predicated region body
PF: predicated region fallthrough
CT: control target
= control target key end

     0   :  { %s22_s0 = inlined_call_operand.vmem [shape: f32[16], index: 0, kind: input, shape index: {}]   ;;  %s23_s1 = inlined_call_operand.vmem [shape: f32[8,16], index: 1, kind: output, shape index: {}]  }
   0x1   :  { %v4_v0 = vld [vmem:[%s22_s0] ss:$0 sm:$0xff] }
   0x2   :  { %5 = vst [vmem:[%s23_s1] sm:$0xff] %v4_v0 }

// kernel: tile.37
= control target key start
LH: loop header
LB: loop body
LE: loop exit
PB: predicated region body
PF: predicated region fallthrough
CT: control target
= control target key end

     0   :  { %s69_s10 = smov 112   ;;  %s70_s11 = smov 80   ;;  %vm3_vm0 = vcmask 130048   ;;  %vm9_vm1 = vcmask 1048448   ;;  %vm15_vm2 = vcmask 917248   ;;  %vm21_vm3 = vcmask 786048   ;;  %s113_s0 = inlined_call_operand.vmem [shape: f32[8,16], index: 0, kind: input, shape index: {}]   ;;  %s114_s1 = inlined_call_operand.vmem [shape: f32[1,128], index: 1, kind: output, shape index: {}]  }
   0x1   :  { %v55_v0 = vld [vmem:[%s113_s0 + $0x7] sm:$0x1]   ;;  %v57_v1 = vld [vmem:[%s113_s0 + $0x5] sm:$0x1]   ;;  %v56_v2 = vld [vmem:[%s113_s0 + $0x6] sm:$0x1]  }
   0x2   :  { %7 = vrot.lane.b32.xlu0 %v55_v0, %s69_s10  ;;  %19 = vrot.lane.b32.xlu1 %v57_v1, %s70_s11  ;;  %v58_v3 = vld [vmem:[%s113_s0 + $0x4] sm:$0x1]   ;;  %v2_v4 = vld [vmem:[%s113_s0] sm:$0x1]   ;;  %s71_s18 = smov 96   ;;  %s72_s19 = smov 64  }
   0x3   :  { %4 = vst.msk [vmem:[#allocation0] sm:$0x1] %vm3_vm0, %v2_v4   ;;  %v59_v5 = vld [vmem:[%s113_s0 + $0x3] sm:$0x1]   ;;  %v60_v6 = vld [vmem:[%s113_s0 + $0x2] sm:$0x1]  }
   0x4   :  { %s73_s24 = smov 48   ;;  %s74_s25 = smov 32   ;;  %v61_v7 = vld [vmem:[%s113_s0 + $0x1] sm:$0x1]   ;;  %vm27_vm4 = vcmask 654848   ;;  %vm33_vm5 = vcmask 523648  }
   0x5   :  { %s75_s0 = smov 16   ;;  %vm39_vm6 = vcmask 392448   ;;  %vm45_vm7 = vcmask 261248  }
   0x6   :  { %13 = vrot.lane.b32.xlu0 %v56_v2, %s71_s18  ;;  %25 = vrot.lane.b32.xlu1 %v58_v3, %s72_s19 }
   0xa   :  { %31 = vrot.lane.b32.xlu0 %v59_v5, %s73_s24  ;;  %37 = vrot.lane.b32.xlu1 %v60_v6, %s74_s25 }
   0xe   :  { %43 = vrot.lane.b32.xlu0 %v61_v7, %s75_s0 }
  0x74   :  { %v8_v8 = vpop.permute.xlu0 %7   ;;  %v20_v9 = vpop.permute.xlu1 %19  }
  0x75   :  { %10 = vst.msk [vmem:[#allocation0] sm:$0x1] %vm9_vm1, %v8_v8  }
  0x78   :  { %v14_v10 = vpop.permute.xlu0 %13   ;;  %v26_v11 = vpop.permute.xlu1 %25  }
  0x79   :  { %16 = vst.msk [vmem:[#allocation0] sm:$0x1] %vm15_vm2, %v14_v10  }
  0x7a   :  { %22 = vst.msk [vmem:[#allocation0] sm:$0x1] %vm21_vm3, %v20_v9  }
  0x7b   :  { %28 = vst.msk [vmem:[#allocation0] sm:$0x1] %vm27_vm4, %v26_v11  }
  0x7c   :  { %v32_v12 = vpop.permute.xlu0 %31   ;;  %v38_v13 = vpop.permute.xlu1 %37  }
  0x7d   :  { %34 = vst.msk [vmem:[#allocation0] sm:$0x1] %vm33_vm5, %v32_v12  }
  0x7e   :  { %40 = vst.msk [vmem:[#allocation0] sm:$0x1] %vm39_vm6, %v38_v13  }
  0x80   :  { %v44_v14 = vpop.permute.xlu0 %43  }
  0x81   :  { %46 = vst.msk [vmem:[#allocation0] sm:$0x1] %vm45_vm7, %v44_v14  }
  0x88   :  { %v51_v15 = vld [vmem:[#allocation0] sm:$0x1] }
  0x89   :  { %54 = vst [vmem:[%s114_s1] sm:$0x1] %v51_v15 }

// kernel: _forward_impl.1
= control target key start
LH: loop header
LB: loop body
LE: loop exit
PB: predicated region body
PF: predicated region fallthrough
CT: control target
= control target key end

     0   :  { %s3555_s18 = smov 0   ;;  %s4626_s0 = inlined_call_operand.vmem [shape: f32[2,16,128], index: 0, kind: input, shape index: {}]   ;;  %s4627_s1 = inlined_call_operand.vmem [shape: f32[128,8], index: 1, kind: input, shape index: {}]   ;;  %s4628_s2 = inlined_call_operand.vmem [shape: f32[8,128], index: 2, kind: input, shape index: {}]   ;;  %s4629_s3 = inlined_call_operand.vmem [shape: f32[4,128], index: 3, kind: input, shape index: {}]   ;;  %s4630_s4 = inlined_call_operand.vmem [shape: bf16[32,16], index: 4, kind: input, shape index: {}]   ;;  %s4631_s5 = inlined_call_operand.vmem [shape: bf16[16,144], index: 5, kind: input, shape index: {}]   ;;  %s4632_s6 = inlined_call_operand.vmem [shape: bf16[16,144], index: 6, kind: input, shape index: {}]   ;;  %s4633_s7 = inlined_call_operand.vmem [shape: bf16[16,16], index: 7, kind: input, shape index: {}]   ;;  %s4634_s8 = inlined_call_operand.vmem [shape: bf16[16,16], index: 8, kind: input, shape index: {}]   ;;  %s4635_s9 = inlined_call_operand.vmem [shape: bf16[16,16], index: 9, kind: input, shape index: {}]   ;;  %s4636_s10 = inlined_call_operand.vmem [shape: bf16[16,16], index: 10, kind: input, shape index: {}]   ;;  %s4637_s11 = inlined_call_operand.vmem [shape: f32[16,17], index: 11, kind: input, shape index: {}]   ;;  %s4638_s12 = inlined_call_operand.vmem [shape: bf16[64,16], index: 12, kind: input, shape index: {}]   ;;  %s4639_s13 = inlined_call_operand.vmem [shape: f32[64,1], index: 13, kind: input, shape index: {}]   ;;  %s4640_s14 = inlined_call_operand.vmem [shape: bf16[16,64], index: 14, kind: input, shape index: {}]   ;;  %s4641_s15 = inlined_call_operand.vmem [shape: f32[2,16,128], index: 15, kind: output, shape index: {}]  }
   0x1 LB: > { %s2919_s19 = sadd.s32 4294967295, %s3439_s18   ;;  %p2923_p0 = scmp.ge.s32.totalorder %s3439_s18, 1  ;;  %s3439_s18 = sphi %s3555_s18, %s25_s18  }
   0x2   : > { %p437_p1 = scmp.lt.s32.totalorder %s3439_s18, 3 }
   0x4   : > { %p438_p2 = pnand %p2923_p0, %p437_p1 }
   0x5   : > { %p485_p3 = scmp.lt.s32.totalorder (!%p438_p2), %s2919_s19, 1  ;;  %s3445_s24 = smov (!%p438_p2), 125  }
   0x6   : > { %441 = sbr.rel (%p438_p2) target bundleno = 4396 (0x112c), region = 80  ;;  %s3446_s25 = smov (!%p438_p2), 126  }
   0x7   : > { %s3447_s26 = smov (!%p438_p2), 80   ;;  %s4651_s27 = smov (!%p438_p2), 96  }
   0x8   : > { %s3449_s29 = smov (!%p438_p2), 127   ;;  %s4649_s30 = smov (!%p438_p2), 112  }
   0x9   : > { %s3451_s16 = smov (!%p438_p2), 1   ;;  %s4653_s17 = smov (!%p438_p2), 16  }
   0xa   : > { %s3453_s21 = smov (!%p438_p2), 2  }
   0xb   : > { %v513_v0 = vld [vmem:[%s4627_s1 + $0x78] sm:$0xff]  ;;  %v512_v1 = vld [vmem:[%s4627_s1 + $0x70] sm:$0xff]  ;;  %v511_v2 = vld [vmem:[%s4627_s1 + $0x68] sm:$0xff]  ;;  %s4702_s19 = smov (!%p485_p3, %s2919_s19), 1  ;;  %vm4642_vm0 = vcmask 64512   ;;  %vm4643_vm1 = vcmask 130048   ;;  %v518_v41 = vlaneseq }
   0xc   : > { %3066 = vmatprep.subr.mxu0 %v513_v0  ;;  %v510_v3 = vld [vmem:[%s4627_s1 + $0x60] sm:$0xff]  ;;  %s4646_s28 = sshll.u32 %s4702_s19, 4  ;;  %v509_v4 = vld [vmem:[%s4627_s1 + $0x58] sm:$0xff]  ;;  %v508_v5 = vld [vmem:[%s4627_s1 + $0x50] sm:$0xff]  ;;  %v4655_v27 = vmov 0  }
   0xd   : > { %3067 = vmatpush3.msra.mxu0 %v513_v0  ;;  %s3586_s20 = scalar_lea.vmem %s4626_s0, %s4646_s28  ;;  %v507_v7 = vld [vmem:[%s4627_s1 + $0x48] sm:$0xff]  ;;  %v506_v8 = vld [vmem:[%s4627_s1 + $0x40] sm:$0xff]  ;;  %v505_v9 = vld [vmem:[%s4627_s1 + $0x38] sm:$0xff]  ;;  %3270 = vset.pattern.permute.xlu0 %v4655_v27  ;;  %v3654_v42 = vshrl.u32 %v518_v41, 7  ;;  %s3459_s28 = smov 17  }
   0xe   : > { %3068 = vmatprep.subr.mxu0 %v512_v1  ;;  %v3592_v6 = vld [vmem:[%s3586_s20] sm:$0xff]  ;;  %v504_v10 = vld [vmem:[%s4627_s1 + $0x30] sm:$0xff]  ;;  %v503_v11 = vld [vmem:[%s4627_s1 + $0x28] sm:$0xff] }
   0xf   : > { %3069 = vmatpush3.msra.mxu0 %v512_v1  ;;  %3098 = vmatprep.mubr.f32.mxu0 %v3592_v6  ;;  %v502_v12 = vld [vmem:[%s4627_s1 + $0x20] sm:$0xff]  ;;  %v501_v13 = vld [vmem:[%s4627_s1 + $0x18] sm:$0xff]  ;;  %v500_v14 = vld [vmem:[%s4627_s1 + $0x10] sm:$0xff]  ;;  %v699_v18 = vmul.f32 %v3592_v6, %v3592_v6  ;;  %v900_v43 = vsub.s32 0, %v3654_v42  ;;  %v906_v47 = vsub.s32 1, %v3654_v42 }
  0x10   : > { %3070 = vmatprep.subr.mxu0 %v511_v2  ;;  %v499_v15 = vld [vmem:[%s4627_s1 + $0x8] sm:$0xff]  ;;  %v498_v16 = vld [vmem:[%s4627_s1] sm:$0xff] }
  0x11   : > { %3071 = vmatpush3.msra.mxu0 %v511_v2  ;;  %v497_v17 = vld [vmem:[%s3586_s20 + $0x8] sm:$0xff]  ;;  %v514_v20 = vld [vmem:[%s4628_s2] sm:$0xff] }
  0x12   : > { %3072 = vmatprep.subr.mxu0 %v510_v3  ;;  %v700_v19 = vmul.f32 %v497_v17, %v497_v17  ;;  %3104 = vmatprep.subr.mxu1 %v514_v20  ;;  %v3296_v25 = vld [vmem:[%s4630_s4] sm:$0xff]   ;;  %v3650_v28 = vld [vmem:[%s4637_s11 + $0x8] sm:$0xff] }
  0x13   : > { %3073 = vmatpush3.msra.mxu0 %v510_v3  ;;  %3105 = vmatpush3.msra.mxu1 %v514_v20  ;;  %v3642_v26 = vld [vmem:[%s4637_s11] sm:$0xff]  ;;  %v3297_v59 = vld [vmem:[%s4630_s4 + $0x8] sm:$0xff]  }
  0x14   : > { %3074 = vmatprep.subr.mxu0 %v509_v4  ;;  %983 = vperm.xlu0 %3270, %v3642_v26   ;;  %v515_v44 = vld [vmem:[%s4629_s3] sm:$0xf] }
  0x15   : > { %3075 = vmatpush3.msra.mxu0 %v509_v4  ;;  %v901_v46 = vrot.slane %v515_v44, %v900_v43  ;;  %v907_v54 = vrot.slane %v515_v44, %v906_v47 }
  0x16   : > { %3076 = vmatprep.subr.mxu0 %v508_v5 }
  0x17   : > { %3077 = vmatpush3.msra.mxu0 %v508_v5  ;;  %v3442_v5 = vmov 5  }
  0x18   : > { %3078 = vmatprep.subr.mxu0 %v507_v7  ;;  %988 = vperm.xlu0 %3270, %v3650_v28  }
  0x19   : > { %3079 = vmatpush3.msra.mxu0 %v507_v7  ;;  %3272 = vset.pattern.permute.xlu1 %v3442_v5 }
  0x1a   : > { %3080 = vmatprep.subr.mxu0 %v506_v8 }
  0x1b   : > { %3081 = vmatpush3.msra.mxu0 %v506_v8 }
  0x1c   : > { %3082 = vmatprep.subr.mxu0 %v505_v9  ;;  %3271 = vset.pattern.permute.xlu0 %v3442_v5 }
  0x1d   : > { %3083 = vmatpush3.msra.mxu0 %v505_v9  ;;  %1027 = vperm.xlu0 %3271, %v3642_v26  }
  0x1e   : > { %3084 = vmatprep.subr.mxu0 %v504_v10 }
  0x1f   : > { %3085 = vmatpush3.msra.mxu0 %v504_v10 }
  0x20   : > { %3086 = vmatprep.subr.mxu0 %v503_v11 }
  0x21   : > { %3087 = vmatpush3.msra.mxu0 %v503_v11 }
  0x22   : > { %3088 = vmatprep.subr.mxu0 %v502_v12 }
  0x23   : > { %3089 = vmatpush3.msra.mxu0 %v502_v12 }
  0x24   : > { %3090 = vmatprep.subr.mxu0 %v501_v13 }
  0x25   : > { %3091 = vmatpush3.msra.mxu0 %v501_v13 }
  0x26   : > { %3092 = vmatprep.subr.mxu0 %v500_v14 }
  0x27   : > { %3093 = vmatpush3.msra.mxu0 %v500_v14 }
  0x28   : > { %3094 = vmatprep.subr.mxu0 %v499_v15 }
  0x29   : > { %3095 = vmatpush3.msra.mxu0 %v499_v15 }
  0x2a   : > { %3096 = vmatprep.subr.mxu0 %v498_v16 }
  0x2b   : > { %3097 = vmatpush3.msra.mxu0 %v498_v16 }
  0x2c   : > { %3099 = vmatmul.mubr.f32.vlgmr.msra.gmra.mxu0 %v497_v17  ;;  %1461 = vmatprep.subr.bf16.mxu0 %v4655_v27 }
  0x2d   : > { %3101 = vmatprep.mubr.f32.mxu0 %v699_v18 }
  0x30   : > { %3102 = vmatmul.mubr.f32.gmra.mxu0 %v700_v19 }
  0x8f   : > { %v984_v60 = vpop.permute.xlu0 %983 }
  0x93   : > { %v989_v0 = vpop.permute.xlu0 %988 }
  0xec   : > { %v3100_v21 = vpop.f32.mrf.mxu0 }
  0xee   : > { %v767_v22 = vpop.f32.mrf.mxu0 }
  0xef   : > { %3106 = vmatprep.mubr.msk.f32.mxu1 %vm4642_vm0, %v767_v22 }
  0xf0   : > { %v3103_v23 = vpop.f32.mrf.mxu0  ;;  %3107 = vmatmul.mubr.msk.f32.vlgmr.msra.gmra.mxu1 %vm4642_vm0, %v3100_v21 }
  0xf2   : > { %v777_v24 = vpop.f32.mrf.mxu0 }
  0xf3   : > { %3109 = vmatprep.mubr.msk.f32.mxu1 %vm4642_vm0, %v777_v24 }
  0xf4   : > { %3110 = vmatmul.mubr.msk.f32.gmra.mxu1 %vm4642_vm0, %v3103_v23 }
  0xf5   : > { %3114 = vmatprep.mubr.msk.bf16.mxu1 %vm4643_vm1, %v3296_v25 }
 0x1b0   : > { %v3108_v29 = vpop.f32.mrf.mxu1 }
 0x1b1   : > { %v885_v31 = vmul.f32 %v3108_v29, %v3108_v29  ;;  %v891_v45 = vsub.f32 %v497_v17, %v3108_v29 }
 0x1b2   : > { %v865_v30 = vpop.f32.mrf.mxu1 }
 0x1b3   : > { %v884_v33 = vmul.f32 %v865_v30, %v865_v30  ;;  %v890_v49 = vsub.f32 %v3592_v6, %v865_v30  ;;  %v3443_v6 = vmov 6  }
 0x1b4   : > { %v3111_v32 = vpop.f32.mrf.mxu1  ;;  %3273 = vset.pattern.permute.xlu0 %v3443_v6 }
 0x1b5   : > { %v887_v34 = vsub.f32 %v3111_v32, %v885_v31  ;;  %1037 = vperm.xlu0 %3273, %v3642_v26  }
 0x1b6   : > { %v875_v35 = vpop.f32.mrf.mxu1 }
 0x1b7   : > { %v889_v36 = vmax.f32 %v887_v34, 0.0  ;;  %v886_v37 = vsub.f32 %v875_v35, %v884_v33  ;;  %v1028_v34 = vpop.permute.xlu0 %1027 }
 0x1b9   : > { %v893_v38 = vadd.f32 1e-05, %v889_v36  ;;  %v888_v39 = vmax.f32 %v886_v37, 0.0  ;;  %1041 = vperm.xlu0 %3273, %v3650_v28  }
 0x1bb   : > { %3313 = vrsqrt.f32 %v893_v38  ;;  %v892_v40 = vadd.f32 1e-05, %v888_v39 }
 0x1bd   : > { %3315 = vrsqrt.f32 %v892_v40 }
 0x1c8   : > { %v3314_v48 = vpop.eup %3313 }
 0x1c9   : > { %v897_v50 = vmul.f32 %v3314_v48, %v891_v45 }
 0x1ca   : > { %v3316_v51 = vpop.eup %3315 }
 0x1cb   : > { %v896_v52 = vmul.f32 %v3316_v51, %v890_v49  ;;  %v903_v53 = vmul.f32 %v901_v46, %v897_v50 }
 0x1cd   : > { %v902_v55 = vmul.f32 %v901_v46, %v896_v52  ;;  %v909_v57 = vadd.f32 %v907_v54, %v903_v53 }
 0x1cf   : > { %v908_v56 = vadd.f32 %v907_v54, %v902_v55 }
 0x1d1   : > { %v914_v58 = vpack.c.bf16 %v909_v57, %v908_v56 }
 0x1d3   : > { %3112 = vmatprep.subr.bf16.mxu1 %v914_v58 }
 0x1d4   : > { %3113 = vmatpush3.bf16.msra.mxu1 %v914_v58 }
 0x1d5   : > { %1287 = vmatprep.subr.bf16.mxu1 %v4655_v27 }
 0x1d7   : > { %3115 = vmatmul.mubr.msk.bf16.vlgmr.msra.gmra.mxu1 %vm4643_vm1, %v3297_v59 }
 0x230   : > { %v1038_v35 = vpop.permute.xlu0 %1037 }
 0x234   : > { %v1042_v44 = vpop.permute.xlu0 %1041 }
 0x297   : > { %v3667_v61 = vpop.f32.mrf.mxu1 }
 0x299   : > { %v966_v62 = vpop.f32.mrf.mxu1 }
 0x29a   : > { %v991_v2 = vadd.f32 %v984_v60, %v966_v62 }
 0x29b   : > { %v3669_v63 = vpop.f32.mrf.mxu1 }
 0x29d   : > { %v969_v1 = vpop.f32.mrf.mxu1 }
 0x29e   : > { %v992_v3 = vadd.f32 %v989_v0, %v969_v1 }
 0x2a0   : > { %v993_v4 = vadd.f32 %v992_v3, %v991_v2 }
 0x2a2   : > { %994 = vadd.xlane.f32.xlu1 %v993_v4 }
 0x32b   : > { %v995_v7 = vpop.xlane.xlu1 %994 }
 0x32c   : > { %v996_v8 = vrot.slane %v995_v7, 4 }
 0x32e   : > { %v997_v9 = vadd.f32 %v996_v8, %v995_v7 }
 0x330   : > { %v998_v10 = vrot.slane %v997_v9, 2 }
 0x332   : > { %v999_v11 = vadd.f32 %v998_v10, %v997_v9 }
 0x334   : > { %v1000_v12 = vrot.slane %v999_v11, 1 }
 0x336   : > { %v1001_v13 = vadd.f32 %v1000_v12, %v999_v11 }
 0x338   : > { %3212 = vpush %v1001_v13 }
 0x369   : > { %s3213_s22 = spop %3212 }
 0x36a   : > { %v1003_v14 = vstv %s3213_s22  ;;  %s4647_s22 = smov 32  }
 0x36b   : > { %v1005_v15 = vmul.f32 0.00048828125, %v1003_v14 }
 0x36d   : > { %v1006_v16 = vsub.f32 %v991_v2, %v1005_v15  ;;  %v1007_v17 = vsub.f32 %v992_v3, %v1005_v15 }
 0x36f   : > { %v1008_v18 = vmul.f32 %v1006_v16, %v1006_v16  ;;  %v1009_v19 = vmul.f32 %v1007_v17, %v1007_v17 }
 0x371   : > { %v1010_v20 = vadd.f32 %v1009_v19, %v1008_v18 }
 0x373   : > { %1011 = vadd.xlane.f32.xlu1 %v1010_v20 }
 0x384   : > { %1031 = vperm.xlu1 %3272, %v3650_v28  }
 0x3fc   : > { %v1012_v21 = vpop.xlane.xlu1 %1011 }
 0x3fd   : > { %v1013_v22 = vrot.slane %v1012_v21, 4 }
 0x3ff   : > { %v1014_v23 = vadd.f32 %v1013_v22, %v1012_v21 }
 0x400   : > { %v1032_v37 = vpop.permute.xlu1 %1031 }
 0x401   : > { %v1015_v24 = vrot.slane %v1014_v23, 2 }
 0x403   : > { %v1016_v25 = vadd.f32 %v1015_v24, %v1014_v23  ;;  %v4644_v24 = vmov 1.0  }
 0x405   : > { %v1017_v29 = vrot.slane %v1016_v25, 1 }
 0x407   : > { %v1018_v30 = vadd.f32 %v1017_v29, %v1016_v25 }
 0x409   : > { %3214 = vpush %v1018_v30 }
 0x43a   : > { %s3215_s23 = spop %3214 }
 0x43b   : > { %v1020_v31 = vstv %s3215_s23  ;;  %s3457_s23 = smov 113  }
 0x43c   : > { %v1021_v32 = vmul.f32 0.00048828125, %v1020_v31 }
 0x43e   : > { %v1022_v33 = vadd.f32 1e-05, %v1021_v32 }
 0x440   : > { %3317 = vrsqrt.f32 %v1022_v33 }
 0x44d   : > { %v3318_v36 = vpop.eup %3317 }
 0x44e   : > { %v1024_v38 = vmul.f32 %v3318_v36, %v1006_v16  ;;  %v1025_v39 = vmul.f32 %v3318_v36, %v1007_v17 }
 0x450   : > { %v1034_v40 = vmul.f32 %v1028_v34, %v1024_v38  ;;  %v1035_v43 = vmul.f32 %v1032_v37, %v1025_v39  ;;  %v519_v39 = vand.u32 127, %v518_v41 }
 0x452   : > { %v1044_v45 = vadd.f32 %v1038_v35, %v1034_v40  ;;  %v1045_v46 = vadd.f32 %v1042_v44, %v1035_v43  ;;  %vm520_vm4 = vcmp.ge.s32.totalorder %v519_v39, 16  ;;  %vm522_vm5 = vcmp.ge.s32.totalorder %v519_v39, 32 }
 0x453   : > { %v521_v40 = vsel %vm520_vm4, 1, %v4655_v27  ;;  %v523_v43 = vsel %vm522_vm5, 1, %v4655_v27  ;;  %vm525_vm6 = vcmp.ge.s32.totalorder %v519_v39, 48  ;;  %vm528_vm7 = vcmp.ge.s32.totalorder %v519_v39, 64 }
 0x454   : > { %v1048_v47 = vmul.f32 0.70710677, %v1044_v45  ;;  %v1049_v48 = vmul.f32 0.70710677, %v1045_v46  ;;  %v1046_v33 = vmul.f32 0.5, %v1044_v45  ;;  %v1047_v35 = vmul.f32 0.5, %v1045_v46 }
 0x455   : > { %v524_v44 = vadd.s32 %v523_v43, %v521_v40  ;;  %v526_v45 = vsel %vm525_vm6, 1, %v4655_v27  ;;  %v3455_v46 = vmov 2   ;;  %vm531_vm8 = vcmp.ge.s32.totalorder %v519_v39, 80 }
 0x456   : > { %v1054_v49 = vand.u32 2147483647, %v1048_v47  ;;  %v1055_v50 = vand.u32 2147483647, %v1049_v48  ;;  %vm1050_vm2 = vcmp.lt.f32.partialorder %v1048_v47, 0.0  ;;  %vm1051_vm3 = vcmp.lt.f32.partialorder %v1049_v48, 0.0  ;;  %3274 = vset.pattern.permute.xlu1 %v3455_v46  ;;  %3275 = vset.pattern.permute.xlu0 %v3455_v46 }
 0x457   : > { %v1052_v25 = vsel %vm1050_vm2, -1.0, %v4644_v24  ;;  %v1053_v31 = vsel %vm1051_vm3, -1.0, %v4644_v24  ;;  %v527_v47 = vadd.s32 %v526_v45, %v524_v44  ;;  %v529_v48 = vsel %vm528_vm7, 1, %v4655_v27 }
 0x458   : > { %v1056_v51 = vmul.f32 0.3275911, %v1054_v49  ;;  %v1057_v52 = vmul.f32 0.3275911, %v1055_v50  ;;  %v1082_v55 = vsub.f32 0.0, %v1054_v49  ;;  %v1083_v56 = vsub.f32 0.0, %v1055_v50 }
 0x459   : > { %v532_v41 = vsel %vm531_vm8, 1, %v4655_v27  ;;  %vm534_vm9 = vcmp.ge.s32.totalorder %v519_v39, 96  ;;  %vm537_vm10 = vcmp.ge.s32.totalorder %v519_v39, 112 }
 0x45a   : > { %v1058_v53 = vadd.f32 1.0, %v1056_v51  ;;  %v1059_v54 = vadd.f32 1.0, %v1057_v52  ;;  %v1084_v57 = vmul.f32 %v1082_v55, %v1054_v49  ;;  %v1085_v58 = vmul.f32 %v1083_v56, %v1055_v50 }
 0x45b   : > { %v530_v49 = vadd.s32 %v529_v48, %v527_v47  ;;  %v535_v51 = vsel %vm534_vm9, 1, %v4655_v27  ;;  %v3733_v56 = vadd.s32 8, %v3654_v42  ;;  %vm567_vm9 = vcmp.ge.s32.totalorder %v3654_v42, 3 }
 0x45c   : > { %3319 = vrcp.f32 %v1058_v53  ;;  %v1086_v0 = vmul.f32 1.442695, %v1084_v57  ;;  %v1088_v2 = vmul.f32 1.442695, %v1085_v58  ;;  %v538_v53 = vsel %vm537_vm10, 1, %v4655_v27 }
 0x45d   : > { %3321 = vrcp.f32 %v1059_v54  ;;  %v533_v50 = vadd.s32 %v532_v41, %v530_v49  ;;  %vm612_vm11 = vcmp.ge.s32.totalorder %v3733_v56, 9  ;;  %vm614_vm12 = vcmp.lt.s32.totalorder %v3733_v56, 12 }
 0x45e   : > { %3323 = vpow2.f32 %v1086_v0  ;;  %vm616_vm5 = vmand %vm612_vm11, %vm614_vm12  ;;  %vm569_vm10 = vcmp.lt.s32.totalorder %v3654_v42, 6 }
 0x45f   : > { %3325 = vpow2.f32 %v1088_v2  ;;  %v536_v52 = vadd.s32 %v535_v51, %v533_v50 }
 0x461   : > { %v3729_v54 = vadd.s32 %v538_v53, %v536_v52 }
 0x463   : > { %v540_v55 = vmul.u32 16, %v3729_v54  ;;  %v561_v0 = vadd.s32 3, %v3729_v54  ;;  %vm626_vm15 = vcmp.ge.s32.totalorder %v3729_v54, 0  ;;  %vm627_vm2 = vcmp.lt.s32.totalorder %v3729_v54, 8 }
 0x464   : > { %v583_v2 = vadd.s32 2, %v3729_v54  ;;  %vm3762_vm0 = vmand %vm626_vm15, %vm627_vm2  ;;  %v647_v44 = vadd.s32 4294967295, %v3729_v54 }
 0x465   : > { %v3735_v57 = vsub.s32 %v519_v39, %v540_v55  ;;  %vm562_vm11 = vcmp.ge.s32.totalorder %v561_v0, 0  ;;  %vm563_vm12 = vcmp.lt.s32.totalorder %v561_v0, 8 }
 0x466   : > { %vm584_vm15 = vcmp.ge.s32.totalorder %v583_v2, 0  ;;  %vm585_vm2 = vcmp.lt.s32.totalorder %v583_v2, 8 }
 0x467   : > { %v555_v58 = vadd.s32 3, %v3735_v57  ;;  %vm621_vm13 = vcmp.ge.s32.totalorder %v3735_v57, 0  ;;  %vm622_vm14 = vcmp.lt.s32.totalorder %v3735_v57, 16  ;;  %v663_v48 = vadd.s32 4294967294, %v3735_v57 }
 0x468   : > { %vm3756_vm8 = vmand %vm621_vm13, %vm622_vm14  ;;  %vm547_vm13 = vcmp.lt.s32.totalorder %v3654_v42, 3 }
 0x469   : > { %v3320_v59 = vpop.eup %3319  ;;  %vm556_vm3 = vcmp.ge.s32.totalorder %v555_v58, 0  ;;  %vm557_vm4 = vcmp.lt.s32.totalorder %v555_v58, 16 }
 0x46a   : > { %v3322_v60 = vpop.eup %3321  ;;  %v1064_v62 = vmul.f32 1.0614054, %v3320_v59  ;;  %vm3766_vm1 = vmand %vm556_vm3, %vm557_vm4 }
 0x46b   : > { %v1065_v1 = vmul.f32 1.0614054, %v3322_v60  ;;  %v3324_v18 = vpop.eup %3323  ;;  %vm3781_vm3 = vmand %vm567_vm9, %vm569_vm10 }
 0x46c   : > { %v1066_v3 = vadd.f32 -1.4531521, %v1064_v62  ;;  %v3326_v20 = vpop.eup %3325  ;;  %v577_v62 = vadd.s32 2, %v3735_v57 }
 0x46d   : > { %v1067_v4 = vadd.f32 -1.4531521, %v1065_v1 }
 0x46e   : > { %v1068_v5 = vmul.f32 %v3320_v59, %v1066_v3  ;;  %vm578_vm6 = vcmp.ge.s32.totalorder %v577_v62, 0  ;;  %vm579_vm7 = vcmp.lt.s32.totalorder %v577_v62, 16 }
 0x46f   : > { %v1069_v6 = vmul.f32 %v3322_v60, %v1067_v4  ;;  %v599_v4 = vadd.s32 1, %v3735_v57  ;;  %vm3772_vm14 = vmand %vm578_vm6, %vm579_vm7 }
 0x470   : > { %v1070_v7 = vadd.f32 1.4214138, %v1068_v5  ;;  %vm3796_vm6 = vmand %vm562_vm11, %vm563_vm12  ;;  %vm592_vm12 = vcmp.lt.s32.totalorder %v3733_v56, 9 }
 0x471   : > { %v1071_v8 = vadd.f32 1.4214138, %v1069_v6  ;;  %vm600_vm4 = vcmp.ge.s32.totalorder %v599_v4, 0  ;;  %vm3801_vm7 = vmand %vm584_vm15, %vm585_vm2  ;;  %vm632_vm2 = vcmp.ge.s32.totalorder %v3733_v56, 12 }
 0x472   : > { %v1072_v9 = vmul.f32 %v3320_v59, %v1070_v7  ;;  %v669_v7 = vadd.s32 4294967294, %v3729_v54 }
 0x473   : > { %v1073_v10 = vmul.f32 %v3322_v60, %v1071_v8  ;;  %v3456_v8 = vmov 0.0  }
 0x474   : > { %v1074_v11 = vadd.f32 -0.28449672, %v1072_v9  ;;  %v2938_v9 = vsel %vm616_vm5, 1.0, %v3456_v8  ;;  %vm601_vm5 = vcmp.lt.s32.totalorder %v599_v4, 16  ;;  %v2930_v39 = vsel %vm3796_vm6, 1.0, %v3456_v8 }
 0x475   : > { %v1075_v12 = vadd.f32 -0.28449672, %v1073_v10  ;;  %vm3809_vm9 = vmand %vm600_vm4, %vm601_vm5  ;;  %v2933_v40 = vsel %vm3801_vm7, 1.0, %v3456_v8  ;;  %v2935_v41 = vsel %vm592_vm12, 1.0, %v3456_v8  ;;  %v3857_v52 = vmul.f32 0.0, %v2930_v39 }
 0x476   : > { %v1076_v13 = vmul.f32 %v3320_v59, %v1074_v11  ;;  %v2936_v43 = vsel %vm3809_vm9, 1.0, %v3456_v8  ;;  %v3861_v55 = vmul.f32 0.0, %v2933_v40  ;;  %vm648_vm5 = vcmp.ge.s32.totalorder %v647_v44, 0 }
 0x477   : > { %v1077_v14 = vmul.f32 %v3322_v60, %v1075_v12  ;;  %v2939_v12 = vsel %vm3756_vm8, 1.0, %v3456_v8  ;;  %vm649_vm6 = vcmp.lt.s32.totalorder %v647_v44, 8  ;;  %v3872_v0 = vmul.f32 %v2936_v43, %v2935_v41 }
 0x478   : > { %v1078_v15 = vadd.f32 0.2548296, %v1076_v13  ;;  %vm654_vm12 = vcmp.ge.s32.totalorder %v3733_v56, 15 }
 0x479   : > { %v1079_v16 = vadd.f32 0.2548296, %v1077_v14 }
 0x47a   : > { %v1080_v17 = vmul.f32 %v3320_v59, %v1078_v15  ;;  %v605_v15 = vadd.s32 1, %v3729_v54 }
 0x47b   : > { %v1081_v19 = vmul.f32 %v3322_v60, %v1079_v16  ;;  %v2940_v16 = vsel %vm3762_vm0, 1.0, %v3456_v8 }
 0x47c   : > { %v1090_v21 = vmul.f32 %v3324_v18, %v1080_v17  ;;  %v2929_v17 = vsel %vm3766_vm1, 1.0, %v3456_v8  ;;  %vm589_vm1 = vcmp.ge.s32.totalorder %v3654_v42, 6  ;;  %vm606_vm10 = vcmp.ge.s32.totalorder %v605_v15, 0 }
 0x47d   : > { %v1091_v22 = vmul.f32 %v3326_v20, %v1081_v19  ;;  %v2928_v19 = vsel %vm547_vm13, 1.0, %v3456_v8  ;;  %vm607_vm11 = vcmp.lt.s32.totalorder %v605_v15, 8  ;;  %v2934_v45 = vsel %vm589_vm1, 1.0, %v3456_v8 }
 0x47e   : > { %v1092_v23 = vsub.f32 1.0, %v1090_v21  ;;  %v3805_v21 = vmul.f32 %v2939_v12, %v2938_v9  ;;  %vm3845_vm13 = vmand %vm606_vm10, %vm607_vm11  ;;  %v3859_v53 = vmul.f32 %v2930_v39, %v2928_v19  ;;  %v3863_v58 = vmul.f32 %v2936_v43, %v2934_v45 }
 0x47f   : > { %v1093_v29 = vsub.f32 1.0, %v1091_v22  ;;  %vm664_vm1 = vcmp.ge.s32.totalorder %v663_v48, 0  ;;  %vm665_vm10 = vcmp.lt.s32.totalorder %v663_v48, 16  ;;  %vm3898_vm11 = vmand %vm648_vm5, %vm649_vm6  ;;  %vm4681_vm5 = vcmask 130048  }
 0x480   : > { %v1094_v30 = vmul.f32 %v1092_v23, %v1052_v25  ;;  %v641_v25 = vadd.s32 4294967295, %v3735_v57  ;;  %v2937_v57 = vsel %vm3845_vm13, 1.0, %v3456_v8  ;;  %v2943_v44 = vsel %vm3898_vm11, 1.0, %v3456_v8  ;;  %vm4682_vm6 = vmmov %vm4681_vm5 }
 0x481   : > { %v1095_v32 = vmul.f32 %v1093_v29, %v1053_v31  ;;  %v3814_v29 = vmul.f32 0.0, %v2939_v12  ;;  %v3818_v31 = vmul.f32 0.0, %v2940_v16  ;;  %v3891_v18 = vmul.f32 %v2937_v57, %v2934_v45 }
 0x482   : > { %v1096_v34 = vadd.f32 1.0, %v1094_v30  ;;  %v3816_v30 = vmul.f32 %v2940_v16, %v2938_v9  ;;  %vm643_vm15 = vcmp.lt.s32.totalorder %v641_v25, 16 }
 0x483   : > { %v1097_v36 = vadd.f32 1.0, %v1095_v32  ;;  %v3820_v32 = vmul.f32 0.0, %v2929_v17 }
 0x484   : > { %v3677_v37 = vmul.f32 %v1096_v34, %v1046_v33  ;;  %v3825_v34 = vmul.f32 %v2929_v17, %v2928_v19  ;;  %v3889_v17 = vmul.f32 %v2937_v57, %v2935_v41  ;;  %v2944_v57 = vsel %vm654_vm12, 1.0, %v3456_v8 }
 0x485   : > { %v3679_v38 = vmul.f32 %v1097_v36, %v1047_v35  ;;  %v2932_v35 = vsel %vm3772_vm14, 1.0, %v3456_v8  ;;  %v2931_v36 = vsel %vm3781_vm3, 1.0, %v3456_v8  ;;  %vm642_vm14 = vcmp.ge.s32.totalorder %v641_v25, 0 }
 0x486   : > { %1100 = vrot.lane.b32.xlu1 %v3677_v37, %s3445_s24  ;;  %v3850_v49 = vmul.f32 %v2932_v35, %v2931_v36  ;;  %vm634_vm3 = vcmp.lt.s32.totalorder %v3733_v56, 15  ;;  %v3855_v51 = vmul.f32 0.0, %v2932_v35  ;;  %vm3868_vm4 = vmand %vm642_vm14, %vm643_vm15  ;;  %v3881_v10 = vmul.f32 %v2933_v40, %v2931_v36 }
 0x487   : > { %1102 = vrot.lane.b32.xlu0 %v3679_v38, %s3445_s24  ;;  %vm3874_vm7 = vmand %vm632_vm2, %vm634_vm3  ;;  %v1131_v13 = vmul.f32 %v3805_v21, %v3679_v38  ;;  %v1130_v15 = vmul.f32 %v3814_v29, %v3677_v37  ;;  %v2942_v54 = vsel %vm3868_vm4, 1.0, %v3456_v8  ;;  %vm670_vm15 = vcmp.ge.s32.totalorder %v669_v7, 0 }
 0x488   : > { %vm666_vm14 = vmand %vm664_vm1, %vm665_vm10  ;;  %vm671_vm2 = vcmp.lt.s32.totalorder %v669_v7, 8  ;;  %v3916_v43 = vmul.f32 0.0, %v2942_v54 }
 0x489   : > { %v2945_v48 = vsel %vm666_vm14, 1.0, %v3456_v8  ;;  %vm672_vm3 = vmand %vm670_vm15, %vm671_vm2 }
 0x48a   : > { %1108 = vrot.lane.b32.xlu1 %v3677_v37, %s3446_s25  ;;  %vm690_vm1 = vmand %vm3845_vm13, %vm3868_vm4 }
 0x48b   : > { %1110 = vrot.lane.b32.xlu0 %v3679_v38, %s3446_s25  ;;  %vm687_vm10 = vmand %vm3762_vm0, %vm3809_vm9 }
 0x48c   : > { %vm684_vm12 = vmand %vm3762_vm0, %vm3868_vm4 }
 0x48d   : > { %vm681_vm0 = vmand %vm3898_vm11, %vm3809_vm9 }
 0x48e   : > { %1154 = vrot.lane.b32.xlu1 %v3677_v37, %s3447_s26  ;;  %vm678_vm14 = vmand %vm3898_vm11, %vm3756_vm8 }
 0x48f   : > { %1156 = vrot.lane.b32.xlu0 %v3679_v38, %s3447_s26 }
 0x492   : > { %1162 = vrot.lane.b32.xlu1 %v3677_v37, %s4651_s27 }
 0x493   : > { %1164 = vrot.lane.b32.xlu0 %v3679_v38, %s4651_s27 }
 0x496   : > { %1118 = vrot.lane.b32.xlu1 %v3677_v37, %s3449_s29 }
 0x497   : > { %1120 = vrot.lane.b32.xlu0 %v3679_v38, %s3449_s29 }
 0x49a   : > { %1172 = vrot.lane.b32.xlu1 %v3677_v37, %s4649_s30 }
 0x49b   : > { %1174 = vrot.lane.b32.xlu0 %v3679_v38, %s4649_s30 }
 0x49e   : > { %1134 = vrot.lane.b32.xlu1 %v3677_v37, %s3451_s16 }
 0x49f   : > { %1136 = vrot.lane.b32.xlu0 %v3679_v38, %s3451_s16 }
 0x4a2   : > { %1188 = vrot.lane.b32.xlu1 %v3677_v37, %s4653_s17 }
 0x4a3   : > { %1190 = vrot.lane.b32.xlu0 %v3679_v38, %s4653_s17 }
 0x4a6   : > { %1144 = vrot.lane.b32.xlu1 %v3677_v37, %s3453_s21 }
 0x4a7   : > { %1146 = vrot.lane.b32.xlu0 %v3679_v38, %s3453_s21 }
 0x4aa   : > { %1198 = vrot.lane.b32.xlu1 %v3677_v37, %s4647_s22 }
 0x4ab   : > { %1200 = vrot.lane.b32.xlu0 %v3679_v38, %s4647_s22 }
 0x4f8   : > { %v3738_v59 = vpop.permute.xlu1 %1100 }
 0x4f9   : > { %v3740_v60 = vpop.permute.xlu0 %1102  ;;  %v1106_v19 = vmul.f32 %v3825_v34, %v3738_v59 }
 0x4fa   : > { %v1107_v25 = vmul.f32 %v3820_v32, %v3740_v60 }
 0x4fc   : > { %v3750_v1 = vpop.permute.xlu1 %1108 }
 0x4fd   : > { %v3753_v3 = vpop.permute.xlu0 %1110  ;;  %v1114_v9 = vmul.f32 %v3850_v49, %v3750_v1 }
 0x4fe   : > { %v1115_v16 = vmul.f32 %v3855_v51, %v3753_v3  ;;  %v2941_v3 = vsel %vm3874_vm7, 1.0, %v3456_v8  ;;  %vm693_vm7 = vmand %vm3845_vm13, %vm3756_vm8 }
 0x4ff   : > { %v1116_v59 = vadd.f32 %v1114_v9, %v1106_v19  ;;  %vm675_vm8 = vmand %vm3898_vm11, %vm3868_vm4 }
 0x500   : > { %v3776_v11 = vpop.permute.xlu1 %1154  ;;  %v1117_v45 = vadd.f32 %v1115_v16, %v1107_v25  ;;  %v3936_v16 = vmul.f32 %v2943_v44, %v2941_v3  ;;  %v3941_v25 = vmul.f32 0.0, %v2945_v48  ;;  %vm696_vm4 = vmand %vm3845_vm13, %vm3809_vm9 }
 0x501   : > { %v3785_v14 = vpop.permute.xlu0 %1156  ;;  %v1160_v41 = vmul.f32 %v3859_v53, %v3776_v11 }
 0x502   : > { %v1161_v4 = vmul.f32 %v3857_v52, %v3785_v14  ;;  %v2946_v14 = vsel %vm672_vm3, 1.0, %v3456_v8 }
 0x504   : > { %v3807_v22 = vpop.permute.xlu1 %1162 }
 0x505   : > { %v3822_v33 = vpop.permute.xlu0 %1164  ;;  %v1168_v39 = vmul.f32 %v3881_v10, %v3807_v22 }
 0x506   : > { %v1169_v60 = vmul.f32 %v3861_v55, %v3822_v33 }
 0x507   : > { %v1170_v19 = vadd.f32 %v1168_v39, %v1160_v41  ;;  %v1185_v39 = vmul.f32 %v3816_v30, %v3679_v38 }
 0x508   : > { %v1119_v46 = vpop.permute.xlu1 %1118  ;;  %v1171_v56 = vadd.f32 %v1169_v60, %v1161_v4 }
 0x509   : > { %v1121_v50 = vpop.permute.xlu0 %1120  ;;  %v1124_v20 = vmul.f32 %v3863_v58, %v1119_v46  ;;  %v3923_v46 = vmul.f32 %v2942_v54, %v2941_v3 }
 0x50a   : > { %v1125_v35 = vmul.f32 %v3872_v0, %v1121_v50 }
 0x50b   : > { %v1126_v50 = vadd.f32 %v1124_v20, %v1116_v59  ;;  %v3944_v59 = vmul.f32 %v2945_v48, %v2944_v57  ;;  %v3953_v48 = vmul.f32 0.0, %v2946_v14 }
 0x50c   : > { %v1173_v2 = vpop.permute.xlu1 %1172  ;;  %v1127_v33 = vadd.f32 %v1125_v35, %v1117_v45 }
 0x50d   : > { %v1175_v12 = vpop.permute.xlu0 %1174  ;;  %v1178_v22 = vmul.f32 %v3891_v18, %v1173_v2  ;;  %v3939_v2 = vmul.f32 0.0, %v2943_v44 }
 0x50e   : > { %v1179_v9 = vmul.f32 %v3889_v17, %v1175_v12  ;;  %v1132_v12 = vadd.f32 %v1130_v15, %v1126_v50  ;;  %v1133_v45 = vadd.f32 %v1131_v13, %v1127_v33  ;;  %v3957_v50 = vmul.f32 %v2946_v14, %v2944_v57 }
 0x50f   : > { %v1180_v35 = vadd.f32 %v1178_v22, %v1170_v19 }
 0x510   : > { %v1135_v36 = vpop.permute.xlu1 %1134  ;;  %v1181_v3 = vadd.f32 %v1179_v9, %v1171_v56 }
 0x511   : > { %v1137_v40 = vpop.permute.xlu0 %1136  ;;  %v1140_v11 = vmul.f32 %v3916_v43, %v1135_v36  ;;  %v1184_v36 = vmul.f32 %v3818_v31, %v3677_v37 }
 0x512   : > { %v1141_v7 = vmul.f32 %v3923_v46, %v1137_v40  ;;  %v1187_v37 = vadd.f32 %v1185_v39, %v1181_v3  ;;  %v3461_v3 = vmov 3   ;;  %v2953_v39 = vsel %vm693_vm7, 1.0, %v3456_v8  ;;  %vm4688_vm7 = vmmov %vm4682_vm6 }
 0x513   : > { %v1142_v41 = vadd.f32 %v1140_v11, %v1132_v12  ;;  %v1186_v38 = vadd.f32 %v1184_v36, %v1180_v35  ;;  %v3298_v35 = vld [vmem:[%s4631_s5 + $0x4] ss:$8 sps:$4 sm:$0xff]  }
 0x514   : > { %v1189_v54 = vpop.permute.xlu1 %1188  ;;  %v1143_v24 = vadd.f32 %v1141_v7, %v1133_v45  ;;  %2965 = vmatprep.mubr.msk.bf16.mxu1 %vm4681_vm5, %v3298_v35  ;;  %v3303_v12 = vld [vmem:[%s4632_s6 + $0x4] ss:$8 sps:$4 sm:$0xff]   ;;  %v3462_v45 = vmov 1   ;;  %vm3467_vm5 = vmmov 0  }
 0x515   : > { %v1191_v20 = vpop.permute.xlu0 %1190  ;;  %v1194_v60 = vmul.f32 %v3939_v2, %v1189_v54  ;;  %2968 = vmatprep.mubr.msk.bf16.mxu0 %vm4682_vm6, %v3303_v12 }
 0x516   : > { %v1195_v15 = vmul.f32 %v3936_v16, %v1191_v20 }
 0x517   : > { %v1196_v54 = vadd.f32 %v1194_v60, %v1186_v38 }
 0x518   : > { %v1145_v44 = vpop.permute.xlu1 %1144  ;;  %v1197_v56 = vadd.f32 %v1195_v15, %v1187_v37 }
 0x519   : > { %v1147_v4 = vpop.permute.xlu0 %1146  ;;  %v1150_v40 = vmul.f32 %v3941_v25, %v1145_v44 }
 0x51a   : > { %v1151_v13 = vmul.f32 %v3944_v59, %v1147_v4 }
 0x51b   : > { %v3959_v22 = vadd.f32 %v1150_v40, %v1142_v41 }
 0x51c   : > { %v3961_v33 = vadd.f32 %v1151_v13, %v1143_v24  ;;  %v1199_v9 = vpop.permute.xlu1 %1198  ;;  %v2952_v13 = vsel %vm690_vm1, 1.0, %v3456_v8  ;;  %vm4689_vm1 = vmmov %vm4682_vm6 }
 0x51d   : > { %v1201_v19 = vpop.permute.xlu0 %1200  ;;  %v1204_v11 = vmul.f32 %v3953_v48, %v1199_v9  ;;  %1251 = vrot.lane.b32.xlu1 %v3959_v22, %s4649_s30 }
 0x51e   : > { %v1205_v20 = vmul.f32 %v3957_v50, %v1201_v19  ;;  %1253 = vrot.lane.b32.xlu0 %v3961_v33, %s4649_s30  ;;  %v1236_v57 = vpack.c.bf16 %v3961_v33, %v3959_v22 }
 0x51f   : > { %v3971_v7 = vadd.f32 %v1204_v11, %v1196_v54 }
 0x520   : > { %v3973_v24 = vadd.f32 %v1205_v20, %v1197_v56 }
 0x521   : > { %1425 = vrot.lane.b32.xlu1 %v3971_v7, %s4649_s30 }
 0x522   : > { %1427 = vrot.lane.b32.xlu0 %v3973_v24, %s4649_s30  ;;  %v1410_v14 = vpack.c.bf16 %v3973_v24, %v3971_v7 }
 0x525   : > { %1244 = vrot.lane.b32.xlu1 %v3959_v22, %s3457_s23 }
 0x526   : > { %1246 = vrot.lane.b32.xlu0 %v3961_v33, %s3457_s23 }
 0x529   : > { %1418 = vrot.lane.b32.xlu1 %v3971_v7, %s3457_s23 }
 0x52a   : > { %1420 = vrot.lane.b32.xlu0 %v3973_v24, %s3457_s23  ;;  %s3458_s23 = smov 15  }
 0x52d   : > { %1237 = vrot.lane.b32.xlu1 %v3959_v22, %s3449_s29 }
 0x52e   : > { %1239 = vrot.lane.b32.xlu0 %v3961_v33, %s3449_s29 }
 0x531   : > { %1411 = vrot.lane.b32.xlu1 %v3971_v7, %s3449_s29 }
 0x532   : > { %1413 = vrot.lane.b32.xlu0 %v3973_v24, %s3449_s29 }
 0x535   : > { %1229 = vrot.lane.b32.xlu1 %v3959_v22, %s3451_s16 }
 0x536   : > { %1231 = vrot.lane.b32.xlu0 %v3961_v33, %s3451_s16 }
 0x539   : > { %1403 = vrot.lane.b32.xlu1 %v3971_v7, %s3451_s16 }
 0x53a   : > { %1405 = vrot.lane.b32.xlu0 %v3973_v24, %s3451_s16 }
 0x53d   : > { %1222 = vrot.lane.b32.xlu1 %v3959_v22, %s3458_s23 }
 0x53e   : > { %1224 = vrot.lane.b32.xlu0 %v3961_v33, %s3458_s23 }
 0x541   : > { %1396 = vrot.lane.b32.xlu1 %v3971_v7, %s3458_s23 }
 0x542   : > { %1398 = vrot.lane.b32.xlu0 %v3973_v24, %s3458_s23 }
 0x545   : > { %1215 = vrot.lane.b32.xlu1 %v3959_v22, %s4653_s17 }
 0x546   : > { %1217 = vrot.lane.b32.xlu0 %v3961_v33, %s4653_s17 }
 0x549   : > { %1389 = vrot.lane.b32.xlu1 %v3971_v7, %s4653_s17 }
 0x54a   : > { %1391 = vrot.lane.b32.xlu0 %v3973_v24, %s4653_s17  ;;  %s3460_s17 = smov 111  }
 0x54d   : > { %1208 = vrot.lane.b32.xlu1 %v3959_v22, %s3459_s28 }
 0x54e   : > { %1210 = vrot.lane.b32.xlu0 %v3961_v33, %s3459_s28 }
 0x551   : > { %1382 = vrot.lane.b32.xlu1 %v3971_v7, %s3459_s28 }
 0x552   : > { %1384 = vrot.lane.b32.xlu0 %v3973_v24, %s3459_s28 }
 0x555   : > { %1258 = vrot.lane.b32.xlu1 %v3959_v22, %s3460_s17  ;;  %v2949_v22 = vsel %vm681_vm0, 1.0, %v3456_v8 }
 0x556   : > { %1260 = vrot.lane.b32.xlu0 %v3961_v33, %s3460_s17 }
 0x559   : > { %1432 = vrot.lane.b32.xlu1 %v3971_v7, %s3460_s17 }
 0x55a   : > { %1434 = vrot.lane.b32.xlu0 %v3973_v24, %s3460_s17 }
 0x55d   : > { %1268 = vperm.xlu1 %3274, %v3642_v26  }
 0x55e   : > { %1272 = vperm.xlu0 %3275, %v3650_v28  }
 0x561   : > { %3276 = vset.pattern.permute.xlu1 %v3461_v3  ;;  %v2951_v3 = vsel %vm687_vm10, 1.0, %v3456_v8 }
 0x562   : > { %1442 = vperm.xlu1 %3276, %v3642_v26  }
 0x566   : > { %1446 = vperm.xlu1 %3276, %v3650_v28  }
 0x56a   : > { %3277 = vset.pattern.permute.xlu1 %v3462_v45 }
 0x56b   : > { %1671 = vperm.xlu1 %3277, %v3642_v26  }
 0x56f   : > { %1675 = vperm.xlu1 %3277, %v3650_v28  }
 0x58f   : > { %v1252_v36 = vpop.permute.xlu1 %1251 }
 0x590   : > { %v1254_v44 = vpop.permute.xlu0 %1253  ;;  %v1255_v41 = vmul.f32 %v2953_v39, %v1252_v36 }
 0x591   : > { %v1256_v60 = vmul.f32 %v2953_v39, %v1254_v44 }
 0x593   : > { %v1257_v4 = vpack.c.bf16 %v1256_v60, %v1255_v41  ;;  %v1426_v26 = vpop.permute.xlu1 %1425 }
 0x594   : > { %v1428_v40 = vpop.permute.xlu0 %1427  ;;  %v1429_v28 = vmul.f32 %v2953_v39, %v1426_v26 }
 0x595   : > { %v1430_v15 = vmul.f32 %v2953_v39, %v1428_v40  ;;  %1288 = vmatpush1.bf16.msra.mxu1 %v1257_v4 }
 0x596   : > { %1289 = vmatprep.subr.bf16.mxu1 %v4655_v27 }
 0x597   : > { %v1431_v38 = vpack.c.bf16 %v1430_v15, %v1429_v28  ;;  %v1245_v37 = vpop.permute.xlu1 %1244  ;;  %v2950_v15 = vsel %vm684_vm12, 1.0, %v3456_v8 }
 0x598   : > { %v1247_v9 = vpop.permute.xlu0 %1246  ;;  %v1248_v54 = vmul.f32 %v2952_v13, %v1245_v37 }
 0x599   : > { %v1249_v19 = vmul.f32 %v2952_v13, %v1247_v9  ;;  %1462 = vmatpush1.bf16.msra.mxu0 %v1431_v38 }
 0x59a   : > { %1463 = vmatprep.subr.bf16.mxu0 %v4655_v27 }
 0x59b   : > { %v1250_v11 = vpack.c.bf16 %v1249_v19, %v1248_v54  ;;  %v1419_v56 = vpop.permute.xlu1 %1418 }
 0x59c   : > { %v1421_v20 = vpop.permute.xlu0 %1420  ;;  %v1422_v35 = vmul.f32 %v2952_v13, %v1419_v56 }
 0x59d   : > { %v1423_v12 = vmul.f32 %v2952_v13, %v1421_v20  ;;  %1290 = vmatpush1.bf16.msra.mxu1 %v1250_v11 }
 0x59e   : > { %1291 = vmatprep.subr.bf16.mxu1 %v4655_v27 }
 0x59f   : > { %v1424_v45 = vpack.c.bf16 %v1423_v12, %v1422_v35  ;;  %v1238_v39 = vpop.permute.xlu1 %1237 }
 0x5a0   : > { %v1240_v36 = vpop.permute.xlu0 %1239  ;;  %v1241_v44 = vmul.f32 %v2951_v3, %v1238_v39 }
 0x5a1   : > { %v1242_v41 = vmul.f32 %v2951_v3, %v1240_v36  ;;  %1464 = vmatpush1.bf16.msra.mxu0 %v1424_v45  ;;  %v2948_v36 = vsel %vm678_vm14, 1.0, %v3456_v8 }
 0x5a2   : > { %1465 = vmatprep.subr.bf16.mxu0 %v4655_v27 }
 0x5a3   : > { %v1243_v60 = vpack.c.bf16 %v1242_v41, %v1241_v44  ;;  %v1412_v4 = vpop.permute.xlu1 %1411 }
 0x5a4   : > { %v1414_v26 = vpop.permute.xlu0 %1413  ;;  %v1415_v40 = vmul.f32 %v2951_v3, %v1412_v4 }
 0x5a5   : > { %v1416_v28 = vmul.f32 %v2951_v3, %v1414_v26  ;;  %1292 = vmatpush1.bf16.msra.mxu1 %v1243_v60 }
 0x5a6   : > { %1293 = vmatprep.subr.bf16.mxu1 %v4655_v27 }
 0x5a7   : > { %v1417_v13 = vpack.c.bf16 %v1416_v28, %v1415_v40  ;;  %v1230_v38 = vpop.permute.xlu1 %1229 }
 0x5a8   : > { %v1232_v37 = vpop.permute.xlu0 %1231  ;;  %v1233_v9 = vmul.f32 %v2950_v15, %v1230_v38  ;;  %v2947_v38 = vsel %vm675_vm8, 1.0, %v3456_v8  ;;  %vm4691_vm8 = vmmov %vm4689_vm1 }
 0x5a9   : > { %v1234_v54 = vmul.f32 %v2950_v15, %v1232_v37  ;;  %1294 = vmatpush1.bf16.msra.mxu1 %v1236_v57  ;;  %1466 = vmatpush1.bf16.msra.mxu0 %v1417_v13 }
 0x5aa   : > { %1295 = vmatprep.subr.bf16.mxu1 %v4655_v27  ;;  %1467 = vmatprep.subr.bf16.mxu0 %v4655_v27 }
 0x5ab   : > { %v1235_v6 = vpack.c.bf16 %v1234_v54, %v1233_v9  ;;  %v1404_v19 = vpop.permute.xlu1 %1403 }
 0x5ac   : > { %v1406_v11 = vpop.permute.xlu0 %1405  ;;  %v1407_v56 = vmul.f32 %v2950_v15, %v1404_v19 }
 0x5ad   : > { %v1408_v20 = vmul.f32 %v2950_v15, %v1406_v11  ;;  %1296 = vmatpush1.bf16.msra.mxu1 %v1235_v6  ;;  %1468 = vmatpush1.bf16.msra.mxu0 %v1410_v14 }
 0x5ae   : > { %1469 = vmatprep.subr.bf16.mxu0 %v4655_v27  ;;  %1297 = vmatprep.subr.bf16.mxu1 %v4655_v27 }
 0x5af   : > { %v1409_v33 = vpack.c.bf16 %v1408_v20, %v1407_v56  ;;  %v1223_v57 = vpop.permute.xlu1 %1222 }
 0x5b0   : > { %v1225_v35 = vpop.permute.xlu0 %1224  ;;  %v1226_v12 = vmul.f32 %v2949_v22, %v1223_v57 }
 0x5b1   : > { %v1227_v3 = vmul.f32 %v2949_v22, %v1225_v35  ;;  %1470 = vmatpush1.bf16.msra.mxu0 %v1409_v33 }
 0x5b2   : > { %1471 = vmatprep.subr.bf16.mxu0 %v4655_v27 }
 0x5b3   : > { %v1228_v7 = vpack.c.bf16 %v1227_v3, %v1226_v12  ;;  %v1397_v24 = vpop.permute.xlu1 %1396 }
 0x5b4   : > { %v1399_v14 = vpop.permute.xlu0 %1398  ;;  %v1400_v45 = vmul.f32 %v2949_v22, %v1397_v24 }
 0x5b5   : > { %v1401_v39 = vmul.f32 %v2949_v22, %v1399_v14  ;;  %1298 = vmatpush1.bf16.msra.mxu1 %v1228_v7  ;;  %v2954_v22 = vsel %vm696_vm4, 1.0, %v3456_v8  ;;  %v3300_v14 = vld [vmem:[%s4631_s5] ss:$8 sps:$4 sm:$0xff]   ;;  %vm4692_vm4 = vcmask 64512  }
 0x5b6   : > { %1299 = vmatprep.subr.bf16.mxu1 %v4655_v27 }
 0x5b7   : > { %v1402_v44 = vpack.c.bf16 %v1401_v39, %v1400_v45  ;;  %v1216_v41 = vpop.permute.xlu1 %1215 }
 0x5b8   : > { %v1218_v60 = vpop.permute.xlu0 %1217  ;;  %v1219_v4 = vmul.f32 %v2948_v36, %v1216_v41 }
 0x5b9   : > { %v1220_v5 = vmul.f32 %v2948_v36, %v1218_v60  ;;  %1472 = vmatpush1.bf16.msra.mxu0 %v1402_v44 }
 0x5ba   : > { %1473 = vmatprep.subr.bf16.mxu0 %v4655_v27 }
 0x5bb   : > { %v1221_v26 = vpack.c.bf16 %v1220_v5, %v1219_v4  ;;  %v1390_v40 = vpop.permute.xlu1 %1389 }
 0x5bc   : > { %v1392_v28 = vpop.permute.xlu0 %1391  ;;  %v1393_v15 = vmul.f32 %v2948_v36, %v1390_v40 }
 0x5bd   : > { %v1394_v13 = vmul.f32 %v2948_v36, %v1392_v28  ;;  %1300 = vmatpush1.bf16.msra.mxu1 %v1221_v26  ;;  %v3301_v36 = vld [vmem:[%s4632_s6] ss:$8 sps:$4 sm:$0xff]  }
 0x5be   : > { %1301 = vmatprep.subr.bf16.mxu1 %v4655_v27 }
 0x5bf   : > { %v1395_v37 = vpack.c.bf16 %v1394_v13, %v1393_v15  ;;  %v1209_v9 = vpop.permute.xlu1 %1208 }
 0x5c0   : > { %v1211_v54 = vpop.permute.xlu0 %1210  ;;  %v1212_v6 = vmul.f32 %v2947_v38, %v1209_v9 }
 0x5c1   : > { %v1213_v62 = vmul.f32 %v2947_v38, %v1211_v54  ;;  %1474 = vmatpush1.bf16.msra.mxu0 %v1395_v37 }
 0x5c2   : > { %1475 = vmatprep.subr.bf16.mxu0 %v4655_v27 }
 0x5c3   : > { %v1214_v1 = vpack.c.bf16 %v1213_v62, %v1212_v6  ;;  %v1383_v19 = vpop.permute.xlu1 %1382 }
 0x5c4   : > { %v1385_v11 = vpop.permute.xlu0 %1384  ;;  %v1386_v56 = vmul.f32 %v2947_v38, %v1383_v19 }
 0x5c5   : > { %v1387_v20 = vmul.f32 %v2947_v38, %v1385_v11  ;;  %1302 = vmatpush1.bf16.msra.mxu1 %v1214_v1 }
 0x5c6   : > { %1317 = vmatprep.subr.bf16.mxu1 %v4655_v27 }
 0x5c7   : > { %v1388_v33 = vpack.c.bf16 %v1387_v20, %v1386_v56  ;;  %v1259_v57 = vpop.permute.xlu1 %1258 }
 0x5c8   : > { %v1261_v35 = vpop.permute.xlu0 %1260  ;;  %v1262_v12 = vmul.f32 %v2954_v22, %v1259_v57 }
 0x5c9   : > { %v1263_v23 = vmul.f32 %v2954_v22, %v1261_v35  ;;  %1476 = vmatpush1.bf16.msra.mxu0 %v1388_v33 }
 0x5ca   : > { %1491 = vmatprep.subr.bf16.mxu0 %v4655_v27 }
 0x5cb   : > { %v1264_v47 = vpack.c.bf16 %v1263_v23, %v1262_v12  ;;  %v1433_v3 = vpop.permute.xlu1 %1432 }
 0x5cc   : > { %v1435_v7 = vpop.permute.xlu0 %1434  ;;  %v1436_v24 = vmul.f32 %v2954_v22, %v1433_v3 }
 0x5cd   : > { %v1437_v45 = vmul.f32 %v2954_v22, %v1435_v7  ;;  %1318 = vmatpush2.bf16.msra.mxu1 %v1264_v47 }
 0x5ce   : > { %3118 = vmatprep.subr.bf16.mxu1 %v3456_v8 }
 0x5cf   : > { %v1438_v39 = vpack.c.bf16 %v1437_v45, %v1436_v24 }
 0x5d0   : > { %1320 = vmatmul.mubr.bf16.vlgmr.msra.gmra.mxu1 %v3300_v14 }
 0x5d1   : > { %1492 = vmatpush2.bf16.msra.mxu0 %v1438_v39  ;;  %3120 = vmatprep.mubr.msk.bf16.mxu1 %vm3467_vm5, %v3456_v8 }
 0x5d2   : > { %3136 = vmatprep.subr.bf16.mxu0 %v3456_v8 }
 0x5d4   : > { %1494 = vmatmul.mubr.bf16.vlgmr.msra.gmra.mxu0 %v3301_v36 }
 0x5d5   : > { %3138 = vmatprep.mubr.msk.bf16.mxu0 %vm3467_vm5, %v3456_v8 }
 0x5d8   : > { %v1269_v44 = vpop.permute.xlu1 %1268 }
 0x5d9   : > { %v1273_v5 = vpop.permute.xlu0 %1272 }
 0x5dd   : > { %v1443_v26 = vpop.permute.xlu1 %1442 }
 0x5e1   : > { %v1447_v11 = vpop.permute.xlu1 %1446 }
 0x690   : > { %v1321_v41 = vpop.f32.mrf.mxu1 }
 0x691   : > { %v4105_v60 = vadd.f32 %v1321_v41, %v1269_v44 }
 0x692   : > { %v1323_v4 = vpop.f32.mrf.mxu1 }
 0x693   : > { %v4108_v40 = vmul.f32 0.70710677, %v4105_v60 }
 0x694   : > { %v1324_v28 = vpop.f32.mrf.mxu1  ;;  %v1495_v15 = vpop.f32.mrf.mxu0 }
 0x695   : > { %v1336_v13 = vand.u32 2147483647, %v4108_v40  ;;  %v4111_v38 = vadd.f32 %v1324_v28, %v1273_v5  ;;  %v4113_v37 = vadd.f32 %v1495_v15, %v1443_v26  ;;  %vm1332_vm9 = vcmp.lt.f32.partialorder %v4108_v40, 0.0 }
 0x696   : > { %v1326_v9 = vpop.f32.mrf.mxu1  ;;  %v1497_v54 = vpop.f32.mrf.mxu0 }
 0x697   : > { %v1338_v6 = vmul.f32 0.3275911, %v1336_v13  ;;  %v4116_v62 = vmul.f32 0.70710677, %v4111_v38  ;;  %v4119_v1 = vmul.f32 0.70710677, %v4113_v37 }
 0x698   : > { %v1498_v19 = vpop.f32.mrf.mxu0  ;;  %v1364_v14 = vsub.f32 0.0, %v1336_v13 }
 0x699   : > { %v1340_v56 = vadd.f32 1.0, %v1338_v6  ;;  %v1337_v20 = vand.u32 2147483647, %v4116_v62  ;;  %v1510_v22 = vand.u32 2147483647, %v4119_v1  ;;  %v4123_v33 = vadd.f32 %v1498_v19, %v1447_v11 }
 0x69a   : > { %v1500_v57 = vpop.f32.mrf.mxu0  ;;  %v1366_v44 = vmul.f32 %v1364_v14, %v1336_v13  ;;  %vm1506_vm13 = vcmp.lt.f32.partialorder %v4119_v1, 0.0  ;;  %vm1333_vm11 = vcmp.lt.f32.partialorder %v4116_v62, 0.0  ;;  %v1672_v62 = vpop.permute.xlu1 %1671 }
 0x69b   : > { %3327 = vrcp.f32 %v1340_v56  ;;  %v1339_v35 = vmul.f32 0.3275911, %v1337_v20  ;;  %v1512_v12 = vmul.f32 0.3275911, %v1510_v22  ;;  %v4126_v47 = vmul.f32 0.70710677, %v4123_v33 }
 0x69c   : > { %v1365_v39 = vsub.f32 0.0, %v1337_v20  ;;  %v1538_v36 = vsub.f32 0.0, %v1510_v22  ;;  %v1368_v9 = vmul.f32 1.442695, %v1366_v44 }
 0x69d   : > { %v1341_v23 = vadd.f32 1.0, %v1339_v35  ;;  %v1514_v3 = vadd.f32 1.0, %v1512_v12  ;;  %v1511_v7 = vand.u32 2147483647, %v4126_v47  ;;  %vm1507_vm15 = vcmp.lt.f32.partialorder %v4126_v47, 0.0 }
 0x69e   : > { %v1367_v5 = vmul.f32 %v1365_v39, %v1337_v20  ;;  %v1540_v26 = vmul.f32 %v1538_v36, %v1510_v22 }
 0x69f   : > { %3329 = vrcp.f32 %v1341_v23  ;;  %v1513_v24 = vmul.f32 0.3275911, %v1511_v7  ;;  %v1539_v28 = vsub.f32 0.0, %v1511_v7 }
 0x6a0   : > { %3331 = vrcp.f32 %v1514_v3  ;;  %v1370_v56 = vmul.f32 1.442695, %v1367_v5  ;;  %v1542_v35 = vmul.f32 1.442695, %v1540_v26 }
 0x6a1   : > { %v1515_v45 = vadd.f32 1.0, %v1513_v24  ;;  %v1541_v12 = vmul.f32 %v1539_v28, %v1511_v7 }
 0x6a3   : > { %3333 = vrcp.f32 %v1515_v45  ;;  %v1544_v45 = vmul.f32 1.442695, %v1541_v12 }
 0x6a4   : > { %3335 = vpow2.f32 %v1368_v9 }
 0x6a5   : > { %3337 = vpow2.f32 %v1370_v56 }
 0x6a6   : > { %3339 = vpow2.f32 %v1542_v35 }
 0x6a7   : > { %3341 = vpow2.f32 %v1544_v45 }
 0x6a8   : > { %v3328_v41 = vpop.eup %3327 }
 0x6a9   : > { %v1346_v4 = vmul.f32 1.0614054, %v3328_v41 }
 0x6ab   : > { %v1348_v15 = vadd.f32 -1.4531521, %v1346_v4 }
 0x6ac   : > { %v3330_v54 = vpop.eup %3329 }
 0x6ad   : > { %v3332_v6 = vpop.eup %3331  ;;  %v1350_v19 = vmul.f32 %v3328_v41, %v1348_v15  ;;  %v1347_v11 = vmul.f32 1.0614054, %v3330_v54 }
 0x6ae   : > { %v1520_v57 = vmul.f32 1.0614054, %v3332_v6 }
 0x6af   : > { %v1352_v23 = vadd.f32 1.4214138, %v1350_v19  ;;  %v1349_v3 = vadd.f32 -1.4531521, %v1347_v11 }
 0x6b0   : > { %v1522_v24 = vadd.f32 -1.4531521, %v1520_v57  ;;  %v3334_v20 = vpop.eup %3333 }
 0x6b1   : > { %v1354_v13 = vmul.f32 %v3328_v41, %v1352_v23  ;;  %v1351_v14 = vmul.f32 %v3330_v54, %v1349_v3  ;;  %v1521_v44 = vmul.f32 1.0614054, %v3334_v20  ;;  %v3336_v12 = vpop.eup %3335 }
 0x6b2   : > { %v1524_v22 = vmul.f32 %v3332_v6, %v1522_v24 }
 0x6b3   : > { %v1356_v39 = vadd.f32 -0.28449672, %v1354_v13  ;;  %v1353_v36 = vadd.f32 1.4214138, %v1351_v14  ;;  %v1523_v27 = vadd.f32 -1.4531521, %v1521_v44 }
 0x6b4   : > { %v1526_v4 = vadd.f32 1.4214138, %v1524_v22 }
 0x6b5   : > { %v1358_v15 = vmul.f32 %v3328_v41, %v1356_v39  ;;  %v1355_v5 = vmul.f32 %v3330_v54, %v1353_v36  ;;  %v1525_v9 = vmul.f32 %v3334_v20, %v1523_v27  ;;  %v3338_v39 = vpop.eup %3337 }
 0x6b6   : > { %v1528_v26 = vmul.f32 %v3332_v6, %v1526_v4  ;;  %v3340_v44 = vpop.eup %3339 }
 0x6b7   : > { %v1360_v7 = vadd.f32 0.2548296, %v1358_v15  ;;  %v1357_v28 = vadd.f32 -0.28449672, %v1355_v5  ;;  %v1527_v56 = vadd.f32 1.4214138, %v1525_v9  ;;  %v3342_v9 = vpop.eup %3341 }
 0x6b8   : > { %v1530_v19 = vadd.f32 -0.28449672, %v1528_v26 }
 0x6b9   : > { %v1362_v11 = vmul.f32 %v3328_v41, %v1360_v7  ;;  %v1359_v57 = vmul.f32 %v3330_v54, %v1357_v28  ;;  %v1529_v35 = vmul.f32 %v3334_v20, %v1527_v56  ;;  %v4683_v7 = vmov 1.0  }
 0x6ba   : > { %v1532_v23 = vmul.f32 %v3332_v6, %v1530_v19  ;;  %v1508_v28 = vsel %vm1506_vm13, -1.0, %v4683_v7  ;;  %v1335_v19 = vsel %vm1333_vm11, -1.0, %v4683_v7  ;;  %vm4694_vm13 = vmmov %vm4692_vm4 }
 0x6bb   : > { %v1361_v3 = vadd.f32 0.2548296, %v1359_v57  ;;  %v1372_v13 = vmul.f32 %v3336_v12, %v1362_v11  ;;  %v1531_v22 = vadd.f32 -0.28449672, %v1529_v35  ;;  %vm4695_vm11 = vmmov %vm4692_vm4 }
 0x6bc   : > { %v1534_v24 = vadd.f32 0.2548296, %v1532_v23 }
 0x6bd   : > { %v1363_v14 = vmul.f32 %v3330_v54, %v1361_v3  ;;  %v1533_v15 = vmul.f32 %v3334_v20, %v1531_v22  ;;  %v1374_v41 = vsub.f32 1.0, %v1372_v13  ;;  %v1509_v3 = vsel %vm1507_vm15, -1.0, %v4683_v7  ;;  %vm4696_vm15 = vmmov %vm4689_vm1 }
 0x6be   : > { %v1536_v36 = vmul.f32 %v3332_v6, %v1534_v24  ;;  %v1334_v6 = vsel %vm1332_vm9, -1.0, %v4683_v7  ;;  %v1328_v13 = vmul.f32 0.5, %v4105_v60  ;;  %vm4693_vm9 = vmmov %vm4692_vm4 }
 0x6bf   : > { %v1373_v4 = vmul.f32 %v3338_v39, %v1363_v14  ;;  %v1535_v5 = vadd.f32 0.2548296, %v1533_v15  ;;  %v1376_v57 = vmul.f32 %v1374_v41, %v1334_v6  ;;  %v1329_v14 = vmul.f32 0.5, %v4111_v38  ;;  %v1676_v15 = vpop.permute.xlu1 %1675 }
 0x6c0   : > { %v1546_v27 = vmul.f32 %v3340_v44, %v1536_v36  ;;  %v1503_v39 = vmul.f32 0.5, %v4123_v33  ;;  %v3463_v38 = vmov 12  }
 0x6c1   : > { %v1375_v45 = vsub.f32 1.0, %v1373_v4  ;;  %v1537_v54 = vmul.f32 %v3334_v20, %v1535_v5  ;;  %v1378_v35 = vadd.f32 1.0, %v1376_v57  ;;  %v1502_v20 = vmul.f32 0.5, %v4113_v37  ;;  %3279 = vset.pattern.permute.xlu1 %v3463_v38  ;;  %3278 = vset.pattern.permute.xlu0 %v3463_v38 }
 0x6c2   : > { %v1548_v26 = vsub.f32 1.0, %v1546_v27  ;;  %v4145_v37 = vadd.f32 %v3667_v61, %v1672_v62  ;;  %v3464_v62 = vmov 13  }
 0x6c3   : > { %v1377_v40 = vmul.f32 %v1375_v45, %v1335_v19  ;;  %v1547_v1 = vmul.f32 %v3342_v9, %v1537_v54  ;;  %v1380_v47 = vmul.f32 %v1378_v35, %v1328_v13  ;;  %v4142_v45 = vadd.f32 %v3669_v63, %v1676_v15 }
 0x6c4   : > { %v1550_v11 = vmul.f32 %v1548_v26, %v1508_v28  ;;  %v3465_v35 = vmov 7  }
 0x6c5   : > { %v1549_v23 = vsub.f32 1.0, %v1547_v1  ;;  %v1379_v12 = vadd.f32 1.0, %v1377_v40  ;;  %v1680_v60 = vadd.f32 %v4142_v45, %v4145_v37 }
 0x6c6   : > { %v1552_v56 = vadd.f32 1.0, %v1550_v11 }
 0x6c7   : > { %v1551_v24 = vmul.f32 %v1549_v23, %v1509_v3  ;;  %v1381_v44 = vmul.f32 %v1379_v12, %v1329_v14  ;;  %v4152_v23 = vld [vmem:[%s4637_s11 + $0x8] sm:$0xff]  ;;  %v4158_v3 = vld [vmem:[%s4637_s11] sm:$0xff]  ;;  %v3466_v12 = vmov 8  }
 0x6c8   : > { %v1554_v22 = vmul.f32 %v1552_v56, %v1502_v20 }
 0x6c9   : > { %v1553_v36 = vadd.f32 1.0, %v1551_v24 }
 0x6ca   : > { %v1556_v27 = vadd.f32 %v1554_v22, %v1380_v47 }
 0x6cb   : > { %v1555_v4 = vmul.f32 %v1553_v36, %v1503_v39 }
 0x6cd   : > { %v1557_v41 = vadd.f32 %v1555_v4, %v1381_v44 }
 0x6cf   : > { %v1558_v5 = vadd.f32 %v1557_v41, %v1556_v27 }
 0x6d1   : > { %1559 = vadd.xlane.f32.xlu0 %v1558_v5 }
 0x6d5   : > { %1681 = vadd.xlane.f32.xlu0 %v1680_v60 }
 0x75a   : > { %v1560_v33 = vpop.xlane.xlu0 %1559 }
 0x75b   : > { %v1561_v26 = vrot.slane %v1560_v33, 4 }
 0x75d   : > { %v1562_v28 = vadd.f32 %v1561_v26, %v1560_v33 }
 0x75e   : > { %v1682_v20 = vpop.xlane.xlu0 %1681 }
 0x75f   : > { %v1563_v54 = vrot.slane %v1562_v28, 2  ;;  %v1683_v24 = vrot.slane %v1682_v20, 4 }
 0x761   : > { %v1564_v9 = vadd.f32 %v1563_v54, %v1562_v28  ;;  %v1684_v13 = vadd.f32 %v1683_v24, %v1682_v20 }
 0x763   : > { %v1565_v6 = vrot.slane %v1564_v9, 1  ;;  %v1685_v14 = vrot.slane %v1684_v13, 2 }
 0x765   : > { %v1566_v63 = vadd.f32 %v1565_v6, %v1564_v9  ;;  %v1686_v47 = vadd.f32 %v1685_v14, %v1684_v13 }
 0x767   : > { %3216 = vpush %v1566_v63  ;;  %v1687_v15 = vrot.slane %v1686_v47, 1 }
 0x769   : > { %v1688_v5 = vadd.f32 %v1687_v15, %v1686_v47 }
 0x798   : > { %s3217_s22 = spop %3216 }
 0x799   : > { %v1568_v19 = vstv %s3217_s22 }
 0x79a   : > { %v1569_v61 = vmul.f32 0.00048828125, %v1568_v19 }
 0x79c   : > { %v1570_v11 = vsub.f32 %v1556_v27, %v1569_v61  ;;  %v1571_v57 = vsub.f32 %v1557_v41, %v1569_v61 }
 0x79e   : > { %v1572_v40 = vmul.f32 %v1570_v11, %v1570_v11  ;;  %v1573_v1 = vmul.f32 %v1571_v57, %v1571_v57 }
 0x7a0   : > { %v1574_v56 = vadd.f32 %v1573_v1, %v1572_v40 }
 0x7a2   : > { %1575 = vadd.xlane.f32.xlu1 %v1574_v56 }
 0x7b3   : > { %1717 = vperm.xlu1 %3279, %v4152_v23  }
 0x7b7   : > { %3280 = vset.pattern.permute.xlu1 %v3464_v62 }
 0x7b8   : > { %1723 = vperm.xlu1 %3280, %v4158_v3  }
 0x7bc   : > { %1727 = vperm.xlu1 %3280, %v4152_v23  }
 0x7c0   : > { %3281 = vset.pattern.permute.xlu1 %v3465_v35 }
 0x7c1   : > { %1591 = vperm.xlu1 %3281, %v4158_v3  }
 0x7c5   : > { %1595 = vperm.xlu1 %3281, %v4152_v23  }
 0x7c9   : > { %3282 = vset.pattern.permute.xlu1 %v3466_v12 }
 0x7ca   : > { %1601 = vperm.xlu1 %3282, %v4158_v3  }
 0x7ce   : > { %1605 = vperm.xlu1 %3282, %v4152_v23  }
 0x82b   : > { %v1576_v22 = vpop.xlane.xlu1 %1575 }
 0x82c   : > { %v1577_v39 = vrot.slane %v1576_v22, 4 }
 0x82e   : > { %v1578_v36 = vadd.f32 %v1577_v39, %v1576_v22 }
 0x82f   : > { %v1718_v60 = vpop.permute.xlu1 %1717 }
 0x830   : > { %v1579_v44 = vrot.slane %v1578_v36, 2 }
 0x832   : > { %v1580_v4 = vadd.f32 %v1579_v44, %v1578_v36 }
 0x833   : > { %v1724_v38 = vpop.permute.xlu1 %1723 }
 0x834   : > { %v1581_v27 = vrot.slane %v1580_v4, 1 }
 0x836   : > { %v1582_v41 = vadd.f32 %v1581_v27, %v1580_v4 }
 0x837   : > { %v1728_v33 = vpop.permute.xlu1 %1727 }
 0x838   : > { %3218 = vpush %v1582_v41 }
 0x839   : > { %3220 = vpush %v1688_v5 }
 0x83c   : > { %v1592_v6 = vpop.permute.xlu1 %1591 }
 0x840   : > { %v1596_v62 = vpop.permute.xlu1 %1595 }
 0x845   : > { %v1602_v35 = vpop.permute.xlu1 %1601 }
 0x849   : > { %v1606_v13 = vpop.permute.xlu1 %1605 }
 0x869   : > { %s3219_s17 = spop %3218 }
 0x86a   : > { %v1584_v26 = vstv %s3219_s17  ;;  %s3221_s22 = spop %3220 }
 0x86b   : > { %v1585_v28 = vmul.f32 0.00048828125, %v1584_v26  ;;  %v1690_v54 = vstv %s3221_s22 }
 0x86c   : > { %v1691_v9 = vmul.f32 0.00048828125, %v1690_v54 }
 0x86d   : > { %v1586_v63 = vadd.f32 1e-05, %v1585_v28 }
 0x86e   : > { %v1692_v19 = vsub.f32 %v4145_v37, %v1691_v9  ;;  %v1693_v61 = vsub.f32 %v4142_v45, %v1691_v9 }
 0x86f   : > { %3343 = vrsqrt.f32 %v1586_v63 }
 0x870   : > { %v1694_v40 = vmul.f32 %v1692_v19, %v1692_v19  ;;  %v1695_v1 = vmul.f32 %v1693_v61, %v1693_v61 }
 0x872   : > { %v1696_v56 = vadd.f32 %v1695_v1, %v1694_v40 }
 0x874   : > { %1697 = vadd.xlane.f32.xlu0 %v1696_v56 }
 0x87c   : > { %v3344_v12 = vpop.eup %3343 }
 0x87d   : > { %v1588_v20 = vmul.f32 %v3344_v12, %v1570_v11  ;;  %v1589_v24 = vmul.f32 %v3344_v12, %v1571_v57 }
 0x87f   : > { %v1598_v14 = vmul.f32 %v1592_v6, %v1588_v20  ;;  %v1599_v22 = vmul.f32 %v1596_v62, %v1589_v24 }
 0x881   : > { %v1608_v39 = vadd.f32 %v1602_v35, %v1598_v14  ;;  %v1609_v36 = vadd.f32 %v1606_v13, %v1599_v22 }
 0x883   : > { %v1612_v47 = vpack.c.bf16 %v1609_v36, %v1608_v39 }
 0x885   : > { %3119 = vmatpush3.bf16.msra.mxu1 %v1612_v47 }
 0x886   : > { %3124 = vmatprep.subr.bf16.mxu1 %v3456_v8 }
 0x88a   : > { %1713 = vperm.xlu0 %3278, %v4158_v3  }
 0x8fd   : > { %v1698_v45 = vpop.xlane.xlu0 %1697 }
 0x8fe   : > { %v1699_v37 = vrot.slane %v1698_v45, 4 }
 0x900   : > { %v1700_v44 = vadd.f32 %v1699_v37, %v1698_v45 }
 0x902   : > { %v1701_v4 = vrot.slane %v1700_v44, 2 }
 0x904   : > { %v1702_v15 = vadd.f32 %v1701_v4, %v1700_v44 }
 0x905   : > { %v1714_v28 = vpop.permute.xlu0 %1713 }
 0x906   : > { %v1703_v27 = vrot.slane %v1702_v15, 1 }
 0x908   : > { %v1704_v41 = vadd.f32 %v1703_v27, %v1702_v15 }
 0x90a   : > { %3222 = vpush %v1704_v41 }
 0x93b   : > { %s3223_s23 = spop %3222 }
 0x93c   : > { %v1706_v11 = vstv %s3223_s23 }
 0x93d   : > { %v1707_v57 = vmul.f32 0.00048828125, %v1706_v11 }
 0x93f   : > { %v1708_v5 = vadd.f32 1e-05, %v1707_v57 }
 0x941   : > { %3345 = vrsqrt.f32 %v1708_v5 }
 0x94e   : > { %v3346_v26 = vpop.eup %3345 }
 0x94f   : > { %v1711_v54 = vmul.f32 %v3346_v26, %v1693_v61  ;;  %v1710_v9 = vmul.f32 %v3346_v26, %v1692_v19 }
 0x951   : > { %v1721_v6 = vmul.f32 %v1718_v60, %v1711_v54  ;;  %v1720_v63 = vmul.f32 %v1714_v28, %v1710_v9 }
 0x953   : > { %v1731_v40 = vadd.f32 %v1728_v33, %v1721_v6  ;;  %v1730_v1 = vadd.f32 %v1724_v38, %v1720_v63 }
 0x955   : > { %v1735_v56 = vmul.f32 0.70710677, %v1731_v40  ;;  %v1734_v62 = vmul.f32 0.70710677, %v1730_v1 }
 0x957   : > { %v1741_v35 = vand.u32 2147483647, %v1735_v56  ;;  %v1740_v12 = vand.u32 2147483647, %v1734_v62  ;;  %vm1737_vm2 = vcmp.lt.f32.partialorder %v1735_v56, 0.0  ;;  %vm1736_vm3 = vcmp.lt.f32.partialorder %v1734_v62, 0.0 }
 0x958   : > { %v3304_v56 = vld [vmem:[%s4633_s7] sm:$0xff]  }
 0x959   : > { %v1743_v20 = vmul.f32 0.3275911, %v1741_v35  ;;  %v1742_v24 = vmul.f32 0.3275911, %v1740_v12  ;;  %v1769_v22 = vsub.f32 0.0, %v1741_v35  ;;  %v1768_v39 = vsub.f32 0.0, %v1740_v12  ;;  %3121 = vmatmul.mubr.msk.bf16.vlgmr.msra.gmra.mxu1 %vm4682_vm6, %v3304_v56  ;;  %vm4699_vm6 = vmmov %vm4689_vm1 }
 0x95a   : > { %3126 = vmatprep.mubr.msk.bf16.mxu1 %vm3467_vm5, %v3456_v8 }
 0x95b   : > { %v1745_v13 = vadd.f32 1.0, %v1743_v20  ;;  %v1744_v14 = vadd.f32 1.0, %v1742_v24  ;;  %v1771_v36 = vmul.f32 %v1769_v22, %v1741_v35  ;;  %v1770_v47 = vmul.f32 %v1768_v39, %v1740_v12 }
 0x95c   : > { %v1739_v22 = vsel %vm1737_vm2, -1.0, %v4683_v7  ;;  %vm4697_vm2 = vmmov %vm4689_vm1 }
 0x95d   : > { %3347 = vrcp.f32 %v1745_v13  ;;  %v1774_v45 = vmul.f32 1.442695, %v1771_v36  ;;  %v1772_v38 = vmul.f32 1.442695, %v1770_v47  ;;  %v1738_v47 = vsel %vm1736_vm3, -1.0, %v4683_v7  ;;  %vm4698_vm3 = vmmov %vm4689_vm1 }
 0x95e   : > { %3349 = vrcp.f32 %v1744_v14 }
 0x95f   : > { %3351 = vpow2.f32 %v1774_v45  ;;  %v1733_v45 = vmul.f32 0.5, %v1731_v40  ;;  %v3468_v40 = vmov 9  }
 0x960   : > { %3353 = vpow2.f32 %v1772_v38  ;;  %v1732_v38 = vmul.f32 0.5, %v1730_v1  ;;  %3283 = vset.pattern.permute.xlu0 %v3468_v40  ;;  %3284 = vset.pattern.permute.xlu1 %v3468_v40  ;;  %v3469_v1 = vmov 10  }
 0x96a   : > { %v3348_v61 = vpop.eup %3347 }
 0x96b   : > { %v3350_v19 = vpop.eup %3349  ;;  %v1751_v60 = vmul.f32 1.0614054, %v3348_v61 }
 0x96c   : > { %v1750_v33 = vmul.f32 1.0614054, %v3350_v19  ;;  %v3352_v35 = vpop.eup %3351 }
 0x96d   : > { %v1753_v37 = vadd.f32 -1.4531521, %v1751_v60  ;;  %v3354_v20 = vpop.eup %3353 }
 0x96e   : > { %v1752_v44 = vadd.f32 -1.4531521, %v1750_v33 }
 0x96f   : > { %v1755_v4 = vmul.f32 %v3348_v61, %v1753_v37 }
 0x970   : > { %v1754_v15 = vmul.f32 %v3350_v19, %v1752_v44 }
 0x971   : > { %v1757_v27 = vadd.f32 1.4214138, %v1755_v4 }
 0x972   : > { %v1756_v41 = vadd.f32 1.4214138, %v1754_v15 }
 0x973   : > { %v1759_v11 = vmul.f32 %v3348_v61, %v1757_v27 }
 0x974   : > { %v1758_v57 = vmul.f32 %v3350_v19, %v1756_v41 }
 0x975   : > { %v1761_v5 = vadd.f32 -0.28449672, %v1759_v11 }
 0x976   : > { %v1760_v26 = vadd.f32 -0.28449672, %v1758_v57 }
 0x977   : > { %v1763_v28 = vmul.f32 %v3348_v61, %v1761_v5 }
 0x978   : > { %v1762_v54 = vmul.f32 %v3350_v19, %v1760_v26 }
 0x979   : > { %v1765_v9 = vadd.f32 0.2548296, %v1763_v28 }
 0x97a   : > { %v1764_v6 = vadd.f32 0.2548296, %v1762_v54 }
 0x97b   : > { %v1767_v63 = vmul.f32 %v3348_v61, %v1765_v9 }
 0x97c   : > { %v1766_v12 = vmul.f32 %v3350_v19, %v1764_v6 }
 0x97d   : > { %v1777_v24 = vmul.f32 %v3352_v35, %v1767_v63 }
 0x97e   : > { %v1776_v13 = vmul.f32 %v3354_v20, %v1766_v12 }
 0x97f   : > { %v1779_v14 = vsub.f32 1.0, %v1777_v24 }
 0x980   : > { %v1778_v39 = vsub.f32 1.0, %v1776_v13 }
 0x981   : > { %v1781_v36 = vmul.f32 %v1779_v14, %v1739_v22 }
 0x982   : > { %v1780_v60 = vmul.f32 %v1778_v39, %v1738_v47 }
 0x983   : > { %v1783_v33 = vadd.f32 1.0, %v1781_v36 }
 0x984   : > { %v1782_v37 = vadd.f32 1.0, %v1780_v60 }
 0x985   : > { %v4172_v61 = vmul.f32 %v1783_v33, %v1733_v45 }
 0x986   : > { %v4174_v19 = vmul.f32 %v1782_v37, %v1732_v38 }
 0x987   : > { %1788 = vrot.lane.b32.xlu1 %v4172_v61, %s3445_s24  ;;  %v1809_v35 = vmul.f32 %v4172_v61, %v3805_v21 }
 0x988   : > { %1786 = vrot.lane.b32.xlu0 %v4174_v19, %s3445_s24  ;;  %s4684_s24 = smov 96  }
 0x98b   : > { %1794 = vrot.lane.b32.xlu1 %v4172_v61, %s3446_s25 }
 0x98c   : > { %1792 = vrot.lane.b32.xlu0 %v4174_v19, %s3446_s25  ;;  %s4685_s25 = smov 112  }
 0x98f   : > { %1802 = vrot.lane.b32.xlu1 %v4172_v61, %s3449_s29 }
 0x990   : > { %1800 = vrot.lane.b32.xlu0 %v4174_v19, %s3449_s29  ;;  %s4686_s29 = smov 16  }
 0x993   : > { %1814 = vrot.lane.b32.xlu1 %v4172_v61, %s3451_s16 }
 0x994   : > { %1812 = vrot.lane.b32.xlu0 %v4174_v19, %s3451_s16 }
 0x997   : > { %1822 = vrot.lane.b32.xlu1 %v4172_v61, %s3453_s21 }
 0x998   : > { %1820 = vrot.lane.b32.xlu0 %v4174_v19, %s3453_s21 }
 0x99b   : > { %1830 = vrot.lane.b32.xlu1 %v4172_v61, %s3447_s26 }
 0x99c   : > { %1828 = vrot.lane.b32.xlu0 %v4174_v19, %s3447_s26  ;;  %s4687_s26 = smov 32  }
 0x99f   : > { %1836 = vrot.lane.b32.xlu1 %v4172_v61, %s4684_s24 }
 0x9a0   : > { %1834 = vrot.lane.b32.xlu0 %v4174_v19, %s4684_s24 }
 0x9a3   : > { %1844 = vrot.lane.b32.xlu1 %v4172_v61, %s4685_s25 }
 0x9a4   : > { %1842 = vrot.lane.b32.xlu0 %v4174_v19, %s4685_s25 }
 0x9a7   : > { %1856 = vrot.lane.b32.xlu1 %v4172_v61, %s4686_s29 }
 0x9a8   : > { %1854 = vrot.lane.b32.xlu0 %v4174_v19, %s4686_s29 }
 0x9ab   : > { %1864 = vrot.lane.b32.xlu1 %v4172_v61, %s4687_s26 }
 0x9ac   : > { %1862 = vrot.lane.b32.xlu0 %v4174_v19, %s4687_s26  ;;  %s4700_s26 = sshll.u32 %s4702_s19, 4 }
 0x9af   : > { %1878 = vperm.xlu1 %3284, %v4152_v23  }
 0x9b0   : > { %1874 = vperm.xlu0 %3283, %v4158_v3  }
 0x9b3   : > { %3285 = vset.pattern.permute.xlu1 %v3469_v1 }
 0x9b4   : > { %1988 = vperm.xlu1 %3285, %v4158_v3   ;;  %3286 = vset.pattern.permute.xlu0 %v3469_v1 }
 0x9b5   : > { %1992 = vperm.xlu0 %3286, %v4152_v23  }
 0x9f9   : > { %v1789_v62 = vpop.permute.xlu1 %1788 }
 0x9fa   : > { %v1787_v44 = vpop.permute.xlu0 %1786  ;;  %v1791_v11 = vmul.f32 %v1789_v62, %v3820_v32 }
 0x9fb   : > { %v1790_v57 = vmul.f32 %v1787_v44, %v3825_v34 }
 0x9fd   : > { %v1795_v4 = vpop.permute.xlu1 %1794 }
 0x9fe   : > { %v1793_v15 = vpop.permute.xlu0 %1792  ;;  %v1797_v27 = vmul.f32 %v1795_v4, %v3855_v51 }
 0x9ff   : > { %v1796_v41 = vmul.f32 %v1793_v15, %v3850_v49  ;;  %v1808_v49 = vmul.f32 %v4174_v19, %v3814_v29  ;;  %v1850_v15 = vmul.f32 %v4174_v19, %v3818_v31  ;;  %v3306_v31 = vld [vmem:[%s4635_s9] sm:$0xff]   ;;  %v3415_v19 = vld [vmem:[%s4627_s1 + $0x58] sm:$0xff] }
 0xa00   : > { %v1799_v26 = vadd.f32 %v1797_v27, %v1791_v11 }
 0xa01   : > { %v1803_v5 = vpop.permute.xlu1 %1802  ;;  %v1798_v9 = vadd.f32 %v1796_v41, %v1790_v57 }
 0xa02   : > { %v1801_v28 = vpop.permute.xlu0 %1800  ;;  %v1805_v54 = vmul.f32 %v1803_v5, %v3872_v0 }
 0xa03   : > { %v1804_v6 = vmul.f32 %v1801_v28, %v3863_v58 }
 0xa04   : > { %v1807_v63 = vadd.f32 %v1805_v54, %v1799_v26 }
 0xa05   : > { %v1806_v12 = vadd.f32 %v1804_v6, %v1798_v9  ;;  %v1815_v51 = vpop.permute.xlu1 %1814 }
 0xa06   : > { %v1813_v32 = vpop.permute.xlu0 %1812  ;;  %v1811_v20 = vadd.f32 %v1809_v35, %v1807_v63  ;;  %v1817_v34 = vmul.f32 %v1815_v51, %v3923_v46  ;;  %v3305_v46 = vld [vmem:[%s4634_s8] sm:$0xff]   ;;  %v3416_v63 = vld [vmem:[%s4627_s1 + $0x50] sm:$0xff]  ;;  %v3417_v35 = vld [vmem:[%s4627_s1 + $0x48] sm:$0xff] }
 0xa07   : > { %v1810_v24 = vadd.f32 %v1808_v49, %v1806_v12  ;;  %v1816_v13 = vmul.f32 %v1813_v32, %v3916_v43  ;;  %v3418_v12 = vld [vmem:[%s4627_s1 + $0x40] sm:$0xff]  ;;  %v3419_v49 = vld [vmem:[%s4627_s1 + $0x38] sm:$0xff]  ;;  %v3420_v51 = vld [vmem:[%s4627_s1 + $0x30] sm:$0xff] }
 0xa08   : > { %v1819_v14 = vadd.f32 %v1817_v34, %v1811_v20  ;;  %v3421_v32 = vld [vmem:[%s4627_s1 + $0x28] sm:$0xff]  ;;  %v3422_v20 = vld [vmem:[%s4627_s1 + $0x20] sm:$0xff]  ;;  %v3423_v34 = vld [vmem:[%s4627_s1 + $0x18] sm:$0xff] }
 0xa09   : > { %v1823_v0 = vpop.permute.xlu1 %1822  ;;  %v1818_v39 = vadd.f32 %v1816_v13, %v1810_v24  ;;  %v3424_v24 = vld [vmem:[%s4627_s1 + $0x10] sm:$0xff]  ;;  %v3425_v13 = vld [vmem:[%s4627_s1 + $0x8] sm:$0xff] }
 0xa0a   : > { %v1821_v22 = vpop.permute.xlu0 %1820  ;;  %v1825_v58 = vmul.f32 %v1823_v0, %v3944_v59  ;;  %v3426_v0 = vld [vmem:[%s4627_s1] sm:$0xff] }
 0xa0b   : > { %v1824_v21 = vmul.f32 %v1821_v22, %v3941_v25 }
 0xa0c   : > { %v1827_v36 = vadd.f32 %v1825_v58, %v1819_v14  ;;  %v4320_v14 = vld [vmem:[%s4628_s2] sm:$0xff] }
 0xa0d   : > { %v1826_v47 = vadd.f32 %v1824_v21, %v1818_v39  ;;  %v1831_v60 = vpop.permute.xlu1 %1830 }
 0xa0e   : > { %v1829_v29 = vpop.permute.xlu0 %1828  ;;  %v1833_v25 = vmul.f32 %v1831_v60, %v3857_v52 }
 0xa0f   : > { %v1870_v45 = vpack.c.bf16 %v1827_v36, %v1826_v47  ;;  %v1832_v37 = vmul.f32 %v1829_v29, %v3859_v53  ;;  %v3470_v36 = vmov 14  }
 0xa10   : > { %3288 = vset.pattern.permute.xlu1 %v3470_v36  ;;  %3287 = vset.pattern.permute.xlu0 %v3470_v36 }
 0xa11   : > { %3125 = vmatpush3.bf16.msra.mxu1 %v1870_v45  ;;  %v1837_v33 = vpop.permute.xlu1 %1836 }
 0xa12   : > { %v1835_v43 = vpop.permute.xlu0 %1834  ;;  %v1839_v38 = vmul.f32 %v1837_v33, %v3861_v55  ;;  %3130 = vmatprep.subr.bf16.mxu1 %v3456_v8 }
 0xa13   : > { %v1838_v59 = vmul.f32 %v1835_v43, %v3881_v10  ;;  %v1851_v10 = vmul.f32 %v4172_v61, %v3816_v30 }
 0xa14   : > { %3127 = vmatmul.mubr.msk.bf16.vlgmr.msra.gmra.mxu1 %vm4688_vm7, %v3305_v46  ;;  %v1841_v40 = vadd.f32 %v1839_v38, %v1833_v25 }
 0xa15   : > { %v1845_v56 = vpop.permute.xlu1 %1844  ;;  %3132 = vmatprep.mubr.msk.bf16.mxu1 %vm3467_vm5, %v3456_v8  ;;  %v1840_v44 = vadd.f32 %v1838_v59, %v1832_v37 }
 0xa16   : > { %v1843_v1 = vpop.permute.xlu0 %1842  ;;  %v1847_v62 = vmul.f32 %v1845_v56, %v3889_v17 }
 0xa17   : > { %v1846_v55 = vmul.f32 %v1843_v1, %v3891_v18 }
 0xa18   : > { %v1849_v4 = vadd.f32 %v1847_v62, %v1841_v40 }
 0xa19   : > { %v1848_v52 = vadd.f32 %v1846_v55, %v1840_v44  ;;  %v1857_v53 = vpop.permute.xlu1 %1856  ;;  %v4323_v22 = vpop.f32.mrf.mxu1 }
 0xa1a   : > { %v1855_v27 = vpop.permute.xlu0 %1854  ;;  %v1853_v41 = vadd.f32 %v1851_v10, %v1849_v4  ;;  %v1859_v11 = vmul.f32 %v1857_v53, %v3936_v16  ;;  %v3411_v16 = vld [vmem:[%s4627_s1 + $0x78] sm:$0xff] }
 0xa1b   : > { %v1852_v57 = vadd.f32 %v1850_v15, %v1848_v52  ;;  %v1858_v5 = vmul.f32 %v1855_v27, %v3939_v2  ;;  %v3412_v2 = vld [vmem:[%s4627_s1 + $0x70] sm:$0xff]  ;;  %v3122_v58 = vpop.f32.mrf.mxu1 }
 0xa1c   : > { %v1861_v26 = vadd.f32 %v1859_v11, %v1853_v41 }
 0xa1d   : > { %v1865_v17 = vpop.permute.xlu1 %1864  ;;  %v1860_v54 = vadd.f32 %v1858_v5, %v1852_v57  ;;  %v4325_v39 = vpop.f32.mrf.mxu1 }
 0xa1e   : > { %v1863_v28 = vpop.permute.xlu0 %1862  ;;  %v1867_v18 = vmul.f32 %v1865_v17, %v3957_v50  ;;  %v3414_v50 = vld [vmem:[%s4627_s1 + $0x60] sm:$0xff] }
 0xa1f   : > { %v1866_v30 = vmul.f32 %v1863_v28, %v3953_v48  ;;  %v3413_v48 = vld [vmem:[%s4627_s1 + $0x68] sm:$0xff]  ;;  %v3123_v21 = vpop.f32.mrf.mxu1 }
 0xa20   : > { %v1869_v61 = vadd.f32 %v1867_v18, %v1861_v26 }
 0xa21   : > { %v1868_v9 = vadd.f32 %v1866_v30, %v1860_v54 }
 0xa23   : > { %v1984_v6 = vpack.c.bf16 %v1869_v61, %v1868_v9 }
 0xa25   : > { %3131 = vmatpush3.bf16.msra.mxu1 %v1984_v6 }
 0xa26   : > { %3142 = vmatprep.subr.mxu1 %v3411_v16 }
 0xa28   : > { %3133 = vmatmul.mubr.msk.bf16.vlgmr.msra.gmra.mxu1 %vm4689_vm1, %v3306_v31 }
 0xa29   : > { %3143 = vmatpush3.msra.mxu1 %v3411_v16 }
 0xa2a   : > { %3144 = vmatprep.subr.mxu1 %v3412_v2  ;;  %v1879_v46 = vpop.permute.xlu1 %1878 }
 0xa2b   : > { %3145 = vmatpush3.msra.mxu1 %v3412_v2  ;;  %v1875_v47 = vpop.permute.xlu0 %1874 }
 0xa2c   : > { %3146 = vmatprep.subr.mxu1 %v3413_v48 }
 0xa2d   : > { %3147 = vmatpush3.msra.mxu1 %v3413_v48 }
 0xa2e   : > { %3148 = vmatprep.subr.mxu1 %v3414_v50 }
 0xa2f   : > { %3149 = vmatpush3.msra.mxu1 %v3414_v50  ;;  %v1989_v55 = vpop.permute.xlu1 %1988 }
 0xa30   : > { %3150 = vmatprep.subr.mxu1 %v3415_v19  ;;  %v1993_v15 = vpop.permute.xlu0 %1992 }
 0xa31   : > { %3151 = vmatpush3.msra.mxu1 %v3415_v19 }
 0xa32   : > { %3152 = vmatprep.subr.mxu1 %v3416_v63 }
 0xa33   : > { %3153 = vmatpush3.msra.mxu1 %v3416_v63 }
 0xa34   : > { %3154 = vmatprep.subr.mxu1 %v3417_v35 }
 0xa35   : > { %3155 = vmatpush3.msra.mxu1 %v3417_v35 }
 0xa36   : > { %3156 = vmatprep.subr.mxu1 %v3418_v12 }
 0xa37   : > { %3157 = vmatpush3.msra.mxu1 %v3418_v12 }
 0xa38   : > { %3158 = vmatprep.subr.mxu1 %v3419_v49 }
 0xa39   : > { %3159 = vmatpush3.msra.mxu1 %v3419_v49 }
 0xa3a   : > { %3160 = vmatprep.subr.mxu1 %v3420_v51 }
 0xa3b   : > { %3161 = vmatpush3.msra.mxu1 %v3420_v51 }
 0xa3c   : > { %3162 = vmatprep.subr.mxu1 %v3421_v32 }
 0xa3d   : > { %3163 = vmatpush3.msra.mxu1 %v3421_v32 }
 0xa3e   : > { %3164 = vmatprep.subr.mxu1 %v3422_v20 }
 0xa3f   : > { %3165 = vmatpush3.msra.mxu1 %v3422_v20 }
 0xa40   : > { %3166 = vmatprep.subr.mxu1 %v3423_v34 }
 0xa41   : > { %3167 = vmatpush3.msra.mxu1 %v3423_v34 }
 0xa42   : > { %3168 = vmatprep.subr.mxu1 %v3424_v24 }
 0xa43   : > { %3169 = vmatpush3.msra.mxu1 %v3424_v24 }
 0xa44   : > { %3170 = vmatprep.subr.mxu1 %v3425_v13 }
 0xa45   : > { %3171 = vmatpush3.msra.mxu1 %v3425_v13 }
 0xa46   : > { %3172 = vmatprep.subr.mxu1 %v3426_v0 }
 0xa47   : > { %3173 = vmatpush3.msra.mxu1 %v3426_v0 }
 0xa48   : > { %3210 = vmatprep.subr.mxu1 %v4320_v14 }
 0xad4   : > { %v1923_v60 = vpop.f32.mrf.mxu1 }
 0xad5   : > { %v4327_v29 = vadd.f32 %v1923_v60, %v1875_v47 }
 0xad6   : > { %v3128_v45 = vpop.f32.mrf.mxu1 }
 0xad7   : > { %v4330_v33 = vmul.f32 0.70710677, %v4327_v29 }
 0xad8   : > { %v1926_v43 = vpop.f32.mrf.mxu1 }
 0xad9   : > { %v1938_v38 = vand.u32 2147483647, %v4330_v33  ;;  %v4333_v59 = vadd.f32 %v1926_v43, %v1879_v46  ;;  %vm1934_vm10 = vcmp.lt.f32.partialorder %v4330_v33, 0.0 }
 0xada   : > { %v3129_v25 = vpop.f32.mrf.mxu1 }
 0xadb   : > { %v1940_v37 = vmul.f32 0.3275911, %v1938_v38  ;;  %v4336_v56 = vmul.f32 0.70710677, %v4333_v59  ;;  %v1966_v2 = vsub.f32 0.0, %v1938_v38 }
 0xadd   : > { %v1942_v40 = vadd.f32 1.0, %v1940_v37  ;;  %v1939_v1 = vand.u32 2147483647, %v4336_v56  ;;  %v1968_v12 = vmul.f32 %v1966_v2, %v1938_v38  ;;  %vm1935_vm0 = vcmp.lt.f32.partialorder %v4336_v56, 0.0 }
 0xadf   : > { %3355 = vrcp.f32 %v1942_v40  ;;  %v1941_v62 = vmul.f32 0.3275911, %v1939_v1  ;;  %v1967_v50 = vsub.f32 0.0, %v1939_v1  ;;  %v1970_v34 = vmul.f32 1.442695, %v1968_v12 }
 0xae1   : > { %v1943_v44 = vadd.f32 1.0, %v1941_v62  ;;  %v1969_v51 = vmul.f32 %v1967_v50, %v1939_v1 }
 0xae3   : > { %3357 = vrcp.f32 %v1943_v44  ;;  %v1972_v13 = vmul.f32 1.442695, %v1969_v51 }
 0xae8   : > { %v2037_v4 = vpop.f32.mrf.mxu1 }
 0xae9   : > { %v4339_v10 = vadd.f32 %v2037_v4, %v1989_v55 }
 0xaea   : > { %v3134_v52 = vpop.f32.mrf.mxu1 }
 0xaeb   : > { %v4342_v53 = vmul.f32 0.70710677, %v4339_v10 }
 0xaec   : > { %v3356_v27 = vpop.eup %3355  ;;  %v2040_v41 = vpop.f32.mrf.mxu1 }
 0xaed   : > { %v1948_v11 = vmul.f32 1.0614054, %v3356_v27  ;;  %v2052_v57 = vand.u32 2147483647, %v4342_v53  ;;  %v4345_v5 = vadd.f32 %v2040_v41, %v1993_v15  ;;  %vm2048_vm12 = vcmp.lt.f32.partialorder %v4342_v53, 0.0 }
 0xaee   : > { %v3135_v17 = vpop.f32.mrf.mxu1  ;;  %v2050_v12 = vsel %vm2048_vm12, -1.0, %v4683_v7 }
 0xaef   : > { %v2054_v26 = vmul.f32 0.3275911, %v2052_v57  ;;  %v1950_v18 = vadd.f32 -1.4531521, %v1948_v11  ;;  %v4348_v54 = vmul.f32 0.70710677, %v4345_v5 }
 0xaf0   : > { %v3358_v28 = vpop.eup %3357  ;;  %v2080_v49 = vsub.f32 0.0, %v2052_v57 }
 0xaf1   : > { %v1949_v30 = vmul.f32 1.0614054, %v3358_v28  ;;  %v2056_v61 = vadd.f32 1.0, %v2054_v26  ;;  %v2053_v9 = vand.u32 2147483647, %v4348_v54  ;;  %v1952_v31 = vmul.f32 %v3356_v27, %v1950_v18 }
 0xaf2   : > { %v2082_v24 = vmul.f32 %v2080_v49, %v2052_v57  ;;  %vm2049_vm14 = vcmp.lt.f32.partialorder %v4348_v54, 0.0 }
 0xaf3   : > { %v1951_v6 = vadd.f32 -1.4531521, %v1949_v30  ;;  %3359 = vrcp.f32 %v2056_v61  ;;  %v2055_v16 = vmul.f32 0.3275911, %v2053_v9  ;;  %v1954_v63 = vadd.f32 1.4214138, %v1952_v31 }
 0xaf4   : > { %v2081_v0 = vsub.f32 0.0, %v2053_v9  ;;  %v2084_v60 = vmul.f32 1.442695, %v2082_v24  ;;  %v2051_v56 = vsel %vm2049_vm14, -1.0, %v4683_v7 }
 0xaf5   : > { %v1953_v48 = vmul.f32 %v3358_v28, %v1951_v6  ;;  %v2057_v19 = vadd.f32 1.0, %v2055_v16  ;;  %v1956_v32 = vmul.f32 %v3356_v27, %v1954_v63 }
 0xaf6   : > { %v2083_v45 = vmul.f32 %v2081_v0, %v2053_v9 }
 0xaf7   : > { %v1955_v35 = vadd.f32 1.4214138, %v1953_v48  ;;  %3361 = vrcp.f32 %v2057_v19  ;;  %v1958_v21 = vadd.f32 -0.28449672, %v1956_v32  ;;  %v1936_v32 = vsel %vm1934_vm10, -1.0, %v4683_v7 }
 0xaf8   : > { %3363 = vpow2.f32 %v1970_v34  ;;  %v2086_v1 = vmul.f32 1.442695, %v2083_v45  ;;  %v1931_v45 = vmul.f32 0.5, %v4333_v59 }
 0xaf9   : > { %v1957_v20 = vmul.f32 %v3358_v28, %v1955_v35  ;;  %3365 = vpow2.f32 %v1972_v13  ;;  %v1960_v43 = vmul.f32 %v3356_v27, %v1958_v21 }
 0xafa   : > { %3367 = vpow2.f32 %v2084_v60  ;;  %v1930_v60 = vmul.f32 0.5, %v4327_v29  ;;  %v3472_v29 = vmov 4  }
 0xafb   : > { %v1959_v36 = vadd.f32 -0.28449672, %v1957_v20  ;;  %v1962_v44 = vadd.f32 0.2548296, %v1960_v43  ;;  %3369 = vpow2.f32 %v2086_v1  ;;  %v1937_v20 = vsel %vm1935_vm0, -1.0, %v4683_v7 }
 0xafc   : > { %v2045_v43 = vmul.f32 0.5, %v4345_v5 }
 0xafd   : > { %v1961_v25 = vmul.f32 %v3358_v28, %v1959_v36  ;;  %v1964_v11 = vmul.f32 %v3356_v27, %v1962_v44  ;;  %v2044_v36 = vmul.f32 0.5, %v4339_v10  ;;  %v3471_v44 = vmov 15  }
 0xaff   : > { %v1963_v55 = vadd.f32 0.2548296, %v1961_v25 }
 0xb00   : > { %v3360_v58 = vpop.eup %3359 }
 0xb01   : > { %v2062_v47 = vmul.f32 1.0614054, %v3360_v58  ;;  %v1965_v57 = vmul.f32 %v3358_v28, %v1963_v55 }
 0xb03   : > { %v2064_v46 = vadd.f32 -1.4531521, %v2062_v47 }
 0xb04   : > { %v3362_v38 = vpop.eup %3361 }
 0xb05   : > { %v2066_v37 = vmul.f32 %v3360_v58, %v2064_v46  ;;  %v2063_v40 = vmul.f32 1.0614054, %v3362_v38  ;;  %v3364_v18 = vpop.eup %3363 }
 0xb06   : > { %v3366_v61 = vpop.eup %3365  ;;  %v1974_v6 = vmul.f32 %v3364_v18, %v1964_v11 }
 0xb07   : > { %v2068_v62 = vadd.f32 1.4214138, %v2066_v37  ;;  %v2065_v4 = vadd.f32 -1.4531521, %v2063_v40  ;;  %v1975_v31 = vmul.f32 %v3366_v61, %v1965_v57  ;;  %v3368_v48 = vpop.eup %3367  ;;  %v4690_v61 = vmov 0  }
 0xb08   : > { %v1976_v63 = vsub.f32 1.0, %v1974_v6  ;;  %v3370_v51 = vpop.eup %3369 }
 0xb09   : > { %v2070_v52 = vmul.f32 %v3360_v58, %v2068_v62  ;;  %v2067_v15 = vmul.f32 %v3362_v38, %v2065_v4  ;;  %v1977_v27 = vsub.f32 1.0, %v1975_v31 }
 0xb0a   : > { %v1978_v24 = vmul.f32 %v1976_v63, %v1936_v32 }
 0xb0b   : > { %v2072_v41 = vadd.f32 -0.28449672, %v2070_v52  ;;  %v2069_v17 = vadd.f32 1.4214138, %v2067_v15  ;;  %v1979_v33 = vmul.f32 %v1977_v27, %v1937_v20 }
 0xb0d   : > { %v2074_v26 = vmul.f32 %v3360_v58, %v2072_v41  ;;  %v2071_v30 = vmul.f32 %v3362_v38, %v2069_v17  ;;  %v1981_v21 = vadd.f32 1.0, %v1979_v33 }
 0xb0f   : > { %v2076_v9 = vadd.f32 0.2548296, %v2074_v26  ;;  %v2073_v16 = vadd.f32 -0.28449672, %v2071_v30  ;;  %v1983_v54 = vmul.f32 %v1981_v21, %v1931_v45 }
 0xb11   : > { %v2078_v2 = vmul.f32 %v3360_v58, %v2076_v9  ;;  %v2075_v50 = vmul.f32 %v3362_v38, %v2073_v16  ;;  %v1980_v58 = vadd.f32 1.0, %v1978_v24  ;;  %v3473_v9 = vmov 11  }
 0xb13   : > { %v2088_v19 = vmul.f32 %v3368_v48, %v2078_v2  ;;  %v2077_v28 = vadd.f32 0.2548296, %v2075_v50 }
 0xb15   : > { %v2090_v35 = vsub.f32 1.0, %v2088_v19  ;;  %v2079_v49 = vmul.f32 %v3362_v38, %v2077_v28  ;;  %v1982_v38 = vmul.f32 %v1980_v58, %v1930_v60 }
 0xb17   : > { %v2092_v34 = vmul.f32 %v2090_v35, %v2050_v12  ;;  %v2089_v53 = vmul.f32 %v3370_v51, %v2079_v49 }
 0xb19   : > { %v2094_v13 = vadd.f32 1.0, %v2092_v34  ;;  %v2091_v0 = vsub.f32 1.0, %v2089_v53 }
 0xb1b   : > { %v2093_v47 = vmul.f32 %v2091_v0, %v2051_v56  ;;  %v2096_v46 = vmul.f32 %v2094_v13, %v2044_v36  ;;  %v3307_v13 = vld [vmem:[%s4636_s10] sm:$0xff]  }
 0xb1d   : > { %v2095_v25 = vadd.f32 1.0, %v2093_v47  ;;  %v2098_v40 = vadd.f32 %v2096_v46, %v1982_v38  ;;  %v3428_v47 = vld [vmem:[%s3586_s20] sm:$0xff] }
 0xb1f   : > { %v2097_v37 = vmul.f32 %v2095_v25, %v2045_v43 }
 0xb21   : > { %v2099_v1 = vadd.f32 %v2097_v37, %v1983_v54  ;;  %v3429_v37 = vld [vmem:[%s3586_s20 + $0x8] sm:$0xff] }
 0xb23   : > { %v2100_v62 = vadd.f32 %v2099_v1, %v2098_v40 }
 0xb25   : > { %2101 = vadd.xlane.f32.xlu1 %v2100_v62 }
 0xb36   : > { %2137 = vperm.xlu1 %3288, %v4152_v23  }
 0xb3a   : > { %3289 = vset.pattern.permute.xlu1 %v3471_v44 }
 0xb3b   : > { %2143 = vperm.xlu1 %3289, %v4158_v3  }
 0xb3f   : > { %2147 = vperm.xlu1 %3289, %v4152_v23  }
 0xb43   : > { %3290 = vset.pattern.permute.xlu1 %v3472_v29 }
 0xb44   : > { %1614 = vperm.xlu1 %3290, %v4158_v3  }
 0xb48   : > { %1618 = vperm.xlu1 %3290, %v4152_v23  }
 0xb4c   : > { %3291 = vset.pattern.permute.xlu1 %v3473_v9 }
 0xb4d   : > { %2156 = vperm.xlu1 %3291, %v4158_v3  }
 0xb51   : > { %2160 = vperm.xlu1 %3291, %v4152_v23  }
 0xb55   : > { %3292 = vset.pattern.permute.xlu1 %v4690_v61 }
 0xbae   : > { %v2102_v59 = vpop.xlane.xlu1 %2101 }
 0xbaf   : > { %v2103_v10 = vrot.slane %v2102_v59, 4 }
 0xbb1   : > { %v2104_v5 = vadd.f32 %v2103_v10, %v2102_v59 }
 0xbb2   : > { %v2138_v35 = vpop.permute.xlu1 %2137 }
 0xbb3   : > { %v2105_v55 = vrot.slane %v2104_v5, 2 }
 0xbb5   : > { %v2106_v4 = vadd.f32 %v2105_v55, %v2104_v5  ;;  %v2441_v55 = vld [vmem:[%s4639_s13 + $0x30] sm:$0xff] }
 0xbb6   : > { %v2144_v12 = vpop.permute.xlu1 %2143  ;;  %2475 = vperm.xlu1 %3292, %v2441_v55  }
 0xbb7   : > { %v2107_v52 = vrot.slane %v2106_v4, 1 }
 0xbb9   : > { %v2108_v15 = vadd.f32 %v2107_v52, %v2106_v4  ;;  %v2442_v4 = vld [vmem:[%s4639_s13 + $0x38] sm:$0xff]  ;;  %v2439_v52 = vld [vmem:[%s4639_s13 + $0x20] sm:$0xff] }
 0xbba   : > { %v2148_v34 = vpop.permute.xlu1 %2147  ;;  %2465 = vperm.xlu1 %3292, %v2439_v52  }
 0xbbb   : > { %3224 = vpush %v2108_v15  ;;  %v2437_v15 = vld [vmem:[%s4639_s13 + $0x10] sm:$0xff] }
 0xbbf   : > { %v1615_v0 = vpop.permute.xlu1 %1614 }
 0xbc0   : > { %v1664_v58 = vadd.f32 %v4323_v22, %v1615_v0  ;;  %v3309_v0 = vld [vmem:[%s4638_s12 + $0x8] sm:$0xff]  }
 0xbc2   : > { %v2212_v60 = vadd.f32 %v3428_v47, %v1664_v58  ;;  %v3474_v58 = vmov 16  }
 0xbc3   : > { %v1619_v56 = vpop.permute.xlu1 %1618 }
 0xbc4   : > { %v1667_v45 = vadd.f32 %v4325_v39, %v1619_v56  ;;  %v3311_v56 = vld [vmem:[%s4638_s12 + $0x18] sm:$0xff]  }
 0xbc8   : > { %v2157_v21 = vpop.permute.xlu1 %2156 }
 0xbcc   : > { %v2161_v54 = vpop.permute.xlu1 %2160 }
 0xbec   : > { %s3225_s30 = spop %3224 }
 0xbed   : > { %v2110_v41 = vstv %s3225_s30  ;;  %s494_s30 = scalar_lea.vmem %s4641_s15, %s4700_s26 }
 0xbee   : > { %v2111_v11 = vmul.f32 0.00048828125, %v2110_v41  ;;  %v2440_v41 = vld [vmem:[%s4639_s13 + $0x28] sm:$0xff] }
 0xbef   : > { %2470 = vperm.xlu1 %3292, %v2440_v41  }
 0xbf0   : > { %v2112_v57 = vsub.f32 %v2098_v40, %v2111_v11  ;;  %v2113_v17 = vsub.f32 %v2099_v1, %v2111_v11  ;;  %v2213_v40 = vadd.f32 %v3429_v37, %v1667_v45  ;;  %v2435_v11 = vld [vmem:[%s4639_s13] sm:$0xff] }
 0xbf2   : > { %v2114_v26 = vmul.f32 %v2112_v57, %v2112_v57  ;;  %v2115_v18 = vmul.f32 %v2113_v17, %v2113_v17 }
 0xbf4   : > { %v2116_v30 = vadd.f32 %v2115_v18, %v2114_v26 }
 0xbf6   : > { %2117 = vadd.xlane.f32.xlu0 %v2116_v30 }
 0xc0c   : > { %2133 = vperm.xlu0 %3287, %v4158_v3  }
 0xc10   : > { %3293 = vset.pattern.permute.xlu0 %v4690_v61 }
 0xc11   : > { %2480 = vperm.xlu0 %3293, %v2442_v4  }
 0xc15   : > { %2455 = vperm.xlu0 %3293, %v2437_v15  }
 0xc19   : > { %2445 = vperm.xlu0 %3293, %v2435_v11  }
 0xc1d   : > { %3294 = vset.pattern.permute.xlu0 %v3474_v58 }
 0xc31   : > { %v2476_v47 = vpop.permute.xlu1 %2475 }
 0xc7f   : > { %v2118_v6 = vpop.xlane.xlu0 %2117 }
 0xc80   : > { %v2119_v31 = vrot.slane %v2118_v6, 4 }
 0xc82   : > { %v2120_v16 = vadd.f32 %v2119_v31, %v2118_v6 }
 0xc84   : > { %v2121_v2 = vrot.slane %v2120_v16, 2 }
 0xc86   : > { %v2122_v48 = vadd.f32 %v2121_v2, %v2120_v16 }
 0xc87   : > { %v2134_v49 = vpop.permute.xlu0 %2133 }
 0xc88   : > { %v2123_v50 = vrot.slane %v2122_v48, 1 }
 0xc8a   : > { %v2124_v19 = vadd.f32 %v2123_v50, %v2122_v48 }
 0xc8c   : > { %3226 = vpush %v2124_v19  ;;  %v2481_v45 = vpop.permute.xlu0 %2480 }
 0xcbd   : > { %s3227_s17 = spop %3226 }
 0xcbe   : > { %v2126_v63 = vstv %s3227_s17 }
 0xcbf   : > { %v2127_v27 = vmul.f32 0.00048828125, %v2126_v63  ;;  %v2416_v63 = vsub.s32 2, %v3654_v42 }
 0xcc1   : > { %v2128_v28 = vadd.f32 1e-05, %v2127_v27 }
 0xcc3   : > { %3371 = vrsqrt.f32 %v2128_v28  ;;  %v3430_v28 = vld [vmem:[%s4629_s3] sm:$0xf] }
 0xcd0   : > { %v3372_v3 = vpop.eup %3371 }
 0xcd1   : > { %v2130_v23 = vmul.f32 %v3372_v3, %v2112_v57  ;;  %v2131_v51 = vmul.f32 %v3372_v3, %v2113_v17  ;;  %v2438_v57 = vld [vmem:[%s4639_s13 + $0x18] sm:$0xff]  ;;  %v2436_v17 = vld [vmem:[%s4639_s13 + $0x8] sm:$0xff] }
 0xcd2   : > { %2460 = vperm.xlu1 %3292, %v2438_v57  }
 0xcd3   : > { %v2140_v32 = vmul.f32 %v2134_v49, %v2130_v23  ;;  %v2141_v20 = vmul.f32 %v2138_v35, %v2131_v51  ;;  %v2417_v35 = vrot.slane %v3430_v28, %v2416_v63 }
 0xcd5   : > { %v2150_v24 = vadd.f32 %v2144_v12, %v2140_v32  ;;  %v2151_v33 = vadd.f32 %v2148_v34, %v2141_v20  ;;  %v2422_v12 = vsub.s32 3, %v3654_v42  ;;  %v3310_v42 = vld [vmem:[%s4638_s12 + $0x10] sm:$0xff]  }
 0xcd6   : > { %2450 = vperm.xlu1 %3292, %v2436_v17  }
 0xcd7   : > { %v2154_v53 = vpack.c.bf16 %v2151_v33, %v2150_v24  ;;  %v2423_v34 = vrot.slane %v3430_v28, %v2422_v12 }
 0xcd9   : > { %3137 = vmatpush3.bf16.msra.mxu0 %v2154_v53 }
 0xcda   : > { %3180 = vmatprep.subr.mxu0 %v4320_v14  ;;  %3295 = vset.pattern.permute.xlu1 %v3474_v58 }
 0xcdc   : > { %3139 = vmatmul.mubr.msk.bf16.vlgmr.msra.gmra.mxu0 %vm4691_vm8, %v3307_v13 }
 0xcdd   : > { %3181 = vmatpush3.msra.mxu0 %v4320_v14 }
 0xd9c   : > { %v2205_v36 = vpop.f32.mrf.mxu0 }
 0xd9d   : > { %v2206_v46 = vadd.f32 %v2205_v36, %v2157_v21  ;;  %v3431_v21 = vld [vmem:[%s4637_s11] sm:$0xff]  ;;  %v3432_v36 = vld [vmem:[%s4637_s11 + $0x8] sm:$0xff] }
 0xd9e   : > { %v3140_v43 = vpop.f32.mrf.mxu0  ;;  %2803 = vperm.xlu0 %3294, %v3431_v21   ;;  %2807 = vperm.xlu1 %3295, %v3432_v36  }
 0xd9f   : > { %v4382_v25 = vadd.f32 %v2212_v60, %v2206_v46  ;;  %v2466_v60 = vpop.permute.xlu1 %2465  ;;  %v2456_v43 = vpop.permute.xlu0 %2455 }
 0xda0   : > { %v2208_v38 = vpop.f32.mrf.mxu0 }
 0xda1   : > { %v2209_v1 = vadd.f32 %v2208_v38, %v2161_v54  ;;  %3174 = vmatprep.mubr.f32.mxu1 %v4382_v25  ;;  %v2216_v22 = vmul.f32 %v4382_v25, %v4382_v25 }
 0xda2   : > { %v3141_v62 = vpop.f32.mrf.mxu0 }
 0xda3   : > { %v4386_v44 = vadd.f32 %v2213_v40, %v2209_v1  ;;  %v2471_v46 = vpop.permute.xlu1 %2470  ;;  %v2446_v37 = vpop.permute.xlu0 %2445 }
 0xda5   : > { %3175 = vmatmul.mubr.f32.vlgmr.msra.gmra.mxu1 %v4386_v44  ;;  %v2217_v39 = vmul.f32 %v4386_v44, %v4386_v44 }
 0xda6   : > { %3177 = vmatprep.mubr.f32.mxu1 %v2216_v22  ;;  %3211 = vmatpush3.msra.mxu1 %v4320_v14  ;;  %v3308_v14 = vld [vmem:[%s4638_s12] sm:$0xff]  }
 0xda7   : > { %v2461_v38 = vpop.permute.xlu1 %2460 }
 0xda9   : > { %3178 = vmatmul.mubr.f32.gmra.mxu1 %v2217_v39 }
 0xe65   : > { %v3176_v29 = vpop.f32.mrf.mxu1 }
 0xe67   : > { %v2284_v59 = vpop.f32.mrf.mxu1 }
 0xe68   : > { %3182 = vmatprep.mubr.msk.f32.mxu0 %vm4692_vm4, %v2284_v59  ;;  %vm2815_vm4 = vcmask 523264  }
 0xe69   : > { %v3179_v10 = vpop.f32.mrf.mxu1  ;;  %3183 = vmatmul.mubr.msk.f32.vlgmr.msra.gmra.mxu0 %vm4693_vm9, %v3176_v29 }
 0xe6a   : > { %3190 = vmatprep.mubr.msk.bf16.mxu0 %vm4696_vm15, %v3308_v14 }
 0xe6b   : > { %v2294_v5 = vpop.f32.mrf.mxu1 }
 0xe6c   : > { %3185 = vmatprep.mubr.msk.f32.mxu1 %vm4694_vm13, %v2294_v5 }
 0xe6d   : > { %3186 = vmatmul.mubr.msk.f32.vlgmr.msra.gmra.mxu1 %vm4695_vm11, %v3179_v10  ;;  %v2451_v10 = vpop.permute.xlu1 %2450 }
 0xf29   : > { %v3184_v26 = vpop.f32.mrf.mxu0 }
 0xf2a   : > { %v2401_v30 = vmul.f32 %v3184_v26, %v3184_v26  ;;  %v2407_v27 = vsub.f32 %v4386_v44, %v3184_v26 }
 0xf2b   : > { %v2381_v18 = vpop.f32.mrf.mxu0 }
 0xf2c   : > { %v2400_v9 = vmul.f32 %v2381_v18, %v2381_v18  ;;  %v2406_v49 = vsub.f32 %v4382_v25, %v2381_v18 }
 0xf2d   : > { %v3187_v61 = vpop.f32.mrf.mxu1 }
 0xf2e   : > { %v2403_v6 = vsub.f32 %v3187_v61, %v2401_v30 }
 0xf2f   : > { %v2391_v31 = vpop.f32.mrf.mxu1 }
 0xf30   : > { %v2405_v16 = vmax.f32 %v2403_v6, 0.0  ;;  %v2402_v2 = vsub.f32 %v2391_v31, %v2400_v9 }
 0xf32   : > { %v2409_v48 = vadd.f32 1e-05, %v2405_v16  ;;  %v2404_v50 = vmax.f32 %v2402_v2, 0.0 }
 0xf34   : > { %3373 = vrsqrt.f32 %v2409_v48  ;;  %v2408_v19 = vadd.f32 1e-05, %v2404_v50 }
 0xf36   : > { %3375 = vrsqrt.f32 %v2408_v19 }
 0xf41   : > { %v3374_v3 = vpop.eup %3373 }
 0xf42   : > { %v2413_v23 = vmul.f32 %v3374_v3, %v2407_v27 }
 0xf43   : > { %v3376_v51 = vpop.eup %3375 }
 0xf44   : > { %v2412_v32 = vmul.f32 %v3376_v51, %v2406_v49  ;;  %v2419_v20 = vmul.f32 %v2417_v35, %v2413_v23 }
 0xf46   : > { %v2418_v24 = vmul.f32 %v2417_v35, %v2412_v32  ;;  %v2425_v53 = vadd.f32 %v2423_v34, %v2419_v20 }
 0xf48   : > { %v2424_v33 = vadd.f32 %v2423_v34, %v2418_v24 }
 0xf4a   : > { %v2434_v13 = vpack.c.bf16 %v2425_v53, %v2424_v33 }
 0xf4c   : > { %3188 = vmatprep.subr.bf16.mxu0 %v2434_v13 }
 0xf4d   : > { %3189 = vmatpush3.bf16.msra.mxu0 %v2434_v13 }
 0xf4e   : > { %3198 = vmatprep.subr.bf16.mxu0 %v3456_v8 }
 0xf50   : > { %3191 = vmatmul.mubr.msk.bf16.vlgmr.msra.gmra.mxu0 %vm4697_vm2, %v3309_v0 }
 0xf51   : > { %3194 = vmatprep.mubr.msk.bf16.mxu0 %vm4698_vm3, %v3310_v42 }
 0xf58   : > { %3195 = vmatmul.mubr.msk.bf16.gmra.mxu0 %vm4699_vm6, %v3311_v56 }
 0xf59   : > { %3206 = vmatprep.mubr.msk.bf16.mxu0 %vm3467_vm5, %v3456_v8 }
0x1010   : > { %v3192_v54 = vpop.f32.mrf.mxu0 }
0x1011   : > { %v4454_v40 = vadd.f32 %v3192_v54, %v2456_v43 }
0x1012   : > { %v2549_v1 = vpop.f32.mrf.mxu0 }
0x1013   : > { %v4457_v62 = vmul.f32 0.70710677, %v4454_v40  ;;  %v4459_v22 = vadd.f32 %v2549_v1, %v2446_v37 }
0x1014   : > { %v3193_v39 = vpop.f32.mrf.mxu0 }
0x1015   : > { %v4462_v29 = vand.u32 2147483647, %v4457_v62  ;;  %v4465_v59 = vmul.f32 0.70710677, %v4459_v22  ;;  %v4467_v5 = vadd.f32 %v3193_v39, %v2461_v38  ;;  %vm2598_vm7 = vcmp.lt.f32.partialorder %v4457_v62, 0.0 }
0x1016   : > { %v2552_v14 = vpop.f32.mrf.mxu0 }
0x1017   : > { %v2622_v55 = vmul.f32 0.3275911, %v4462_v29  ;;  %v4471_v4 = vand.u32 2147483647, %v4465_v59  ;;  %v4474_v52 = vmul.f32 0.70710677, %v4467_v5  ;;  %v4476_v15 = vadd.f32 %v2552_v14, %v2451_v10 }
0x1018   : > { %v3196_v41 = vpop.f32.mrf.mxu0  ;;  %vm2596_vm8 = vcmp.lt.f32.partialorder %v4465_v59, 0.0 }
0x1019   : > { %v2630_v11 = vadd.f32 1.0, %v2622_v55  ;;  %v2620_v57 = vmul.f32 0.3275911, %v4471_v4  ;;  %v4480_v17 = vand.u32 2147483647, %v4474_v52  ;;  %v4489_v31 = vadd.f32 %v3196_v41, %v2476_v47 }
0x101a   : > { %v4483_v26 = vmul.f32 0.70710677, %v4476_v15  ;;  %v2565_v18 = vpop.f32.mrf.mxu0  ;;  %v2726_v47 = vsub.f32 0.0, %v4462_v29  ;;  %v2724_v38 = vsub.f32 0.0, %v4471_v4  ;;  %vm2599_vm1 = vcmp.lt.f32.partialorder %v4474_v52, 0.0 }
0x101b   : > { %3377 = vrcp.f32 %v2630_v11  ;;  %v2628_v30 = vadd.f32 1.0, %v2620_v57  ;;  %v2623_v61 = vmul.f32 0.3275911, %v4480_v17  ;;  %v4492_v48 = vadd.f32 %v2565_v18, %v2466_v60 }
0x101c   : > { %v4487_v9 = vand.u32 2147483647, %v4483_v26  ;;  %v3197_v16 = vpop.f32.mrf.mxu0  ;;  %v4495_v50 = vmul.f32 0.70710677, %v4489_v31  ;;  %v2727_v39 = vsub.f32 0.0, %v4480_v17  ;;  %v2734_v10 = vmul.f32 %v2726_v47, %v4462_v29 }
0x101d   : > { %3379 = vrcp.f32 %v2628_v30  ;;  %v2631_v6 = vadd.f32 1.0, %v2623_v61  ;;  %v4498_v63 = vmul.f32 0.70710677, %v4492_v48  ;;  %v4501_v28 = vadd.f32 %v3197_v16, %v2481_v45 }
0x101e   : > { %v2621_v2 = vmul.f32 0.3275911, %v4487_v9  ;;  %v2618_v27 = vand.u32 2147483647, %v4495_v50  ;;  %v2568_v35 = vpop.f32.mrf.mxu0  ;;  %v2732_v30 = vmul.f32 %v2724_v38, %v4471_v4  ;;  %v2744_v29 = vmul.f32 1.442695, %v2734_v10 }
0x101f   : > { %3381 = vrcp.f32 %v2631_v6  ;;  %v2616_v3 = vand.u32 2147483647, %v4498_v63  ;;  %v4505_v49 = vmul.f32 0.70710677, %v4501_v28  ;;  %v4507_v23 = vadd.f32 %v2568_v35, %v2471_v46 }
0x1020   : > { %v2629_v19 = vadd.f32 1.0, %v2621_v2  ;;  %v2626_v12 = vmul.f32 0.3275911, %v2618_v27  ;;  %v2730_v46 = vsub.f32 0.0, %v2618_v27  ;;  %v2735_v2 = vmul.f32 %v2727_v39, %v4480_v17 }
0x1021   : > { %v2624_v32 = vmul.f32 0.3275911, %v2616_v3  ;;  %v2619_v20 = vand.u32 2147483647, %v4505_v49  ;;  %v4511_v34 = vmul.f32 0.70710677, %v4507_v23 }
0x1022   : > { %3383 = vrcp.f32 %v2629_v19  ;;  %v2634_v51 = vadd.f32 1.0, %v2626_v12  ;;  %v2728_v41 = vsub.f32 0.0, %v2616_v3  ;;  %v2738_v57 = vmul.f32 %v2730_v46, %v2618_v27 }
0x1023   : > { %v2632_v33 = vadd.f32 1.0, %v2624_v32  ;;  %v2627_v13 = vmul.f32 0.3275911, %v2619_v20  ;;  %v2617_v0 = vand.u32 2147483647, %v4511_v34  ;;  %v2731_v18 = vsub.f32 0.0, %v2619_v20 }
0x1024   : > { %3385 = vrcp.f32 %v2634_v51  ;;  %v2725_v19 = vsub.f32 0.0, %v4487_v9  ;;  %v2736_v32 = vmul.f32 %v2728_v41, %v2616_v3  ;;  %v2746_v47 = vmul.f32 1.442695, %v2735_v2 }
0x1025   : > { %3387 = vrcp.f32 %v2632_v33  ;;  %v2635_v56 = vadd.f32 1.0, %v2627_v13  ;;  %v2625_v21 = vmul.f32 0.3275911, %v2617_v0  ;;  %v2752_v33 = vmul.f32 1.442695, %v2738_v57 }
0x1026   : > { %v2729_v4 = vsub.f32 0.0, %v2617_v0  ;;  %v2740_v13 = vmul.f32 1.442695, %v2732_v30  ;;  %vm2602_vm5 = vcmp.lt.f32.partialorder %v4495_v50, 0.0  ;;  %vm2600_vm10 = vcmp.lt.f32.partialorder %v4498_v63, 0.0 }
0x1027   : > { %3389 = vrcp.f32 %v2635_v56  ;;  %v2633_v43 = vadd.f32 1.0, %v2625_v21  ;;  %vm2603_vm12 = vcmp.lt.f32.partialorder %v4505_v49, 0.0  ;;  %vm2601_vm0 = vcmp.lt.f32.partialorder %v4511_v34, 0.0 }
0x1028   : > { %v4513_v24 = vpop.eup %3377  ;;  %vm2597_vm14 = vcmp.lt.f32.partialorder %v4483_v26, 0.0  ;;  %v2609_v49 = vsel %vm2601_vm0, -1.0, %v4683_v7 }
0x1029   : > { %v2654_v53 = vmul.f32 1.0614054, %v4513_v24  ;;  %3391 = vrcp.f32 %v2633_v43  ;;  %v2748_v43 = vmul.f32 1.442695, %v2736_v32  ;;  %v2605_v26 = vsel %vm2597_vm14, -1.0, %v4683_v7 }
0x102a   : > { %v4517_v42 = vpop.eup %3379  ;;  %3393 = vpow2.f32 %v2744_v29 }
0x102b   : > { %v2662_v58 = vadd.f32 -1.4531521, %v2654_v53  ;;  %v2652_v60 = vmul.f32 1.0614054, %v4517_v42  ;;  %v2739_v53 = vmul.f32 %v2731_v18, %v2619_v20  ;;  %3395 = vpow2.f32 %v2752_v33 }
0x102c   : > { %v4519_v36 = vpop.eup %3381  ;;  %3397 = vpow2.f32 %v2746_v47 }
0x102d   : > { %v2655_v45 = vmul.f32 1.0614054, %v4519_v36  ;;  %v2670_v37 = vmul.f32 %v4513_v24, %v2662_v58  ;;  %v2660_v14 = vadd.f32 -1.4531521, %v2652_v60  ;;  %v2733_v60 = vmul.f32 %v2725_v19, %v4487_v9 }
0x102e   : > { %3399 = vpow2.f32 %v2748_v43 }
0x102f   : > { %v4525_v54 = vpop.eup %3383  ;;  %v2663_v1 = vadd.f32 -1.4531521, %v2655_v45  ;;  %v2678_v6 = vadd.f32 1.4214138, %v2670_v37  ;;  %v2668_v12 = vmul.f32 %v4517_v42, %v2660_v14  ;;  %v2754_v37 = vmul.f32 1.442695, %v2739_v53 }
0x1030   : > { %v2653_v55 = vmul.f32 1.0614054, %v4525_v54  ;;  %v2742_v41 = vmul.f32 1.442695, %v2733_v60 }
0x1031   : > { %v2671_v11 = vmul.f32 %v4519_v36, %v2663_v1  ;;  %v4535_v35 = vpop.eup %3385  ;;  %v2686_v21 = vmul.f32 %v4513_v24, %v2678_v6  ;;  %v2676_v46 = vadd.f32 1.4214138, %v2668_v12  ;;  %v2737_v1 = vmul.f32 %v2729_v4, %v2617_v0 }
0x1032   : > { %v2661_v61 = vadd.f32 -1.4531521, %v2653_v55  ;;  %v2658_v27 = vmul.f32 1.0614054, %v4535_v35  ;;  %v4541_v17 = vpop.eup %3387  ;;  %3401 = vpow2.f32 %v2754_v37 }
0x1033   : > { %v2679_v16 = vadd.f32 1.4214138, %v2671_v11  ;;  %v2656_v3 = vmul.f32 1.0614054, %v4541_v17  ;;  %v2694_v9 = vadd.f32 -0.28449672, %v2686_v21  ;;  %v2684_v18 = vmul.f32 %v4517_v42, %v2676_v46 }
0x1034   : > { %v2669_v51 = vmul.f32 %v4525_v54, %v2661_v61  ;;  %v2666_v45 = vadd.f32 -1.4531521, %v2658_v27  ;;  %v4546_v38 = vpop.eup %3389  ;;  %3403 = vpow2.f32 %v2740_v13 }
0x1035   : > { %v2687_v56 = vmul.f32 %v4519_v36, %v2679_v16  ;;  %v2664_v14 = vadd.f32 -1.4531521, %v2656_v3  ;;  %v2659_v55 = vmul.f32 1.0614054, %v4546_v38  ;;  %v2750_v16 = vmul.f32 1.442695, %v2737_v1 }
0x1036   : > { %v2677_v58 = vadd.f32 1.4214138, %v2669_v51  ;;  %v2674_v20 = vmul.f32 %v4535_v35, %v2666_v45  ;;  %v4551_v57 = vpop.eup %3391  ;;  %v2702_v51 = vmul.f32 %v4513_v24, %v2694_v9  ;;  %v2692_v33 = vadd.f32 -0.28449672, %v2684_v18 }
0x1037   : > { %v2695_v39 = vadd.f32 -0.28449672, %v2687_v56  ;;  %v2672_v30 = vmul.f32 %v4541_v17, %v2664_v14  ;;  %v2667_v61 = vadd.f32 -1.4531521, %v2659_v55  ;;  %v2657_v6 = vmul.f32 1.0614054, %v4551_v57  ;;  %v3394_v1 = vpop.eup %3393 }
0x1038   : > { %v2685_v10 = vmul.f32 %v4525_v54, %v2677_v58  ;;  %v2682_v11 = vadd.f32 1.4214138, %v2674_v20  ;;  %3405 = vpow2.f32 %v2742_v41  ;;  %v2710_v46 = vadd.f32 0.2548296, %v2702_v51  ;;  %v3396_v14 = vpop.eup %3395 }
0x1039   : > { %v2703_v2 = vmul.f32 %v4519_v36, %v2695_v39  ;;  %v2680_v29 = vadd.f32 1.4214138, %v2672_v30  ;;  %v2675_v12 = vmul.f32 %v4546_v38, %v2667_v61  ;;  %v2665_v27 = vadd.f32 -1.4531521, %v2657_v6 }
0x103a   : > { %v2690_v0 = vmul.f32 %v4535_v35, %v2682_v11  ;;  %v2693_v19 = vadd.f32 -0.28449672, %v2685_v10  ;;  %3407 = vpow2.f32 %v2750_v16  ;;  %v2700_v43 = vmul.f32 %v4517_v42, %v2692_v33 }
0x103b   : > { %v2688_v53 = vmul.f32 %v4541_v17, %v2680_v29  ;;  %v2683_v4 = vadd.f32 1.4214138, %v2675_v12  ;;  %v2673_v58 = vmul.f32 %v4551_v57, %v2665_v27  ;;  %v2711_v21 = vadd.f32 0.2548296, %v2703_v2 }
0x103c   : > { %v2698_v32 = vadd.f32 -0.28449672, %v2690_v0  ;;  %v2701_v47 = vmul.f32 %v4525_v54, %v2693_v19  ;;  %v2718_v18 = vmul.f32 %v4513_v24, %v2710_v46  ;;  %v3398_v0 = vpop.eup %3397  ;;  %v2708_v6 = vadd.f32 0.2548296, %v2700_v43 }
0x103d   : > { %v2696_v60 = vadd.f32 -0.28449672, %v2688_v53  ;;  %v2691_v45 = vmul.f32 %v4546_v38, %v2683_v4  ;;  %v2681_v3 = vadd.f32 1.4214138, %v2673_v58  ;;  %v2719_v55 = vmul.f32 %v4519_v36, %v2711_v21  ;;  %v3400_v2 = vpop.eup %3399 }
0x103e   : > { %v2706_v56 = vmul.f32 %v4535_v35, %v2698_v32  ;;  %v2709_v9 = vadd.f32 0.2548296, %v2701_v47  ;;  %v2610_v36 = vsel %vm2602_vm5, -1.0, %v4683_v7  ;;  %v2758_v33 = vmul.f32 %v3394_v1, %v2718_v18 }
0x103f   : > { %v2704_v20 = vmul.f32 %v4541_v17, %v2696_v60  ;;  %v2699_v37 = vadd.f32 -0.28449672, %v2691_v45  ;;  %v2689_v10 = vmul.f32 %v4551_v57, %v2681_v3  ;;  %v3402_v24 = vpop.eup %3401  ;;  %v2759_v12 = vmul.f32 %v3398_v0, %v2719_v55 }
0x1040   : > { %v2714_v13 = vadd.f32 0.2548296, %v2706_v56  ;;  %v2717_v51 = vmul.f32 %v4525_v54, %v2709_v9  ;;  %v2716_v50 = vmul.f32 %v4517_v42, %v2708_v6  ;;  %v2606_v54 = vsel %vm2598_vm7, -1.0, %v4683_v7 }
0x1041   : > { %v2712_v41 = vadd.f32 0.2548296, %v2704_v20  ;;  %v2707_v11 = vmul.f32 %v4546_v38, %v2699_v37  ;;  %v2697_v61 = vadd.f32 -0.28449672, %v2689_v10  ;;  %v3404_v53 = vpop.eup %3403  ;;  %v2767_v60 = vsub.f32 1.0, %v2759_v12 }
0x1042   : > { %v2722_v39 = vmul.f32 %v4535_v35, %v2714_v13  ;;  %v2608_v46 = vsel %vm2600_vm10, -1.0, %v4683_v7  ;;  %v2766_v13 = vsub.f32 1.0, %v2758_v33  ;;  %v2611_v3 = vsel %vm2603_vm12, -1.0, %v4683_v7 }
0x1043   : > { %v2720_v16 = vmul.f32 %v4541_v17, %v2712_v41  ;;  %v2715_v35 = vadd.f32 0.2548296, %v2707_v11  ;;  %v2705_v29 = vmul.f32 %v4551_v57, %v2697_v61  ;;  %v2756_v43 = vmul.f32 %v3404_v53, %v2716_v50  ;;  %v3312_v53 = vld [vmem:[%s4640_s14] sm:$0xff]  }
0x1044   : > { %v2762_v30 = vmul.f32 %v3396_v14, %v2722_v39  ;;  %v2587_v1 = vmul.f32 0.5, %v4501_v28  ;;  %v2774_v9 = vmul.f32 %v2766_v13, %v2606_v54  ;;  %v2584_v6 = vmul.f32 0.5, %v4492_v48 }
0x1045   : > { %v2760_v32 = vmul.f32 %v3400_v2, %v2720_v16  ;;  %v2723_v27 = vmul.f32 %v4546_v38, %v2715_v35  ;;  %v2713_v17 = vadd.f32 0.2548296, %v2705_v29  ;;  %v3406_v21 = vpop.eup %3405  ;;  %v2607_v38 = vsel %vm2599_vm1, -1.0, %v4683_v7 }
0x1046   : > { %v2770_v19 = vsub.f32 1.0, %v2762_v30  ;;  %v2757_v45 = vmul.f32 %v3406_v21, %v2717_v51  ;;  %v2775_v10 = vmul.f32 %v2767_v60, %v2607_v38  ;;  %v2764_v41 = vsub.f32 1.0, %v2756_v43 }
0x1047   : > { %v2768_v56 = vsub.f32 1.0, %v2760_v32  ;;  %v2763_v58 = vmul.f32 %v3402_v24, %v2723_v27  ;;  %v2721_v63 = vmul.f32 %v4551_v57, %v2713_v17  ;;  %v3408_v47 = vpop.eup %3407  ;;  %v2586_v57 = vmul.f32 0.5, %v4489_v31 }
0x1048   : > { %v2778_v4 = vmul.f32 %v2770_v19, %v2610_v36  ;;  %v2765_v14 = vsub.f32 1.0, %v2757_v45  ;;  %v2585_v31 = vmul.f32 0.5, %v4507_v23  ;;  %v2783_v28 = vadd.f32 1.0, %v2775_v10 }
0x1049   : > { %v2771_v42 = vsub.f32 1.0, %v2763_v58  ;;  %v2761_v62 = vmul.f32 %v3408_v47, %v2721_v63  ;;  %v2776_v52 = vmul.f32 %v2768_v56, %v2608_v46  ;;  %v2604_v35 = vsel %vm2596_vm8, -1.0, %v4683_v7  ;;  %v2808_v56 = vpop.permute.xlu1 %2807 }
0x104a   : > { %v2786_v20 = vadd.f32 1.0, %v2778_v4  ;;  %v2773_v0 = vmul.f32 %v2765_v14, %v2605_v26  ;;  %v2782_v36 = vadd.f32 1.0, %v2774_v9  ;;  %v2772_v59 = vmul.f32 %v2764_v41, %v2604_v35 }
0x104b   : > { %v2779_v37 = vmul.f32 %v2771_v42, %v2611_v3  ;;  %v2769_v39 = vsub.f32 1.0, %v2761_v62  ;;  %v2784_v18 = vadd.f32 1.0, %v2776_v52  ;;  %v2583_v19 = vmul.f32 0.5, %v4467_v5 }
0x104c   : > { %v2794_v11 = vmul.f32 %v2786_v20, %v2586_v57  ;;  %v2582_v24 = vmul.f32 0.5, %v4454_v40  ;;  %v2781_v12 = vadd.f32 1.0, %v2773_v0  ;;  %v2780_v27 = vadd.f32 1.0, %v2772_v59 }
0x104d   : > { %v2787_v55 = vadd.f32 1.0, %v2779_v37  ;;  %v2777_v34 = vmul.f32 %v2769_v39, %v2609_v49  ;;  %v2792_v29 = vmul.f32 %v2784_v18, %v2584_v6  ;;  %v2791_v23 = vmul.f32 %v2783_v28, %v2583_v19 }
0x104e   : > { %v2790_v32 = vmul.f32 %v2782_v36, %v2582_v24  ;;  %v2581_v48 = vmul.f32 0.5, %v4476_v15  ;;  %v2580_v7 = vmul.f32 0.5, %v4459_v22  ;;  %v2804_v15 = vpop.permute.xlu0 %2803 }
0x104f   : > { %v2795_v30 = vmul.f32 %v2787_v55, %v2587_v1  ;;  %v2785_v61 = vadd.f32 1.0, %v2777_v34 }
0x1050   : > { %v2799_v5 = vpack.c.bf16 %v2791_v23, %v2790_v32  ;;  %v2789_v33 = vmul.f32 %v2781_v12, %v2581_v48  ;;  %v2788_v17 = vmul.f32 %v2780_v27, %v2580_v7 }
0x1051   : > { %v2801_v16 = vpack.c.bf16 %v2795_v30, %v2794_v11  ;;  %v2793_v2 = vmul.f32 %v2785_v61, %v2585_v31 }
0x1052   : > { %v2798_v40 = vpack.c.bf16 %v2789_v33, %v2788_v17 }
0x1053   : > { %3199 = vmatpush3.bf16.msra.mxu0 %v2801_v16  ;;  %v2800_v51 = vpack.c.bf16 %v2793_v2, %v2792_v29 }
0x1054   : > { %3200 = vmatprep.subr.bf16.mxu0 %v3456_v8 }
0x1057   : > { %3201 = vmatpush3.bf16.msra.mxu0 %v2800_v51 }
0x1058   : > { %3202 = vmatprep.subr.bf16.mxu0 %v3456_v8 }
0x105b   : > { %3203 = vmatpush3.bf16.msra.mxu0 %v2799_v5 }
0x105c   : > { %3204 = vmatprep.subr.bf16.mxu0 %v3456_v8 }
0x105f   : > { %3205 = vmatpush3.bf16.msra.mxu0 %v2798_v40 }
0x1062   : > { %3207 = vmatmul.mubr.msk.bf16.vlgmr.msra.gmra.mxu0 %vm2815_vm4, %v3312_v53 }
0x1122   : > { %v2853_v50 = vpop.f32.mrf.mxu0 }
0x1123   : > { %v2854_v4 = vadd.f32 %v2853_v50, %v2804_v15 }
0x1124   : > { %v3208_v22 = vpop.f32.mrf.mxu0 }
0x1125   : > { %v2860_v8 = vadd.f32 %v2854_v4, %v4382_v25 }
0x1126   : > { %v2856_v58 = vpop.f32.mrf.mxu0 }
0x1127   : > { %2862 = vst [vmem:[%s494_s30] sm:$0xff] %v2860_v8  ;;  %v2857_v21 = vadd.f32 %v2856_v58, %v2808_v56 }
0x1128   : > { %v3209_v54 = vpop.f32.mrf.mxu0 }
0x1129   : > { %v2861_v38 = vadd.f32 %v2857_v21, %v4386_v44 }
0x112b   : > { %2863 = vst [vmem:[%s494_s30 + $0x8] sm:$0xff] %v2861_v38 }
0x112c PF: > { %s25_s18 = sadd.s32 1, %s3439_s18  }
0x112d   : > { %p22_p4 = scmp.ge.s32.totalorder %s25_s18, 4  }
0x112f   :  { %24 = sbr.rel (!%p22_p4) target bundleno = 1 (0x1), region = 110 }

// kernel: tile.27
= control target key start
LH: loop header
LB: loop body
LE: loop exit
PB: predicated region body
PF: predicated region fallthrough
CT: control target
= control target key end

     0   :  { %s22_s0 = inlined_call_operand.vmem [shape: f32[16], index: 0, kind: input, shape index: {}]   ;;  %s23_s1 = inlined_call_operand.vmem [shape: f32[8,16], index: 1, kind: output, shape index: {}]  }
   0x1   :  { %v4_v0 = vld [vmem:[%s22_s0] ss:$0 sm:$0xff] }
   0x2   :  { %5 = vst [vmem:[%s23_s1] sm:$0xff] %v4_v0 }

// kernel: tile.37
= control target key start
LH: loop header
LB: loop body
LE: loop exit
PB: predicated region body
PF: predicated region fallthrough
CT: control target
= control target key end

     0   :  { %s69_s10 = smov 112   ;;  %s70_s11 = smov 80   ;;  %vm3_vm0 = vcmask 130048   ;;  %vm9_vm1 = vcmask 1048448   ;;  %vm15_vm2 = vcmask 917248   ;;  %vm21_vm3 = vcmask 786048   ;;  %s113_s0 = inlined_call_operand.vmem [shape: f32[8,16], index: 0, kind: input, shape index: {}]   ;;  %s114_s1 = inlined_call_operand.vmem [shape: f32[1,128], index: 1, kind: output, shape index: {}]  }
   0x1   :  { %v55_v0 = vld [vmem:[%s113_s0 + $0x7] sm:$0x1]   ;;  %v57_v1 = vld [vmem:[%s113_s0 + $0x5] sm:$0x1]   ;;  %v56_v2 = vld [vmem:[%s113_s0 + $0x6] sm:$0x1]  }
   0x2   :  { %7 = vrot.lane.b32.xlu0 %v55_v0, %s69_s10  ;;  %19 = vrot.lane.b32.xlu1 %v57_v1, %s70_s11  ;;  %v58_v3 = vld [vmem:[%s113_s0 + $0x4] sm:$0x1]   ;;  %v2_v4 = vld [vmem:[%s113_s0] sm:$0x1]   ;;  %s71_s18 = smov 96   ;;  %s72_s19 = smov 64  }
   0x3   :  { %4 = vst.msk [vmem:[#allocation0] sm:$0x1] %vm3_vm0, %v2_v4   ;;  %v59_v5 = vld [vmem:[%s113_s0 + $0x3] sm:$0x1]   ;;  %v60_v6 = vld [vmem:[%s113_s0 + $0x2] sm:$0x1]  }
   0x4   :  { %s73_s24 = smov 48   ;;  %s74_s25 = smov 32   ;;  %v61_v7 = vld [vmem:[%s113_s0 + $0x1] sm:$0x1]   ;;  %vm27_vm4 = vcmask 654848   ;;  %vm33_vm5 = vcmask 523648  }
   0x5   :  { %s75_s0 = smov 16   ;;  %vm39_vm6 = vcmask 392448   ;;  %vm45_vm7 = vcmask 261248  }
   0x6   :  { %13 = vrot.lane.b32.xlu0 %v56_v2, %s71_s18  ;;  %25 = vrot.lane.b32.xlu1 %v58_v3, %s72_s19 }
   0xa   :  { %31 = vrot.lane.b32.xlu0 %v59_v5, %s73_s24  ;;  %37 = vrot.lane.b32.xlu1 %v60_v6, %s74_s25 }
   0xe   :  { %43 = vrot.lane.b32.xlu0 %v61_v7, %s75_s0 }
  0x74   :  { %v8_v8 = vpop.permute.xlu0 %7   ;;  %v20_v9 = vpop.permute.xlu1 %19  }
  0x75   :  { %10 = vst.msk [vmem:[#allocation0] sm:$0x1] %vm9_vm1, %v8_v8  }
  0x78   :  { %v14_v10 = vpop.permute.xlu0 %13   ;;  %v26_v11 = vpop.permute.xlu1 %25  }
  0x79   :  { %16 = vst.msk [vmem:[#allocation0] sm:$0x1] %vm15_vm2, %v14_v10  }
  0x7a   :  { %22 = vst.msk [vmem:[#allocation0] sm:$0x1] %vm21_vm3, %v20_v9  }
  0x7b   :  { %28 = vst.msk [vmem:[#allocation0] sm:$0x1] %vm27_vm4, %v26_v11  }
  0x7c   :  { %v32_v12 = vpop.permute.xlu0 %31   ;;  %v38_v13 = vpop.permute.xlu1 %37  }
  0x7d   :  { %34 = vst.msk [vmem:[#allocation0] sm:$0x1] %vm33_vm5, %v32_v12  }
  0x7e   :  { %40 = vst.msk [vmem:[#allocation0] sm:$0x1] %vm39_vm6, %v38_v13  }
  0x80   :  { %v44_v14 = vpop.permute.xlu0 %43  }
  0x81   :  { %46 = vst.msk [vmem:[#allocation0] sm:$0x1] %vm45_vm7, %v44_v14  }
  0x88   :  { %v51_v15 = vld [vmem:[#allocation0] sm:$0x1] }
  0x89   :  { %54 = vst [vmem:[%s114_s1] sm:$0x1] %v51_v15 }

// kernel: _forward_impl.1
= control target key start
LH: loop header
LB: loop body
LE: loop exit
PB: predicated region body
PF: predicated region fallthrough
CT: control target
= control target key end

     0   :  { %s3555_s18 = smov 0   ;;  %s4626_s0 = inlined_call_operand.vmem [shape: f32[2,16,128], index: 0, kind: input, shape index: {}]   ;;  %s4627_s1 = inlined_call_operand.vmem [shape: f32[128,8], index: 1, kind: input, shape index: {}]   ;;  %s4628_s2 = inlined_call_operand.vmem [shape: f32[8,128], index: 2, kind: input, shape index: {}]   ;;  %s4629_s3 = inlined_call_operand.vmem [shape: f32[4,128], index: 3, kind: input, shape index: {}]   ;;  %s4630_s4 = inlined_call_operand.vmem [shape: bf16[32,16], index: 4, kind: input, shape index: {}]   ;;  %s4631_s5 = inlined_call_operand.vmem [shape: bf16[16,144], index: 5, kind: input, shape index: {}]   ;;  %s4632_s6 = inlined_call_operand.vmem [shape: bf16[16,144], index: 6, kind: input, shape index: {}]   ;;  %s4633_s7 = inlined_call_operand.vmem [shape: bf16[16,16], index: 7, kind: input, shape index: {}]   ;;  %s4634_s8 = inlined_call_operand.vmem [shape: bf16[16,16], index: 8, kind: input, shape index: {}]   ;;  %s4635_s9 = inlined_call_operand.vmem [shape: bf16[16,16], index: 9, kind: input, shape index: {}]   ;;  %s4636_s10 = inlined_call_operand.vmem [shape: bf16[16,16], index: 10, kind: input, shape index: {}]   ;;  %s4637_s11 = inlined_call_operand.vmem [shape: f32[16,17], index: 11, kind: input, shape index: {}]   ;;  %s4638_s12 = inlined_call_operand.vmem [shape: bf16[64,16], index: 12, kind: input, shape index: {}]   ;;  %s4639_s13 = inlined_call_operand.vmem [shape: f32[64,1], index: 13, kind: input, shape index: {}]   ;;  %s4640_s14 = inlined_call_operand.vmem [shape: bf16[16,64], index: 14, kind: input, shape index: {}]   ;;  %s4641_s15 = inlined_call_operand.vmem [shape: f32[2,16,128], index: 15, kind: output, shape index: {}]  }
   0x1 LB: > { %s2919_s19 = sadd.s32 4294967295, %s3439_s18   ;;  %p2923_p0 = scmp.ge.s32.totalorder %s3439_s18, 1  ;;  %s3439_s18 = sphi %s3555_s18, %s25_s18  }
   0x2   : > { %p437_p1 = scmp.lt.s32.totalorder %s3439_s18, 3 }
   0x4   : > { %p438_p2 = pnand %p2923_p0, %p437_p1 }
   0x5   : > { %p485_p3 = scmp.lt.s32.totalorder (!%p438_p2), %s2919_s19, 1  ;;  %s3445_s24 = smov (!%p438_p2), 125  }
   0x6   : > { %441 = sbr.rel (%p438_p2) target bundleno = 4396 (0x112c), region = 80  ;;  %s3446_s25 = smov (!%p438_p2), 126  }
   0x7   : > { %s3447_s26 = smov (!%p438_p2), 80   ;;  %s4651_s27 = smov (!%p438_p2), 96  }
   0x8   : > { %s3449_s29 = smov (!%p438_p2), 127   ;;  %s4649_s30 = smov (!%p438_p2), 112  }
   0x9   : > { %s3451_s16 = smov (!%p438_p2), 1   ;;  %s4653_s17 = smov (!%p438_p2), 16  }
   0xa   : > { %s3453_s21 = smov (!%p438_p2), 2  }
   0xb   : > { %v513_v0 = vld [vmem:[%s4627_s1 + $0x78] sm:$0xff]  ;;  %v512_v1 = vld [vmem:[%s4627_s1 + $0x70] sm:$0xff]  ;;  %v511_v2 = vld [vmem:[%s4627_s1 + $0x68] sm:$0xff]  ;;  %s4702_s19 = smov (!%p485_p3, %s2919_s19), 1  ;;  %vm4642_vm0 = vcmask 64512   ;;  %vm4643_vm1 = vcmask 130048   ;;  %v518_v41 = vlaneseq }
   0xc   : > { %3066 = vmatprep.subr.mxu0 %v513_v0  ;;  %v510_v3 = vld [vmem:[%s4627_s1 + $0x60] sm:$0xff]  ;;  %s4646_s28 = sshll.u32 %s4702_s19, 4  ;;  %v509_v4 = vld [vmem:[%s4627_s1 + $0x58] sm:$0xff]  ;;  %v508_v5 = vld [vmem:[%s4627_s1 + $0x50] sm:$0xff]  ;;  %v4655_v27 = vmov 0  }
   0xd   : > { %3067 = vmatpush3.msra.mxu0 %v513_v0  ;;  %s3586_s20 = scalar_lea.vmem %s4626_s0, %s4646_s28  ;;  %v507_v7 = vld [vmem:[%s4627_s1 + $0x48] sm:$0xff]  ;;  %v506_v8 = vld [vmem:[%s4627_s1 + $0x40] sm:$0xff]  ;;  %v505_v9 = vld [vmem:[%s4627_s1 + $0x38] sm:$0xff]  ;;  %3270 = vset.pattern.permute.xlu0 %v4655_v27  ;;  %v3654_v42 = vshrl.u32 %v518_v41, 7  ;;  %s3459_s28 = smov 17  }
   0xe   : > { %3068 = vmatprep.subr.mxu0 %v512_v1  ;;  %v3592_v6 = vld [vmem:[%s3586_s20] sm:$0xff]  ;;  %v504_v10 = vld [vmem:[%s4627_s1 + $0x30] sm:$0xff]  ;;  %v503_v11 = vld [vmem:[%s4627_s1 + $0x28] sm:$0xff] }
   0xf   : > { %3069 = vmatpush3.msra.mxu0 %v512_v1  ;;  %3098 = vmatprep.mubr.f32.mxu0 %v3592_v6  ;;  %v502_v12 = vld [vmem:[%s4627_s1 + $0x20] sm:$0xff]  ;;  %v501_v13 = vld [vmem:[%s4627_s1 + $0x18] sm:$0xff]  ;;  %v500_v14 = vld [vmem:[%s4627_s1 + $0x10] sm:$0xff]  ;;  %v699_v18 = vmul.f32 %v3592_v6, %v3592_v6  ;;  %v900_v43 = vsub.s32 0, %v3654_v42  ;;  %v906_v47 = vsub.s32 1, %v3654_v42 }
  0x10   : > { %3070 = vmatprep.subr.mxu0 %v511_v2  ;;  %v499_v15 = vld [vmem:[%s4627_s1 + $0x8] sm:$0xff]  ;;  %v498_v16 = vld [vmem:[%s4627_s1] sm:$0xff] }
  0x11   : > { %3071 = vmatpush3.msra.mxu0 %v511_v2  ;;  %v497_v17 = vld [vmem:[%s3586_s20 + $0x8] sm:$0xff]  ;;  %v514_v20 = vld [vmem:[%s4628_s2] sm:$0xff] }
  0x12   : > { %3072 = vmatprep.subr.mxu0 %v510_v3  ;;  %v700_v19 = vmul.f32 %v497_v17, %v497_v17  ;;  %3104 = vmatprep.subr.mxu1 %v514_v20  ;;  %v3296_v25 = vld [vmem:[%s4630_s4] sm:$0xff]   ;;  %v3650_v28 = vld [vmem:[%s4637_s11 + $0x8] sm:$0xff] }
  0x13   : > { %3073 = vmatpush3.msra.mxu0 %v510_v3  ;;  %3105 = vmatpush3.msra.mxu1 %v514_v20  ;;  %v3642_v26 = vld [vmem:[%s4637_s11] sm:$0xff]  ;;  %v3297_v59 = vld [vmem:[%s4630_s4 + $0x8] sm:$0xff]  }
  0x14   : > { %3074 = vmatprep.subr.mxu0 %v509_v4  ;;  %983 = vperm.xlu0 %3270, %v3642_v26   ;;  %v515_v44 = vld [vmem:[%s4629_s3] sm:$0xf] }
  0x15   : > { %3075 = vmatpush3.msra.mxu0 %v509_v4  ;;  %v901_v46 = vrot.slane %v515_v44, %v900_v43  ;;  %v907_v54 = vrot.slane %v515_v44, %v906_v47 }
  0x16   : > { %3076 = vmatprep.subr.mxu0 %v508_v5 }
  0x17   : > { %3077 = vmatpush3.msra.mxu0 %v508_v5  ;;  %v3442_v5 = vmov 5  }
  0x18   : > { %3078 = vmatprep.subr.mxu0 %v507_v7  ;;  %988 = vperm.xlu0 %3270, %v3650_v28  }
  0x19   : > { %3079 = vmatpush3.msra.mxu0 %v507_v7  ;;  %3272 = vset.pattern.permute.xlu1 %v3442_v5 }
  0x1a   : > { %3080 = vmatprep.subr.mxu0 %v506_v8 }
  0x1b   : > { %3081 = vmatpush3.msra.mxu0 %v506_v8 }
  0x1c   : > { %3082 = vmatprep.subr.mxu0 %v505_v9  ;;  %3271 = vset.pattern.permute.xlu0 %v3442_v5 }
  0x1d   : > { %3083 = vmatpush3.msra.mxu0 %v505_v9  ;;  %1027 = vperm.xlu0 %3271, %v3642_v26  }
  0x1e   : > { %3084 = vmatprep.subr.mxu0 %v504_v10 }
  0x1f   : > { %3085 = vmatpush3.msra.mxu0 %v504_v10 }
  0x20   : > { %3086 = vmatprep.subr.mxu0 %v503_v11 }
  0x21   : > { %3087 = vmatpush3.msra.mxu0 %v503_v11 }
  0x22   : > { %3088 = vmatprep.subr.mxu0 %v502_v12 }
  0x23   : > { %3089 = vmatpush3.msra.mxu0 %v502_v12 }
  0x24   : > { %3090 = vmatprep.subr.mxu0 %v501_v13 }
  0x25   : > { %3091 = vmatpush3.msra.mxu0 %v501_v13 }
  0x26   : > { %3092 = vmatprep.subr.mxu0 %v500_v14 }
  0x27   : > { %3093 = vmatpush3.msra.mxu0 %v500_v14 }
  0x28   : > { %3094 = vmatprep.subr.mxu0 %v499_v15 }
  0x29   : > { %3095 = vmatpush3.msra.mxu0 %v499_v15 }
  0x2a   : > { %3096 = vmatprep.subr.mxu0 %v498_v16 }
  0x2b   : > { %3097 = vmatpush3.msra.mxu0 %v498_v16 }
  0x2c   : > { %3099 = vmatmul.mubr.f32.vlgmr.msra.gmra.mxu0 %v497_v17  ;;  %1461 = vmatprep.subr.bf16.mxu0 %v4655_v27 }
  0x2d   : > { %3101 = vmatprep.mubr.f32.mxu0 %v699_v18 }
  0x30   : > { %3102 = vmatmul.mubr.f32.gmra.mxu0 %v700_v19 }
  0x8f   : > { %v984_v60 = vpop.permute.xlu0 %983 }
  0x93   : > { %v989_v0 = vpop.permute.xlu0 %988 }
  0xec   : > { %v3100_v21 = vpop.f32.mrf.mxu0 }
  0xee   : > { %v767_v22 = vpop.f32.mrf.mxu0 }
  0xef   : > { %3106 = vmatprep.mubr.msk.f32.mxu1 %vm4642_vm0, %v767_v22 }
  0xf0   : > { %v3103_v23 = vpop.f32.mrf.mxu0  ;;  %3107 = vmatmul.mubr.msk.f32.vlgmr.msra.gmra.mxu1 %vm4642_vm0, %v3100_v21 }
  0xf2   : > { %v777_v24 = vpop.f32.mrf.mxu0 }
  0xf3   : > { %3109 = vmatprep.mubr.msk.f32.mxu1 %vm4642_vm0, %v777_v24 }
  0xf4   : > { %3110 = vmatmul.mubr.msk.f32.gmra.mxu1 %vm4642_vm0, %v3103_v23 }
  0xf5   : > { %3114 = vmatprep.mubr.msk.bf16.mxu1 %vm4643_vm1, %v3296_v25 }
 0x1b0   : > { %v3108_v29 = vpop.f32.mrf.mxu1 }
 0x1b1   : > { %v885_v31 = vmul.f32 %v3108_v29, %v3108_v29  ;;  %v891_v45 = vsub.f32 %v497_v17, %v3108_v29 }
 0x1b2   : > { %v865_v30 = vpop.f32.mrf.mxu1 }
 0x1b3   : > { %v884_v33 = vmul.f32 %v865_v30, %v865_v30  ;;  %v890_v49 = vsub.f32 %v3592_v6, %v865_v30  ;;  %v3443_v6 = vmov 6  }
 0x1b4   : > { %v3111_v32 = vpop.f32.mrf.mxu1  ;;  %3273 = vset.pattern.permute.xlu0 %v3443_v6 }
 0x1b5   : > { %v887_v34 = vsub.f32 %v3111_v32, %v885_v31  ;;  %1037 = vperm.xlu0 %3273, %v3642_v26  }
 0x1b6   : > { %v875_v35 = vpop.f32.mrf.mxu1 }
 0x1b7   : > { %v889_v36 = vmax.f32 %v887_v34, 0.0  ;;  %v886_v37 = vsub.f32 %v875_v35, %v884_v33  ;;  %v1028_v34 = vpop.permute.xlu0 %1027 }
 0x1b9   : > { %v893_v38 = vadd.f32 1e-05, %v889_v36  ;;  %v888_v39 = vmax.f32 %v886_v37, 0.0  ;;  %1041 = vperm.xlu0 %3273, %v3650_v28  }
 0x1bb   : > { %3313 = vrsqrt.f32 %v893_v38  ;;  %v892_v40 = vadd.f32 1e-05, %v888_v39 }
 0x1bd   : > { %3315 = vrsqrt.f32 %v892_v40 }
 0x1c8   : > { %v3314_v48 = vpop.eup %3313 }
 0x1c9   : > { %v897_v50 = vmul.f32 %v3314_v48, %v891_v45 }
 0x1ca   : > { %v3316_v51 = vpop.eup %3315 }
 0x1cb   : > { %v896_v52 = vmul.f32 %v3316_v51, %v890_v49  ;;  %v903_v53 = vmul.f32 %v901_v46, %v897_v50 }
 0x1cd   : > { %v902_v55 = vmul.f32 %v901_v46, %v896_v52  ;;  %v909_v57 = vadd.f32 %v907_v54, %v903_v53 }
 0x1cf   : > { %v908_v56 = vadd.f32 %v907_v54, %v902_v55 }
 0x1d1   : > { %v914_v58 = vpack.c.bf16 %v909_v57, %v908_v56 }
 0x1d3   : > { %3112 = vmatprep.subr.bf16.mxu1 %v914_v58 }
 0x1d4   : > { %3113 = vmatpush3.bf16.msra.mxu1 %v914_v58 }
 0x1d5   : > { %1287 = vmatprep.subr.bf16.mxu1 %v4655_v27 }
 0x1d7   : > { %3115 = vmatmul.mubr.msk.bf16.vlgmr.msra.gmra.mxu1 %vm4643_vm1, %v3297_v59 }
 0x230   : > { %v1038_v35 = vpop.permute.xlu0 %1037 }
 0x234   : > { %v1042_v44 = vpop.permute.xlu0 %1041 }
 0x297   : > { %v3667_v61 = vpop.f32.mrf.mxu1 }
 0x299   : > { %v966_v62 = vpop.f32.mrf.mxu1 }
 0x29a   : > { %v991_v2 = vadd.f32 %v984_v60, %v966_v62 }
 0x29b   : > { %v3669_v63 = vpop.f32.mrf.mxu1 }
 0x29d   : > { %v969_v1 = vpop.f32.mrf.mxu1 }
 0x29e   : > { %v992_v3 = vadd.f32 %v989_v0, %v969_v1 }
 0x2a0   : > { %v993_v4 = vadd.f32 %v992_v3, %v991_v2 }
 0x2a2   : > { %994 = vadd.xlane.f32.xlu1 %v993_v4 }
 0x32b   : > { %v995_v7 = vpop.xlane.xlu1 %994 }
 0x32c   : > { %v996_v8 = vrot.slane %v995_v7, 4 }
 0x32e   : > { %v997_v9 = vadd.f32 %v996_v8, %v995_v7 }
 0x330   : > { %v998_v10 = vrot.slane %v997_v9, 2 }
 0x332   : > { %v999_v11 = vadd.f32 %v998_v10, %v997_v9 }
 0x334   : > { %v1000_v12 = vrot.slane %v999_v11, 1 }
 0x336   : > { %v1001_v13 = vadd.f32 %v1000_v12, %v999_v11 }
 0x338   : > { %3212 = vpush %v1001_v13 }
 0x369   : > { %s3213_s22 = spop %3212 }
 0x36a   : > { %v1003_v14 = vstv %s3213_s22  ;;  %s4647_s22 = smov 32  }
 0x36b   : > { %v1005_v15 = vmul.f32 0.00048828125, %v1003_v14 }
 0x36d   : > { %v1006_v16 = vsub.f32 %v991_v2, %v1005_v15  ;;  %v1007_v17 = vsub.f32 %v992_v3, %v1005_v15 }
 0x36f   : > { %v1008_v18 = vmul.f32 %v1006_v16, %v1006_v16  ;;  %v1009_v19 = vmul.f32 %v1007_v17, %v1007_v17 }
 0x371   : > { %v1010_v20 = vadd.f32 %v1009_v19, %v1008_v18 }
 0x373   : > { %1011 = vadd.xlane.f32.xlu1 %v1010_v20 }
 0x384   : > { %1031 = vperm.xlu1 %3272, %v3650_v28  }
 0x3fc   : > { %v1012_v21 = vpop.xlane.xlu1 %1011 }
 0x3fd   : > { %v1013_v22 = vrot.slane %v1012_v21, 4 }
 0x3ff   : > { %v1014_v23 = vadd.f32 %v1013_v22, %v1012_v21 }
 0x400   : > { %v1032_v37 = vpop.permute.xlu1 %1031 }
 0x401   : > { %v1015_v24 = vrot.slane %v1014_v23, 2 }
 0x403   : > { %v1016_v25 = vadd.f32 %v1015_v24, %v1014_v23  ;;  %v4644_v24 = vmov 1.0  }
 0x405   : > { %v1017_v29 = vrot.slane %v1016_v25, 1 }
 0x407   : > { %v1018_v30 = vadd.f32 %v1017_v29, %v1016_v25 }
 0x409   : > { %3214 = vpush %v1018_v30 }
 0x43a   : > { %s3215_s23 = spop %3214 }
 0x43b   : > { %v1020_v31 = vstv %s3215_s23  ;;  %s3457_s23 = smov 113  }
 0x43c   : > { %v1021_v32 = vmul.f32 0.00048828125, %v1020_v31 }
 0x43e   : > { %v1022_v33 = vadd.f32 1e-05, %v1021_v32 }
 0x440   : > { %3317 = vrsqrt.f32 %v1022_v33 }
 0x44d   : > { %v3318_v36 = vpop.eup %3317 }
 0x44e   : > { %v1024_v38 = vmul.f32 %v3318_v36, %v1006_v16  ;;  %v1025_v39 = vmul.f32 %v3318_v36, %v1007_v17 }
 0x450   : > { %v1034_v40 = vmul.f32 %v1028_v34, %v1024_v38  ;;  %v1035_v43 = vmul.f32 %v1032_v37, %v1025_v39  ;;  %v519_v39 = vand.u32 127, %v518_v41 }
 0x452   : > { %v1044_v45 = vadd.f32 %v1038_v35, %v1034_v40  ;;  %v1045_v46 = vadd.f32 %v1042_v44, %v1035_v43  ;;  %vm520_vm4 = vcmp.ge.s32.totalorder %v519_v39, 16  ;;  %vm522_vm5 = vcmp.ge.s32.totalorder %v519_v39, 32 }
 0x453   : > { %v521_v40 = vsel %vm520_vm4, 1, %v4655_v27  ;;  %v523_v43 = vsel %vm522_vm5, 1, %v4655_v27  ;;  %vm525_vm6 = vcmp.ge.s32.totalorder %v519_v39, 48  ;;  %vm528_vm7 = vcmp.ge.s32.totalorder %v519_v39, 64 }
 0x454   : > { %v1048_v47 = vmul.f32 0.70710677, %v1044_v45  ;;  %v1049_v48 = vmul.f32 0.70710677, %v1045_v46  ;;  %v1046_v33 = vmul.f32 0.5, %v1044_v45  ;;  %v1047_v35 = vmul.f32 0.5, %v1045_v46 }
 0x455   : > { %v524_v44 = vadd.s32 %v523_v43, %v521_v40  ;;  %v526_v45 = vsel %vm525_vm6, 1, %v4655_v27  ;;  %v3455_v46 = vmov 2   ;;  %vm531_vm8 = vcmp.ge.s32.totalorder %v519_v39, 80 }
 0x456   : > { %v1054_v49 = vand.u32 2147483647, %v1048_v47  ;;  %v1055_v50 = vand.u32 2147483647, %v1049_v48  ;;  %vm1050_vm2 = vcmp.lt.f32.partialorder %v1048_v47, 0.0  ;;  %vm1051_vm3 = vcmp.lt.f32.partialorder %v1049_v48, 0.0  ;;  %3274 = vset.pattern.permute.xlu1 %v3455_v46  ;;  %3275 = vset.pattern.permute.xlu0 %v3455_v46 }
 0x457   : > { %v1052_v25 = vsel %vm1050_vm2, -1.0, %v4644_v24  ;;  %v1053_v31 = vsel %vm1051_vm3, -1.0, %v4644_v24  ;;  %v527_v47 = vadd.s32 %v526_v45, %v524_v44  ;;  %v529_v48 = vsel %vm528_vm7, 1, %v4655_v27 }
 0x458   : > { %v1056_v51 = vmul.f32 0.3275911, %v1054_v49  ;;  %v1057_v52 = vmul.f32 0.3275911, %v1055_v50  ;;  %v1082_v55 = vsub.f32 0.0, %v1054_v49  ;;  %v1083_v56 = vsub.f32 0.0, %v1055_v50 }
 0x459   : > { %v532_v41 = vsel %vm531_vm8, 1, %v4655_v27  ;;  %vm534_vm9 = vcmp.ge.s32.totalorder %v519_v39, 96  ;;  %vm537_vm10 = vcmp.ge.s32.totalorder %v519_v39, 112 }
 0x45a   : > { %v1058_v53 = vadd.f32 1.0, %v1056_v51  ;;  %v1059_v54 = vadd.f32 1.0, %v1057_v52  ;;  %v1084_v57 = vmul.f32 %v1082_v55, %v1054_v49  ;;  %v1085_v58 = vmul.f32 %v1083_v56, %v1055_v50 }
 0x45b   : > { %v530_v49 = vadd.s32 %v529_v48, %v527_v47  ;;  %v535_v51 = vsel %vm534_vm9, 1, %v4655_v27  ;;  %v3733_v56 = vadd.s32 8, %v3654_v42  ;;  %vm567_vm9 = vcmp.ge.s32.totalorder %v3654_v42, 3 }
 0x45c   : > { %3319 = vrcp.f32 %v1058_v53  ;;  %v1086_v0 = vmul.f32 1.442695, %v1084_v57  ;;  %v1088_v2 = vmul.f32 1.442695, %v1085_v58  ;;  %v538_v53 = vsel %vm537_vm10, 1, %v4655_v27 }
 0x45d   : > { %3321 = vrcp.f32 %v1059_v54  ;;  %v533_v50 = vadd.s32 %v532_v41, %v530_v49  ;;  %vm612_vm11 = vcmp.ge.s32.totalorder %v3733_v56, 9  ;;  %vm614_vm12 = vcmp.lt.s32.totalorder %v3733_v56, 12 }
 0x45e   : > { %3323 = vpow2.f32 %v1086_v0  ;;  %vm616_vm5 = vmand %vm612_vm11, %vm614_vm12  ;;  %vm569_vm10 = vcmp.lt.s32.totalorder %v3654_v42, 6 }
 0x45f   : > { %3325 = vpow2.f32 %v1088_v2  ;;  %v536_v52 = vadd.s32 %v535_v51, %v533_v50 }
 0x461   : > { %v3729_v54 = vadd.s32 %v538_v53, %v536_v52 }
 0x463   : > { %v540_v55 = vmul.u32 16, %v3729_v54  ;;  %v561_v0 = vadd.s32 3, %v3729_v54  ;;  %vm626_vm15 = vcmp.ge.s32.totalorder %v3729_v54, 0  ;;  %vm627_vm2 = vcmp.lt.s32.totalorder %v3729_v54, 8 }
 0x464   : > { %v583_v2 = vadd.s32 2, %v3729_v54  ;;  %vm3762_vm0 = vmand %vm626_vm15, %vm627_vm2  ;;  %v647_v44 = vadd.s32 4294967295, %v3729_v54 }
 0x465   : > { %v3735_v57 = vsub.s32 %v519_v39, %v540_v55  ;;  %vm562_vm11 = vcmp.ge.s32.totalorder %v561_v0, 0  ;;  %vm563_vm12 = vcmp.lt.s32.totalorder %v561_v0, 8 }
 0x466   : > { %vm584_vm15 = vcmp.ge.s32.totalorder %v583_v2, 0  ;;  %vm585_vm2 = vcmp.lt.s32.totalorder %v583_v2, 8 }
 0x467   : > { %v555_v58 = vadd.s32 3, %v3735_v57  ;;  %vm621_vm13 = vcmp.ge.s32.totalorder %v3735_v57, 0  ;;  %vm622_vm14 = vcmp.lt.s32.totalorder %v3735_v57, 16  ;;  %v663_v48 = vadd.s32 4294967294, %v3735_v57 }
 0x468   : > { %vm3756_vm8 = vmand %vm621_vm13, %vm622_vm14  ;;  %vm547_vm13 = vcmp.lt.s32.totalorder %v3654_v42, 3 }
 0x469   : > { %v3320_v59 = vpop.eup %3319  ;;  %vm556_vm3 = vcmp.ge.s32.totalorder %v555_v58, 0  ;;  %vm557_vm4 = vcmp.lt.s32.totalorder %v555_v58, 16 }
 0x46a   : > { %v3322_v60 = vpop.eup %3321  ;;  %v1064_v62 = vmul.f32 1.0614054, %v3320_v59  ;;  %vm3766_vm1 = vmand %vm556_vm3, %vm557_vm4 }
 0x46b   : > { %v1065_v1 = vmul.f32 1.0614054, %v3322_v60  ;;  %v3324_v18 = vpop.eup %3323  ;;  %vm3781_vm3 = vmand %vm567_vm9, %vm569_vm10 }
 0x46c   : > { %v1066_v3 = vadd.f32 -1.4531521, %v1064_v62  ;;  %v3326_v20 = vpop.eup %3325  ;;  %v577_v62 = vadd.s32 2, %v3735_v57 }
 0x46d   : > { %v1067_v4 = vadd.f32 -1.4531521, %v1065_v1 }
 0x46e   : > { %v1068_v5 = vmul.f32 %v3320_v59, %v1066_v3  ;;  %vm578_vm6 = vcmp.ge.s32.totalorder %v577_v62, 0  ;;  %vm579_vm7 = vcmp.lt.s32.totalorder %v577_v62, 16 }
 0x46f   : > { %v1069_v6 = vmul.f32 %v3322_v60, %v1067_v4  ;;  %v599_v4 = vadd.s32 1, %v3735_v57  ;;  %vm3772_vm14 = vmand %vm578_vm6, %vm579_vm7 }
 0x470   : > { %v1070_v7 = vadd.f32 1.4214138, %v1068_v5  ;;  %vm3796_vm6 = vmand %vm562_vm11, %vm563_vm12  ;;  %vm592_vm12 = vcmp.lt.s32.totalorder %v3733_v56, 9 }
 0x471   : > { %v1071_v8 = vadd.f32 1.4214138, %v1069_v6  ;;  %vm600_vm4 = vcmp.ge.s32.totalorder %v599_v4, 0  ;;  %vm3801_vm7 = vmand %vm584_vm15, %vm585_vm2  ;;  %vm632_vm2 = vcmp.ge.s32.totalorder %v3733_v56, 12 }
 0x472   : > { %v1072_v9 = vmul.f32 %v3320_v59, %v1070_v7  ;;  %v669_v7 = vadd.s32 4294967294, %v3729_v54 }
 0x473   : > { %v1073_v10 = vmul.f32 %v3322_v60, %v1071_v8  ;;  %v3456_v8 = vmov 0.0  }
 0x474   : > { %v1074_v11 = vadd.f32 -0.28449672, %v1072_v9  ;;  %v2938_v9 = vsel %vm616_vm5, 1.0, %v3456_v8  ;;  %vm601_vm5 = vcmp.lt.s32.totalorder %v599_v4, 16  ;;  %v2930_v39 = vsel %vm3796_vm6, 1.0, %v3456_v8 }
 0x475   : > { %v1075_v12 = vadd.f32 -0.28449672, %v1073_v10  ;;  %vm3809_vm9 = vmand %vm600_vm4, %vm601_vm5  ;;  %v2933_v40 = vsel %vm3801_vm7, 1.0, %v3456_v8  ;;  %v2935_v41 = vsel %vm592_vm12, 1.0, %v3456_v8  ;;  %v3857_v52 = vmul.f32 0.0, %v2930_v39 }
 0x476   : > { %v1076_v13 = vmul.f32 %v3320_v59, %v1074_v11  ;;  %v2936_v43 = vsel %vm3809_vm9, 1.0, %v3456_v8  ;;  %v3861_v55 = vmul.f32 0.0, %v2933_v40  ;;  %vm648_vm5 = vcmp.ge.s32.totalorder %v647_v44, 0 }
 0x477   : > { %v1077_v14 = vmul.f32 %v3322_v60, %v1075_v12  ;;  %v2939_v12 = vsel %vm3756_vm8, 1.0, %v3456_v8  ;;  %vm649_vm6 = vcmp.lt.s32.totalorder %v647_v44, 8  ;;  %v3872_v0 = vmul.f32 %v2936_v43, %v2935_v41 }
 0x478   : > { %v1078_v15 = vadd.f32 0.2548296, %v1076_v13  ;;  %vm654_vm12 = vcmp.ge.s32.totalorder %v3733_v56, 15 }
 0x479   : > { %v1079_v16 = vadd.f32 0.2548296, %v1077_v14 }
 0x47a   : > { %v1080_v17 = vmul.f32 %v3320_v59, %v1078_v15  ;;  %v605_v15 = vadd.s32 1, %v3729_v54 }
 0x47b   : > { %v1081_v19 = vmul.f32 %v3322_v60, %v1079_v16  ;;  %v2940_v16 = vsel %vm3762_vm0, 1.0, %v3456_v8 }
 0x47c   : > { %v1090_v21 = vmul.f32 %v3324_v18, %v1080_v17  ;;  %v2929_v17 = vsel %vm3766_vm1, 1.0, %v3456_v8  ;;  %vm589_vm1 = vcmp.ge.s32.totalorder %v3654_v42, 6  ;;  %vm606_vm10 = vcmp.ge.s32.totalorder %v605_v15, 0 }
 0x47d   : > { %v1091_v22 = vmul.f32 %v3326_v20, %v1081_v19  ;;  %v2928_v19 = vsel %vm547_vm13, 1.0, %v3456_v8  ;;  %vm607_vm11 = vcmp.lt.s32.totalorder %v605_v15, 8  ;;  %v2934_v45 = vsel %vm589_vm1, 1.0, %v3456_v8 }
 0x47e   : > { %v1092_v23 = vsub.f32 1.0, %v1090_v21  ;;  %v3805_v21 = vmul.f32 %v2939_v12, %v2938_v9  ;;  %vm3845_vm13 = vmand %vm606_vm10, %vm607_vm11  ;;  %v3859_v53 = vmul.f32 %v2930_v39, %v2928_v19  ;;  %v3863_v58 = vmul.f32 %v2936_v43, %v2934_v45 }
 0x47f   : > { %v1093_v29 = vsub.f32 1.0, %v1091_v22  ;;  %vm664_vm1 = vcmp.ge.s32.totalorder %v663_v48, 0  ;;  %vm665_vm10 = vcmp.lt.s32.totalorder %v663_v48, 16  ;;  %vm3898_vm11 = vmand %vm648_vm5, %vm649_vm6  ;;  %vm4681_vm5 = vcmask 130048  }
 0x480   : > { %v1094_v30 = vmul.f32 %v1092_v23, %v1052_v25  ;;  %v641_v25 = vadd.s32 4294967295, %v3735_v57  ;;  %v2937_v57 = vsel %vm3845_vm13, 1.0, %v3456_v8  ;;  %v2943_v44 = vsel %vm3898_vm11, 1.0, %v3456_v8  ;;  %vm4682_vm6 = vmmov %vm4681_vm5 }
 0x481   : > { %v1095_v32 = vmul.f32 %v1093_v29, %v1053_v31  ;;  %v3814_v29 = vmul.f32 0.0, %v2939_v12  ;;  %v3818_v31 = vmul.f32 0.0, %v2940_v16  ;;  %v3891_v18 = vmul.f32 %v2937_v57, %v2934_v45 }
 0x482   : > { %v1096_v34 = vadd.f32 1.0, %v1094_v30  ;;  %v3816_v30 = vmul.f32 %v2940_v16, %v2938_v9  ;;  %vm643_vm15 = vcmp.lt.s32.totalorder %v641_v25, 16 }
 0x483   : > { %v1097_v36 = vadd.f32 1.0, %v1095_v32  ;;  %v3820_v32 = vmul.f32 0.0, %v2929_v17 }
 0x484   : > { %v3677_v37 = vmul.f32 %v1096_v34, %v1046_v33  ;;  %v3825_v34 = vmul.f32 %v2929_v17, %v2928_v19  ;;  %v3889_v17 = vmul.f32 %v2937_v57, %v2935_v41  ;;  %v2944_v57 = vsel %vm654_vm12, 1.0, %v3456_v8 }
 0x485   : > { %v3679_v38 = vmul.f32 %v1097_v36, %v1047_v35  ;;  %v2932_v35 = vsel %vm3772_vm14, 1.0, %v3456_v8  ;;  %v2931_v36 = vsel %vm3781_vm3, 1.0, %v3456_v8  ;;  %vm642_vm14 = vcmp.ge.s32.totalorder %v641_v25, 0 }
 0x486   : > { %1100 = vrot.lane.b32.xlu1 %v3677_v37, %s3445_s24  ;;  %v3850_v49 = vmul.f32 %v2932_v35, %v2931_v36  ;;  %vm634_vm3 = vcmp.lt.s32.totalorder %v3733_v56, 15  ;;  %v3855_v51 = vmul.f32 0.0, %v2932_v35  ;;  %vm3868_vm4 = vmand %vm642_vm14, %vm643_vm15  ;;  %v3881_v10 = vmul.f32 %v2933_v40, %v2931_v36 }
 0x487   : > { %1102 = vrot.lane.b32.xlu0 %v3679_v38, %s3445_s24  ;;  %vm3874_vm7 = vmand %vm632_vm2, %vm634_vm3  ;;  %v1131_v13 = vmul.f32 %v3805_v21, %v3679_v38  ;;  %v1130_v15 = vmul.f32 %v3814_v29, %v3677_v37  ;;  %v2942_v54 = vsel %vm3868_vm4, 1.0, %v3456_v8  ;;  %vm670_vm15 = vcmp.ge.s32.totalorder %v669_v7, 0 }
 0x488   : > { %vm666_vm14 = vmand %vm664_vm1, %vm665_vm10  ;;  %vm671_vm2 = vcmp.lt.s32.totalorder %v669_v7, 8  ;;  %v3916_v43 = vmul.f32 0.0, %v2942_v54 }
 0x489   : > { %v2945_v48 = vsel %vm666_vm14, 1.0, %v3456_v8  ;;  %vm672_vm3 = vmand %vm670_vm15, %vm671_vm2 }
 0x48a   : > { %1108 = vrot.lane.b32.xlu1 %v3677_v37, %s3446_s25  ;;  %vm690_vm1 = vmand %vm3845_vm13, %vm3868_vm4 }
 0x48b   : > { %1110 = vrot.lane.b32.xlu0 %v3679_v38, %s3446_s25  ;;  %vm687_vm10 = vmand %vm3762_vm0, %vm3809_vm9 }
 0x48c   : > { %vm684_vm12 = vmand %vm3762_vm0, %vm3868_vm4 }
 0x48d   : > { %vm681_vm0 = vmand %vm3898_vm11, %vm3809_vm9 }
 0x48e   : > { %1154 = vrot.lane.b32.xlu1 %v3677_v37, %s3447_s26  ;;  %vm678_vm14 = vmand %vm3898_vm11, %vm3756_vm8 }
 0x48f   : > { %1156 = vrot.lane.b32.xlu0 %v3679_v38, %s3447_s26 }
 0x492   : > { %1162 = vrot.lane.b32.xlu1 %v3677_v37, %s4651_s27 }
 0x493   : > { %1164 = vrot.lane.b32.xlu0 %v3679_v38, %s4651_s27 }
 0x496   : > { %1118 = vrot.lane.b32.xlu1 %v3677_v37, %s3449_s29 }
 0x497   : > { %1120 = vrot.lane.b32.xlu0 %v3679_v38, %s3449_s29 }
 0x49a   : > { %1172 = vrot.lane.b32.xlu1 %v3677_v37, %s4649_s30 }
 0x49b   : > { %1174 = vrot.lane.b32.xlu0 %v3679_v38, %s4649_s30 }
 0x49e   : > { %1134 = vrot.lane.b32.xlu1 %v3677_v37, %s3451_s16 }
 0x49f   : > { %1136 = vrot.lane.b32.xlu0 %v3679_v38, %s3451_s16 }
 0x4a2   : > { %1188 = vrot.lane.b32.xlu1 %v3677_v37, %s4653_s17 }
 0x4a3   : > { %1190 = vrot.lane.b32.xlu0 %v3679_v38, %s4653_s17 }
 0x4a6   : > { %1144 = vrot.lane.b32.xlu1 %v3677_v37, %s3453_s21 }
 0x4a7   : > { %1146 = vrot.lane.b32.xlu0 %v3679_v38, %s3453_s21 }
 0x4aa   : > { %1198 = vrot.lane.b32.xlu1 %v3677_v37, %s4647_s22 }
 0x4ab   : > { %1200 = vrot.lane.b32.xlu0 %v3679_v38, %s4647_s22 }
 0x4f8   : > { %v3738_v59 = vpop.permute.xlu1 %1100 }
 0x4f9   : > { %v3740_v60 = vpop.permute.xlu0 %1102  ;;  %v1106_v19 = vmul.f32 %v3825_v34, %v3738_v59 }
 0x4fa   : > { %v1107_v25 = vmul.f32 %v3820_v32, %v3740_v60 }
 0x4fc   : > { %v3750_v1 = vpop.permute.xlu1 %1108 }
 0x4fd   : > { %v3753_v3 = vpop.permute.xlu0 %1110  ;;  %v1114_v9 = vmul.f32 %v3850_v49, %v3750_v1 }
 0x4fe   : > { %v1115_v16 = vmul.f32 %v3855_v51, %v3753_v3  ;;  %v2941_v3 = vsel %vm3874_vm7, 1.0, %v3456_v8  ;;  %vm693_vm7 = vmand %vm3845_vm13, %vm3756_vm8 }
 0x4ff   : > { %v1116_v59 = vadd.f32 %v1114_v9, %v1106_v19  ;;  %vm675_vm8 = vmand %vm3898_vm11, %vm3868_vm4 }
 0x500   : > { %v3776_v11 = vpop.permute.xlu1 %1154  ;;  %v1117_v45 = vadd.f32 %v1115_v16, %v1107_v25  ;;  %v3936_v16 = vmul.f32 %v2943_v44, %v2941_v3  ;;  %v3941_v25 = vmul.f32 0.0, %v2945_v48  ;;  %vm696_vm4 = vmand %vm3845_vm13, %vm3809_vm9 }
 0x501   : > { %v3785_v14 = vpop.permute.xlu0 %1156  ;;  %v1160_v41 = vmul.f32 %v3859_v53, %v3776_v11 }
 0x502   : > { %v1161_v4 = vmul.f32 %v3857_v52, %v3785_v14  ;;  %v2946_v14 = vsel %vm672_vm3, 1.0, %v3456_v8 }
 0x504   : > { %v3807_v22 = vpop.permute.xlu1 %1162 }
 0x505   : > { %v3822_v33 = vpop.permute.xlu0 %1164  ;;  %v1168_v39 = vmul.f32 %v3881_v10, %v3807_v22 }
 0x506   : > { %v1169_v60 = vmul.f32 %v3861_v55, %v3822_v33 }
 0x507   : > { %v1170_v19 = vadd.f32 %v1168_v39, %v1160_v41  ;;  %v1185_v39 = vmul.f32 %v3816_v30, %v3679_v38 }
 0x508   : > { %v1119_v46 = vpop.permute.xlu1 %1118  ;;  %v1171_v56 = vadd.f32 %v1169_v60, %v1161_v4 }
 0x509   : > { %v1121_v50 = vpop.permute.xlu0 %1120  ;;  %v1124_v20 = vmul.f32 %v3863_v58, %v1119_v46  ;;  %v3923_v46 = vmul.f32 %v2942_v54, %v2941_v3 }
 0x50a   : > { %v1125_v35 = vmul.f32 %v3872_v0, %v1121_v50 }
 0x50b   : > { %v1126_v50 = vadd.f32 %v1124_v20, %v1116_v59  ;;  %v3944_v59 = vmul.f32 %v2945_v48, %v2944_v57  ;;  %v3953_v48 = vmul.f32 0.0, %v2946_v14 }
 0x50c   : > { %v1173_v2 = vpop.permute.xlu1 %1172  ;;  %v1127_v33 = vadd.f32 %v1125_v35, %v1117_v45 }
 0x50d   : > { %v1175_v12 = vpop.permute.xlu0 %1174  ;;  %v1178_v22 = vmul.f32 %v3891_v18, %v1173_v2  ;;  %v3939_v2 = vmul.f32 0.0, %v2943_v44 }
 0x50e   : > { %v1179_v9 = vmul.f32 %v3889_v17, %v1175_v12  ;;  %v1132_v12 = vadd.f32 %v1130_v15, %v1126_v50  ;;  %v1133_v45 = vadd.f32 %v1131_v13, %v1127_v33  ;;  %v3957_v50 = vmul.f32 %v2946_v14, %v2944_v57 }
 0x50f   : > { %v1180_v35 = vadd.f32 %v1178_v22, %v1170_v19 }
 0x510   : > { %v1135_v36 = vpop.permute.xlu1 %1134  ;;  %v1181_v3 = vadd.f32 %v1179_v9, %v1171_v56 }
 0x511   : > { %v1137_v40 = vpop.permute.xlu0 %1136  ;;  %v1140_v11 = vmul.f32 %v3916_v43, %v1135_v36  ;;  %v1184_v36 = vmul.f32 %v3818_v31, %v3677_v37 }
 0x512   : > { %v1141_v7 = vmul.f32 %v3923_v46, %v1137_v40  ;;  %v1187_v37 = vadd.f32 %v1185_v39, %v1181_v3  ;;  %v3461_v3 = vmov 3   ;;  %v2953_v39 = vsel %vm693_vm7, 1.0, %v3456_v8  ;;  %vm4688_vm7 = vmmov %vm4682_vm6 }
 0x513   : > { %v1142_v41 = vadd.f32 %v1140_v11, %v1132_v12  ;;  %v1186_v38 = vadd.f32 %v1184_v36, %v1180_v35  ;;  %v3298_v35 = vld [vmem:[%s4631_s5 + $0x4] ss:$8 sps:$4 sm:$0xff]  }
 0x514   : > { %v1189_v54 = vpop.permute.xlu1 %1188  ;;  %v1143_v24 = vadd.f32 %v1141_v7, %v1133_v45  ;;  %2965 = vmatprep.mubr.msk.bf16.mxu1 %vm4681_vm5, %v3298_v35  ;;  %v3303_v12 = vld [vmem:[%s4632_s6 + $0x4] ss:$8 sps:$4 sm:$0xff]   ;;  %v3462_v45 = vmov 1   ;;  %vm3467_vm5 = vmmov 0  }
 0x515   : > { %v1191_v20 = vpop.permute.xlu0 %1190  ;;  %v1194_v60 = vmul.f32 %v3939_v2, %v1189_v54  ;;  %2968 = vmatprep.mubr.msk.bf16.mxu0 %vm4682_vm6, %v3303_v12 }
 0x516   : > { %v1195_v15 = vmul.f32 %v3936_v16, %v1191_v20 }
 0x517   : > { %v1196_v54 = vadd.f32 %v1194_v60, %v1186_v38 }
 0x518   : > { %v1145_v44 = vpop.permute.xlu1 %1144  ;;  %v1197_v56 = vadd.f32 %v1195_v15, %v1187_v37 }
 0x519   : > { %v1147_v4 = vpop.permute.xlu0 %1146  ;;  %v1150_v40 = vmul.f32 %v3941_v25, %v1145_v44 }
 0x51a   : > { %v1151_v13 = vmul.f32 %v3944_v59, %v1147_v4 }
 0x51b   : > { %v3959_v22 = vadd.f32 %v1150_v40, %v1142_v41 }
 0x51c   : > { %v3961_v33 = vadd.f32 %v1151_v13, %v1143_v24  ;;  %v1199_v9 = vpop.permute.xlu1 %1198  ;;  %v2952_v13 = vsel %vm690_vm1, 1.0, %v3456_v8  ;;  %vm4689_vm1 = vmmov %vm4682_vm6 }
 0x51d   : > { %v1201_v19 = vpop.permute.xlu0 %1200  ;;  %v1204_v11 = vmul.f32 %v3953_v48, %v1199_v9  ;;  %1251 = vrot.lane.b32.xlu1 %v3959_v22, %s4649_s30 }
 0x51e   : > { %v1205_v20 = vmul.f32 %v3957_v50, %v1201_v19  ;;  %1253 = vrot.lane.b32.xlu0 %v3961_v33, %s4649_s30  ;;  %v1236_v57 = vpack.c.bf16 %v3961_v33, %v3959_v22 }
 0x51f   : > { %v3971_v7 = vadd.f32 %v1204_v11, %v1196_v54 }
 0x520   : > { %v3973_v24 = vadd.f32 %v1205_v20, %v1197_v56 }
 0x521   : > { %1425 = vrot.lane.b32.xlu1 %v3971_v7, %s4649_s30 }
 0x522   : > { %1427 = vrot.lane.b32.xlu0 %v3973_v24, %s4649_s30  ;;  %v1410_v14 = vpack.c.bf16 %v3973_v24, %v3971_v7 }
 0x525   : > { %1244 = vrot.lane.b32.xlu1 %v3959_v22, %s3457_s23 }
 0x526   : > { %1246 = vrot.lane.b32.xlu0 %v3961_v33, %s3457_s23 }
 0x529   : > { %1418 = vrot.lane.b32.xlu1 %v3971_v7, %s3457_s23 }
 0x52a   : > { %1420 = vrot.lane.b32.xlu0 %v3973_v24, %s3457_s23  ;;  %s3458_s23 = smov 15  }
 0x52d   : > { %1237 = vrot.lane.b32.xlu1 %v3959_v22, %s3449_s29 }
 0x52e   : > { %1239 = vrot.lane.b32.xlu0 %v3961_v33, %s3449_s29 }
 0x531   : > { %1411 = vrot.lane.b32.xlu1 %v3971_v7, %s3449_s29 }
 0x532   : > { %1413 = vrot.lane.b32.xlu0 %v3973_v24, %s3449_s29 }
 0x535   : > { %1229 = vrot.lane.b32.xlu1 %v3959_v22, %s3451_s16 }
 0x536   : > { %1231 = vrot.lane.b32.xlu0 %v3961_v33, %s3451_s16 }
 0x539   : > { %1403 = vrot.lane.b32.xlu1 %v3971_v7, %s3451_s16 }
 0x53a   : > { %1405 = vrot.lane.b32.xlu0 %v3973_v24, %s3451_s16 }
 0x53d   : > { %1222 = vrot.lane.b32.xlu1 %v3959_v22, %s3458_s23 }
 0x53e   : > { %1224 = vrot.lane.b32.xlu0 %v3961_v33, %s3458_s23 }
 0x541   : > { %1396 = vrot.lane.b32.xlu1 %v3971_v7, %s3458_s23 }
 0x542   : > { %1398 = vrot.lane.b32.xlu0 %v3973_v24, %s3458_s23 }
 0x545   : > { %1215 = vrot.lane.b32.xlu1 %v3959_v22, %s4653_s17 }
 0x546   : > { %1217 = vrot.lane.b32.xlu0 %v3961_v33, %s4653_s17 }
 0x549   : > { %1389 = vrot.lane.b32.xlu1 %v3971_v7, %s4653_s17 }
 0x54a   : > { %1391 = vrot.lane.b32.xlu0 %v3973_v24, %s4653_s17  ;;  %s3460_s17 = smov 111  }
 0x54d   : > { %1208 = vrot.lane.b32.xlu1 %v3959_v22, %s3459_s28 }
 0x54e   : > { %1210 = vrot.lane.b32.xlu0 %v3961_v33, %s3459_s28 }
 0x551   : > { %1382 = vrot.lane.b32.xlu1 %v3971_v7, %s3459_s28 }
 0x552   : > { %1384 = vrot.lane.b32.xlu0 %v3973_v24, %s3459_s28 }
 0x555   : > { %1258 = vrot.lane.b32.xlu1 %v3959_v22, %s3460_s17  ;;  %v2949_v22 = vsel %vm681_vm0, 1.0, %v3456_v8 }
 0x556   : > { %1260 = vrot.lane.b32.xlu0 %v3961_v33, %s3460_s17 }
 0x559   : > { %1432 = vrot.lane.b32.xlu1 %v3971_v7, %s3460_s17 }
 0x55a   : > { %1434 = vrot.lane.b32.xlu0 %v3973_v24, %s3460_s17 }
 0x55d   : > { %1268 = vperm.xlu1 %3274, %v3642_v26  }
 0x55e   : > { %1272 = vperm.xlu0 %3275, %v3650_v28  }
 0x561   : > { %3276 = vset.pattern.permute.xlu1 %v3461_v3  ;;  %v2951_v3 = vsel %vm687_vm10, 1.0, %v3456_v8 }
 0x562   : > { %1442 = vperm.xlu1 %3276, %v3642_v26  }
 0x566   : > { %1446 = vperm.xlu1 %3276, %v3650_v28  }
 0x56a   : > { %3277 = vset.pattern.permute.xlu1 %v3462_v45 }
 0x56b   : > { %1671 = vperm.xlu1 %3277, %v3642_v26  }
 0x56f   : > { %1675 = vperm.xlu1 %3277, %v3650_v28  }
 0x58f   : > { %v1252_v36 = vpop.permute.xlu1 %1251 }
 0x590   : > { %v1254_v44 = vpop.permute.xlu0 %1253  ;;  %v1255_v41 = vmul.f32 %v2953_v39, %v1252_v36 }
 0x591   : > { %v1256_v60 = vmul.f32 %v2953_v39, %v1254_v44 }
 0x593   : > { %v1257_v4 = vpack.c.bf16 %v1256_v60, %v1255_v41  ;;  %v1426_v26 = vpop.permute.xlu1 %1425 }
 0x594   : > { %v1428_v40 = vpop.permute.xlu0 %1427  ;;  %v1429_v28 = vmul.f32 %v2953_v39, %v1426_v26 }
 0x595   : > { %v1430_v15 = vmul.f32 %v2953_v39, %v1428_v40  ;;  %1288 = vmatpush1.bf16.msra.mxu1 %v1257_v4 }
 0x596   : > { %1289 = vmatprep.subr.bf16.mxu1 %v4655_v27 }
 0x597   : > { %v1431_v38 = vpack.c.bf16 %v1430_v15, %v1429_v28  ;;  %v1245_v37 = vpop.permute.xlu1 %1244  ;;  %v2950_v15 = vsel %vm684_vm12, 1.0, %v3456_v8 }
 0x598   : > { %v1247_v9 = vpop.permute.xlu0 %1246  ;;  %v1248_v54 = vmul.f32 %v2952_v13, %v1245_v37 }
 0x599   : > { %v1249_v19 = vmul.f32 %v2952_v13, %v1247_v9  ;;  %1462 = vmatpush1.bf16.msra.mxu0 %v1431_v38 }
 0x59a   : > { %1463 = vmatprep.subr.bf16.mxu0 %v4655_v27 }
 0x59b   : > { %v1250_v11 = vpack.c.bf16 %v1249_v19, %v1248_v54  ;;  %v1419_v56 = vpop.permute.xlu1 %1418 }
 0x59c   : > { %v1421_v20 = vpop.permute.xlu0 %1420  ;;  %v1422_v35 = vmul.f32 %v2952_v13, %v1419_v56 }
 0x59d   : > { %v1423_v12 = vmul.f32 %v2952_v13, %v1421_v20  ;;  %1290 = vmatpush1.bf16.msra.mxu1 %v1250_v11 }
 0x59e   : > { %1291 = vmatprep.subr.bf16.mxu1 %v4655_v27 }
 0x59f   : > { %v1424_v45 = vpack.c.bf16 %v1423_v12, %v1422_v35  ;;  %v1238_v39 = vpop.permute.xlu1 %1237 }
 0x5a0   : > { %v1240_v36 = vpop.permute.xlu0 %1239  ;;  %v1241_v44 = vmul.f32 %v2951_v3, %v1238_v39 }
 0x5a1   : > { %v1242_v41 = vmul.f32 %v2951_v3, %v1240_v36  ;;  %1464 = vmatpush1.bf16.msra.mxu0 %v1424_v45  ;;  %v2948_v36 = vsel %vm678_vm14, 1.0, %v3456_v8 }
 0x5a2   : > { %1465 = vmatprep.subr.bf16.mxu0 %v4655_v27 }
 0x5a3   : > { %v1243_v60 = vpack.c.bf16 %v1242_v41, %v1241_v44  ;;  %v1412_v4 = vpop.permute.xlu1 %1411 }
 0x5a4   : > { %v1414_v26 = vpop.permute.xlu0 %1413  ;;  %v1415_v40 = vmul.f32 %v2951_v3, %v1412_v4 }
 0x5a5   : > { %v1416_v28 = vmul.f32 %v2951_v3, %v1414_v26  ;;  %1292 = vmatpush1.bf16.msra.mxu1 %v1243_v60 }
 0x5a6   : > { %1293 = vmatprep.subr.bf16.mxu1 %v4655_v27 }
 0x5a7   : > { %v1417_v13 = vpack.c.bf16 %v1416_v28, %v1415_v40  ;;  %v1230_v38 = vpop.permute.xlu1 %1229 }
 0x5a8   : > { %v1232_v37 = vpop.permute.xlu0 %1231  ;;  %v1233_v9 = vmul.f32 %v2950_v15, %v1230_v38  ;;  %v2947_v38 = vsel %vm675_vm8, 1.0, %v3456_v8  ;;  %vm4691_vm8 = vmmov %vm4689_vm1 }
 0x5a9   : > { %v1234_v54 = vmul.f32 %v2950_v15, %v1232_v37  ;;  %1294 = vmatpush1.bf16.msra.mxu1 %v1236_v57  ;;  %1466 = vmatpush1.bf16.msra.mxu0 %v1417_v13 }
 0x5aa   : > { %1295 = vmatprep.subr.bf16.mxu1 %v4655_v27  ;;  %1467 = vmatprep.subr.bf16.mxu0 %v4655_v27 }
 0x5ab   : > { %v1235_v6 = vpack.c.bf16 %v1234_v54, %v1233_v9  ;;  %v1404_v19 = vpop.permute.xlu1 %1403 }
 0x5ac   : > { %v1406_v11 = vpop.permute.xlu0 %1405  ;;  %v1407_v56 = vmul.f32 %v2950_v15, %v1404_v19 }
 0x5ad   : > { %v1408_v20 = vmul.f32 %v2950_v15, %v1406_v11  ;;  %1296 = vmatpush1.bf16.msra.mxu1 %v1235_v6  ;;  %1468 = vmatpush1.bf16.msra.mxu0 %v1410_v14 }
 0x5ae   : > { %1469 = vmatprep.subr.bf16.mxu0 %v4655_v27  ;;  %1297 = vmatprep.subr.bf16.mxu1 %v4655_v27 }
 0x5af   : > { %v1409_v33 = vpack.c.bf16 %v1408_v20, %v1407_v56  ;;  %v1223_v57 = vpop.permute.xlu1 %1222 }
 0x5b0   : > { %v1225_v35 = vpop.permute.xlu0 %1224  ;;  %v1226_v12 = vmul.f32 %v2949_v22, %v1223_v57 }
 0x5b1   : > { %v1227_v3 = vmul.f32 %v2949_v22, %v1225_v35  ;;  %1470 = vmatpush1.bf16.msra.mxu0 %v1409_v33 }
 0x5b2   : > { %1471 = vmatprep.subr.bf16.mxu0 %v4655_v27 }
 0x5b3   : > { %v1228_v7 = vpack.c.bf16 %v1227_v3, %v1226_v12  ;;  %v1397_v24 = vpop.permute.xlu1 %1396 }
 0x5b4   : > { %v1399_v14 = vpop.permute.xlu0 %1398  ;;  %v1400_v45 = vmul.f32 %v2949_v22, %v1397_v24 }
 0x5b5   : > { %v1401_v39 = vmul.f32 %v2949_v22, %v1399_v14  ;;  %1298 = vmatpush1.bf16.msra.mxu1 %v1228_v7  ;;  %v2954_v22 = vsel %vm696_vm4, 1.0, %v3456_v8  ;;  %v3300_v14 = vld [vmem:[%s4631_s5] ss:$8 sps:$4 sm:$0xff]   ;;  %vm4692_vm4 = vcmask 64512  }
 0x5b6   : > { %1299 = vmatprep.subr.bf16.mxu1 %v4655_v27 }
 0x5b7   : > { %v1402_v44 = vpack.c.bf16 %v1401_v39, %v1400_v45  ;;  %v1216_v41 = vpop.permute.xlu1 %1215 }
 0x5b8   : > { %v1218_v60 = vpop.permute.xlu0 %1217  ;;  %v1219_v4 = vmul.f32 %v2948_v36, %v1216_v41 }
 0x5b9   : > { %v1220_v5 = vmul.f32 %v2948_v36, %v1218_v60  ;;  %1472 = vmatpush1.bf16.msra.mxu0 %v1402_v44 }
 0x5ba   : > { %1473 = vmatprep.subr.bf16.mxu0 %v4655_v27 }
 0x5bb   : > { %v1221_v26 = vpack.c.bf16 %v1220_v5, %v1219_v4  ;;  %v1390_v40 = vpop.permute.xlu1 %1389 }
 0x5bc   : > { %v1392_v28 = vpop.permute.xlu0 %1391  ;;  %v1393_v15 = vmul.f32 %v2948_v36, %v1390_v40 }
 0x5bd   : > { %v1394_v13 = vmul.f32 %v2948_v36, %v1392_v28  ;;  %1300 = vmatpush1.bf16.msra.mxu1 %v1221_v26  ;;  %v3301_v36 = vld [vmem:[%s4632_s6] ss:$8 sps:$4 sm:$0xff]  }
 0x5be   : > { %1301 = vmatprep.subr.bf16.mxu1 %v4655_v27 }
 0x5bf   : > { %v1395_v37 = vpack.c.bf16 %v1394_v13, %v1393_v15  ;;  %v1209_v9 = vpop.permute.xlu1 %1208 }
 0x5c0   : > { %v1211_v54 = vpop.permute.xlu0 %1210  ;;  %v1212_v6 = vmul.f32 %v2947_v38, %v1209_v9 }
 0x5c1   : > { %v1213_v62 = vmul.f32 %v2947_v38, %v1211_v54  ;;  %1474 = vmatpush1.bf16.msra.mxu0 %v1395_v37 }
 0x5c2   : > { %1475 = vmatprep.subr.bf16.mxu0 %v4655_v27 }
 0x5c3   : > { %v1214_v1 = vpack.c.bf16 %v1213_v62, %v1212_v6  ;;  %v1383_v19 = vpop.permute.xlu1 %1382 }
 0x5c4   : > { %v1385_v11 = vpop.permute.xlu0 %1384  ;;  %v1386_v56 = vmul.f32 %v2947_v38, %v1383_v19 }
 0x5c5   : > { %v1387_v20 = vmul.f32 %v2947_v38, %v1385_v11  ;;  %1302 = vmatpush1.bf16.msra.mxu1 %v1214_v1 }
 0x5c6   : > { %1317 = vmatprep.subr.bf16.mxu1 %v4655_v27 }
 0x5c7   : > { %v1388_v33 = vpack.c.bf16 %v1387_v20, %v1386_v56  ;;  %v1259_v57 = vpop.permute.xlu1 %1258 }
 0x5c8   : > { %v1261_v35 = vpop.permute.xlu0 %1260  ;;  %v1262_v12 = vmul.f32 %v2954_v22, %v1259_v57 }
 0x5c9   : > { %v1263_v23 = vmul.f32 %v2954_v22, %v1261_v35  ;;  %1476 = vmatpush1.bf16.msra.mxu0 %v1388_v33 }
 0x5ca   : > { %1491 = vmatprep.subr.bf16.mxu0 %v4655_v27 }
 0x5cb   : > { %v1264_v47 = vpack.c.bf16 %v1263_v23, %v1262_v12  ;;  %v1433_v3 = vpop.permute.xlu1 %1432 }
 0x5cc   : > { %v1435_v7 = vpop.permute.xlu0 %1434  ;;  %v1436_v24 = vmul.f32 %v2954_v22, %v1433_v3 }
 0x5cd   : > { %v1437_v45 = vmul.f32 %v2954_v22, %v1435_v7  ;;  %1318 = vmatpush2.bf16.msra.mxu1 %v1264_v47 }
 0x5ce   : > { %3118 = vmatprep.subr.bf16.mxu1 %v3456_v8 }
 0x5cf   : > { %v1438_v39 = vpack.c.bf16 %v1437_v45, %v1436_v24 }
 0x5d0   : > { %1320 = vmatmul.mubr.bf16.vlgmr.msra.gmra.mxu1 %v3300_v14 }
 0x5d1   : > { %1492 = vmatpush2.bf16.msra.mxu0 %v1438_v39  ;;  %3120 = vmatprep.mubr.msk.bf16.mxu1 %vm3467_vm5, %v3456_v8 }
 0x5d2   : > { %3136 = vmatprep.subr.bf16.mxu0 %v3456_v8 }
 0x5d4   : > { %1494 = vmatmul.mubr.bf16.vlgmr.msra.gmra.mxu0 %v3301_v36 }
 0x5d5   : > { %3138 = vmatprep.mubr.msk.bf16.mxu0 %vm3467_vm5, %v3456_v8 }
 0x5d8   : > { %v1269_v44 = vpop.permute.xlu1 %1268 }
 0x5d9   : > { %v1273_v5 = vpop.permute.xlu0 %1272 }
 0x5dd   : > { %v1443_v26 = vpop.permute.xlu1 %1442 }
 0x5e1   : > { %v1447_v11 = vpop.permute.xlu1 %1446 }
 0x690   : > { %v1321_v41 = vpop.f32.mrf.mxu1 }
 0x691   : > { %v4105_v60 = vadd.f32 %v1321_v41, %v1269_v44 }
 0x692   : > { %v1323_v4 = vpop.f32.mrf.mxu1 }
 0x693   : > { %v4108_v40 = vmul.f32 0.70710677, %v4105_v60 }
 0x694   : > { %v1324_v28 = vpop.f32.mrf.mxu1  ;;  %v1495_v15 = vpop.f32.mrf.mxu0 }
 0x695   : > { %v1336_v13 = vand.u32 2147483647, %v4108_v40  ;;  %v4111_v38 = vadd.f32 %v1324_v28, %v1273_v5  ;;  %v4113_v37 = vadd.f32 %v1495_v15, %v1443_v26  ;;  %vm1332_vm9 = vcmp.lt.f32.partialorder %v4108_v40, 0.0 }
 0x696   : > { %v1326_v9 = vpop.f32.mrf.mxu1  ;;  %v1497_v54 = vpop.f32.mrf.mxu0 }
 0x697   : > { %v1338_v6 = vmul.f32 0.3275911, %v1336_v13  ;;  %v4116_v62 = vmul.f32 0.70710677, %v4111_v38  ;;  %v4119_v1 = vmul.f32 0.70710677, %v4113_v37 }
 0x698   : > { %v1498_v19 = vpop.f32.mrf.mxu0  ;;  %v1364_v14 = vsub.f32 0.0, %v1336_v13 }
 0x699   : > { %v1340_v56 = vadd.f32 1.0, %v1338_v6  ;;  %v1337_v20 = vand.u32 2147483647, %v4116_v62  ;;  %v1510_v22 = vand.u32 2147483647, %v4119_v1  ;;  %v4123_v33 = vadd.f32 %v1498_v19, %v1447_v11 }
 0x69a   : > { %v1500_v57 = vpop.f32.mrf.mxu0  ;;  %v1366_v44 = vmul.f32 %v1364_v14, %v1336_v13  ;;  %vm1506_vm13 = vcmp.lt.f32.partialorder %v4119_v1, 0.0  ;;  %vm1333_vm11 = vcmp.lt.f32.partialorder %v4116_v62, 0.0  ;;  %v1672_v62 = vpop.permute.xlu1 %1671 }
 0x69b   : > { %3327 = vrcp.f32 %v1340_v56  ;;  %v1339_v35 = vmul.f32 0.3275911, %v1337_v20  ;;  %v1512_v12 = vmul.f32 0.3275911, %v1510_v22  ;;  %v4126_v47 = vmul.f32 0.70710677, %v4123_v33 }
 0x69c   : > { %v1365_v39 = vsub.f32 0.0, %v1337_v20  ;;  %v1538_v36 = vsub.f32 0.0, %v1510_v22  ;;  %v1368_v9 = vmul.f32 1.442695, %v1366_v44 }
 0x69d   : > { %v1341_v23 = vadd.f32 1.0, %v1339_v35  ;;  %v1514_v3 = vadd.f32 1.0, %v1512_v12  ;;  %v1511_v7 = vand.u32 2147483647, %v4126_v47  ;;  %vm1507_vm15 = vcmp.lt.f32.partialorder %v4126_v47, 0.0 }
 0x69e   : > { %v1367_v5 = vmul.f32 %v1365_v39, %v1337_v20  ;;  %v1540_v26 = vmul.f32 %v1538_v36, %v1510_v22 }
 0x69f   : > { %3329 = vrcp.f32 %v1341_v23  ;;  %v1513_v24 = vmul.f32 0.3275911, %v1511_v7  ;;  %v1539_v28 = vsub.f32 0.0, %v1511_v7 }
 0x6a0   : > { %3331 = vrcp.f32 %v1514_v3  ;;  %v1370_v56 = vmul.f32 1.442695, %v1367_v5  ;;  %v1542_v35 = vmul.f32 1.442695, %v1540_v26 }
 0x6a1   : > { %v1515_v45 = vadd.f32 1.0, %v1513_v24  ;;  %v1541_v12 = vmul.f32 %v1539_v28, %v1511_v7 }
 0x6a3   : > { %3333 = vrcp.f32 %v1515_v45  ;;  %v1544_v45 = vmul.f32 1.442695, %v1541_v12 }
 0x6a4   : > { %3335 = vpow2.f32 %v1368_v9 }
 0x6a5   : > { %3337 = vpow2.f32 %v1370_v56 }
 0x6a6   : > { %3339 = vpow2.f32 %v1542_v35 }
 0x6a7   : > { %3341 = vpow2.f32 %v1544_v45 }
 0x6a8   : > { %v3328_v41 = vpop.eup %3327 }
 0x6a9   : > { %v1346_v4 = vmul.f32 1.0614054, %v3328_v41 }
 0x6ab   : > { %v1348_v15 = vadd.f32 -1.4531521, %v1346_v4 }
 0x6ac   : > { %v3330_v54 = vpop.eup %3329 }
 0x6ad   : > { %v3332_v6 = vpop.eup %3331  ;;  %v1350_v19 = vmul.f32 %v3328_v41, %v1348_v15  ;;  %v1347_v11 = vmul.f32 1.0614054, %v3330_v54 }
 0x6ae   : > { %v1520_v57 = vmul.f32 1.0614054, %v3332_v6 }
 0x6af   : > { %v1352_v23 = vadd.f32 1.4214138, %v1350_v19  ;;  %v1349_v3 = vadd.f32 -1.4531521, %v1347_v11 }
 0x6b0   : > { %v1522_v24 = vadd.f32 -1.4531521, %v1520_v57  ;;  %v3334_v20 = vpop.eup %3333 }
 0x6b1   : > { %v1354_v13 = vmul.f32 %v3328_v41, %v1352_v23  ;;  %v1351_v14 = vmul.f32 %v3330_v54, %v1349_v3  ;;  %v1521_v44 = vmul.f32 1.0614054, %v3334_v20  ;;  %v3336_v12 = vpop.eup %3335 }
 0x6b2   : > { %v1524_v22 = vmul.f32 %v3332_v6, %v1522_v24 }
 0x6b3   : > { %v1356_v39 = vadd.f32 -0.28449672, %v1354_v13  ;;  %v1353_v36 = vadd.f32 1.4214138, %v1351_v14  ;;  %v1523_v27 = vadd.f32 -1.4531521, %v1521_v44 }
 0x6b4   : > { %v1526_v4 = vadd.f32 1.4214138, %v1524_v22 }
 0x6b5   : > { %v1358_v15 = vmul.f32 %v3328_v41, %v1356_v39  ;;  %v1355_v5 = vmul.f32 %v3330_v54, %v1353_v36  ;;  %v1525_v9 = vmul.f32 %v3334_v20, %v1523_v27  ;;  %v3338_v39 = vpop.eup %3337 }
 0x6b6   : > { %v1528_v26 = vmul.f32 %v3332_v6, %v1526_v4  ;;  %v3340_v44 = vpop.eup %3339 }
 0x6b7   : > { %v1360_v7 = vadd.f32 0.2548296, %v1358_v15  ;;  %v1357_v28 = vadd.f32 -0.28449672, %v1355_v5  ;;  %v1527_v56 = vadd.f32 1.4214138, %v1525_v9  ;;  %v3342_v9 = vpop.eup %3341 }
 0x6b8   : > { %v1530_v19 = vadd.f32 -0.28449672, %v1528_v26 }
 0x6b9   : > { %v1362_v11 = vmul.f32 %v3328_v41, %v1360_v7  ;;  %v1359_v57 = vmul.f32 %v3330_v54, %v1357_v28  ;;  %v1529_v35 = vmul.f32 %v3334_v20, %v1527_v56  ;;  %v4683_v7 = vmov 1.0  }
 0x6ba   : > { %v1532_v23 = vmul.f32 %v3332_v6, %v1530_v19  ;;  %v1508_v28 = vsel %vm1506_vm13, -1.0, %v4683_v7  ;;  %v1335_v19 = vsel %vm1333_vm11, -1.0, %v4683_v7  ;;  %vm4694_vm13 = vmmov %vm4692_vm4 }
 0x6bb   : > { %v1361_v3 = vadd.f32 0.2548296, %v1359_v57  ;;  %v1372_v13 = vmul.f32 %v3336_v12, %v1362_v11  ;;  %v1531_v22 = vadd.f32 -0.28449672, %v1529_v35  ;;  %vm4695_vm11 = vmmov %vm4692_vm4 }
 0x6bc   : > { %v1534_v24 = vadd.f32 0.2548296, %v1532_v23 }
 0x6bd   : > { %v1363_v14 = vmul.f32 %v3330_v54, %v1361_v3  ;;  %v1533_v15 = vmul.f32 %v3334_v20, %v1531_v22  ;;  %v1374_v41 = vsub.f32 1.0, %v1372_v13  ;;  %v1509_v3 = vsel %vm1507_vm15, -1.0, %v4683_v7  ;;  %vm4696_vm15 = vmmov %vm4689_vm1 }
 0x6be   : > { %v1536_v36 = vmul.f32 %v3332_v6, %v1534_v24  ;;  %v1334_v6 = vsel %vm1332_vm9, -1.0, %v4683_v7  ;;  %v1328_v13 = vmul.f32 0.5, %v4105_v60  ;;  %vm4693_vm9 = vmmov %vm4692_vm4 }
 0x6bf   : > { %v1373_v4 = vmul.f32 %v3338_v39, %v1363_v14  ;;  %v1535_v5 = vadd.f32 0.2548296, %v1533_v15  ;;  %v1376_v57 = vmul.f32 %v1374_v41, %v1334_v6  ;;  %v1329_v14 = vmul.f32 0.5, %v4111_v38  ;;  %v1676_v15 = vpop.permute.xlu1 %1675 }
 0x6c0   : > { %v1546_v27 = vmul.f32 %v3340_v44, %v1536_v36  ;;  %v1503_v39 = vmul.f32 0.5, %v4123_v33  ;;  %v3463_v38 = vmov 12  }
 0x6c1   : > { %v1375_v45 = vsub.f32 1.0, %v1373_v4  ;;  %v1537_v54 = vmul.f32 %v3334_v20, %v1535_v5  ;;  %v1378_v35 = vadd.f32 1.0, %v1376_v57  ;;  %v1502_v20 = vmul.f32 0.5, %v4113_v37  ;;  %3279 = vset.pattern.permute.xlu1 %v3463_v38  ;;  %3278 = vset.pattern.permute.xlu0 %v3463_v38 }
 0x6c2   : > { %v1548_v26 = vsub.f32 1.0, %v1546_v27  ;;  %v4145_v37 = vadd.f32 %v3667_v61, %v1672_v62  ;;  %v3464_v62 = vmov 13  }
 0x6c3   : > { %v1377_v40 = vmul.f32 %v1375_v45, %v1335_v19  ;;  %v1547_v1 = vmul.f32 %v3342_v9, %v1537_v54  ;;  %v1380_v47 = vmul.f32 %v1378_v35, %v1328_v13  ;;  %v4142_v45 = vadd.f32 %v3669_v63, %v1676_v15 }
 0x6c4   : > { %v1550_v11 = vmul.f32 %v1548_v26, %v1508_v28  ;;  %v3465_v35 = vmov 7  }
 0x6c5   : > { %v1549_v23 = vsub.f32 1.0, %v1547_v1  ;;  %v1379_v12 = vadd.f32 1.0, %v1377_v40  ;;  %v1680_v60 = vadd.f32 %v4142_v45, %v4145_v37 }
 0x6c6   : > { %v1552_v56 = vadd.f32 1.0, %v1550_v11 }
 0x6c7   : > { %v1551_v24 = vmul.f32 %v1549_v23, %v1509_v3  ;;  %v1381_v44 = vmul.f32 %v1379_v12, %v1329_v14  ;;  %v4152_v23 = vld [vmem:[%s4637_s11 + $0x8] sm:$0xff]  ;;  %v4158_v3 = vld [vmem:[%s4637_s11] sm:$0xff]  ;;  %v3466_v12 = vmov 8  }
 0x6c8   : > { %v1554_v22 = vmul.f32 %v1552_v56, %v1502_v20 }
 0x6c9   : > { %v1553_v36 = vadd.f32 1.0, %v1551_v24 }
 0x6ca   : > { %v1556_v27 = vadd.f32 %v1554_v22, %v1380_v47 }
 0x6cb   : > { %v1555_v4 = vmul.f32 %v1553_v36, %v1503_v39 }
 0x6cd   : > { %v1557_v41 = vadd.f32 %v1555_v4, %v1381_v44 }
 0x6cf   : > { %v1558_v5 = vadd.f32 %v1557_v41, %v1556_v27 }
 0x6d1   : > { %1559 = vadd.xlane.f32.xlu0 %v1558_v5 }
 0x6d5   : > { %1681 = vadd.xlane.f32.xlu0 %v1680_v60 }
 0x75a   : > { %v1560_v33 = vpop.xlane.xlu0 %1559 }
 0x75b   : > { %v1561_v26 = vrot.slane %v1560_v33, 4 }
 0x75d   : > { %v1562_v28 = vadd.f32 %v1561_v26, %v1560_v33 }
 0x75e   : > { %v1682_v20 = vpop.xlane.xlu0 %1681 }
 0x75f   : > { %v1563_v54 = vrot.slane %v1562_v28, 2  ;;  %v1683_v24 = vrot.slane %v1682_v20, 4 }
 0x761   : > { %v1564_v9 = vadd.f32 %v1563_v54, %v1562_v28  ;;  %v1684_v13 = vadd.f32 %v1683_v24, %v1682_v20 }
 0x763   : > { %v1565_v6 = vrot.slane %v1564_v9, 1  ;;  %v1685_v14 = vrot.slane %v1684_v13, 2 }
 0x765   : > { %v1566_v63 = vadd.f32 %v1565_v6, %v1564_v9  ;;  %v1686_v47 = vadd.f32 %v1685_v14, %v1684_v13 }
 0x767   : > { %3216 = vpush %v1566_v63  ;;  %v1687_v15 = vrot.slane %v1686_v47, 1 }
 0x769   : > { %v1688_v5 = vadd.f32 %v1687_v15, %v1686_v47 }
 0x798   : > { %s3217_s22 = spop %3216 }
 0x799   : > { %v1568_v19 = vstv %s3217_s22 }
 0x79a   : > { %v1569_v61 = vmul.f32 0.00048828125, %v1568_v19 }
 0x79c   : > { %v1570_v11 = vsub.f32 %v1556_v27, %v1569_v61  ;;  %v1571_v57 = vsub.f32 %v1557_v41, %v1569_v61 }
 0x79e   : > { %v1572_v40 = vmul.f32 %v1570_v11, %v1570_v11  ;;  %v1573_v1 = vmul.f32 %v1571_v57, %v1571_v57 }
 0x7a0   : > { %v1574_v56 = vadd.f32 %v1573_v1, %v1572_v40 }
 0x7a2   : > { %1575 = vadd.xlane.f32.xlu1 %v1574_v56 }
 0x7b3   : > { %1717 = vperm.xlu1 %3279, %v4152_v23  }
 0x7b7   : > { %3280 = vset.pattern.permute.xlu1 %v3464_v62 }
 0x7b8   : > { %1723 = vperm.xlu1 %3280, %v4158_v3  }
 0x7bc   : > { %1727 = vperm.xlu1 %3280, %v4152_v23  }
 0x7c0   : > { %3281 = vset.pattern.permute.xlu1 %v3465_v35 }
 0x7c1   : > { %1591 = vperm.xlu1 %3281, %v4158_v3  }
 0x7c5   : > { %1595 = vperm.xlu1 %3281, %v4152_v23  }
 0x7c9   : > { %3282 = vset.pattern.permute.xlu1 %v3466_v12 }
 0x7ca   : > { %1601 = vperm.xlu1 %3282, %v4158_v3  }
 0x7ce   : > { %1605 = vperm.xlu1 %3282, %v4152_v23  }
 0x82b   : > { %v1576_v22 = vpop.xlane.xlu1 %1575 }
 0x82c   : > { %v1577_v39 = vrot.slane %v1576_v22, 4 }
 0x82e   : > { %v1578_v36 = vadd.f32 %v1577_v39, %v1576_v22 }
 0x82f   : > { %v1718_v60 = vpop.permute.xlu1 %1717 }
 0x830   : > { %v1579_v44 = vrot.slane %v1578_v36, 2 }
 0x832   : > { %v1580_v4 = vadd.f32 %v1579_v44, %v1578_v36 }
 0x833   : > { %v1724_v38 = vpop.permute.xlu1 %1723 }
 0x834   : > { %v1581_v27 = vrot.slane %v1580_v4, 1 }
 0x836   : > { %v1582_v41 = vadd.f32 %v1581_v27, %v1580_v4 }
 0x837   : > { %v1728_v33 = vpop.permute.xlu1 %1727 }
 0x838   : > { %3218 = vpush %v1582_v41 }
 0x839   : > { %3220 = vpush %v1688_v5 }
 0x83c   : > { %v1592_v6 = vpop.permute.xlu1 %1591 }
 0x840   : > { %v1596_v62 = vpop.permute.xlu1 %1595 }
 0x845   : > { %v1602_v35 = vpop.permute.xlu1 %1601 }
 0x849   : > { %v1606_v13 = vpop.permute.xlu1 %1605 }
 0x869   : > { %s3219_s17 = spop %3218 }
 0x86a   : > { %v1584_v26 = vstv %s3219_s17  ;;  %s3221_s22 = spop %3220 }
 0x86b   : > { %v1585_v28 = vmul.f32 0.00048828125, %v1584_v26  ;;  %v1690_v54 = vstv %s3221_s22 }
 0x86c   : > { %v1691_v9 = vmul.f32 0.00048828125, %v1690_v54 }
 0x86d   : > { %v1586_v63 = vadd.f32 1e-05, %v1585_v28 }
 0x86e   : > { %v1692_v19 = vsub.f32 %v4145_v37, %v1691_v9  ;;  %v1693_v61 = vsub.f32 %v4142_v45, %v1691_v9 }
 0x86f   : > { %3343 = vrsqrt.f32 %v1586_v63 }
 0x870   : > { %v1694_v40 = vmul.f32 %v1692_v19, %v1692_v19  ;;  %v1695_v1 = vmul.f32 %v1693_v61, %v1693_v61 }
 0x872   : > { %v1696_v56 = vadd.f32 %v1695_v1, %v1694_v40 }
 0x874   : > { %1697 = vadd.xlane.f32.xlu0 %v1696_v56 }
 0x87c   : > { %v3344_v12 = vpop.eup %3343 }
 0x87d   : > { %v1588_v20 = vmul.f32 %v3344_v12, %v1570_v11  ;;  %v1589_v24 = vmul.f32 %v3344_v12, %v1571_v57 }
 0x87f   : > { %v1598_v14 = vmul.f32 %v1592_v6, %v1588_v20  ;;  %v1599_v22 = vmul.f32 %v1596_v62, %v1589_v24 }
 0x881   : > { %v1608_v39 = vadd.f32 %v1602_v35, %v1598_v14  ;;  %v1609_v36 = vadd.f32 %v1606_v13, %v1599_v22 }
 0x883   : > { %v1612_v47 = vpack.c.bf16 %v1609_v36, %v1608_v39 }
 0x885   : > { %3119 = vmatpush3.bf16.msra.mxu1 %v1612_v47 }
 0x886   : > { %3124 = vmatprep.subr.bf16.mxu1 %v3456_v8 }
 0x88a   : > { %1713 = vperm.xlu0 %3278, %v4158_v3  }
 0x8fd   : > { %v1698_v45 = vpop.xlane.xlu0 %1697 }
 0x8fe   : > { %v1699_v37 = vrot.slane %v1698_v45, 4 }
 0x900   : > { %v1700_v44 = vadd.f32 %v1699_v37, %v1698_v45 }
 0x902   : > { %v1701_v4 = vrot.slane %v1700_v44, 2 }
 0x904   : > { %v1702_v15 = vadd.f32 %v1701_v4, %v1700_v44 }
 0x905   : > { %v1714_v28 = vpop.permute.xlu0 %1713 }
 0x906   : > { %v1703_v27 = vrot.slane %v1702_v15, 1 }
 0x908   : > { %v1704_v41 = vadd.f32 %v1703_v27, %v1702_v15 }
 0x90a   : > { %3222 = vpush %v1704_v41 }
 0x93b   : > { %s3223_s23 = spop %3222 }
 0x93c   : > { %v1706_v11 = vstv %s3223_s23 }
 0x93d   : > { %v1707_v57 = vmul.f32 0.00048828125, %v1706_v11 }
 0x93f   : > { %v1708_v5 = vadd.f32 1e-05, %v1707_v57 }
 0x941   : > { %3345 = vrsqrt.f32 %v1708_v5 }
 0x94e   : > { %v3346_v26 = vpop.eup %3345 }
 0x94f   : > { %v1711_v54 = vmul.f32 %v3346_v26, %v1693_v61  ;;  %v1710_v9 = vmul.f32 %v3346_v26, %v1692_v19 }
 0x951   : > { %v1721_v6 = vmul.f32 %v1718_v60, %v1711_v54  ;;  %v1720_v63 = vmul.f32 %v1714_v28, %v1710_v9 }
 0x953   : > { %v1731_v40 = vadd.f32 %v1728_v33, %v1721_v6  ;;  %v1730_v1 = vadd.f32 %v1724_v38, %v1720_v63 }
 0x955   : > { %v1735_v56 = vmul.f32 0.70710677, %v1731_v40  ;;  %v1734_v62 = vmul.f32 0.70710677, %v1730_v1 }
 0x957   : > { %v1741_v35 = vand.u32 2147483647, %v1735_v56  ;;  %v1740_v12 = vand.u32 2147483647, %v1734_v62  ;;  %vm1737_vm2 = vcmp.lt.f32.partialorder %v1735_v56, 0.0  ;;  %vm1736_vm3 = vcmp.lt.f32.partialorder %v1734_v62, 0.0 }
 0x958   : > { %v3304_v56 = vld [vmem:[%s4633_s7] sm:$0xff]  }
 0x959   : > { %v1743_v20 = vmul.f32 0.3275911, %v1741_v35  ;;  %v1742_v24 = vmul.f32 0.3275911, %v1740_v12  ;;  %v1769_v22 = vsub.f32 0.0, %v1741_v35  ;;  %v1768_v39 = vsub.f32 0.0, %v1740_v12  ;;  %3121 = vmatmul.mubr.msk.bf16.vlgmr.msra.gmra.mxu1 %vm4682_vm6, %v3304_v56  ;;  %vm4699_vm6 = vmmov %vm4689_vm1 }
 0x95a   : > { %3126 = vmatprep.mubr.msk.bf16.mxu1 %vm3467_vm5, %v3456_v8 }
 0x95b   : > { %v1745_v13 = vadd.f32 1.0, %v1743_v20  ;;  %v1744_v14 = vadd.f32 1.0, %v1742_v24  ;;  %v1771_v36 = vmul.f32 %v1769_v22, %v1741_v35  ;;  %v1770_v47 = vmul.f32 %v1768_v39, %v1740_v12 }
 0x95c   : > { %v1739_v22 = vsel %vm1737_vm2, -1.0, %v4683_v7  ;;  %vm4697_vm2 = vmmov %vm4689_vm1 }
 0x95d   : > { %3347 = vrcp.f32 %v1745_v13  ;;  %v1774_v45 = vmul.f32 1.442695, %v1771_v36  ;;  %v1772_v38 = vmul.f32 1.442695, %v1770_v47  ;;  %v1738_v47 = vsel %vm1736_vm3, -1.0, %v4683_v7  ;;  %vm4698_vm3 = vmmov %vm4689_vm1 }
 0x95e   : > { %3349 = vrcp.f32 %v1744_v14 }
 0x95f   : > { %3351 = vpow2.f32 %v1774_v45  ;;  %v1733_v45 = vmul.f32 0.5, %v1731_v40  ;;  %v3468_v40 = vmov 9  }
 0x960   : > { %3353 = vpow2.f32 %v1772_v38  ;;  %v1732_v38 = vmul.f32 0.5, %v1730_v1  ;;  %3283 = vset.pattern.permute.xlu0 %v3468_v40  ;;  %3284 = vset.pattern.permute.xlu1 %v3468_v40  ;;  %v3469_v1 = vmov 10  }
 0x96a   : > { %v3348_v61 = vpop.eup %3347 }
 0x96b   : > { %v3350_v19 = vpop.eup %3349  ;;  %v1751_v60 = vmul.f32 1.0614054, %v3348_v61 }
 0x96c   : > { %v1750_v33 = vmul.f32 1.0614054, %v3350_v19  ;;  %v3352_v35 = vpop.eup %3351 }
 0x96d   : > { %v1753_v37 = vadd.f32 -1.4531521, %v1751_v60  ;;  %v3354_v20 = vpop.eup %3353 }
 0x96e   : > { %v1752_v44 = vadd.f32 -1.4531521, %v1750_v33 }
 0x96f   : > { %v1755_v4 = vmul.f32 %v3348_v61, %v1753_v37 }
 0x970   : > { %v1754_v15 = vmul.f32 %v3350_v19, %v1752_v44 }
 0x971   : > { %v1757_v27 = vadd.f32 1.4214138, %v1755_v4 }
 0x972   : > { %v1756_v41 = vadd.f32 1.4214138, %v1754_v15 }
 0x973   : > { %v1759_v11 = vmul.f32 %v3348_v61, %v1757_v27 }
 0x974   : > { %v1758_v57 = vmul.f32 %v3350_v19, %v1756_v41 }
 0x975   : > { %v1761_v5 = vadd.f32 -0.28449672, %v1759_v11 }
 0x976   : > { %v1760_v26 = vadd.f32 -0.28449672, %v1758_v57 }
 0x977   : > { %v1763_v28 = vmul.f32 %v3348_v61, %v1761_v5 }
 0x978   : > { %v1762_v54 = vmul.f32 %v3350_v19, %v1760_v26 }
 0x979   : > { %v1765_v9 = vadd.f32 0.2548296, %v1763_v28 }
 0x97a   : > { %v1764_v6 = vadd.f32 0.2548296, %v1762_v54 }
 0x97b   : > { %v1767_v63 = vmul.f32 %v3348_v61, %v1765_v9 }
 0x97c   : > { %v1766_v12 = vmul.f32 %v3350_v19, %v1764_v6 }
 0x97d   : > { %v1777_v24 = vmul.f32 %v3352_v35, %v1767_v63 }
 0x97e   : > { %v1776_v13 = vmul.f32 %v3354_v20, %v1766_v12 }
 0x97f   : > { %v1779_v14 = vsub.f32 1.0, %v1777_v24 }
 0x980   : > { %v1778_v39 = vsub.f32 1.0, %v1776_v13 }
 0x981   : > { %v1781_v36 = vmul.f32 %v1779_v14, %v1739_v22 }
 0x982   : > { %v1780_v60 = vmul.f32 %v1778_v39, %v1738_v47 }
 0x983   : > { %v1783_v33 = vadd.f32 1.0, %v1781_v36 }
 0x984   : > { %v1782_v37 = vadd.f32 1.0, %v1780_v60 }
 0x985   : > { %v4172_v61 = vmul.f32 %v1783_v33, %v1733_v45 }
 0x986   : > { %v4174_v19 = vmul.f32 %v1782_v37, %v1732_v38 }
 0x987   : > { %1788 = vrot.lane.b32.xlu1 %v4172_v61, %s3445_s24  ;;  %v1809_v35 = vmul.f32 %v4172_v61, %v3805_v21 }
 0x988   : > { %1786 = vrot.lane.b32.xlu0 %v4174_v19, %s3445_s24  ;;  %s4684_s24 = smov 96  }
 0x98b   : > { %1794 = vrot.lane.b32.xlu1 %v4172_v61, %s3446_s25 }
 0x98c   : > { %1792 = vrot.lane.b32.xlu0 %v4174_v19, %s3446_s25  ;;  %s4685_s25 = smov 112  }
 0x98f   : > { %1802 = vrot.lane.b32.xlu1 %v4172_v61, %s3449_s29 }
 0x990   : > { %1800 = vrot.lane.b32.xlu0 %v4174_v19, %s3449_s29  ;;  %s4686_s29 = smov 16  }
 0x993   : > { %1814 = vrot.lane.b32.xlu1 %v4172_v61, %s3451_s16 }
 0x994   : > { %1812 = vrot.lane.b32.xlu0 %v4174_v19, %s3451_s16 }
 0x997   : > { %1822 = vrot.lane.b32.xlu1 %v4172_v61, %s3453_s21 }
 0x998   : > { %1820 = vrot.lane.b32.xlu0 %v4174_v19, %s3453_s21 }
 0x99b   : > { %1830 = vrot.lane.b32.xlu1 %v4172_v61, %s3447_s26 }
 0x99c   : > { %1828 = vrot.lane.b32.xlu0 %v4174_v19, %s3447_s26  ;;  %s4687_s26 = smov 32  }
 0x99f   : > { %1836 = vrot.lane.b32.xlu1 %v4172_v61, %s4684_s24 }
 0x9a0   : > { %1834 = vrot.lane.b32.xlu0 %v4174_v19, %s4684_s24 }
 0x9a3   : > { %1844 = vrot.lane.b32.xlu1 %v4172_v61, %s4685_s25 }
 0x9a4   : > { %1842 = vrot.lane.b32.xlu0 %v4174_v19, %s4685_s25 }
 0x9a7   : > { %1856 = vrot.lane.b32.xlu1 %v4172_v61, %s4686_s29 }
 0x9a8   : > { %1854 = vrot.lane.b32.xlu0 %v4174_v19, %s4686_s29 }
 0x9ab   : > { %1864 = vrot.lane.b32.xlu1 %v4172_v61, %s4687_s26 }
 0x9ac   : > { %1862 = vrot.lane.b32.xlu0 %v4174_v19, %s4687_s26  ;;  %s4700_s26 = sshll.u32 %s4702_s19, 4 }
 0x9af   : > { %1878 = vperm.xlu1 %3284, %v4152_v23  }
 0x9b0   : > { %1874 = vperm.xlu0 %3283, %v4158_v3  }
 0x9b3   : > { %3285 = vset.pattern.permute.xlu1 %v3469_v1 }
 0x9b4   : > { %1988 = vperm.xlu1 %3285, %v4158_v3   ;;  %3286 = vset.pattern.permute.xlu0 %v3469_v1 }
 0x9b5   : > { %1992 = vperm.xlu0 %3286, %v4152_v23  }
 0x9f9   : > { %v1789_v62 = vpop.permute.xlu1 %1788 }
 0x9fa   : > { %v1787_v44 = vpop.permute.xlu0 %1786  ;;  %v1791_v11 = vmul.f32 %v1789_v62, %v3820_v32 }
 0x9fb   : > { %v1790_v57 = vmul.f32 %v1787_v44, %v3825_v34 }
 0x9fd   : > { %v1795_v4 = vpop.permute.xlu1 %1794 }
 0x9fe   : > { %v1793_v15 = vpop.permute.xlu0 %1792  ;;  %v1797_v27 = vmul.f32 %v1795_v4, %v3855_v51 }
 0x9ff   : > { %v1796_v41 = vmul.f32 %v1793_v15, %v3850_v49  ;;  %v1808_v49 = vmul.f32 %v4174_v19, %v3814_v29  ;;  %v1850_v15 = vmul.f32 %v4174_v19, %v3818_v31  ;;  %v3306_v31 = vld [vmem:[%s4635_s9] sm:$0xff]   ;;  %v3415_v19 = vld [vmem:[%s4627_s1 + $0x58] sm:$0xff] }
 0xa00   : > { %v1799_v26 = vadd.f32 %v1797_v27, %v1791_v11 }
 0xa01   : > { %v1803_v5 = vpop.permute.xlu1 %1802  ;;  %v1798_v9 = vadd.f32 %v1796_v41, %v1790_v57 }
 0xa02   : > { %v1801_v28 = vpop.permute.xlu0 %1800  ;;  %v1805_v54 = vmul.f32 %v1803_v5, %v3872_v0 }
 0xa03   : > { %v1804_v6 = vmul.f32 %v1801_v28, %v3863_v58 }
 0xa04   : > { %v1807_v63 = vadd.f32 %v1805_v54, %v1799_v26 }
 0xa05   : > { %v1806_v12 = vadd.f32 %v1804_v6, %v1798_v9  ;;  %v1815_v51 = vpop.permute.xlu1 %1814 }
 0xa06   : > { %v1813_v32 = vpop.permute.xlu0 %1812  ;;  %v1811_v20 = vadd.f32 %v1809_v35, %v1807_v63  ;;  %v1817_v34 = vmul.f32 %v1815_v51, %v3923_v46  ;;  %v3305_v46 = vld [vmem:[%s4634_s8] sm:$0xff]   ;;  %v3416_v63 = vld [vmem:[%s4627_s1 + $0x50] sm:$0xff]  ;;  %v3417_v35 = vld [vmem:[%s4627_s1 + $0x48] sm:$0xff] }
 0xa07   : > { %v1810_v24 = vadd.f32 %v1808_v49, %v1806_v12  ;;  %v1816_v13 = vmul.f32 %v1813_v32, %v3916_v43  ;;  %v3418_v12 = vld [vmem:[%s4627_s1 + $0x40] sm:$0xff]  ;;  %v3419_v49 = vld [vmem:[%s4627_s1 + $0x38] sm:$0xff]  ;;  %v3420_v51 = vld [vmem:[%s4627_s1 + $0x30] sm:$0xff] }
 0xa08   : > { %v1819_v14 = vadd.f32 %v1817_v34, %v1811_v20  ;;  %v3421_v32 = vld [vmem:[%s4627_s1 + $0x28] sm:$0xff]  ;;  %v3422_v20 = vld [vmem:[%s4627_s1 + $0x20] sm:$0xff]  ;;  %v3423_v34 = vld [vmem:[%s4627_s1 + $0x18] sm:$0xff] }
 0xa09   : > { %v1823_v0 = vpop.permute.xlu1 %1822  ;;  %v1818_v39 = vadd.f32 %v1816_v13, %v1810_v24  ;;  %v3424_v24 = vld [vmem:[%s4627_s1 + $0x10] sm:$0xff]  ;;  %v3425_v13 = vld [vmem:[%s4627_s1 + $0x8] sm:$0xff] }
 0xa0a   : > { %v1821_v22 = vpop.permute.xlu0 %1820  ;;  %v1825_v58 = vmul.f32 %v1823_v0, %v3944_v59  ;;  %v3426_v0 = vld [vmem:[%s4627_s1] sm:$0xff] }
 0xa0b   : > { %v1824_v21 = vmul.f32 %v1821_v22, %v3941_v25 }
 0xa0c   : > { %v1827_v36 = vadd.f32 %v1825_v58, %v1819_v14  ;;  %v4320_v14 = vld [vmem:[%s4628_s2] sm:$0xff] }
 0xa0d   : > { %v1826_v47 = vadd.f32 %v1824_v21, %v1818_v39  ;;  %v1831_v60 = vpop.permute.xlu1 %1830 }
 0xa0e   : > { %v1829_v29 = vpop.permute.xlu0 %1828  ;;  %v1833_v25 = vmul.f32 %v1831_v60, %v3857_v52 }
 0xa0f   : > { %v1870_v45 = vpack.c.bf16 %v1827_v36, %v1826_v47  ;;  %v1832_v37 = vmul.f32 %v1829_v29, %v3859_v53  ;;  %v3470_v36 = vmov 14  }
 0xa10   : > { %3288 = vset.pattern.permute.xlu1 %v3470_v36  ;;  %3287 = vset.pattern.permute.xlu0 %v3470_v36 }
 0xa11   : > { %3125 = vmatpush3.bf16.msra.mxu1 %v1870_v45  ;;  %v1837_v33 = vpop.permute.xlu1 %1836 }
 0xa12   : > { %v1835_v43 = vpop.permute.xlu0 %1834  ;;  %v1839_v38 = vmul.f32 %v1837_v33, %v3861_v55  ;;  %3130 = vmatprep.subr.bf16.mxu1 %v3456_v8 }
 0xa13   : > { %v1838_v59 = vmul.f32 %v1835_v43, %v3881_v10  ;;  %v1851_v10 = vmul.f32 %v4172_v61, %v3816_v30 }
 0xa14   : > { %3127 = vmatmul.mubr.msk.bf16.vlgmr.msra.gmra.mxu1 %vm4688_vm7, %v3305_v46  ;;  %v1841_v40 = vadd.f32 %v1839_v38, %v1833_v25 }
 0xa15   : > { %v1845_v56 = vpop.permute.xlu1 %1844  ;;  %3132 = vmatprep.mubr.msk.bf16.mxu1 %vm3467_vm5, %v3456_v8  ;;  %v1840_v44 = vadd.f32 %v1838_v59, %v1832_v37 }
 0xa16   : > { %v1843_v1 = vpop.permute.xlu0 %1842  ;;  %v1847_v62 = vmul.f32 %v1845_v56, %v3889_v17 }
 0xa17   : > { %v1846_v55 = vmul.f32 %v1843_v1, %v3891_v18 }
 0xa18   : > { %v1849_v4 = vadd.f32 %v1847_v62, %v1841_v40 }
 0xa19   : > { %v1848_v52 = vadd.f32 %v1846_v55, %v1840_v44  ;;  %v1857_v53 = vpop.permute.xlu1 %1856  ;;  %v4323_v22 = vpop.f32.mrf.mxu1 }
 0xa1a   : > { %v1855_v27 = vpop.permute.xlu0 %1854  ;;  %v1853_v41 = vadd.f32 %v1851_v10, %v1849_v4  ;;  %v1859_v11 = vmul.f32 %v1857_v53, %v3936_v16  ;;  %v3411_v16 = vld [vmem:[%s4627_s1 + $0x78] sm:$0xff] }
 0xa1b   : > { %v1852_v57 = vadd.f32 %v1850_v15, %v1848_v52  ;;  %v1858_v5 = vmul.f32 %v1855_v27, %v3939_v2  ;;  %v3412_v2 = vld [vmem:[%s4627_s1 + $0x70] sm:$0xff]  ;;  %v3122_v58 = vpop.f32.mrf.mxu1 }
 0xa1c   : > { %v1861_v26 = vadd.f32 %v1859_v11, %v1853_v41 }
 0xa1d   : > { %v1865_v17 = vpop.permute.xlu1 %1864  ;;  %v1860_v54 = vadd.f32 %v1858_v5, %v1852_v57  ;;  %v4325_v39 = vpop.f32.mrf.mxu1 }
 0xa1e   : > { %v1863_v28 = vpop.permute.xlu0 %1862  ;;  %v1867_v18 = vmul.f32 %v1865_v17, %v3957_v50  ;;  %v3414_v50 = vld [vmem:[%s4627_s1 + $0x60] sm:$0xff] }
 0xa1f   : > { %v1866_v30 = vmul.f32 %v1863_v28, %v3953_v48  ;;  %v3413_v48 = vld [vmem:[%s4627_s1 + $0x68] sm:$0xff]  ;;  %v3123_v21 = vpop.f32.mrf.mxu1 }
 0xa20   : > { %v1869_v61 = vadd.f32 %v1867_v18, %v1861_v26 }
 0xa21   : > { %v1868_v9 = vadd.f32 %v1866_v30, %v1860_v54 }
 0xa23   : > { %v1984_v6 = vpack.c.bf16 %v1869_v61, %v1868_v9 }
 0xa25   : > { %3131 = vmatpush3.bf16.msra.mxu1 %v1984_v6 }
 0xa26   : > { %3142 = vmatprep.subr.mxu1 %v3411_v16 }
 0xa28   : > { %3133 = vmatmul.mubr.msk.bf16.vlgmr.msra.gmra.mxu1 %vm4689_vm1, %v3306_v31 }
 0xa29   : > { %3143 = vmatpush3.msra.mxu1 %v3411_v16 }
 0xa2a   : > { %3144 = vmatprep.subr.mxu1 %v3412_v2  ;;  %v1879_v46 = vpop.permute.xlu1 %1878 }
 0xa2b   : > { %3145 = vmatpush3.msra.mxu1 %v3412_v2  ;;  %v1875_v47 = vpop.permute.xlu0 %1874 }
 0xa2c   : > { %3146 = vmatprep.subr.mxu1 %v3413_v48 }
 0xa2d   : > { %3147 = vmatpush3.msra.mxu1 %v3413_v48 }
 0xa2e   : > { %3148 = vmatprep.subr.mxu1 %v3414_v50 }
 0xa2f   : > { %3149 = vmatpush3.msra.mxu1 %v3414_v50  ;;  %v1989_v55 = vpop.permute.xlu1 %1988 }
 0xa30   : > { %3150 = vmatprep.subr.mxu1 %v3415_v19  ;;  %v1993_v15 = vpop.permute.xlu0 %1992 }
 0xa31   : > { %3151 = vmatpush3.msra.mxu1 %v3415_v19 }
 0xa32   : > { %3152 = vmatprep.subr.mxu1 %v3416_v63 }
 0xa33   : > { %3153 = vmatpush3.msra.mxu1 %v3416_v63 }
 0xa34   : > { %3154 = vmatprep.subr.mxu1 %v3417_v35 }
 0xa35   : > { %3155 = vmatpush3.msra.mxu1 %v3417_v35 }
 0xa36   : > { %3156 = vmatprep.subr.mxu1 %v3418_v12 }
 0xa37   : > { %3157 = vmatpush3.msra.mxu1 %v3418_v12 }
 0xa38   : > { %3158 = vmatprep.subr.mxu1 %v3419_v49 }
 0xa39   : > { %3159 = vmatpush3.msra.mxu1 %v3419_v49 }
 0xa3a   : > { %3160 = vmatprep.subr.mxu1 %v3420_v51 }
 0xa3b   : > { %3161 = vmatpush3.msra.mxu1 %v3420_v51 }
 0xa3c   : > { %3162 = vmatprep.subr.mxu1 %v3421_v32 }
 0xa3d   : > { %3163 = vmatpush3.msra.mxu1 %v3421_v32 }
 0xa3e   : > { %3164 = vmatprep.subr.mxu1 %v3422_v20 }
 0xa3f   : > { %3165 = vmatpush3.msra.mxu1 %v3422_v20 }
 0xa40   : > { %3166 = vmatprep.subr.mxu1 %v3423_v34 }
 0xa41   : > { %3167 = vmatpush3.msra.mxu1 %v3423_v34 }
 0xa42   : > { %3168 = vmatprep.subr.mxu1 %v3424_v24 }
 0xa43   : > { %3169 = vmatpush3.msra.mxu1 %v3424_v24 }
 0xa44   : > { %3170 = vmatprep.subr.mxu1 %v3425_v13 }
 0xa45   : > { %3171 = vmatpush3.msra.mxu1 %v3425_v13 }
 0xa46   : > { %3172 = vmatprep.subr.mxu1 %v3426_v0 }
 0xa47   : > { %3173 = vmatpush3.msra.mxu1 %v3426_v0 }
 0xa48   : > { %3210 = vmatprep.subr.mxu1 %v4320_v14 }
 0xad4   : > { %v1923_v60 = vpop.f32.mrf.mxu1 }
 0xad5   : > { %v4327_v29 = vadd.f32 %v1923_v60, %v1875_v47 }
 0xad6   : > { %v3128_v45 = vpop.f32.mrf.mxu1 }
 0xad7   : > { %v4330_v33 = vmul.f32 0.70710677, %v4327_v29 }
 0xad8   : > { %v1926_v43 = vpop.f32.mrf.mxu1 }
 0xad9   : > { %v1938_v38 = vand.u32 2147483647, %v4330_v33  ;;  %v4333_v59 = vadd.f32 %v1926_v43, %v1879_v46  ;;  %vm1934_vm10 = vcmp.lt.f32.partialorder %v4330_v33, 0.0 }
 0xada   : > { %v3129_v25 = vpop.f32.mrf.mxu1 }
 0xadb   : > { %v1940_v37 = vmul.f32 0.3275911, %v1938_v38  ;;  %v4336_v56 = vmul.f32 0.70710677, %v4333_v59  ;;  %v1966_v2 = vsub.f32 0.0, %v1938_v38 }
 0xadd   : > { %v1942_v40 = vadd.f32 1.0, %v1940_v37  ;;  %v1939_v1 = vand.u32 2147483647, %v4336_v56  ;;  %v1968_v12 = vmul.f32 %v1966_v2, %v1938_v38  ;;  %vm1935_vm0 = vcmp.lt.f32.partialorder %v4336_v56, 0.0 }
 0xadf   : > { %3355 = vrcp.f32 %v1942_v40  ;;  %v1941_v62 = vmul.f32 0.3275911, %v1939_v1  ;;  %v1967_v50 = vsub.f32 0.0, %v1939_v1  ;;  %v1970_v34 = vmul.f32 1.442695, %v1968_v12 }
 0xae1   : > { %v1943_v44 = vadd.f32 1.0, %v1941_v62  ;;  %v1969_v51 = vmul.f32 %v1967_v50, %v1939_v1 }
 0xae3   : > { %3357 = vrcp.f32 %v1943_v44  ;;  %v1972_v13 = vmul.f32 1.442695, %v1969_v51 }
 0xae8   : > { %v2037_v4 = vpop.f32.mrf.mxu1 }
 0xae9   : > { %v4339_v10 = vadd.f32 %v2037_v4, %v1989_v55 }
 0xaea   : > { %v3134_v52 = vpop.f32.mrf.mxu1 }
 0xaeb   : > { %v4342_v53 = vmul.f32 0.70710677, %v4339_v10 }
 0xaec   : > { %v3356_v27 = vpop.eup %3355  ;;  %v2040_v41 = vpop.f32.mrf.mxu1 }
 0xaed   : > { %v1948_v11 = vmul.f32 1.0614054, %v3356_v27  ;;  %v2052_v57 = vand.u32 2147483647, %v4342_v53  ;;  %v4345_v5 = vadd.f32 %v2040_v41, %v1993_v15  ;;  %vm2048_vm12 = vcmp.lt.f32.partialorder %v4342_v53, 0.0 }
 0xaee   : > { %v3135_v17 = vpop.f32.mrf.mxu1  ;;  %v2050_v12 = vsel %vm2048_vm12, -1.0, %v4683_v7 }
 0xaef   : > { %v2054_v26 = vmul.f32 0.3275911, %v2052_v57  ;;  %v1950_v18 = vadd.f32 -1.4531521, %v1948_v11  ;;  %v4348_v54 = vmul.f32 0.70710677, %v4345_v5 }
 0xaf0   : > { %v3358_v28 = vpop.eup %3357  ;;  %v2080_v49 = vsub.f32 0.0, %v2052_v57 }
 0xaf1   : > { %v1949_v30 = vmul.f32 1.0614054, %v3358_v28  ;;  %v2056_v61 = vadd.f32 1.0, %v2054_v26  ;;  %v2053_v9 = vand.u32 2147483647, %v4348_v54  ;;  %v1952_v31 = vmul.f32 %v3356_v27, %v1950_v18 }
 0xaf2   : > { %v2082_v24 = vmul.f32 %v2080_v49, %v2052_v57  ;;  %vm2049_vm14 = vcmp.lt.f32.partialorder %v4348_v54, 0.0 }
 0xaf3   : > { %v1951_v6 = vadd.f32 -1.4531521, %v1949_v30  ;;  %3359 = vrcp.f32 %v2056_v61  ;;  %v2055_v16 = vmul.f32 0.3275911, %v2053_v9  ;;  %v1954_v63 = vadd.f32 1.4214138, %v1952_v31 }
 0xaf4   : > { %v2081_v0 = vsub.f32 0.0, %v2053_v9  ;;  %v2084_v60 = vmul.f32 1.442695, %v2082_v24  ;;  %v2051_v56 = vsel %vm2049_vm14, -1.0, %v4683_v7 }
 0xaf5   : > { %v1953_v48 = vmul.f32 %v3358_v28, %v1951_v6  ;;  %v2057_v19 = vadd.f32 1.0, %v2055_v16  ;;  %v1956_v32 = vmul.f32 %v3356_v27, %v1954_v63 }
 0xaf6   : > { %v2083_v45 = vmul.f32 %v2081_v0, %v2053_v9 }
 0xaf7   : > { %v1955_v35 = vadd.f32 1.4214138, %v1953_v48  ;;  %3361 = vrcp.f32 %v2057_v19  ;;  %v1958_v21 = vadd.f32 -0.28449672, %v1956_v32  ;;  %v1936_v32 = vsel %vm1934_vm10, -1.0, %v4683_v7 }
 0xaf8   : > { %3363 = vpow2.f32 %v1970_v34  ;;  %v2086_v1 = vmul.f32 1.442695, %v2083_v45  ;;  %v1931_v45 = vmul.f32 0.5, %v4333_v59 }
 0xaf9   : > { %v1957_v20 = vmul.f32 %v3358_v28, %v1955_v35  ;;  %3365 = vpow2.f32 %v1972_v13  ;;  %v1960_v43 = vmul.f32 %v3356_v27, %v1958_v21 }
 0xafa   : > { %3367 = vpow2.f32 %v2084_v60  ;;  %v1930_v60 = vmul.f32 0.5, %v4327_v29  ;;  %v3472_v29 = vmov 4  }
 0xafb   : > { %v1959_v36 = vadd.f32 -0.28449672, %v1957_v20  ;;  %v1962_v44 = vadd.f32 0.2548296, %v1960_v43  ;;  %3369 = vpow2.f32 %v2086_v1  ;;  %v1937_v20 = vsel %vm1935_vm0, -1.0, %v4683_v7 }
 0xafc   : > { %v2045_v43 = vmul.f32 0.5, %v4345_v5 }
 0xafd   : > { %v1961_v25 = vmul.f32 %v3358_v28, %v1959_v36  ;;  %v1964_v11 = vmul.f32 %v3356_v27, %v1962_v44  ;;  %v2044_v36 = vmul.f32 0.5, %v4339_v10  ;;  %v3471_v44 = vmov 15  }
 0xaff   : > { %v1963_v55 = vadd.f32 0.2548296, %v1961_v25 }
 0xb00   : > { %v3360_v58 = vpop.eup %3359 }
 0xb01   : > { %v2062_v47 = vmul.f32 1.0614054, %v3360_v58  ;;  %v1965_v57 = vmul.f32 %v3358_v28, %v1963_v55 }
 0xb03   : > { %v2064_v46 = vadd.f32 -1.4531521, %v2062_v47 }
 0xb04   : > { %v3362_v38 = vpop.eup %3361 }
 0xb05   : > { %v2066_v37 = vmul.f32 %v3360_v58, %v2064_v46  ;;  %v2063_v40 = vmul.f32 1.0614054, %v3362_v38  ;;  %v3364_v18 = vpop.eup %3363 }
 0xb06   : > { %v3366_v61 = vpop.eup %3365  ;;  %v1974_v6 = vmul.f32 %v3364_v18, %v1964_v11 }
 0xb07   : > { %v2068_v62 = vadd.f32 1.4214138, %v2066_v37  ;;  %v2065_v4 = vadd.f32 -1.4531521, %v2063_v40  ;;  %v1975_v31 = vmul.f32 %v3366_v61, %v1965_v57  ;;  %v3368_v48 = vpop.eup %3367  ;;  %v4690_v61 = vmov 0  }
 0xb08   : > { %v1976_v63 = vsub.f32 1.0, %v1974_v6  ;;  %v3370_v51 = vpop.eup %3369 }
 0xb09   : > { %v2070_v52 = vmul.f32 %v3360_v58, %v2068_v62  ;;  %v2067_v15 = vmul.f32 %v3362_v38, %v2065_v4  ;;  %v1977_v27 = vsub.f32 1.0, %v1975_v31 }
 0xb0a   : > { %v1978_v24 = vmul.f32 %v1976_v63, %v1936_v32 }
 0xb0b   : > { %v2072_v41 = vadd.f32 -0.28449672, %v2070_v52  ;;  %v2069_v17 = vadd.f32 1.4214138, %v2067_v15  ;;  %v1979_v33 = vmul.f32 %v1977_v27, %v1937_v20 }
 0xb0d   : > { %v2074_v26 = vmul.f32 %v3360_v58, %v2072_v41  ;;  %v2071_v30 = vmul.f32 %v3362_v38, %v2069_v17  ;;  %v1981_v21 = vadd.f32 1.0, %v1979_v33 }
 0xb0f   : > { %v2076_v9 = vadd.f32 0.2548296, %v2074_v26  ;;  %v2073_v16 = vadd.f32 -0.28449672, %v2071_v30  ;;  %v1983_v54 = vmul.f32 %v1981_v21, %v1931_v45 }
 0xb11   : > { %v2078_v2 = vmul.f32 %v3360_v58, %v2076_v9  ;;  %v2075_v50 = vmul.f32 %v3362_v38, %v2073_v16  ;;  %v1980_v58 = vadd.f32 1.0, %v1978_v24  ;;  %v3473_v9 = vmov 11  }
 0xb13   : > { %v2088_v19 = vmul.f32 %v3368_v48, %v2078_v2  ;;  %v2077_v28 = vadd.f32 0.2548296, %v2075_v50 }
 0xb15   : > { %v2090_v35 = vsub.f32 1.0, %v2088_v19  ;;  %v2079_v49 = vmul.f32 %v3362_v38, %v2077_v28  ;;  %v1982_v38 = vmul.f32 %v1980_v58, %v1930_v60 }
 0xb17   : > { %v2092_v34 = vmul.f32 %v2090_v35, %v2050_v12  ;;  %v2089_v53 = vmul.f32 %v3370_v51, %v2079_v49 }
 0xb19   : > { %v2094_v13 = vadd.f32 1.0, %v2092_v34  ;;  %v2091_v0 = vsub.f32 1.0, %v2089_v53 }
 0xb1b   : > { %v2093_v47 = vmul.f32 %v2091_v0, %v2051_v56  ;;  %v2096_v46 = vmul.f32 %v2094_v13, %v2044_v36  ;;  %v3307_v13 = vld [vmem:[%s4636_s10] sm:$0xff]  }
 0xb1d   : > { %v2095_v25 = vadd.f32 1.0, %v2093_v47  ;;  %v2098_v40 = vadd.f32 %v2096_v46, %v1982_v38  ;;  %v3428_v47 = vld [vmem:[%s3586_s20] sm:$0xff] }
 0xb1f   : > { %v2097_v37 = vmul.f32 %v2095_v25, %v2045_v43 }
 0xb21   : > { %v2099_v1 = vadd.f32 %v2097_v37, %v1983_v54  ;;  %v3429_v37 = vld [vmem:[%s3586_s20 + $0x8] sm:$0xff] }
 0xb23   : > { %v2100_v62 = vadd.f32 %v2099_v1, %v2098_v40 }
 0xb25   : > { %2101 = vadd.xlane.f32.xlu1 %v2100_v62 }
 0xb36   : > { %2137 = vperm.xlu1 %3288, %v4152_v23  }
 0xb3a   : > { %3289 = vset.pattern.permute.xlu1 %v3471_v44 }
 0xb3b   : > { %2143 = vperm.xlu1 %3289, %v4158_v3  }
 0xb3f   : > { %2147 = vperm.xlu1 %3289, %v4152_v23  }
 0xb43   : > { %3290 = vset.pattern.permute.xlu1 %v3472_v29 }
 0xb44   : > { %1614 = vperm.xlu1 %3290, %v4158_v3  }
 0xb48   : > { %1618 = vperm.xlu1 %3290, %v4152_v23  }
 0xb4c   : > { %3291 = vset.pattern.permute.xlu1 %v3473_v9 }
 0xb4d   : > { %2156 = vperm.xlu1 %3291, %v4158_v3  }
 0xb51   : > { %2160 = vperm.xlu1 %3291, %v4152_v23  }
 0xb55   : > { %3292 = vset.pattern.permute.xlu1 %v4690_v61 }
 0xbae   : > { %v2102_v59 = vpop.xlane.xlu1 %2101 }
 0xbaf   : > { %v2103_v10 = vrot.slane %v2102_v59, 4 }
 0xbb1   : > { %v2104_v5 = vadd.f32 %v2103_v10, %v2102_v59 }
 0xbb2   : > { %v2138_v35 = vpop.permute.xlu1 %2137 }
 0xbb3   : > { %v2105_v55 = vrot.slane %v2104_v5, 2 }
 0xbb5   : > { %v2106_v4 = vadd.f32 %v2105_v55, %v2104_v5  ;;  %v2441_v55 = vld [vmem:[%s4639_s13 + $0x30] sm:$0xff] }
 0xbb6   : > { %v2144_v12 = vpop.permute.xlu1 %2143  ;;  %2475 = vperm.xlu1 %3292, %v2441_v55  }
 0xbb7   : > { %v2107_v52 = vrot.slane %v2106_v4, 1 }
 0xbb9   : > { %v2108_v15 = vadd.f32 %v2107_v52, %v2106_v4  ;;  %v2442_v4 = vld [vmem:[%s4639_s13 + $0x38] sm:$0xff]  ;;  %v2439_v52 = vld [vmem:[%s4639_s13 + $0x20] sm:$0xff] }
 0xbba   : > { %v2148_v34 = vpop.permute.xlu1 %2147  ;;  %2465 = vperm.xlu1 %3292, %v2439_v52  }
 0xbbb   : > { %3224 = vpush %v2108_v15  ;;  %v2437_v15 = vld [vmem:[%s4639_s13 + $0x10] sm:$0xff] }
 0xbbf   : > { %v1615_v0 = vpop.permute.xlu1 %1614 }
 0xbc0   : > { %v1664_v58 = vadd.f32 %v4323_v22, %v1615_v0  ;;  %v3309_v0 = vld [vmem:[%s4638_s12 + $0x8] sm:$0xff]  }
 0xbc2   : > { %v2212_v60 = vadd.f32 %v3428_v47, %v1664_v58  ;;  %v3474_v58 = vmov 16  }
 0xbc3   : > { %v1619_v56 = vpop.permute.xlu1 %1618 }
 0xbc4   : > { %v1667_v45 = vadd.f32 %v4325_v39, %v1619_v56  ;;  %v3311_v56 = vld [vmem:[%s4638_s12 + $0x18] sm:$0xff]  }
 0xbc8   : > { %v2157_v21 = vpop.permute.xlu1 %2156 }
 0xbcc   : > { %v2161_v54 = vpop.permute.xlu1 %2160 }
 0xbec   : > { %s3225_s30 = spop %3224 }
 0xbed   : > { %v2110_v41 = vstv %s3225_s30  ;;  %s494_s30 = scalar_lea.vmem %s4641_s15, %s4700_s26 }
 0xbee   : > { %v2111_v11 = vmul.f32 0.00048828125, %v2110_v41  ;;  %v2440_v41 = vld [vmem:[%s4639_s13 + $0x28] sm:$0xff] }
 0xbef   : > { %2470 = vperm.xlu1 %3292, %v2440_v41  }
 0xbf0   : > { %v2112_v57 = vsub.f32 %v2098_v40, %v2111_v11  ;;  %v2113_v17 = vsub.f32 %v2099_v1, %v2111_v11  ;;  %v2213_v40 = vadd.f32 %v3429_v37, %v1667_v45  ;;  %v2435_v11 = vld [vmem:[%s4639_s13] sm:$0xff] }
 0xbf2   : > { %v2114_v26 = vmul.f32 %v2112_v57, %v2112_v57  ;;  %v2115_v18 = vmul.f32 %v2113_v17, %v2113_v17 }
 0xbf4   : > { %v2116_v30 = vadd.f32 %v2115_v18, %v2114_v26 }
 0xbf6   : > { %2117 = vadd.xlane.f32.xlu0 %v2116_v30 }
 0xc0c   : > { %2133 = vperm.xlu0 %3287, %v4158_v3  }
 0xc10   : > { %3293 = vset.pattern.permute.xlu0 %v4690_v61 }
 0xc11   : > { %2480 = vperm.xlu0 %3293, %v2442_v4  }
 0xc15   : > { %2455 = vperm.xlu0 %3293, %v2437_v15  }
 0xc19   : > { %2445 = vperm.xlu0 %3293, %v2435_v11  }
 0xc1d   : > { %3294 = vset.pattern.permute.xlu0 %v3474_v58 }
 0xc31   : > { %v2476_v47 = vpop.permute.xlu1 %2475 }
 0xc7f   : > { %v2118_v6 = vpop.xlane.xlu0 %2117 }
 0xc80   : > { %v2119_v31 = vrot.slane %v2118_v6, 4 }
 0xc82   : > { %v2120_v16 = vadd.f32 %v2119_v31, %v2118_v6 }
 0xc84   : > { %v2121_v2 = vrot.slane %v2120_v16, 2 }
 0xc86   : > { %v2122_v48 = vadd.f32 %v2121_v2, %v2120_v16 }
 0xc87   : > { %v2134_v49 = vpop.permute.xlu0 %2133 }
 0xc88   : > { %v2123_v50 = vrot.slane %v2122_v48, 1 }
 0xc8a   : > { %v2124_v19 = vadd.f32 %v2123_v50, %v2122_v48 }
 0xc8c   : > { %3226 = vpush %v2124_v19  ;;  %v2481_v45 = vpop.permute.xlu0 %2480 }
 0xcbd   : > { %s3227_s17 = spop %3226 }
 0xcbe   : > { %v2126_v63 = vstv %s3227_s17 }
 0xcbf   : > { %v2127_v27 = vmul.f32 0.00048828125, %v2126_v63  ;;  %v2416_v63 = vsub.s32 2, %v3654_v42 }
 0xcc1   : > { %v2128_v28 = vadd.f32 1e-05, %v2127_v27 }
 0xcc3   : > { %3371 = vrsqrt.f32 %v2128_v28  ;;  %v3430_v28 = vld [vmem:[%s4629_s3] sm:$0xf] }
 0xcd0   : > { %v3372_v3 = vpop.eup %3371 }
 0xcd1   : > { %v2130_v23 = vmul.f32 %v3372_v3, %v2112_v57  ;;  %v2131_v51 = vmul.f32 %v3372_v3, %v2113_v17  ;;  %v2438_v57 = vld [vmem:[%s4639_s13 + $0x18] sm:$0xff]  ;;  %v2436_v17 = vld [vmem:[%s4639_s13 + $0x8] sm:$0xff] }
 0xcd2   : > { %2460 = vperm.xlu1 %3292, %v2438_v57  }
 0xcd3   : > { %v2140_v32 = vmul.f32 %v2134_v49, %v2130_v23  ;;  %v2141_v20 = vmul.f32 %v2138_v35, %v2131_v51  ;;  %v2417_v35 = vrot.slane %v3430_v28, %v2416_v63 }
 0xcd5   : > { %v2150_v24 = vadd.f32 %v2144_v12, %v2140_v32  ;;  %v2151_v33 = vadd.f32 %v2148_v34, %v2141_v20  ;;  %v2422_v12 = vsub.s32 3, %v3654_v42  ;;  %v3310_v42 = vld [vmem:[%s4638_s12 + $0x10] sm:$0xff]  }
 0xcd6   : > { %2450 = vperm.xlu1 %3292, %v2436_v17  }
 0xcd7   : > { %v2154_v53 = vpack.c.bf16 %v2151_v33, %v2150_v24  ;;  %v2423_v34 = vrot.slane %v3430_v28, %v2422_v12 }
 0xcd9   : > { %3137 = vmatpush3.bf16.msra.mxu0 %v2154_v53 }
 0xcda   : > { %3180 = vmatprep.subr.mxu0 %v4320_v14  ;;  %3295 = vset.pattern.permute.xlu1 %v3474_v58 }
 0xcdc   : > { %3139 = vmatmul.mubr.msk.bf16.vlgmr.msra.gmra.mxu0 %vm4691_vm8, %v3307_v13 }
 0xcdd   : > { %3181 = vmatpush3.msra.mxu0 %v4320_v14 }
 0xd9c   : > { %v2205_v36 = vpop.f32.mrf.mxu0 }
 0xd9d   : > { %v2206_v46 = vadd.f32 %v2205_v36, %v2157_v21  ;;  %v3431_v21 = vld [vmem:[%s4637_s11] sm:$0xff]  ;;  %v3432_v36 = vld [vmem:[%s4637_s11 + $0x8] sm:$0xff] }
 0xd9e   : > { %v3140_v43 = vpop.f32.mrf.mxu0  ;;  %2803 = vperm.xlu0 %3294, %v3431_v21   ;;  %2807 = vperm.xlu1 %3295, %v3432_v36  }
 0xd9f   : > { %v4382_v25 = vadd.f32 %v2212_v60, %v2206_v46  ;;  %v2466_v60 = vpop.permute.xlu1 %2465  ;;  %v2456_v43 = vpop.permute.xlu0 %2455 }
 0xda0   : > { %v2208_v38 = vpop.f32.mrf.mxu0 }
 0xda1   : > { %v2209_v1 = vadd.f32 %v2208_v38, %v2161_v54  ;;  %3174 = vmatprep.mubr.f32.mxu1 %v4382_v25  ;;  %v2216_v22 = vmul.f32 %v4382_v25, %v4382_v25 }
 0xda2   : > { %v3141_v62 = vpop.f32.mrf.mxu0 }
 0xda3   : > { %v4386_v44 = vadd.f32 %v2213_v40, %v2209_v1  ;;  %v2471_v46 = vpop.permute.xlu1 %2470  ;;  %v2446_v37 = vpop.permute.xlu0 %2445 }
 0xda5   : > { %3175 = vmatmul.mubr.f32.vlgmr.msra.gmra.mxu1 %v4386_v44  ;;  %v2217_v39 = vmul.f32 %v4386_v44, %v4386_v44 }
 0xda6   : > { %3177 = vmatprep.mubr.f32.mxu1 %v2216_v22  ;;  %3211 = vmatpush3.msra.mxu1 %v4320_v14  ;;  %v3308_v14 = vld [vmem:[%s4638_s12] sm:$0xff]  }
 0xda7   : > { %v2461_v38 = vpop.permute.xlu1 %2460 }
 0xda9   : > { %3178 = vmatmul.mubr.f32.gmra.mxu1 %v2217_v39 }
 0xe65   : > { %v3176_v29 = vpop.f32.mrf.mxu1 }
 0xe67   : > { %v2284_v59 = vpop.f32.mrf.mxu1 }
 0xe68   : > { %3182 = vmatprep.mubr.msk.f32.mxu0 %vm4692_vm4, %v2284_v59  ;;  %vm2815_vm4 = vcmask 523264  }
 0xe69   : > { %v3179_v10 = vpop.f32.mrf.mxu1  ;;  %3183 = vmatmul.mubr.msk.f32.vlgmr.msra.gmra.mxu0 %vm4693_vm9, %v3176_v29 }
 0xe6a   : > { %3190 = vmatprep.mubr.msk.bf16.mxu0 %vm4696_vm15, %v3308_v14 }
 0xe6b   : > { %v2294_v5 = vpop.f32.mrf.mxu1 }
 0xe6c   : > { %3185 = vmatprep.mubr.msk.f32.mxu1 %vm4694_vm13, %v2294_v5 }
 0xe6d   : > { %3186 = vmatmul.mubr.msk.f32.vlgmr.msra.gmra.mxu1 %vm4695_vm11, %v3179_v10  ;;  %v2451_v10 = vpop.permute.xlu1 %2450 }
 0xf29   : > { %v3184_v26 = vpop.f32.mrf.mxu0 }
 0xf2a   : > { %v2401_v30 = vmul.f32 %v3184_v26, %v3184_v26  ;;  %v2407_v27 = vsub.f32 %v4386_v44, %v3184_v26 }
 0xf2b   : > { %v2381_v18 = vpop.f32.mrf.mxu0 }
 0xf2c   : > { %v2400_v9 = vmul.f32 %v2381_v18, %v2381_v18  ;;  %v2406_v49 = vsub.f32 %v4382_v25, %v2381_v18 }
 0xf2d   : > { %v3187_v61 = vpop.f32.mrf.mxu1 }
 0xf2e   : > { %v2403_v6 = vsub.f32 %v3187_v61, %v2401_v30 }
 0xf2f   : > { %v2391_v31 = vpop.f32.mrf.mxu1 }
 0xf30   : > { %v2405_v16 = vmax.f32 %v2403_v6, 0.0  ;;  %v2402_v2 = vsub.f32 %v2391_v31, %v2400_v9 }
 0xf32   : > { %v2409_v48 = vadd.f32 1e-05, %v2405_v16  ;;  %v2404_v50 = vmax.f32 %v2402_v2, 0.0 }
 0xf34   : > { %3373 = vrsqrt.f32 %v2409_v48  ;;  %v2408_v19 = vadd.f32 1e-05, %v2404_v50 }
 0xf36   : > { %3375 = vrsqrt.f32 %v2408_v19 }
 0xf41   : > { %v3374_v3 = vpop.eup %3373 }
 0xf42   : > { %v2413_v23 = vmul.f32 %v3374_v3, %v2407_v27 }
 0xf43   : > { %v3376_v51 = vpop.eup %3375 }
 0xf44   : > { %v2412_v32 = vmul.f32 %v3376_v51, %v2406_v49  ;;  %v2419_v20 = vmul.f32 %v2417_v35, %v2413_v23 }
 0xf46   : > { %v2418_v24 = vmul.f32 %v2417_v35, %v2412_v32  ;;  %v2425_v53 = vadd.f32 %v2423_v34, %v2419_v20 }
 0xf48   : > { %v2424_v33 = vadd.f32 %v2423_v34, %v2418_v24 }
 0xf4a   : > { %v2434_v13 = vpack.c.bf16 %v2425_v53, %v2424_v33 }
 0xf4c   : > { %3188 = vmatprep.subr.bf16.mxu0 %v2434_v13 }
 0xf4d   : > { %3189 = vmatpush3.bf16.msra.mxu0 %v2434_v13 }
 0xf4e   : > { %3198 = vmatprep.subr.bf16.mxu0 %v3456_v8 }
 0xf50   : > { %3191 = vmatmul.mubr.msk.bf16.vlgmr.msra.gmra.mxu0 %vm4697_vm2, %v3309_v0 }
 0xf51   : > { %3194 = vmatprep.mubr.msk.bf16.mxu0 %vm4698_vm3, %v3310_v42 }
 0xf58   : > { %3195 = vmatmul.mubr.msk.bf16.gmra.mxu0 %vm4699_vm6, %v3311_v56 }
 0xf59   : > { %3206 = vmatprep.mubr.msk.bf16.mxu0 %vm3467_vm5, %v3456_v8 }
0x1010   : > { %v3192_v54 = vpop.f32.mrf.mxu0 }
0x1011   : > { %v4454_v40 = vadd.f32 %v3192_v54, %v2456_v43 }
0x1012   : > { %v2549_v1 = vpop.f32.mrf.mxu0 }
0x1013   : > { %v4457_v62 = vmul.f32 0.70710677, %v4454_v40  ;;  %v4459_v22 = vadd.f32 %v2549_v1, %v2446_v37 }
0x1014   : > { %v3193_v39 = vpop.f32.mrf.mxu0 }
0x1015   : > { %v4462_v29 = vand.u32 2147483647, %v4457_v62  ;;  %v4465_v59 = vmul.f32 0.70710677, %v4459_v22  ;;  %v4467_v5 = vadd.f32 %v3193_v39, %v2461_v38  ;;  %vm2598_vm7 = vcmp.lt.f32.partialorder %v4457_v62, 0.0 }
0x1016   : > { %v2552_v14 = vpop.f32.mrf.mxu0 }
0x1017   : > { %v2622_v55 = vmul.f32 0.3275911, %v4462_v29  ;;  %v4471_v4 = vand.u32 2147483647, %v4465_v59  ;;  %v4474_v52 = vmul.f32 0.70710677, %v4467_v5  ;;  %v4476_v15 = vadd.f32 %v2552_v14, %v2451_v10 }
0x1018   : > { %v3196_v41 = vpop.f32.mrf.mxu0  ;;  %vm2596_vm8 = vcmp.lt.f32.partialorder %v4465_v59, 0.0 }
0x1019   : > { %v2630_v11 = vadd.f32 1.0, %v2622_v55  ;;  %v2620_v57 = vmul.f32 0.3275911, %v4471_v4  ;;  %v4480_v17 = vand.u32 2147483647, %v4474_v52  ;;  %v4489_v31 = vadd.f32 %v3196_v41, %v2476_v47 }
0x101a   : > { %v4483_v26 = vmul.f32 0.70710677, %v4476_v15  ;;  %v2565_v18 = vpop.f32.mrf.mxu0  ;;  %v2726_v47 = vsub.f32 0.0, %v4462_v29  ;;  %v2724_v38 = vsub.f32 0.0, %v4471_v4  ;;  %vm2599_vm1 = vcmp.lt.f32.partialorder %v4474_v52, 0.0 }
0x101b   : > { %3377 = vrcp.f32 %v2630_v11  ;;  %v2628_v30 = vadd.f32 1.0, %v2620_v57  ;;  %v2623_v61 = vmul.f32 0.3275911, %v4480_v17  ;;  %v4492_v48 = vadd.f32 %v2565_v18, %v2466_v60 }
0x101c   : > { %v4487_v9 = vand.u32 2147483647, %v4483_v26  ;;  %v3197_v16 = vpop.f32.mrf.mxu0  ;;  %v4495_v50 = vmul.f32 0.70710677, %v4489_v31  ;;  %v2727_v39 = vsub.f32 0.0, %v4480_v17  ;;  %v2734_v10 = vmul.f32 %v2726_v47, %v4462_v29 }
0x101d   : > { %3379 = vrcp.f32 %v2628_v30  ;;  %v2631_v6 = vadd.f32 1.0, %v2623_v61  ;;  %v4498_v63 = vmul.f32 0.70710677, %v4492_v48  ;;  %v4501_v28 = vadd.f32 %v3197_v16, %v2481_v45 }
0x101e   : > { %v2621_v2 = vmul.f32 0.3275911, %v4487_v9  ;;  %v2618_v27 = vand.u32 2147483647, %v4495_v50  ;;  %v2568_v35 = vpop.f32.mrf.mxu0  ;;  %v2732_v30 = vmul.f32 %v2724_v38, %v4471_v4  ;;  %v2744_v29 = vmul.f32 1.442695, %v2734_v10 }
0x101f   : > { %3381 = vrcp.f32 %v2631_v6  ;;  %v2616_v3 = vand.u32 2147483647, %v4498_v63  ;;  %v4505_v49 = vmul.f32 0.70710677, %v4501_v28  ;;  %v4507_v23 = vadd.f32 %v2568_v35, %v2471_v46 }
0x1020   : > { %v2629_v19 = vadd.f32 1.0, %v2621_v2  ;;  %v2626_v12 = vmul.f32 0.3275911, %v2618_v27  ;;  %v2730_v46 = vsub.f32 0.0, %v2618_v27  ;;  %v2735_v2 = vmul.f32 %v2727_v39, %v4480_v17 }
0x1021   : > { %v2624_v32 = vmul.f32 0.3275911, %v2616_v3  ;;  %v2619_v20 = vand.u32 2147483647, %v4505_v49  ;;  %v4511_v34 = vmul.f32 0.70710677, %v4507_v23 }
0x1022   : > { %3383 = vrcp.f32 %v2629_v19  ;;  %v2634_v51 = vadd.f32 1.0, %v2626_v12  ;;  %v2728_v41 = vsub.f32 0.0, %v2616_v3  ;;  %v2738_v57 = vmul.f32 %v2730_v46, %v2618_v27 }
0x1023   : > { %v2632_v33 = vadd.f32 1.0, %v2624_v32  ;;  %v2627_v13 = vmul.f32 0.3275911, %v2619_v20  ;;  %v2617_v0 = vand.u32 2147483647, %v4511_v34  ;;  %v2731_v18 = vsub.f32 0.0, %v2619_v20 }
0x1024   : > { %3385 = vrcp.f32 %v2634_v51  ;;  %v2725_v19 = vsub.f32 0.0, %v4487_v9  ;;  %v2736_v32 = vmul.f32 %v2728_v41, %v2616_v3  ;;  %v2746_v47 = vmul.f32 1.442695, %v2735_v2 }
0x1025   : > { %3387 = vrcp.f32 %v2632_v33  ;;  %v2635_v56 = vadd.f32 1.0, %v2627_v13  ;;  %v2625_v21 = vmul.f32 0.3275911, %v2617_v0  ;;  %v2752_v33 = vmul.f32 1.442695, %v2738_v57 }
0x1026   : > { %v2729_v4 = vsub.f32 0.0, %v2617_v0  ;;  %v2740_v13 = vmul.f32 1.442695, %v2732_v30  ;;  %vm2602_vm5 = vcmp.lt.f32.partialorder %v4495_v50, 0.0  ;;  %vm2600_vm10 = vcmp.lt.f32.partialorder %v4498_v63, 0.0 }
0x1027   : > { %3389 = vrcp.f32 %v2635_v56  ;;  %v2633_v43 = vadd.f32 1.0, %v2625_v21  ;;  %vm2603_vm12 = vcmp.lt.f32.partialorder %v4505_v49, 0.0  ;;  %vm2601_vm0 = vcmp.lt.f32.partialorder %v4511_v34, 0.0 }
0x1028   : > { %v4513_v24 = vpop.eup %3377  ;;  %vm2597_vm14 = vcmp.lt.f32.partialorder %v4483_v26, 0.0  ;;  %v2609_v49 = vsel %vm2601_vm0, -1.0, %v4683_v7 }
0x1029   : > { %v2654_v53 = vmul.f32 1.0614054, %v4513_v24  ;;  %3391 = vrcp.f32 %v2633_v43  ;;  %v2748_v43 = vmul.f32 1.442695, %v2736_v32  ;;  %v2605_v26 = vsel %vm2597_vm14, -1.0, %v4683_v7 }
0x102a   : > { %v4517_v42 = vpop.eup %3379  ;;  %3393 = vpow2.f32 %v2744_v29 }
0x102b   : > { %v2662_v58 = vadd.f32 -1.4531521, %v2654_v53  ;;  %v2652_v60 = vmul.f32 1.0614054, %v4517_v42  ;;  %v2739_v53 = vmul.f32 %v2731_v18, %v2619_v20  ;;  %3395 = vpow2.f32 %v2752_v33 }
0x102c   : > { %v4519_v36 = vpop.eup %3381  ;;  %3397 = vpow2.f32 %v2746_v47 }
0x102d   : > { %v2655_v45 = vmul.f32 1.0614054, %v4519_v36  ;;  %v2670_v37 = vmul.f32 %v4513_v24, %v2662_v58  ;;  %v2660_v14 = vadd.f32 -1.4531521, %v2652_v60  ;;  %v2733_v60 = vmul.f32 %v2725_v19, %v4487_v9 }
0x102e   : > { %3399 = vpow2.f32 %v2748_v43 }
0x102f   : > { %v4525_v54 = vpop.eup %3383  ;;  %v2663_v1 = vadd.f32 -1.4531521, %v2655_v45  ;;  %v2678_v6 = vadd.f32 1.4214138, %v2670_v37  ;;  %v2668_v12 = vmul.f32 %v4517_v42, %v2660_v14  ;;  %v2754_v37 = vmul.f32 1.442695, %v2739_v53 }
0x1030   : > { %v2653_v55 = vmul.f32 1.0614054, %v4525_v54  ;;  %v2742_v41 = vmul.f32 1.442695, %v2733_v60 }
0x1031   : > { %v2671_v11 = vmul.f32 %v4519_v36, %v2663_v1  ;;  %v4535_v35 = vpop.eup %3385  ;;  %v2686_v21 = vmul.f32 %v4513_v24, %v2678_v6  ;;  %v2676_v46 = vadd.f32 1.4214138, %v2668_v12  ;;  %v2737_v1 = vmul.f32 %v2729_v4, %v2617_v0 }
0x1032   : > { %v2661_v61 = vadd.f32 -1.4531521, %v2653_v55  ;;  %v2658_v27 = vmul.f32 1.0614054, %v4535_v35  ;;  %v4541_v17 = vpop.eup %3387  ;;  %3401 = vpow2.f32 %v2754_v37 }
0x1033   : > { %v2679_v16 = vadd.f32 1.4214138, %v2671_v11  ;;  %v2656_v3 = vmul.f32 1.0614054, %v4541_v17  ;;  %v2694_v9 = vadd.f32 -0.28449672, %v2686_v21  ;;  %v2684_v18 = vmul.f32 %v4517_v42, %v2676_v46 }
0x1034   : > { %v2669_v51 = vmul.f32 %v4525_v54, %v2661_v61  ;;  %v2666_v45 = vadd.f32 -1.4531521, %v2658_v27  ;;  %v4546_v38 = vpop.eup %3389  ;;  %3403 = vpow2.f32 %v2740_v13 }
0x1035   : > { %v2687_v56 = vmul.f32 %v4519_v36, %v2679_v16  ;;  %v2664_v14 = vadd.f32 -1.4531521, %v2656_v3  ;;  %v2659_v55 = vmul.f32 1.0614054, %v4546_v38  ;;  %v2750_v16 = vmul.f32 1.442695, %v2737_v1 }
0x1036   : > { %v2677_v58 = vadd.f32 1.4214138, %v2669_v51  ;;  %v2674_v20 = vmul.f32 %v4535_v35, %v2666_v45  ;;  %v4551_v57 = vpop.eup %3391  ;;  %v2702_v51 = vmul.f32 %v4513_v24, %v2694_v9  ;;  %v2692_v33 = vadd.f32 -0.28449672, %v2684_v18 }
0x1037   : > { %v2695_v39 = vadd.f32 -0.28449672, %v2687_v56  ;;  %v2672_v30 = vmul.f32 %v4541_v17, %v2664_v14  ;;  %v2667_v61 = vadd.f32 -1.4531521, %v2659_v55  ;;  %v2657_v6 = vmul.f32 1.0614054, %v4551_v57  ;;  %v3394_v1 = vpop.eup %3393 }
0x1038   : > { %v2685_v10 = vmul.f32 %v4525_v54, %v2677_v58  ;;  %v2682_v11 = vadd.f32 1.4214138, %v2674_v20  ;;  %3405 = vpow2.f32 %v2742_v41  ;;  %v2710_v46 = vadd.f32 0.2548296, %v2702_v51  ;;  %v3396_v14 = vpop.eup %3395 }
0x1039   : > { %v2703_v2 = vmul.f32 %v4519_v36, %v2695_v39  ;;  %v2680_v29 = vadd.f32 1.4214138, %v2672_v30  ;;  %v2675_v12 = vmul.f32 %v4546_v38, %v2667_v61  ;;  %v2665_v27 = vadd.f32 -1.4531521, %v2657_v6 }
0x103a   : > { %v2690_v0 = vmul.f32 %v4535_v35, %v2682_v11  ;;  %v2693_v19 = vadd.f32 -0.28449672, %v2685_v10  ;;  %3407 = vpow2.f32 %v2750_v16  ;;  %v2700_v43 = vmul.f32 %v4517_v42, %v2692_v33 }
0x103b   : > { %v2688_v53 = vmul.f32 %v4541_v17, %v2680_v29  ;;  %v2683_v4 = vadd.f32 1.4214138, %v2675_v12  ;;  %v2673_v58 = vmul.f32 %v4551_v57, %v2665_v27  ;;  %v2711_v21 = vadd.f32 0.2548296, %v2703_v2 }
0x103c   : > { %v2698_v32 = vadd.f32 -0.28449672, %v2690_v0  ;;  %v2701_v47 = vmul.f32 %v4525_v54, %v2693_v19  ;;  %v2718_v18 = vmul.f32 %v4513_v24, %v2710_v46  ;;  %v3398_v0 = vpop.eup %3397  ;;  %v2708_v6 = vadd.f32 0.2548296, %v2700_v43 }
0x103d   : > { %v2696_v60 = vadd.f32 -0.28449672, %v2688_v53  ;;  %v2691_v45 = vmul.f32 %v4546_v38, %v2683_v4  ;;  %v2681_v3 = vadd.f32 1.4214138, %v2673_v58  ;;  %v2719_v55 = vmul.f32 %v4519_v36, %v2711_v21  ;;  %v3400_v2 = vpop.eup %3399 }
0x103e   : > { %v2706_v56 = vmul.f32 %v4535_v35, %v2698_v32  ;;  %v2709_v9 = vadd.f32 0.2548296, %v2701_v47  ;;  %v2610_v36 = vsel %vm2602_vm5, -1.0, %v4683_v7  ;;  %v2758_v33 = vmul.f32 %v3394_v1, %v2718_v18 }
0x103f   : > { %v2704_v20 = vmul.f32 %v4541_v17, %v2696_v60  ;;  %v2699_v37 = vadd.f32 -0.28449672, %v2691_v45  ;;  %v2689_v10 = vmul.f32 %v4551_v57, %v2681_v3  ;;  %v3402_v24 = vpop.eup %3401  ;;  %v2759_v12 = vmul.f32 %v3398_v0, %v2719_v55 }
0x1040   : > { %v2714_v13 = vadd.f32 0.2548296, %v2706_v56  ;;  %v2717_v51 = vmul.f32 %v4525_v54, %v2709_v9  ;;  %v2716_v50 = vmul.f32 %v4517_v42, %v2708_v6  ;;  %v2606_v54 = vsel %vm2598_vm7, -1.0, %v4683_v7 }
0x1041   : > { %v2712_v41 = vadd.f32 0.2548296, %v2704_v20  ;;  %v2707_v11 = vmul.f32 %v4546_v38, %v2699_v37  ;;  %v2697_v61 = vadd.f32 -0.28449672, %v2689_v10  ;;  %v3404_v53 = vpop.eup %3403  ;;  %v2767_v60 = vsub.f32 1.0, %v2759_v12 }
0x1042   : > { %v2722_v39 = vmul.f32 %v4535_v35, %v2714_v13  ;;  %v2608_v46 = vsel %vm2600_vm10, -1.0, %v4683_v7  ;;  %v2766_v13 = vsub.f32 1.0, %v2758_v33  ;;  %v2611_v3 = vsel %vm2603_vm12, -1.0, %v4683_v7 }
0x1043   : > { %v2720_v16 = vmul.f32 %v4541_v17, %v2712_v41  ;;  %v2715_v35 = vadd.f32 0.2548296, %v2707_v11  ;;  %v2705_v29 = vmul.f32 %v4551_v57, %v2697_v61  ;;  %v2756_v43 = vmul.f32 %v3404_v53, %v2716_v50  ;;  %v3312_v53 = vld [vmem:[%s4640_s14] sm:$0xff]  }
0x1044   : > { %v2762_v30 = vmul.f32 %v3396_v14, %v2722_v39  ;;  %v2587_v1 = vmul.f32 0.5, %v4501_v28  ;;  %v2774_v9 = vmul.f32 %v2766_v13, %v2606_v54  ;;  %v2584_v6 = vmul.f32 0.5, %v4492_v48 }
0x1045   : > { %v2760_v32 = vmul.f32 %v3400_v2, %v2720_v16  ;;  %v2723_v27 = vmul.f32 %v4546_v38, %v2715_v35  ;;  %v2713_v17 = vadd.f32 0.2548296, %v2705_v29  ;;  %v3406_v21 = vpop.eup %3405  ;;  %v2607_v38 = vsel %vm2599_vm1, -1.0, %v4683_v7 }
0x1046   : > { %v2770_v19 = vsub.f32 1.0, %v2762_v30  ;;  %v2757_v45 = vmul.f32 %v3406_v21, %v2717_v51  ;;  %v2775_v10 = vmul.f32 %v2767_v60, %v2607_v38  ;;  %v2764_v41 = vsub.f32 1.0, %v2756_v43 }
0x1047   : > { %v2768_v56 = vsub.f32 1.0, %v2760_v32  ;;  %v2763_v58 = vmul.f32 %v3402_v24, %v2723_v27  ;;  %v2721_v63 = vmul.f32 %v4551_v57, %v2713_v17  ;;  %v3408_v47 = vpop.eup %3407  ;;  %v2586_v57 = vmul.f32 0.5, %v4489_v31 }
0x1048   : > { %v2778_v4 = vmul.f32 %v2770_v19, %v2610_v36  ;;  %v2765_v14 = vsub.f32 1.0, %v2757_v45  ;;  %v2585_v31 = vmul.f32 0.5, %v4507_v23  ;;  %v2783_v28 = vadd.f32 1.0, %v2775_v10 }
0x1049   : > { %v2771_v42 = vsub.f32 1.0, %v2763_v58  ;;  %v2761_v62 = vmul.f32 %v3408_v47, %v2721_v63  ;;  %v2776_v52 = vmul.f32 %v2768_v56, %v2608_v46  ;;  %v2604_v35 = vsel %vm2596_vm8, -1.0, %v4683_v7  ;;  %v2808_v56 = vpop.permute.xlu1 %2807 }
0x104a   : > { %v2786_v20 = vadd.f32 1.0, %v2778_v4  ;;  %v2773_v0 = vmul.f32 %v2765_v14, %v2605_v26  ;;  %v2782_v36 = vadd.f32 1.0, %v2774_v9  ;;  %v2772_v59 = vmul.f32 %v2764_v41, %v2604_v35 }
0x104b   : > { %v2779_v37 = vmul.f32 %v2771_v42, %v2611_v3  ;;  %v2769_v39 = vsub.f32 1.0, %v2761_v62  ;;  %v2784_v18 = vadd.f32 1.0, %v2776_v52  ;;  %v2583_v19 = vmul.f32 0.5, %v4467_v5 }
0x104c   : > { %v2794_v11 = vmul.f32 %v2786_v20, %v2586_v57  ;;  %v2582_v24 = vmul.f32 0.5, %v4454_v40  ;;  %v2781_v12 = vadd.f32 1.0, %v2773_v0  ;;  %v2780_v27 = vadd.f32 1.0, %v2772_v59 }
0x104d   : > { %v2787_v55 = vadd.f32 1.0, %v2779_v37  ;;  %v2777_v34 = vmul.f32 %v2769_v39, %v2609_v49  ;;  %v2792_v29 = vmul.f32 %v2784_v18, %v2584_v6  ;;  %v2791_v23 = vmul.f32 %v2783_v28, %v2583_v19 }
0x104e   : > { %v2790_v32 = vmul.f32 %v2782_v36, %v2582_v24  ;;  %v2581_v48 = vmul.f32 0.5, %v4476_v15  ;;  %v2580_v7 = vmul.f32 0.5, %v4459_v22  ;;  %v2804_v15 = vpop.permute.xlu0 %2803 }
0x104f   : > { %v2795_v30 = vmul.f32 %v2787_v55, %v2587_v1  ;;  %v2785_v61 = vadd.f32 1.0, %v2777_v34 }
0x1050   : > { %v2799_v5 = vpack.c.bf16 %v2791_v23, %v2790_v32  ;;  %v2789_v33 = vmul.f32 %v2781_v12, %v2581_v48  ;;  %v2788_v17 = vmul.f32 %v2780_v27, %v2580_v7 }
0x1051   : > { %v2801_v16 = vpack.c.bf16 %v2795_v30, %v2794_v11  ;;  %v2793_v2 = vmul.f32 %v2785_v61, %v2585_v31 }
0x1052   : > { %v2798_v40 = vpack.c.bf16 %v2789_v33, %v2788_v17 }
0x1053   : > { %3199 = vmatpush3.bf16.msra.mxu0 %v2801_v16  ;;  %v2800_v51 = vpack.c.bf16 %v2793_v2, %v2792_v29 }
0x1054   : > { %3200 = vmatprep.subr.bf16.mxu0 %v3456_v8 }
0x1057   : > { %3201 = vmatpush3.bf16.msra.mxu0 %v2800_v51 }
0x1058   : > { %3202 = vmatprep.subr.bf16.mxu0 %v3456_v8 }
0x105b   : > { %3203 = vmatpush3.bf16.msra.mxu0 %v2799_v5 }
0x105c   : > { %3204 = vmatprep.subr.bf16.mxu0 %v3456_v8 }
0x105f   : > { %3205 = vmatpush3.bf16.msra.mxu0 %v2798_v40 }
0x1062   : > { %3207 = vmatmul.mubr.msk.bf16.vlgmr.msra.gmra.mxu0 %vm2815_vm4, %v3312_v53 }
0x1122   : > { %v2853_v50 = vpop.f32.mrf.mxu0 }
0x1123   : > { %v2854_v4 = vadd.f32 %v2853_v50, %v2804_v15 }
0x1124   : > { %v3208_v22 = vpop.f32.mrf.mxu0 }
0x1125   : > { %v2860_v8 = vadd.f32 %v2854_v4, %v4382_v25 }
0x1126   : > { %v2856_v58 = vpop.f32.mrf.mxu0 }
0x1127   : > { %2862 = vst [vmem:[%s494_s30] sm:$0xff] %v2860_v8  ;;  %v2857_v21 = vadd.f32 %v2856_v58, %v2808_v56 }
0x1128   : > { %v3209_v54 = vpop.f32.mrf.mxu0 }
0x1129   : > { %v2861_v38 = vadd.f32 %v2857_v21, %v4386_v44 }
0x112b   : > { %2863 = vst [vmem:[%s494_s30 + $0x8] sm:$0xff] %v2861_v38 }
0x112c PF: > { %s25_s18 = sadd.s32 1, %s3439_s18  }
0x112d   : > { %p22_p4 = scmp.ge.s32.totalorder %s25_s18, 4  }
0x112f   :  { %24 = sbr.rel (!%p22_p4) target bundleno = 1 (0x1), region = 110 }

</bundles_post_ra>
